<compile_context>
chip_gen: v6e
topology: v6e:2x2x1
jax: 0.10.0
libtpu: 0.0.40
codegen_flags: <defaults>
</compile_context>

<pallas_src>
import functools
import math

import jax
import jax.numpy as jnp
from jax import lax
from jax.experimental import pallas as pl
from jax.experimental.pallas import tpu as pltpu

ALPHA = 8.3       # depth-similarity sharpness: F_D(i,j) = exp(-ALPHA*|d_i - d_j|)
BN_EPS = 1e-5
LAYERS = (1, 1, 1)          # Bottleneck blocks in layer1..3 (layer4 is the MG unit [1,2,4])
OUT_STRIDE = 16             # -> strides [1,2,2,1], dilations [1,1,1,2]


# ----------------------------- Pallas kernels -----------------------------

def _mm_bias_kernel(x_ref, w_ref, b_ref, o_ref, acc_ref, *, relu):
    """Tiled matmul with Cin-reduction grid axis; epilogue = +bias (+ReLU) + cast."""
    @pl.when(pl.program_id(2) == 0)
    def _init():
        acc_ref[...] = jnp.zeros_like(acc_ref)

    acc_ref[...] += jnp.dot(x_ref[...], w_ref[...],
                            preferred_element_type=jnp.float32)

    @pl.when(pl.program_id(2) == pl.num_programs(2) - 1)
    def _fin():
        y = acc_ref[...] + b_ref[...]
        if relu:
            y = jnp.maximum(y, 0.0)
        o_ref[...] = y.astype(o_ref.dtype)


def _mm_bias_res_relu_kernel(x_ref, w_ref, b_ref, r_ref, o_ref, acc_ref):
    """Tiled matmul; epilogue = +bias + residual + ReLU + cast."""
    @pl.when(pl.program_id(2) == 0)
    def _init():
        acc_ref[...] = jnp.zeros_like(acc_ref)

    acc_ref[...] += jnp.dot(x_ref[...], w_ref[...],
                            preferred_element_type=jnp.float32)

    @pl.when(pl.program_id(2) == pl.num_programs(2) - 1)
    def _fin():
        y = acc_ref[...] + b_ref[...] + r_ref[...].astype(jnp.float32)
        o_ref[...] = jnp.maximum(y, 0.0).astype(o_ref.dtype)


def _pick_tile(dim, candidates):
    """Largest candidate tile that divides `dim`; fall back to the full dim."""
    for c in candidates:
        if dim >= c and dim % c == 0:
            return c
    return dim


def matmul_bias_act(x, w, bias, *, relu, residual=None, out_dtype=jnp.bfloat16):
    """y = act(x @ w + bias [+ residual]) with a tiled, pipelined Pallas kernel.

    x: (M, K) any float dtype (cast to bf16), w: (K, Cout) bf16 (BN scale folded),
    bias: (1, Cout) f32, residual: (M, Cout) or None.
    """
    M, Kd = x.shape
    Kd2, Cout = w.shape
    assert Kd == Kd2, (Kd, Kd2)

    tm = _pick_tile(M, (512, 256, 128, 64, 32, 16, 8))
    tk = _pick_tile(Kd, (512, 384, 256, 128))
    tn = _pick_tile(Cout, (512, 256, 128))
    grid = (M // tm, Cout // tn, Kd // tk)

    in_specs = [
        pl.BlockSpec((tm, tk), lambda i, j, k: (i, k)),
        pl.BlockSpec((tk, tn), lambda i, j, k: (k, j)),
        pl.BlockSpec((1, tn), lambda i, j, k: (0, j)),
    ]
    args = [x.astype(jnp.bfloat16), w.astype(jnp.bfloat16), bias]

    if residual is None:
        kernel = functools.partial(_mm_bias_kernel, relu=relu)
    else:
        # Residual block index ignores k -> stays VMEM-resident across the reduction.
        in_specs.append(pl.BlockSpec((tm, tn), lambda i, j, k: (i, j)))
        args.append(residual.astype(jnp.bfloat16))
        kernel = _mm_bias_res_relu_kernel

    return pl.pallas_call(
        kernel,
        out_shape=jax.ShapeDtypeStruct((M, Cout), out_dtype),
        grid_spec=pltpu.PrefetchScalarGridSpec(
            num_scalar_prefetch=0,
            grid=grid,
            in_specs=in_specs,
            out_specs=pl.BlockSpec((tm, tn), lambda i, j, k: (i, j)),
            scratch_shapes=[pltpu.VMEM((tm, tn), jnp.float32)],
        ),
        compiler_params=pltpu.CompilerParams(
            dimension_semantics=("parallel", "parallel", "arbitrary")),
    )(*args)


# ----------------------------- XLA glue (taps, depth weights, pooling) -----------------------------

def _extract_taps(x, k, stride, padding, dilation):
    """x: (N, H, W, C) -> list of K=k*k taps, each (N, Ho, Wo, C)."""
    N, H, W, C = x.shape
    Ho = (H + 2 * padding - dilation * (k - 1) - 1) // stride + 1
    Wo = (W + 2 * padding - dilation * (k - 1) - 1) // stride + 1
    xp = jnp.pad(x, ((0, 0), (padding, padding), (padding, padding), (0, 0)))
    taps = []
    for i in range(k):
        for j in range(k):
            hs, ws = i * dilation, j * dilation
            taps.append(xp[:, hs:hs + (Ho - 1) * stride + 1:stride,
                              ws:ws + (Wo - 1) * stride + 1:stride, :])
    return taps, (N, Ho, Wo)


def _depth_weights(depth, k, stride, padding, dilation):
    """F_D(center, tap) = exp(-ALPHA*|d_center - d_tap|), list of K maps (N,Ho,Wo,1), f32."""
    dtaps, dims = _extract_taps(depth, k, stride, padding, dilation)
    dc = dtaps[(k * k) // 2]
    return [jnp.exp(-ALPHA * jnp.abs(dc - d)) for d in dtaps], dims


def depth_conv_bn(x, depth, w, bias, *, k, stride, padding, dilation, relu):
    """DepthConv(k,stride,padding,dilation,bias=False) + folded BN (+ReLU).

    Taps are scaled by F_D and concatenated along channels, so the whole conv is a
    single (M, K*Cin) @ (K*Cin, Cout) Pallas matmul (contraction depth K*Cin).
    """
    taps, (N, Ho, Wo) = _extract_taps(x, k, stride, padding, dilation)
    fds, _ = _depth_weights(depth, k, stride, padding, dilation)
    cols = jnp.concatenate(
        [(t.astype(jnp.float32) * f).astype(jnp.bfloat16) for t, f in zip(taps, fds)],
        axis=-1)
    Cin = x.shape[-1]
    xcols = cols.reshape(N * Ho * Wo, k * k * Cin)
    out = matmul_bias_act(xcols, w, bias, relu=relu)
    return out.reshape(N, Ho, Wo, w.shape[-1])


def conv1x1_bn(x, w, bias, *, stride=1, relu=True, residual=None):
    """1x1 conv (bias=False) + folded BN, optionally fused residual add + ReLU."""
    if stride != 1:
        x = x[:, ::stride, ::stride, :]
    N, H, W, Cin = x.shape
    Cout = w.shape[-1]
    xf = x.reshape(N * H * W, Cin)
    rf = residual.reshape(N * H * W, Cout) if residual is not None else None
    out = matmul_bias_act(xf, w, bias, relu=relu, residual=rf)
    return out.reshape(N, H, W, Cout)


def depth_avg_pool(x, depth, *, k, stride, padding):
    """DepthAvgPooling: F_D-weighted mean over valid (non-padding) taps.  Kept in XLA
    (lane-sparse, negligible work) per the performance review."""
    taps, _ = _extract_taps(x, k, stride, padding, 1)
    fds, _ = _depth_weights(depth, k, stride, padding, 1)
    mtaps, _ = _extract_taps(jnp.ones_like(depth), k, stride, padding, 1)
    num = jnp.zeros_like(taps[0], dtype=jnp.float32)
    den = jnp.zeros_like(fds[0])
    for t, f, m in zip(taps, fds, mtaps):
        w = f * m
        num = num + w * t.astype(jnp.float32)
        den = den + w
    return (num / den).astype(x.dtype)


def avg_pool2d(depth, *, k, stride, padding):
    """nn.AvgPool2d(k, padding, stride) on the 1-channel depth map (count_include_pad).
    Kept in XLA (1-channel, lane-sparse) per the performance review."""
    s = lax.reduce_window(depth, 0.0, lax.add,
                          (1, k, k, 1), (1, stride, stride, 1),
                          [(0, 0), (padding, padding), (padding, padding), (0, 0)])
    return s / float(k * k)


# ----------------------------- architecture config & parameters -----------------------------

def _block_cfgs():
    if OUT_STRIDE == 16:
        strides, dilations = [1, 2, 2, 1], [1, 1, 1, 2]
    elif OUT_STRIDE == 8:
        strides, dilations = [1, 2, 1, 1], [1, 1, 2, 4]
    else:
        raise NotImplementedError
    mg = [1, 2, 4]
    specs = [(64, LAYERS[0], strides[0], dilations[0], None),
             (128, LAYERS[1], strides[1], dilations[1], None),
             (256, LAYERS[2], strides[2], dilations[2], None),
             (512, len(mg), strides[3], dilations[3], mg)]
    cfg = []
    inplanes = 64
    for planes, nblocks, stride, dilation, mgu in specs:
        blocks = []
        for b in range(nblocks):
            s = stride if b == 0 else 1
            d = dilation * (mgu[b] if mgu is not None else 1)
            has_ds = (b == 0) and (stride != 1 or inplanes != planes * 4)
            blocks.append(dict(inplanes=inplanes, planes=planes, stride=s,
                               dilation=d, has_ds=has_ds))
            inplanes = planes * 4
        cfg.append(blocks)
    return cfg


CONFIG = _block_cfgs()       # static (Python) architecture config — closed over by forward


def _conv_w(key, rows, cout, k):
    std = math.sqrt(2.0 / (k * k * cout))            # matches _init_weight
    return jax.random.normal(key, (rows, cout), jnp.float32) * std


def _fold_bn(w, cout):
    """Fold eval-mode BN (gamma=1, beta=0, mean=0, var=1) into the weight; bias left."""
    scale = 1.0 / math.sqrt(1.0 + BN_EPS)
    bias = jnp.zeros((1, cout), jnp.float32)
    return (w * scale).astype(jnp.bfloat16), bias


def init_params(key):
    nblocks = sum(len(b) for b in CONFIG)
    keys = iter(jax.random.split(key, 1 + 4 * nblocks))
    w, b = _fold_bn(_conv_w(next(keys), 49 * 3, 64, 7), 64)     # conv1 7x7, merged taps
    params = {'conv1_w': w, 'conv1_b': b}
    for li, blocks in enumerate(CONFIG, start=1):
        plist = []
        for bc in blocks:
            cin, planes = bc['inplanes'], bc['planes']
            p = {}
            p['w1'], p['b1'] = _fold_bn(_conv_w(next(keys), cin, planes, 1), planes)
            p['w2'], p['b2'] = _fold_bn(_conv_w(next(keys), 9 * planes, planes, 3), planes)
            p['w3'], p['b3'] = _fold_bn(_conv_w(next(keys), planes, planes * 4, 1), planes * 4)
            if bc['has_ds']:
                p['wd'], p['bd'] = _fold_bn(_conv_w(next(keys), cin, planes * 4, 1), planes * 4)
            plist.append(p)
        params['layer%d' % li] = plist
    return params


# ----------------------------- forward -----------------------------

def _bottleneck_forward(bp, bc, x, depth):
    stride, dilation = bc['stride'], bc['dilation']
    out = conv1x1_bn(x, bp['w1'], bp['b1'], relu=True)
    out = depth_conv_bn(out, depth, bp['w2'], bp['b2'],
                        k=3, stride=stride, padding=dilation, dilation=dilation, relu=True)
    if bc['has_ds']:
        residual = conv1x1_bn(x, bp['wd'], bp['bd'], stride=stride, relu=False)
    else:
        residual = x
    out = conv1x1_bn(out, bp['w3'], bp['b3'], relu=False, residual=residual)
    if stride != 1:
        depth = avg_pool2d(depth, k=3, stride=stride, padding=1)
    return out, depth


def depth_aware_resnet_forward(params, x_nchw):
    """x_nchw: (N, 4, H, W) = RGB + depth. Returns (res5, res2) NCHW (DEEPLAB_OUTPUT)."""
    img = jnp.transpose(x_nchw[:, :3], (0, 2, 3, 1)).astype(jnp.float32)      # NHWC
    depth = jnp.transpose(x_nchw[:, 3:4], (0, 2, 3, 1)).astype(jnp.float32)   # (N,H,W,1)

    x = depth_conv_bn(img, depth, params['conv1_w'], params['conv1_b'],
                      k=7, stride=2, padding=3, dilation=1, relu=True)        # conv1+bn1+relu
    depth = avg_pool2d(depth, k=7, stride=2, padding=3)                        # downsample_depth_a
    x = depth_avg_pool(x, depth, k=3, stride=2, padding=1)                     # maxpool (DepthAvgPooling)
    depth = avg_pool2d(depth, k=3, stride=2, padding=1)                        # downsample_depth_b

    outputs = {}
    layer_params = (params['layer1'], params['layer2'], params['layer3'], params['layer4'])
    for name, blocks_p, blocks_c in zip(('res2', 'res3', 'res4', 'res5'), layer_params, CONFIG):
        for bp, bc in zip(blocks_p, blocks_c):
            x, depth = _bottleneck_forward(bp, bc, x, depth)
        outputs[name] = x

    to_nchw = lambda t: jnp.transpose(t.astype(jnp.float32), (0, 3, 1, 2))
    return to_nchw(outputs['res5']), to_nchw(outputs['res2'])


# ----------------------------- main -----------------------------

if __name__ == "__main__":
    key = jax.random.PRNGKey(0)
    pkey, xkey = jax.random.split(key)
    params = init_params(pkey)

    N, H, W = 2, 16, 16
    x = jax.random.normal(xkey, (N, 4, H, W), jnp.float32)
    x = x.at[:, 3].set(jnp.abs(x[:, 3]))      # depth channel: non-negative

    fwd = jax.jit(depth_aware_resnet_forward)
    res5, res2 = fwd(params, x)
    jax.block_until_ready((res5, res2))

    assert res5.shape == (N, 2048, H // OUT_STRIDE, W // OUT_STRIDE), res5.shape
    assert res2.shape == (N, 256, H // 4, W // 4), res2.shape
    assert bool(jnp.all(jnp.isfinite(res5))) and bool(jnp.all(jnp.isfinite(res2)))
    print("KERNEL_OK")
</pallas_src>

<mosaic_0001>
module attributes {stable_mosaic.version = 11 : i64} {
  func.func @_mm_bias_kernel(%arg0: i32, %arg1: i32, %arg2: i32, %arg3: memref<128x147xbf16, #tpu.memory_space<vmem>>, %arg4: memref<147x64xbf16, #tpu.memory_space<vmem>>, %arg5: memref<1x64xf32, #tpu.memory_space<vmem>>, %arg6: memref<128x64xbf16, #tpu.memory_space<vmem>>, %arg7: memref<128x64xf32, #tpu.memory_space<vmem>>) attributes {dimension_semantics = [#tpu.dimension_semantics<parallel>, #tpu.dimension_semantics<parallel>, #tpu.dimension_semantics<arbitrary>], iteration_bounds = array<i64: 1, 1, 1>, scalar_prefetch = 0 : i64, scratch_operands = 1 : i64, tpu.core_type = #tpu.core_type<tc>, window_params = [{transform_indices = @transform_0, window_bounds = array<i64: 128, 147>}, {transform_indices = @transform_1, window_bounds = array<i64: 147, 64>}, {transform_indices = @transform_2, window_bounds = array<i64: 1, 64>}, {transform_indices = @transform_3, window_bounds = array<i64: 128, 64>}]} {
    %c0_i32 = arith.constant 0 : i32
    %0 = arith.cmpi eq, %arg2, %c0_i32 : i32
    %1 = arith.extui %0 : i1 to i32
    %c0_i32_0 = arith.constant 0 : i32
    %2 = arith.cmpi ne, %1, %c0_i32_0 : i32
    scf.if %2 {
      %cst_10 = arith.constant 0.000000e+00 : f32
      %12 = vector.broadcast %cst_10 : f32 to vector<128x64xf32>
      %c0_11 = arith.constant 0 : index
      %c0_12 = arith.constant 0 : index
      %13 = vector.load %arg7[%c0_11, %c0_12] : memref<128x64xf32, #tpu.memory_space<vmem>>, vector<128x64xf32>
      tpu.vector_store %arg7[%c0_11, %c0_12], %12 {strides = array<i32>} : memref<128x64xf32, #tpu.memory_space<vmem>>, vector<128x64xf32>,
    } else {
    }
    %c0 = arith.constant 0 : index
    %c0_1 = arith.constant 0 : index
    %3 = vector.load %arg7[%c0, %c0_1] : memref<128x64xf32, #tpu.memory_space<vmem>>, vector<128x64xf32>
    %c0_2 = arith.constant 0 : index
    %c0_3 = arith.constant 0 : index
    %4 = vector.load %arg3[%c0_2, %c0_3] : memref<128x147xbf16, #tpu.memory_space<vmem>>, vector<128x147xbf16>
    %c0_4 = arith.constant 0 : index
    %c0_5 = arith.constant 0 : index
    %5 = vector.load %arg4[%c0_4, %c0_5] : memref<147x64xbf16, #tpu.memory_space<vmem>>, vector<147x64xbf16>
    %cst = arith.constant dense<0.000000e+00> : vector<128x64xf32>
    %6 = tpu.matmul %4, %5, %cst {dimension_numbers = #tpu.dot_dimension_numbers<[1], [0], [0], [1], [0, 0, 1, 1], [], []>} : vector<128x147xbf16>, vector<147x64xbf16>, vector<128x64xf32> -> vector<128x64xf32>
    %7 = arith.addf %3, %6 : vector<128x64xf32>
    %c0_6 = arith.constant 0 : index
    %c0_7 = arith.constant 0 : index
    %8 = vector.load %arg7[%c0_6, %c0_7] : memref<128x64xf32, #tpu.memory_space<vmem>>, vector<128x64xf32>
    tpu.vector_store %arg7[%c0_6, %c0_7], %7 {strides = array<i32>} : memref<128x64xf32, #tpu.memory_space<vmem>>, vector<128x64xf32>,
    %c0_i32_8 = arith.constant 0 : i32
    %9 = arith.cmpi eq, %arg2, %c0_i32_8 : i32
    %10 = arith.extui %9 : i1 to i32
    %c0_i32_9 = arith.constant 0 : i32
    %11 = arith.cmpi ne, %10, %c0_i32_9 : i32
    scf.if %11 {
      %c0_10 = arith.constant 0 : index
      %c0_11 = arith.constant 0 : index
      %12 = vector.load %arg7[%c0_10, %c0_11] : memref<128x64xf32, #tpu.memory_space<vmem>>, vector<128x64xf32>
      %c0_12 = arith.constant 0 : index
      %c0_13 = arith.constant 0 : index
      %13 = vector.load %arg5[%c0_12, %c0_13] : memref<1x64xf32, #tpu.memory_space<vmem>>, vector<1x64xf32>
      %14 = vector.broadcast %13 : vector<1x64xf32> to vector<128x64xf32>
      %15 = arith.addf %12, %14 : vector<128x64xf32>
      %cst_14 = arith.constant 0.000000e+00 : f32
      %16 = vector.broadcast %cst_14 : f32 to vector<128x64xf32>
      %17 = arith.maximumf %15, %16 : vector<128x64xf32>
      %18 = arith.truncf %17 : vector<128x64xf32> to vector<128x64xbf16>
      %c0_15 = arith.constant 0 : index
      %c0_16 = arith.constant 0 : index
      %19 = vector.load %arg6[%c0_15, %c0_16] : memref<128x64xbf16, #tpu.memory_space<vmem>>, vector<128x64xbf16>
      tpu.vector_store %arg6[%c0_15, %c0_16], %18 {strides = array<i32>} : memref<128x64xbf16, #tpu.memory_space<vmem>>, vector<128x64xbf16>,
    } else {
    }
    return
  }
  func.func @transform_0(%arg0: i32, %arg1: i32, %arg2: i32) -> (i32, i32) {
    %c0_i32 = arith.constant 0 : i32
    return %arg0, %arg2 : i32, i32
  }
  func.func @transform_1(%arg0: i32, %arg1: i32, %arg2: i32) -> (i32, i32) {
    %c0_i32 = arith.constant 0 : i32
    return %arg2, %arg1 : i32, i32
  }
  func.func @transform_2(%arg0: i32, %arg1: i32, %arg2: i32) -> (i32, i32) {
    %c0_i32 = arith.constant 0 : i32
    %c0_i32_0 = arith.constant 0 : i32
    return %c0_i32, %arg1 : i32, i32
  }
  func.func @transform_3(%arg0: i32, %arg1: i32, %arg2: i32) -> (i32, i32) {
    %c0_i32 = arith.constant 0 : i32
    return %arg0, %arg1 : i32, i32
  }
}

module attributes {stable_mosaic.version = 11 : i64} {
  func.func @_mm_bias_kernel(%arg0: i32, %arg1: i32, %arg2: i32, %arg3: memref<32x64xbf16, #tpu.memory_space<vmem>>, %arg4: memref<64x64xbf16, #tpu.memory_space<vmem>>, %arg5: memref<1x64xf32, #tpu.memory_space<vmem>>, %arg6: memref<32x64xbf16, #tpu.memory_space<vmem>>, %arg7: memref<32x64xf32, #tpu.memory_space<vmem>>) attributes {dimension_semantics = [#tpu.dimension_semantics<parallel>, #tpu.dimension_semantics<parallel>, #tpu.dimension_semantics<arbitrary>], iteration_bounds = array<i64: 1, 1, 1>, scalar_prefetch = 0 : i64, scratch_operands = 1 : i64, tpu.core_type = #tpu.core_type<tc>, window_params = [{transform_indices = @transform_0, window_bounds = array<i64: 32, 64>}, {transform_indices = @transform_1, window_bounds = array<i64: 64, 64>}, {transform_indices = @transform_2, window_bounds = array<i64: 1, 64>}, {transform_indices = @transform_3, window_bounds = array<i64: 32, 64>}]} {
    %c0_i32 = arith.constant 0 : i32
    %0 = arith.cmpi eq, %arg2, %c0_i32 : i32
    %1 = arith.extui %0 : i1 to i32
    %c0_i32_0 = arith.constant 0 : i32
    %2 = arith.cmpi ne, %1, %c0_i32_0 : i32
    scf.if %2 {
      %cst_10 = arith.constant 0.000000e+00 : f32
      %12 = vector.broadcast %cst_10 : f32 to vector<32x64xf32>
      %c0_11 = arith.constant 0 : index
      %c0_12 = arith.constant 0 : index
      %13 = vector.load %arg7[%c0_11, %c0_12] : memref<32x64xf32, #tpu.memory_space<vmem>>, vector<32x64xf32>
      tpu.vector_store %arg7[%c0_11, %c0_12], %12 {strides = array<i32>} : memref<32x64xf32, #tpu.memory_space<vmem>>, vector<32x64xf32>,
    } else {
    }
    %c0 = arith.constant 0 : index
    %c0_1 = arith.constant 0 : index
    %3 = vector.load %arg7[%c0, %c0_1] : memref<32x64xf32, #tpu.memory_space<vmem>>, vector<32x64xf32>
    %c0_2 = arith.constant 0 : index
    %c0_3 = arith.constant 0 : index
    %4 = vector.load %arg3[%c0_2, %c0_3] : memref<32x64xbf16, #tpu.memory_space<vmem>>, vector<32x64xbf16>
    %c0_4 = arith.constant 0 : index
    %c0_5 = arith.constant 0 : index
    %5 = vector.load %arg4[%c0_4, %c0_5] : memref<64x64xbf16, #tpu.memory_space<vmem>>, vector<64x64xbf16>
    %cst = arith.constant dense<0.000000e+00> : vector<32x64xf32>
    %6 = tpu.matmul %4, %5, %cst {dimension_numbers = #tpu.dot_dimension_numbers<[1], [0], [0], [1], [0, 0, 1, 1], [], []>} : vector<32x64xbf16>, vector<64x64xbf16>, vector<32x64xf32> -> vector<32x64xf32>
    %7 = arith.addf %3, %6 : vector<32x64xf32>
    %c0_6 = arith.constant 0 : index
    %c0_7 = arith.constant 0 : index
    %8 = vector.load %arg7[%c0_6, %c0_7] : memref<32x64xf32, #tpu.memory_space<vmem>>, vector<32x64xf32>
    tpu.vector_store %arg7[%c0_6, %c0_7], %7 {strides = array<i32>} : memref<32x64xf32, #tpu.memory_space<vmem>>, vector<32x64xf32>,
    %c0_i32_8 = arith.constant 0 : i32
    %9 = arith.cmpi eq, %arg2, %c0_i32_8 : i32
    %10 = arith.extui %9 : i1 to i32
    %c0_i32_9 = arith.constant 0 : i32
    %11 = arith.cmpi ne, %10, %c0_i32_9 : i32
    scf.if %11 {
      %c0_10 = arith.constant 0 : index
      %c0_11 = arith.constant 0 : index
      %12 = vector.load %arg7[%c0_10, %c0_11] : memref<32x64xf32, #tpu.memory_space<vmem>>, vector<32x64xf32>
      %c0_12 = arith.constant 0 : index
      %c0_13 = arith.constant 0 : index
      %13 = vector.load %arg5[%c0_12, %c0_13] : memref<1x64xf32, #tpu.memory_space<vmem>>, vector<1x64xf32>
      %14 = vector.broadcast %13 : vector<1x64xf32> to vector<32x64xf32>
      %15 = arith.addf %12, %14 : vector<32x64xf32>
      %cst_14 = arith.constant 0.000000e+00 : f32
      %16 = vector.broadcast %cst_14 : f32 to vector<32x64xf32>
      %17 = arith.maximumf %15, %16 : vector<32x64xf32>
      %18 = arith.truncf %17 : vector<32x64xf32> to vector<32x64xbf16>
      %c0_15 = arith.constant 0 : index
      %c0_16 = arith.constant 0 : index
      %19 = vector.load %arg6[%c0_15, %c0_16] : memref<32x64xbf16, #tpu.memory_space<vmem>>, vector<32x64xbf16>
      tpu.vector_store %arg6[%c0_15, %c0_16], %18 {strides = array<i32>} : memref<32x64xbf16, #tpu.memory_space<vmem>>, vector<32x64xbf16>,
    } else {
    }
    return
  }
  func.func @transform_0(%arg0: i32, %arg1: i32, %arg2: i32) -> (i32, i32) {
    %c0_i32 = arith.constant 0 : i32
    return %arg0, %arg2 : i32, i32
  }
  func.func @transform_1(%arg0: i32, %arg1: i32, %arg2: i32) -> (i32, i32) {
    %c0_i32 = arith.constant 0 : i32
    return %arg2, %arg1 : i32, i32
  }
  func.func @transform_2(%arg0: i32, %arg1: i32, %arg2: i32) -> (i32, i32) {
    %c0_i32 = arith.constant 0 : i32
    %c0_i32_0 = arith.constant 0 : i32
    return %c0_i32, %arg1 : i32, i32
  }
  func.func @transform_3(%arg0: i32, %arg1: i32, %arg2: i32) -> (i32, i32) {
    %c0_i32 = arith.constant 0 : i32
    return %arg0, %arg1 : i32, i32
  }
}

module attributes {stable_mosaic.version = 11 : i64} {
  func.func @_mm_bias_kernel(%arg0: i32, %arg1: i32, %arg2: i32, %arg3: memref<32x576xbf16, #tpu.memory_space<vmem>>, %arg4: memref<576x64xbf16, #tpu.memory_space<vmem>>, %arg5: memref<1x64xf32, #tpu.memory_space<vmem>>, %arg6: memref<32x64xbf16, #tpu.memory_space<vmem>>, %arg7: memref<32x64xf32, #tpu.memory_space<vmem>>) attributes {dimension_semantics = [#tpu.dimension_semantics<parallel>, #tpu.dimension_semantics<parallel>, #tpu.dimension_semantics<arbitrary>], iteration_bounds = array<i64: 1, 1, 1>, scalar_prefetch = 0 : i64, scratch_operands = 1 : i64, tpu.core_type = #tpu.core_type<tc>, window_params = [{transform_indices = @transform_0, window_bounds = array<i64: 32, 576>}, {transform_indices = @transform_1, window_bounds = array<i64: 576, 64>}, {transform_indices = @transform_2, window_bounds = array<i64: 1, 64>}, {transform_indices = @transform_3, window_bounds = array<i64: 32, 64>}]} {
    %c0_i32 = arith.constant 0 : i32
    %0 = arith.cmpi eq, %arg2, %c0_i32 : i32
    %1 = arith.extui %0 : i1 to i32
    %c0_i32_0 = arith.constant 0 : i32
    %2 = arith.cmpi ne, %1, %c0_i32_0 : i32
    scf.if %2 {
      %cst_10 = arith.constant 0.000000e+00 : f32
      %12 = vector.broadcast %cst_10 : f32 to vector<32x64xf32>
      %c0_11 = arith.constant 0 : index
      %c0_12 = arith.constant 0 : index
      %13 = vector.load %arg7[%c0_11, %c0_12] : memref<32x64xf32, #tpu.memory_space<vmem>>, vector<32x64xf32>
      tpu.vector_store %arg7[%c0_11, %c0_12], %12 {strides = array<i32>} : memref<32x64xf32, #tpu.memory_space<vmem>>, vector<32x64xf32>,
    } else {
    }
    %c0 = arith.constant 0 : index
    %c0_1 = arith.constant 0 : index
    %3 = vector.load %arg7[%c0, %c0_1] : memref<32x64xf32, #tpu.memory_space<vmem>>, vector<32x64xf32>
    %c0_2 = arith.constant 0 : index
    %c0_3 = arith.constant 0 : index
    %4 = vector.load %arg3[%c0_2, %c0_3] : memref<32x576xbf16, #tpu.memory_space<vmem>>, vector<32x576xbf16>
    %c0_4 = arith.constant 0 : index
    %c0_5 = arith.constant 0 : index
    %5 = vector.load %arg4[%c0_4, %c0_5] : memref<576x64xbf16, #tpu.memory_space<vmem>>, vector<576x64xbf16>
    %cst = arith.constant dense<0.000000e+00> : vector<32x64xf32>
    %6 = tpu.matmul %4, %5, %cst {dimension_numbers = #tpu.dot_dimension_numbers<[1], [0], [0], [1], [0, 0, 1, 1], [], []>} : vector<32x576xbf16>, vector<576x64xbf16>, vector<32x64xf32> -> vector<32x64xf32>
    %7 = arith.addf %3, %6 : vector<32x64xf32>
    %c0_6 = arith.constant 0 : index
    %c0_7 = arith.constant 0 : index
    %8 = vector.load %arg7[%c0_6, %c0_7] : memref<32x64xf32, #tpu.memory_space<vmem>>, vector<32x64xf32>
    tpu.vector_store %arg7[%c0_6, %c0_7], %7 {strides = array<i32>} : memref<32x64xf32, #tpu.memory_space<vmem>>, vector<32x64xf32>,
    %c0_i32_8 = arith.constant 0 : i32
    %9 = arith.cmpi eq, %arg2, %c0_i32_8 : i32
    %10 = arith.extui %9 : i1 to i32
    %c0_i32_9 = arith.constant 0 : i32
    %11 = arith.cmpi ne, %10, %c0_i32_9 : i32
    scf.if %11 {
      %c0_10 = arith.constant 0 : index
      %c0_11 = arith.constant 0 : index
      %12 = vector.load %arg7[%c0_10, %c0_11] : memref<32x64xf32, #tpu.memory_space<vmem>>, vector<32x64xf32>
      %c0_12 = arith.constant 0 : index
      %c0_13 = arith.constant 0 : index
      %13 = vector.load %arg5[%c0_12, %c0_13] : memref<1x64xf32, #tpu.memory_space<vmem>>, vector<1x64xf32>
      %14 = vector.broadcast %13 : vector<1x64xf32> to vector<32x64xf32>
      %15 = arith.addf %12, %14 : vector<32x64xf32>
      %cst_14 = arith.constant 0.000000e+00 : f32
      %16 = vector.broadcast %cst_14 : f32 to vector<32x64xf32>
      %17 = arith.maximumf %15, %16 : vector<32x64xf32>
      %18 = arith.truncf %17 : vector<32x64xf32> to vector<32x64xbf16>
      %c0_15 = arith.constant 0 : index
      %c0_16 = arith.constant 0 : index
      %19 = vector.load %arg6[%c0_15, %c0_16] : memref<32x64xbf16, #tpu.memory_space<vmem>>, vector<32x64xbf16>
      tpu.vector_store %arg6[%c0_15, %c0_16], %18 {strides = array<i32>} : memref<32x64xbf16, #tpu.memory_space<vmem>>, vector<32x64xbf16>,
    } else {
    }
    return
  }
  func.func @transform_0(%arg0: i32, %arg1: i32, %arg2: i32) -> (i32, i32) {
    %c0_i32 = arith.constant 0 : i32
    return %arg0, %arg2 : i32, i32
  }
  func.func @transform_1(%arg0: i32, %arg1: i32, %arg2: i32) -> (i32, i32) {
    %c0_i32 = arith.constant 0 : i32
    return %arg2, %arg1 : i32, i32
  }
  func.func @transform_2(%arg0: i32, %arg1: i32, %arg2: i32) -> (i32, i32) {
    %c0_i32 = arith.constant 0 : i32
    %c0_i32_0 = arith.constant 0 : i32
    return %c0_i32, %arg1 : i32, i32
  }
  func.func @transform_3(%arg0: i32, %arg1: i32, %arg2: i32) -> (i32, i32) {
    %c0_i32 = arith.constant 0 : i32
    return %arg0, %arg1 : i32, i32
  }
}

module attributes {stable_mosaic.version = 11 : i64} {
  func.func @_mm_bias_kernel(%arg0: i32, %arg1: i32, %arg2: i32, %arg3: memref<32x64xbf16, #tpu.memory_space<vmem>>, %arg4: memref<64x256xbf16, #tpu.memory_space<vmem>>, %arg5: memref<1x256xf32, #tpu.memory_space<vmem>>, %arg6: memref<32x256xbf16, #tpu.memory_space<vmem>>, %arg7: memref<32x256xf32, #tpu.memory_space<vmem>>) attributes {dimension_semantics = [#tpu.dimension_semantics<parallel>, #tpu.dimension_semantics<parallel>, #tpu.dimension_semantics<arbitrary>], iteration_bounds = array<i64: 1, 1, 1>, scalar_prefetch = 0 : i64, scratch_operands = 1 : i64, tpu.core_type = #tpu.core_type<tc>, window_params = [{transform_indices = @transform_0, window_bounds = array<i64: 32, 64>}, {transform_indices = @transform_1, window_bounds = array<i64: 64, 256>}, {transform_indices = @transform_2, window_bounds = array<i64: 1, 256>}, {transform_indices = @transform_3, window_bounds = array<i64: 32, 256>}]} {
    %c0_i32 = arith.constant 0 : i32
    %0 = arith.cmpi eq, %arg2, %c0_i32 : i32
    %1 = arith.extui %0 : i1 to i32
    %c0_i32_0 = arith.constant 0 : i32
    %2 = arith.cmpi ne, %1, %c0_i32_0 : i32
    scf.if %2 {
      %cst_10 = arith.constant 0.000000e+00 : f32
      %12 = vector.broadcast %cst_10 : f32 to vector<32x256xf32>
      %c0_11 = arith.constant 0 : index
      %c0_12 = arith.constant 0 : index
      %13 = vector.load %arg7[%c0_11, %c0_12] : memref<32x256xf32, #tpu.memory_space<vmem>>, vector<32x256xf32>
      tpu.vector_store %arg7[%c0_11, %c0_12], %12 {strides = array<i32>} : memref<32x256xf32, #tpu.memory_space<vmem>>, vector<32x256xf32>,
    } else {
    }
    %c0 = arith.constant 0 : index
    %c0_1 = arith.constant 0 : index
    %3 = vector.load %arg7[%c0, %c0_1] : memref<32x256xf32, #tpu.memory_space<vmem>>, vector<32x256xf32>
    %c0_2 = arith.constant 0 : index
    %c0_3 = arith.constant 0 : index
    %4 = vector.load %arg3[%c0_2, %c0_3] : memref<32x64xbf16, #tpu.memory_space<vmem>>, vector<32x64xbf16>
    %c0_4 = arith.constant 0 : index
    %c0_5 = arith.constant 0 : index
    %5 = vector.load %arg4[%c0_4, %c0_5] : memref<64x256xbf16, #tpu.memory_space<vmem>>, vector<64x256xbf16>
    %cst = arith.constant dense<0.000000e+00> : vector<32x256xf32>
    %6 = tpu.matmul %4, %5, %cst {dimension_numbers = #tpu.dot_dimension_numbers<[1], [0], [0], [1], [0, 0, 1, 1], [], []>} : vector<32x64xbf16>, vector<64x256xbf16>, vector<32x256xf32> -> vector<32x256xf32>
    %7 = arith.addf %3, %6 : vector<32x256xf32>
    %c0_6 = arith.constant 0 : index
    %c0_7 = arith.constant 0 : index
    %8 = vector.load %arg7[%c0_6, %c0_7] : memref<32x256xf32, #tpu.memory_space<vmem>>, vector<32x256xf32>
    tpu.vector_store %arg7[%c0_6, %c0_7], %7 {strides = array<i32>} : memref<32x256xf32, #tpu.memory_space<vmem>>, vector<32x256xf32>,
    %c0_i32_8 = arith.constant 0 : i32
    %9 = arith.cmpi eq, %arg2, %c0_i32_8 : i32
    %10 = arith.extui %9 : i1 to i32
    %c0_i32_9 = arith.constant 0 : i32
    %11 = arith.cmpi ne, %10, %c0_i32_9 : i32
    scf.if %11 {
      %c0_10 = arith.constant 0 : index
      %c0_11 = arith.constant 0 : index
      %12 = vector.load %arg7[%c0_10, %c0_11] : memref<32x256xf32, #tpu.memory_space<vmem>>, vector<32x256xf32>
      %c0_12 = arith.constant 0 : index
      %c0_13 = arith.constant 0 : index
      %13 = vector.load %arg5[%c0_12, %c0_13] : memref<1x256xf32, #tpu.memory_space<vmem>>, vector<1x256xf32>
      %14 = vector.broadcast %13 : vector<1x256xf32> to vector<32x256xf32>
      %15 = arith.addf %12, %14 : vector<32x256xf32>
      %16 = arith.truncf %15 : vector<32x256xf32> to vector<32x256xbf16>
      %c0_14 = arith.constant 0 : index
      %c0_15 = arith.constant 0 : index
      %17 = vector.load %arg6[%c0_14, %c0_15] : memref<32x256xbf16, #tpu.memory_space<vmem>>, vector<32x256xbf16>
      tpu.vector_store %arg6[%c0_14, %c0_15], %16 {strides = array<i32>} : memref<32x256xbf16, #tpu.memory_space<vmem>>, vector<32x256xbf16>,
    } else {
    }
    return
  }
  func.func @transform_0(%arg0: i32, %arg1: i32, %arg2: i32) -> (i32, i32) {
    %c0_i32 = arith.constant 0 : i32
    return %arg0, %arg2 : i32, i32
  }
  func.func @transform_1(%arg0: i32, %arg1: i32, %arg2: i32) -> (i32, i32) {
    %c0_i32 = arith.constant 0 : i32
    return %arg2, %arg1 : i32, i32
  }
  func.func @transform_2(%arg0: i32, %arg1: i32, %arg2: i32) -> (i32, i32) {
    %c0_i32 = arith.constant 0 : i32
    %c0_i32_0 = arith.constant 0 : i32
    return %c0_i32, %arg1 : i32, i32
  }
  func.func @transform_3(%arg0: i32, %arg1: i32, %arg2: i32) -> (i32, i32) {
    %c0_i32 = arith.constant 0 : i32
    return %arg0, %arg1 : i32, i32
  }
}

module attributes {stable_mosaic.version = 11 : i64} {
  func.func @_mm_bias_res_relu_kernel(%arg0: i32, %arg1: i32, %arg2: i32, %arg3: memref<32x64xbf16, #tpu.memory_space<vmem>>, %arg4: memref<64x256xbf16, #tpu.memory_space<vmem>>, %arg5: memref<1x256xf32, #tpu.memory_space<vmem>>, %arg6: memref<32x256xbf16, #tpu.memory_space<vmem>>, %arg7: memref<32x256xbf16, #tpu.memory_space<vmem>>, %arg8: memref<32x256xf32, #tpu.memory_space<vmem>>) attributes {dimension_semantics = [#tpu.dimension_semantics<parallel>, #tpu.dimension_semantics<parallel>, #tpu.dimension_semantics<arbitrary>], iteration_bounds = array<i64: 1, 1, 1>, scalar_prefetch = 0 : i64, scratch_operands = 1 : i64, tpu.core_type = #tpu.core_type<tc>, window_params = [{transform_indices = @transform_0, window_bounds = array<i64: 32, 64>}, {transform_indices = @transform_1, window_bounds = array<i64: 64, 256>}, {transform_indices = @transform_2, window_bounds = array<i64: 1, 256>}, {transform_indices = @transform_3, window_bounds = array<i64: 32, 256>}, {transform_indices = @transform_4, window_bounds = array<i64: 32, 256>}]} {
    %c0_i32 = arith.constant 0 : i32
    %0 = arith.cmpi eq, %arg2, %c0_i32 : i32
    %1 = arith.extui %0 : i1 to i32
    %c0_i32_0 = arith.constant 0 : i32
    %2 = arith.cmpi ne, %1, %c0_i32_0 : i32
    scf.if %2 {
      %cst_10 = arith.constant 0.000000e+00 : f32
      %12 = vector.broadcast %cst_10 : f32 to vector<32x256xf32>
      %c0_11 = arith.constant 0 : index
      %c0_12 = arith.constant 0 : index
      %13 = vector.load %arg8[%c0_11, %c0_12] : memref<32x256xf32, #tpu.memory_space<vmem>>, vector<32x256xf32>
      tpu.vector_store %arg8[%c0_11, %c0_12], %12 {strides = array<i32>} : memref<32x256xf32, #tpu.memory_space<vmem>>, vector<32x256xf32>,
    } else {
    }
    %c0 = arith.constant 0 : index
    %c0_1 = arith.constant 0 : index
    %3 = vector.load %arg8[%c0, %c0_1] : memref<32x256xf32, #tpu.memory_space<vmem>>, vector<32x256xf32>
    %c0_2 = arith.constant 0 : index
    %c0_3 = arith.constant 0 : index
    %4 = vector.load %arg3[%c0_2, %c0_3] : memref<32x64xbf16, #tpu.memory_space<vmem>>, vector<32x64xbf16>
    %c0_4 = arith.constant 0 : index
    %c0_5 = arith.constant 0 : index
    %5 = vector.load %arg4[%c0_4, %c0_5] : memref<64x256xbf16, #tpu.memory_space<vmem>>, vector<64x256xbf16>
    %cst = arith.constant dense<0.000000e+00> : vector<32x256xf32>
    %6 = tpu.matmul %4, %5, %cst {dimension_numbers = #tpu.dot_dimension_numbers<[1], [0], [0], [1], [0, 0, 1, 1], [], []>} : vector<32x64xbf16>, vector<64x256xbf16>, vector<32x256xf32> -> vector<32x256xf32>
    %7 = arith.addf %3, %6 : vector<32x256xf32>
    %c0_6 = arith.constant 0 : index
    %c0_7 = arith.constant 0 : index
    %8 = vector.load %arg8[%c0_6, %c0_7] : memref<32x256xf32, #tpu.memory_space<vmem>>, vector<32x256xf32>
    tpu.vector_store %arg8[%c0_6, %c0_7], %7 {strides = array<i32>} : memref<32x256xf32, #tpu.memory_space<vmem>>, vector<32x256xf32>,
    %c0_i32_8 = arith.constant 0 : i32
    %9 = arith.cmpi eq, %arg2, %c0_i32_8 : i32
    %10 = arith.extui %9 : i1 to i32
    %c0_i32_9 = arith.constant 0 : i32
    %11 = arith.cmpi ne, %10, %c0_i32_9 : i32
    scf.if %11 {
      %c0_10 = arith.constant 0 : index
      %c0_11 = arith.constant 0 : index
      %12 = vector.load %arg8[%c0_10, %c0_11] : memref<32x256xf32, #tpu.memory_space<vmem>>, vector<32x256xf32>
      %c0_12 = arith.constant 0 : index
      %c0_13 = arith.constant 0 : index
      %13 = vector.load %arg5[%c0_12, %c0_13] : memref<1x256xf32, #tpu.memory_space<vmem>>, vector<1x256xf32>
      %14 = vector.broadcast %13 : vector<1x256xf32> to vector<32x256xf32>
      %15 = arith.addf %12, %14 : vector<32x256xf32>
      %c0_14 = arith.constant 0 : index
      %c0_15 = arith.constant 0 : index
      %16 = vector.load %arg6[%c0_14, %c0_15] : memref<32x256xbf16, #tpu.memory_space<vmem>>, vector<32x256xbf16>
      %17 = arith.extf %16 : vector<32x256xbf16> to vector<32x256xf32>
      %18 = arith.addf %15, %17 : vector<32x256xf32>
      %cst_16 = arith.constant 0.000000e+00 : f32
      %19 = vector.broadcast %cst_16 : f32 to vector<32x256xf32>
      %20 = arith.maximumf %18, %19 : vector<32x256xf32>
      %21 = arith.truncf %20 : vector<32x256xf32> to vector<32x256xbf16>
      %c0_17 = arith.constant 0 : index
      %c0_18 = arith.constant 0 : index
      %22 = vector.load %arg7[%c0_17, %c0_18] : memref<32x256xbf16, #tpu.memory_space<vmem>>, vector<32x256xbf16>
      tpu.vector_store %arg7[%c0_17, %c0_18], %21 {strides = array<i32>} : memref<32x256xbf16, #tpu.memory_space<vmem>>, vector<32x256xbf16>,
    } else {
    }
    return
  }
  func.func @transform_0(%arg0: i32, %arg1: i32, %arg2: i32) -> (i32, i32) {
    %c0_i32 = arith.constant 0 : i32
    return %arg0, %arg2 : i32, i32
  }
  func.func @transform_1(%arg0: i32, %arg1: i32, %arg2: i32) -> (i32, i32) {
    %c0_i32 = arith.constant 0 : i32
    return %arg2, %arg1 : i32, i32
  }
  func.func @transform_2(%arg0: i32, %arg1: i32, %arg2: i32) -> (i32, i32) {
    %c0_i32 = arith.constant 0 : i32
    %c0_i32_0 = arith.constant 0 : i32
    return %c0_i32, %arg1 : i32, i32
  }
  func.func @transform_3(%arg0: i32, %arg1: i32, %arg2: i32) -> (i32, i32) {
    %c0_i32 = arith.constant 0 : i32
    return %arg0, %arg1 : i32, i32
  }
  func.func @transform_4(%arg0: i32, %arg1: i32, %arg2: i32) -> (i32, i32) {
    %c0_i32 = arith.constant 0 : i32
    return %arg0, %arg1 : i32, i32
  }
}

module attributes {stable_mosaic.version = 11 : i64} {
  func.func @_mm_bias_kernel(%arg0: i32, %arg1: i32, %arg2: i32, %arg3: memref<32x256xbf16, #tpu.memory_space<vmem>>, %arg4: memref<256x128xbf16, #tpu.memory_space<vmem>>, %arg5: memref<1x128xf32, #tpu.memory_space<vmem>>, %arg6: memref<32x128xbf16, #tpu.memory_space<vmem>>, %arg7: memref<32x128xf32, #tpu.memory_space<vmem>>) attributes {dimension_semantics = [#tpu.dimension_semantics<parallel>, #tpu.dimension_semantics<parallel>, #tpu.dimension_semantics<arbitrary>], iteration_bounds = array<i64: 1, 1, 1>, scalar_prefetch = 0 : i64, scratch_operands = 1 : i64, tpu.core_type = #tpu.core_type<tc>, window_params = [{transform_indices = @transform_0, window_bounds = array<i64: 32, 256>}, {transform_indices = @transform_1, window_bounds = array<i64: 256, 128>}, {transform_indices = @transform_2, window_bounds = array<i64: 1, 128>}, {transform_indices = @transform_3, window_bounds = array<i64: 32, 128>}]} {
    %c0_i32 = arith.constant 0 : i32
    %0 = arith.cmpi eq, %arg2, %c0_i32 : i32
    %1 = arith.extui %0 : i1 to i32
    %c0_i32_0 = arith.constant 0 : i32
    %2 = arith.cmpi ne, %1, %c0_i32_0 : i32
    scf.if %2 {
      %cst_10 = arith.constant 0.000000e+00 : f32
      %12 = vector.broadcast %cst_10 : f32 to vector<32x128xf32>
      %c0_11 = arith.constant 0 : index
      %c0_12 = arith.constant 0 : index
      %13 = vector.load %arg7[%c0_11, %c0_12] : memref<32x128xf32, #tpu.memory_space<vmem>>, vector<32x128xf32>
      tpu.vector_store %arg7[%c0_11, %c0_12], %12 {strides = array<i32>} : memref<32x128xf32, #tpu.memory_space<vmem>>, vector<32x128xf32>,
    } else {
    }
    %c0 = arith.constant 0 : index
    %c0_1 = arith.constant 0 : index
    %3 = vector.load %arg7[%c0, %c0_1] : memref<32x128xf32, #tpu.memory_space<vmem>>, vector<32x128xf32>
    %c0_2 = arith.constant 0 : index
    %c0_3 = arith.constant 0 : index
    %4 = vector.load %arg3[%c0_2, %c0_3] : memref<32x256xbf16, #tpu.memory_space<vmem>>, vector<32x256xbf16>
    %c0_4 = arith.constant 0 : index
    %c0_5 = arith.constant 0 : index
    %5 = vector.load %arg4[%c0_4, %c0_5] : memref<256x128xbf16, #tpu.memory_space<vmem>>, vector<256x128xbf16>
    %cst = arith.constant dense<0.000000e+00> : vector<32x128xf32>
    %6 = tpu.matmul %4, %5, %cst {dimension_numbers = #tpu.dot_dimension_numbers<[1], [0], [0], [1], [0, 0, 1, 1], [], []>} : vector<32x256xbf16>, vector<256x128xbf16>, vector<32x128xf32> -> vector<32x128xf32>
    %7 = arith.addf %3, %6 : vector<32x128xf32>
    %c0_6 = arith.constant 0 : index
    %c0_7 = arith.constant 0 : index
    %8 = vector.load %arg7[%c0_6, %c0_7] : memref<32x128xf32, #tpu.memory_space<vmem>>, vector<32x128xf32>
    tpu.vector_store %arg7[%c0_6, %c0_7], %7 {strides = array<i32>} : memref<32x128xf32, #tpu.memory_space<vmem>>, vector<32x128xf32>,
    %c0_i32_8 = arith.constant 0 : i32
    %9 = arith.cmpi eq, %arg2, %c0_i32_8 : i32
    %10 = arith.extui %9 : i1 to i32
    %c0_i32_9 = arith.constant 0 : i32
    %11 = arith.cmpi ne, %10, %c0_i32_9 : i32
    scf.if %11 {
      %c0_10 = arith.constant 0 : index
      %c0_11 = arith.constant 0 : index
      %12 = vector.load %arg7[%c0_10, %c0_11] : memref<32x128xf32, #tpu.memory_space<vmem>>, vector<32x128xf32>
      %c0_12 = arith.constant 0 : index
      %c0_13 = arith.constant 0 : index
      %13 = vector.load %arg5[%c0_12, %c0_13] : memref<1x128xf32, #tpu.memory_space<vmem>>, vector<1x128xf32>
      %14 = vector.broadcast %13 : vector<1x128xf32> to vector<32x128xf32>
      %15 = arith.addf %12, %14 : vector<32x128xf32>
      %cst_14 = arith.constant 0.000000e+00 : f32
      %16 = vector.broadcast %cst_14 : f32 to vector<32x128xf32>
      %17 = arith.maximumf %15, %16 : vector<32x128xf32>
      %18 = arith.truncf %17 : vector<32x128xf32> to vector<32x128xbf16>
      %c0_15 = arith.constant 0 : index
      %c0_16 = arith.constant 0 : index
      %19 = vector.load %arg6[%c0_15, %c0_16] : memref<32x128xbf16, #tpu.memory_space<vmem>>, vector<32x128xbf16>
      tpu.vector_store %arg6[%c0_15, %c0_16], %18 {strides = array<i32>} : memref<32x128xbf16, #tpu.memory_space<vmem>>, vector<32x128xbf16>,
    } else {
    }
    return
  }
  func.func @transform_0(%arg0: i32, %arg1: i32, %arg2: i32) -> (i32, i32) {
    %c0_i32 = arith.constant 0 : i32
    return %arg0, %arg2 : i32, i32
  }
  func.func @transform_1(%arg0: i32, %arg1: i32, %arg2: i32) -> (i32, i32) {
    %c0_i32 = arith.constant 0 : i32
    return %arg2, %arg1 : i32, i32
  }
  func.func @transform_2(%arg0: i32, %arg1: i32, %arg2: i32) -> (i32, i32) {
    %c0_i32 = arith.constant 0 : i32
    %c0_i32_0 = arith.constant 0 : i32
    return %c0_i32, %arg1 : i32, i32
  }
  func.func @transform_3(%arg0: i32, %arg1: i32, %arg2: i32) -> (i32, i32) {
    %c0_i32 = arith.constant 0 : i32
    return %arg0, %arg1 : i32, i32
  }
}

module attributes {stable_mosaic.version = 11 : i64} {
  func.func @_mm_bias_kernel(%arg0: i32, %arg1: i32, %arg2: i32, %arg3: memref<8x384xbf16, #tpu.memory_space<vmem>>, %arg4: memref<384x128xbf16, #tpu.memory_space<vmem>>, %arg5: memref<1x128xf32, #tpu.memory_space<vmem>>, %arg6: memref<8x128xbf16, #tpu.memory_space<vmem>>, %arg7: memref<8x128xf32, #tpu.memory_space<vmem>>) attributes {dimension_semantics = [#tpu.dimension_semantics<parallel>, #tpu.dimension_semantics<parallel>, #tpu.dimension_semantics<arbitrary>], iteration_bounds = array<i64: 1, 1, 3>, scalar_prefetch = 0 : i64, scratch_operands = 1 : i64, tpu.core_type = #tpu.core_type<tc>, window_params = [{transform_indices = @transform_0, window_bounds = array<i64: 8, 384>}, {transform_indices = @transform_1, window_bounds = array<i64: 384, 128>}, {transform_indices = @transform_2, window_bounds = array<i64: 1, 128>}, {transform_indices = @transform_3, window_bounds = array<i64: 8, 128>}]} {
    %c0_i32 = arith.constant 0 : i32
    %0 = arith.cmpi eq, %arg2, %c0_i32 : i32
    %1 = arith.extui %0 : i1 to i32
    %c0_i32_0 = arith.constant 0 : i32
    %2 = arith.cmpi ne, %1, %c0_i32_0 : i32
    scf.if %2 {
      %cst_9 = arith.constant 0.000000e+00 : f32
      %12 = vector.broadcast %cst_9 : f32 to vector<8x128xf32>
      %c0_10 = arith.constant 0 : index
      %c0_11 = arith.constant 0 : index
      %13 = vector.load %arg7[%c0_10, %c0_11] : memref<8x128xf32, #tpu.memory_space<vmem>>, vector<8x128xf32>
      tpu.vector_store %arg7[%c0_10, %c0_11], %12 {strides = array<i32>} : memref<8x128xf32, #tpu.memory_space<vmem>>, vector<8x128xf32>,
    } else {
    }
    %c0 = arith.constant 0 : index
    %c0_1 = arith.constant 0 : index
    %3 = vector.load %arg7[%c0, %c0_1] : memref<8x128xf32, #tpu.memory_space<vmem>>, vector<8x128xf32>
    %c0_2 = arith.constant 0 : index
    %c0_3 = arith.constant 0 : index
    %4 = vector.load %arg3[%c0_2, %c0_3] : memref<8x384xbf16, #tpu.memory_space<vmem>>, vector<8x384xbf16>
    %c0_4 = arith.constant 0 : index
    %c0_5 = arith.constant 0 : index
    %5 = vector.load %arg4[%c0_4, %c0_5] : memref<384x128xbf16, #tpu.memory_space<vmem>>, vector<384x128xbf16>
    %cst = arith.constant dense<0.000000e+00> : vector<8x128xf32>
    %6 = tpu.matmul %4, %5, %cst {dimension_numbers = #tpu.dot_dimension_numbers<[1], [0], [0], [1], [0, 0, 1, 1], [], []>} : vector<8x384xbf16>, vector<384x128xbf16>, vector<8x128xf32> -> vector<8x128xf32>
    %7 = arith.addf %3, %6 : vector<8x128xf32>
    %c0_6 = arith.constant 0 : index
    %c0_7 = arith.constant 0 : index
    %8 = vector.load %arg7[%c0_6, %c0_7] : memref<8x128xf32, #tpu.memory_space<vmem>>, vector<8x128xf32>
    tpu.vector_store %arg7[%c0_6, %c0_7], %7 {strides = array<i32>} : memref<8x128xf32, #tpu.memory_space<vmem>>, vector<8x128xf32>,
    %c2_i32 = arith.constant 2 : i32
    %9 = arith.cmpi eq, %arg2, %c2_i32 : i32
    %10 = arith.extui %9 : i1 to i32
    %c0_i32_8 = arith.constant 0 : i32
    %11 = arith.cmpi ne, %10, %c0_i32_8 : i32
    scf.if %11 {
      %c0_9 = arith.constant 0 : index
      %c0_10 = arith.constant 0 : index
      %12 = vector.load %arg7[%c0_9, %c0_10] : memref<8x128xf32, #tpu.memory_space<vmem>>, vector<8x128xf32>
      %c0_11 = arith.constant 0 : index
      %c0_12 = arith.constant 0 : index
      %13 = vector.load %arg5[%c0_11, %c0_12] : memref<1x128xf32, #tpu.memory_space<vmem>>, vector<1x128xf32>
      %14 = vector.broadcast %13 : vector<1x128xf32> to vector<8x128xf32>
      %15 = arith.addf %12, %14 : vector<8x128xf32>
      %cst_13 = arith.constant 0.000000e+00 : f32
      %16 = vector.broadcast %cst_13 : f32 to vector<8x128xf32>
      %17 = arith.maximumf %15, %16 : vector<8x128xf32>
      %18 = arith.truncf %17 : vector<8x128xf32> to vector<8x128xbf16>
      %c0_14 = arith.constant 0 : index
      %c0_15 = arith.constant 0 : index
      %19 = vector.load %arg6[%c0_14, %c0_15] : memref<8x128xbf16, #tpu.memory_space<vmem>>, vector<8x128xbf16>
      tpu.vector_store %arg6[%c0_14, %c0_15], %18 {strides = array<i32>} : memref<8x128xbf16, #tpu.memory_space<vmem>>, vector<8x128xbf16>,
    } else {
    }
    return
  }
  func.func @transform_0(%arg0: i32, %arg1: i32, %arg2: i32) -> (i32, i32) {
    %c0_i32 = arith.constant 0 : i32
    return %arg0, %arg2 : i32, i32
  }
  func.func @transform_1(%arg0: i32, %arg1: i32, %arg2: i32) -> (i32, i32) {
    %c0_i32 = arith.constant 0 : i32
    return %arg2, %arg1 : i32, i32
  }
  func.func @transform_2(%arg0: i32, %arg1: i32, %arg2: i32) -> (i32, i32) {
    %c0_i32 = arith.constant 0 : i32
    %c0_i32_0 = arith.constant 0 : i32
    return %c0_i32, %arg1 : i32, i32
  }
  func.func @transform_3(%arg0: i32, %arg1: i32, %arg2: i32) -> (i32, i32) {
    %c0_i32 = arith.constant 0 : i32
    return %arg0, %arg1 : i32, i32
  }
}

module attributes {stable_mosaic.version = 11 : i64} {
  func.func @_mm_bias_kernel(%arg0: i32, %arg1: i32, %arg2: i32, %arg3: memref<8x256xbf16, #tpu.memory_space<vmem>>, %arg4: memref<256x512xbf16, #tpu.memory_space<vmem>>, %arg5: memref<1x512xf32, #tpu.memory_space<vmem>>, %arg6: memref<8x512xbf16, #tpu.memory_space<vmem>>, %arg7: memref<8x512xf32, #tpu.memory_space<vmem>>) attributes {dimension_semantics = [#tpu.dimension_semantics<parallel>, #tpu.dimension_semantics<parallel>, #tpu.dimension_semantics<arbitrary>], iteration_bounds = array<i64: 1, 1, 1>, scalar_prefetch = 0 : i64, scratch_operands = 1 : i64, tpu.core_type = #tpu.core_type<tc>, window_params = [{transform_indices = @transform_0, window_bounds = array<i64: 8, 256>}, {transform_indices = @transform_1, window_bounds = array<i64: 256, 512>}, {transform_indices = @transform_2, window_bounds = array<i64: 1, 512>}, {transform_indices = @transform_3, window_bounds = array<i64: 8, 512>}]} {
    %c0_i32 = arith.constant 0 : i32
    %0 = arith.cmpi eq, %arg2, %c0_i32 : i32
    %1 = arith.extui %0 : i1 to i32
    %c0_i32_0 = arith.constant 0 : i32
    %2 = arith.cmpi ne, %1, %c0_i32_0 : i32
    scf.if %2 {
      %cst_10 = arith.constant 0.000000e+00 : f32
      %12 = vector.broadcast %cst_10 : f32 to vector<8x512xf32>
      %c0_11 = arith.constant 0 : index
      %c0_12 = arith.constant 0 : index
      %13 = vector.load %arg7[%c0_11, %c0_12] : memref<8x512xf32, #tpu.memory_space<vmem>>, vector<8x512xf32>
      tpu.vector_store %arg7[%c0_11, %c0_12], %12 {strides = array<i32>} : memref<8x512xf32, #tpu.memory_space<vmem>>, vector<8x512xf32>,
    } else {
    }
    %c0 = arith.constant 0 : index
    %c0_1 = arith.constant 0 : index
    %3 = vector.load %arg7[%c0, %c0_1] : memref<8x512xf32, #tpu.memory_space<vmem>>, vector<8x512xf32>
    %c0_2 = arith.constant 0 : index
    %c0_3 = arith.constant 0 : index
    %4 = vector.load %arg3[%c0_2, %c0_3] : memref<8x256xbf16, #tpu.memory_space<vmem>>, vector<8x256xbf16>
    %c0_4 = arith.constant 0 : index
    %c0_5 = arith.constant 0 : index
    %5 = vector.load %arg4[%c0_4, %c0_5] : memref<256x512xbf16, #tpu.memory_space<vmem>>, vector<256x512xbf16>
    %cst = arith.constant dense<0.000000e+00> : vector<8x512xf32>
    %6 = tpu.matmul %4, %5, %cst {dimension_numbers = #tpu.dot_dimension_numbers<[1], [0], [0], [1], [0, 0, 1, 1], [], []>} : vector<8x256xbf16>, vector<256x512xbf16>, vector<8x512xf32> -> vector<8x512xf32>
    %7 = arith.addf %3, %6 : vector<8x512xf32>
    %c0_6 = arith.constant 0 : index
    %c0_7 = arith.constant 0 : index
    %8 = vector.load %arg7[%c0_6, %c0_7] : memref<8x512xf32, #tpu.memory_space<vmem>>, vector<8x512xf32>
    tpu.vector_store %arg7[%c0_6, %c0_7], %7 {strides = array<i32>} : memref<8x512xf32, #tpu.memory_space<vmem>>, vector<8x512xf32>,
    %c0_i32_8 = arith.constant 0 : i32
    %9 = arith.cmpi eq, %arg2, %c0_i32_8 : i32
    %10 = arith.extui %9 : i1 to i32
    %c0_i32_9 = arith.constant 0 : i32
    %11 = arith.cmpi ne, %10, %c0_i32_9 : i32
    scf.if %11 {
      %c0_10 = arith.constant 0 : index
      %c0_11 = arith.constant 0 : index
      %12 = vector.load %arg7[%c0_10, %c0_11] : memref<8x512xf32, #tpu.memory_space<vmem>>, vector<8x512xf32>
      %c0_12 = arith.constant 0 : index
      %c0_13 = arith.constant 0 : index
      %13 = vector.load %arg5[%c0_12, %c0_13] : memref<1x512xf32, #tpu.memory_space<vmem>>, vector<1x512xf32>
      %14 = vector.broadcast %13 : vector<1x512xf32> to vector<8x512xf32>
      %15 = arith.addf %12, %14 : vector<8x512xf32>
      %16 = arith.truncf %15 : vector<8x512xf32> to vector<8x512xbf16>
      %c0_14 = arith.constant 0 : index
      %c0_15 = arith.constant 0 : index
      %17 = vector.load %arg6[%c0_14, %c0_15] : memref<8x512xbf16, #tpu.memory_space<vmem>>, vector<8x512xbf16>
      tpu.vector_store %arg6[%c0_14, %c0_15], %16 {strides = array<i32>} : memref<8x512xbf16, #tpu.memory_space<vmem>>, vector<8x512xbf16>,
    } else {
    }
    return
  }
  func.func @transform_0(%arg0: i32, %arg1: i32, %arg2: i32) -> (i32, i32) {
    %c0_i32 = arith.constant 0 : i32
    return %arg0, %arg2 : i32, i32
  }
  func.func @transform_1(%arg0: i32, %arg1: i32, %arg2: i32) -> (i32, i32) {
    %c0_i32 = arith.constant 0 : i32
    return %arg2, %arg1 : i32, i32
  }
  func.func @transform_2(%arg0: i32, %arg1: i32, %arg2: i32) -> (i32, i32) {
    %c0_i32 = arith.constant 0 : i32
    %c0_i32_0 = arith.constant 0 : i32
    return %c0_i32, %arg1 : i32, i32
  }
  func.func @transform_3(%arg0: i32, %arg1: i32, %arg2: i32) -> (i32, i32) {
    %c0_i32 = arith.constant 0 : i32
    return %arg0, %arg1 : i32, i32
  }
}

module attributes {stable_mosaic.version = 11 : i64} {
  func.func @_mm_bias_kernel(%arg0: i32, %arg1: i32, %arg2: i32, %arg3: memref<8x512xbf16, #tpu.memory_space<vmem>>, %arg4: memref<512x256xbf16, #tpu.memory_space<vmem>>, %arg5: memref<1x256xf32, #tpu.memory_space<vmem>>, %arg6: memref<8x256xbf16, #tpu.memory_space<vmem>>, %arg7: memref<8x256xf32, #tpu.memory_space<vmem>>) attributes {dimension_semantics = [#tpu.dimension_semantics<parallel>, #tpu.dimension_semantics<parallel>, #tpu.dimension_semantics<arbitrary>], iteration_bounds = array<i64: 1, 1, 1>, scalar_prefetch = 0 : i64, scratch_operands = 1 : i64, tpu.core_type = #tpu.core_type<tc>, window_params = [{transform_indices = @transform_0, window_bounds = array<i64: 8, 512>}, {transform_indices = @transform_1, window_bounds = array<i64: 512, 256>}, {transform_indices = @transform_2, window_bounds = array<i64: 1, 256>}, {transform_indices = @transform_3, window_bounds = array<i64: 8, 256>}]} {
    %c0_i32 = arith.constant 0 : i32
    %0 = arith.cmpi eq, %arg2, %c0_i32 : i32
    %1 = arith.extui %0 : i1 to i32
    %c0_i32_0 = arith.constant 0 : i32
    %2 = arith.cmpi ne, %1, %c0_i32_0 : i32
    scf.if %2 {
      %cst_10 = arith.constant 0.000000e+00 : f32
      %12 = vector.broadcast %cst_10 : f32 to vector<8x256xf32>
      %c0_11 = arith.constant 0 : index
      %c0_12 = arith.constant 0 : index
      %13 = vector.load %arg7[%c0_11, %c0_12] : memref<8x256xf32, #tpu.memory_space<vmem>>, vector<8x256xf32>
      tpu.vector_store %arg7[%c0_11, %c0_12], %12 {strides = array<i32>} : memref<8x256xf32, #tpu.memory_space<vmem>>, vector<8x256xf32>,
    } else {
    }
    %c0 = arith.constant 0 : index
    %c0_1 = arith.constant 0 : index
    %3 = vector.load %arg7[%c0, %c0_1] : memref<8x256xf32, #tpu.memory_space<vmem>>, vector<8x256xf32>
    %c0_2 = arith.constant 0 : index
    %c0_3 = arith.constant 0 : index
    %4 = vector.load %arg3[%c0_2, %c0_3] : memref<8x512xbf16, #tpu.memory_space<vmem>>, vector<8x512xbf16>
    %c0_4 = arith.constant 0 : index
    %c0_5 = arith.constant 0 : index
    %5 = vector.load %arg4[%c0_4, %c0_5] : memref<512x256xbf16, #tpu.memory_space<vmem>>, vector<512x256xbf16>
    %cst = arith.constant dense<0.000000e+00> : vector<8x256xf32>
    %6 = tpu.matmul %4, %5, %cst {dimension_numbers = #tpu.dot_dimension_numbers<[1], [0], [0], [1], [0, 0, 1, 1], [], []>} : vector<8x512xbf16>, vector<512x256xbf16>, vector<8x256xf32> -> vector<8x256xf32>
    %7 = arith.addf %3, %6 : vector<8x256xf32>
    %c0_6 = arith.constant 0 : index
    %c0_7 = arith.constant 0 : index
    %8 = vector.load %arg7[%c0_6, %c0_7] : memref<8x256xf32, #tpu.memory_space<vmem>>, vector<8x256xf32>
    tpu.vector_store %arg7[%c0_6, %c0_7], %7 {strides = array<i32>} : memref<8x256xf32, #tpu.memory_space<vmem>>, vector<8x256xf32>,
    %c0_i32_8 = arith.constant 0 : i32
    %9 = arith.cmpi eq, %arg2, %c0_i32_8 : i32
    %10 = arith.extui %9 : i1 to i32
    %c0_i32_9 = arith.constant 0 : i32
    %11 = arith.cmpi ne, %10, %c0_i32_9 : i32
    scf.if %11 {
      %c0_10 = arith.constant 0 : index
      %c0_11 = arith.constant 0 : index
      %12 = vector.load %arg7[%c0_10, %c0_11] : memref<8x256xf32, #tpu.memory_space<vmem>>, vector<8x256xf32>
      %c0_12 = arith.constant 0 : index
      %c0_13 = arith.constant 0 : index
      %13 = vector.load %arg5[%c0_12, %c0_13] : memref<1x256xf32, #tpu.memory_space<vmem>>, vector<1x256xf32>
      %14 = vector.broadcast %13 : vector<1x256xf32> to vector<8x256xf32>
      %15 = arith.addf %12, %14 : vector<8x256xf32>
      %cst_14 = arith.constant 0.000000e+00 : f32
      %16 = vector.broadcast %cst_14 : f32 to vector<8x256xf32>
      %17 = arith.maximumf %15, %16 : vector<8x256xf32>
      %18 = arith.truncf %17 : vector<8x256xf32> to vector<8x256xbf16>
      %c0_15 = arith.constant 0 : index
      %c0_16 = arith.constant 0 : index
      %19 = vector.load %arg6[%c0_15, %c0_16] : memref<8x256xbf16, #tpu.memory_space<vmem>>, vector<8x256xbf16>
      tpu.vector_store %arg6[%c0_15, %c0_16], %18 {strides = array<i32>} : memref<8x256xbf16, #tpu.memory_space<vmem>>, vector<8x256xbf16>,
    } else {
    }
    return
  }
  func.func @transform_0(%arg0: i32, %arg1: i32, %arg2: i32) -> (i32, i32) {
    %c0_i32 = arith.constant 0 : i32
    return %arg0, %arg2 : i32, i32
  }
  func.func @transform_1(%arg0: i32, %arg1: i32, %arg2: i32) -> (i32, i32) {
    %c0_i32 = arith.constant 0 : i32
    return %arg2, %arg1 : i32, i32
  }
  func.func @transform_2(%arg0: i32, %arg1: i32, %arg2: i32) -> (i32, i32) {
    %c0_i32 = arith.constant 0 : i32
    %c0_i32_0 = arith.constant 0 : i32
    return %c0_i32, %arg1 : i32, i32
  }
  func.func @transform_3(%arg0: i32, %arg1: i32, %arg2: i32) -> (i32, i32) {
    %c0_i32 = arith.constant 0 : i32
    return %arg0, %arg1 : i32, i32
  }
}

module attributes {stable_mosaic.version = 11 : i64} {
  func.func @_mm_bias_res_relu_kernel(%arg0: i32, %arg1: i32, %arg2: i32, %arg3: memref<8x128xbf16, #tpu.memory_space<vmem>>, %arg4: memref<128x512xbf16, #tpu.memory_space<vmem>>, %arg5: memref<1x512xf32, #tpu.memory_space<vmem>>, %arg6: memref<8x512xbf16, #tpu.memory_space<vmem>>, %arg7: memref<8x512xbf16, #tpu.memory_space<vmem>>, %arg8: memref<8x512xf32, #tpu.memory_space<vmem>>) attributes {dimension_semantics = [#tpu.dimension_semantics<parallel>, #tpu.dimension_semantics<parallel>, #tpu.dimension_semantics<arbitrary>], iteration_bounds = array<i64: 1, 1, 1>, scalar_prefetch = 0 : i64, scratch_operands = 1 : i64, tpu.core_type = #tpu.core_type<tc>, window_params = [{transform_indices = @transform_0, window_bounds = array<i64: 8, 128>}, {transform_indices = @transform_1, window_bounds = array<i64: 128, 512>}, {transform_indices = @transform_2, window_bounds = array<i64: 1, 512>}, {transform_indices = @transform_3, window_bounds = array<i64: 8, 512>}, {transform_indices = @transform_4, window_bounds = array<i64: 8, 512>}]} {
    %c0_i32 = arith.constant 0 : i32
    %0 = arith.cmpi eq, %arg2, %c0_i32 : i32
    %1 = arith.extui %0 : i1 to i32
    %c0_i32_0 = arith.constant 0 : i32
    %2 = arith.cmpi ne, %1, %c0_i32_0 : i32
    scf.if %2 {
      %cst_10 = arith.constant 0.000000e+00 : f32
      %12 = vector.broadcast %cst_10 : f32 to vector<8x512xf32>
      %c0_11 = arith.constant 0 : index
      %c0_12 = arith.constant 0 : index
      %13 = vector.load %arg8[%c0_11, %c0_12] : memref<8x512xf32, #tpu.memory_space<vmem>>, vector<8x512xf32>
      tpu.vector_store %arg8[%c0_11, %c0_12], %12 {strides = array<i32>} : memref<8x512xf32, #tpu.memory_space<vmem>>, vector<8x512xf32>,
    } else {
    }
    %c0 = arith.constant 0 : index
    %c0_1 = arith.constant 0 : index
    %3 = vector.load %arg8[%c0, %c0_1] : memref<8x512xf32, #tpu.memory_space<vmem>>, vector<8x512xf32>
    %c0_2 = arith.constant 0 : index
    %c0_3 = arith.constant 0 : index
    %4 = vector.load %arg3[%c0_2, %c0_3] : memref<8x128xbf16, #tpu.memory_space<vmem>>, vector<8x128xbf16>
    %c0_4 = arith.constant 0 : index
    %c0_5 = arith.constant 0 : index
    %5 = vector.load %arg4[%c0_4, %c0_5] : memref<128x512xbf16, #tpu.memory_space<vmem>>, vector<128x512xbf16>
    %cst = arith.constant dense<0.000000e+00> : vector<8x512xf32>
    %6 = tpu.matmul %4, %5, %cst {dimension_numbers = #tpu.dot_dimension_numbers<[1], [0], [0], [1], [0, 0, 1, 1], [], []>} : vector<8x128xbf16>, vector<128x512xbf16>, vector<8x512xf32> -> vector<8x512xf32>
    %7 = arith.addf %3, %6 : vector<8x512xf32>
    %c0_6 = arith.constant 0 : index
    %c0_7 = arith.constant 0 : index
    %8 = vector.load %arg8[%c0_6, %c0_7] : memref<8x512xf32, #tpu.memory_space<vmem>>, vector<8x512xf32>
    tpu.vector_store %arg8[%c0_6, %c0_7], %7 {strides = array<i32>} : memref<8x512xf32, #tpu.memory_space<vmem>>, vector<8x512xf32>,
    %c0_i32_8 = arith.constant 0 : i32
    %9 = arith.cmpi eq, %arg2, %c0_i32_8 : i32
    %10 = arith.extui %9 : i1 to i32
    %c0_i32_9 = arith.constant 0 : i32
    %11 = arith.cmpi ne, %10, %c0_i32_9 : i32
    scf.if %11 {
      %c0_10 = arith.constant 0 : index
      %c0_11 = arith.constant 0 : index
      %12 = vector.load %arg8[%c0_10, %c0_11] : memref<8x512xf32, #tpu.memory_space<vmem>>, vector<8x512xf32>
      %c0_12 = arith.constant 0 : index
      %c0_13 = arith.constant 0 : index
      %13 = vector.load %arg5[%c0_12, %c0_13] : memref<1x512xf32, #tpu.memory_space<vmem>>, vector<1x512xf32>
      %14 = vector.broadcast %13 : vector<1x512xf32> to vector<8x512xf32>
      %15 = arith.addf %12, %14 : vector<8x512xf32>
      %c0_14 = arith.constant 0 : index
      %c0_15 = arith.constant 0 : index
      %16 = vector.load %arg6[%c0_14, %c0_15] : memref<8x512xbf16, #tpu.memory_space<vmem>>, vector<8x512xbf16>
      %17 = arith.extf %16 : vector<8x512xbf16> to vector<8x512xf32>
      %18 = arith.addf %15, %17 : vector<8x512xf32>
      %cst_16 = arith.constant 0.000000e+00 : f32
      %19 = vector.broadcast %cst_16 : f32 to vector<8x512xf32>
      %20 = arith.maximumf %18, %19 : vector<8x512xf32>
      %21 = arith.truncf %20 : vector<8x512xf32> to vector<8x512xbf16>
      %c0_17 = arith.constant 0 : index
      %c0_18 = arith.constant 0 : index
      %22 = vector.load %arg7[%c0_17, %c0_18] : memref<8x512xbf16, #tpu.memory_space<vmem>>, vector<8x512xbf16>
      tpu.vector_store %arg7[%c0_17, %c0_18], %21 {strides = array<i32>} : memref<8x512xbf16, #tpu.memory_space<vmem>>, vector<8x512xbf16>,
    } else {
    }
    return
  }
  func.func @transform_0(%arg0: i32, %arg1: i32, %arg2: i32) -> (i32, i32) {
    %c0_i32 = arith.constant 0 : i32
    return %arg0, %arg2 : i32, i32
  }
  func.func @transform_1(%arg0: i32, %arg1: i32, %arg2: i32) -> (i32, i32) {
    %c0_i32 = arith.constant 0 : i32
    return %arg2, %arg1 : i32, i32
  }
  func.func @transform_2(%arg0: i32, %arg1: i32, %arg2: i32) -> (i32, i32) {
    %c0_i32 = arith.constant 0 : i32
    %c0_i32_0 = arith.constant 0 : i32
    return %c0_i32, %arg1 : i32, i32
  }
  func.func @transform_3(%arg0: i32, %arg1: i32, %arg2: i32) -> (i32, i32) {
    %c0_i32 = arith.constant 0 : i32
    return %arg0, %arg1 : i32, i32
  }
  func.func @transform_4(%arg0: i32, %arg1: i32, %arg2: i32) -> (i32, i32) {
    %c0_i32 = arith.constant 0 : i32
    return %arg0, %arg1 : i32, i32
  }
}

module attributes {stable_mosaic.version = 11 : i64} {
  func.func @_mm_bias_kernel(%arg0: i32, %arg1: i32, %arg2: i32, %arg3: memref<2x384xbf16, #tpu.memory_space<vmem>>, %arg4: memref<384x256xbf16, #tpu.memory_space<vmem>>, %arg5: memref<1x256xf32, #tpu.memory_space<vmem>>, %arg6: memref<2x256xbf16, #tpu.memory_space<vmem>>, %arg7: memref<2x256xf32, #tpu.memory_space<vmem>>) attributes {dimension_semantics = [#tpu.dimension_semantics<parallel>, #tpu.dimension_semantics<parallel>, #tpu.dimension_semantics<arbitrary>], iteration_bounds = array<i64: 1, 1, 6>, scalar_prefetch = 0 : i64, scratch_operands = 1 : i64, tpu.core_type = #tpu.core_type<tc>, window_params = [{transform_indices = @transform_0, window_bounds = array<i64: 2, 384>}, {transform_indices = @transform_1, window_bounds = array<i64: 384, 256>}, {transform_indices = @transform_2, window_bounds = array<i64: 1, 256>}, {transform_indices = @transform_3, window_bounds = array<i64: 2, 256>}]} {
    %c0_i32 = arith.constant 0 : i32
    %0 = arith.cmpi eq, %arg2, %c0_i32 : i32
    %1 = arith.extui %0 : i1 to i32
    %c0_i32_0 = arith.constant 0 : i32
    %2 = arith.cmpi ne, %1, %c0_i32_0 : i32
    scf.if %2 {
      %cst_9 = arith.constant 0.000000e+00 : f32
      %12 = vector.broadcast %cst_9 : f32 to vector<2x256xf32>
      %c0_10 = arith.constant 0 : index
      %c0_11 = arith.constant 0 : index
      %13 = vector.load %arg7[%c0_10, %c0_11] : memref<2x256xf32, #tpu.memory_space<vmem>>, vector<2x256xf32>
      tpu.vector_store %arg7[%c0_10, %c0_11], %12 {strides = array<i32>} : memref<2x256xf32, #tpu.memory_space<vmem>>, vector<2x256xf32>,
    } else {
    }
    %c0 = arith.constant 0 : index
    %c0_1 = arith.constant 0 : index
    %3 = vector.load %arg7[%c0, %c0_1] : memref<2x256xf32, #tpu.memory_space<vmem>>, vector<2x256xf32>
    %c0_2 = arith.constant 0 : index
    %c0_3 = arith.constant 0 : index
    %4 = vector.load %arg3[%c0_2, %c0_3] : memref<2x384xbf16, #tpu.memory_space<vmem>>, vector<2x384xbf16>
    %c0_4 = arith.constant 0 : index
    %c0_5 = arith.constant 0 : index
    %5 = vector.load %arg4[%c0_4, %c0_5] : memref<384x256xbf16, #tpu.memory_space<vmem>>, vector<384x256xbf16>
    %cst = arith.constant dense<0.000000e+00> : vector<2x256xf32>
    %6 = tpu.matmul %4, %5, %cst {dimension_numbers = #tpu.dot_dimension_numbers<[1], [0], [0], [1], [0, 0, 1, 1], [], []>} : vector<2x384xbf16>, vector<384x256xbf16>, vector<2x256xf32> -> vector<2x256xf32>
    %7 = arith.addf %3, %6 : vector<2x256xf32>
    %c0_6 = arith.constant 0 : index
    %c0_7 = arith.constant 0 : index
    %8 = vector.load %arg7[%c0_6, %c0_7] : memref<2x256xf32, #tpu.memory_space<vmem>>, vector<2x256xf32>
    tpu.vector_store %arg7[%c0_6, %c0_7], %7 {strides = array<i32>} : memref<2x256xf32, #tpu.memory_space<vmem>>, vector<2x256xf32>,
    %c5_i32 = arith.constant 5 : i32
    %9 = arith.cmpi eq, %arg2, %c5_i32 : i32
    %10 = arith.extui %9 : i1 to i32
    %c0_i32_8 = arith.constant 0 : i32
    %11 = arith.cmpi ne, %10, %c0_i32_8 : i32
    scf.if %11 {
      %c0_9 = arith.constant 0 : index
      %c0_10 = arith.constant 0 : index
      %12 = vector.load %arg7[%c0_9, %c0_10] : memref<2x256xf32, #tpu.memory_space<vmem>>, vector<2x256xf32>
      %c0_11 = arith.constant 0 : index
      %c0_12 = arith.constant 0 : index
      %13 = vector.load %arg5[%c0_11, %c0_12] : memref<1x256xf32, #tpu.memory_space<vmem>>, vector<1x256xf32>
      %14 = vector.broadcast %13 : vector<1x256xf32> to vector<2x256xf32>
      %15 = arith.addf %12, %14 : vector<2x256xf32>
      %cst_13 = arith.constant 0.000000e+00 : f32
      %16 = vector.broadcast %cst_13 : f32 to vector<2x256xf32>
      %17 = arith.maximumf %15, %16 : vector<2x256xf32>
      %18 = arith.truncf %17 : vector<2x256xf32> to vector<2x256xbf16>
      %c0_14 = arith.constant 0 : index
      %c0_15 = arith.constant 0 : index
      %19 = vector.load %arg6[%c0_14, %c0_15] : memref<2x256xbf16, #tpu.memory_space<vmem>>, vector<2x256xbf16>
      tpu.vector_store %arg6[%c0_14, %c0_15], %18 {strides = array<i32>} : memref<2x256xbf16, #tpu.memory_space<vmem>>, vector<2x256xbf16>,
    } else {
    }
    return
  }
  func.func @transform_0(%arg0: i32, %arg1: i32, %arg2: i32) -> (i32, i32) {
    %c0_i32 = arith.constant 0 : i32
    return %arg0, %arg2 : i32, i32
  }
  func.func @transform_1(%arg0: i32, %arg1: i32, %arg2: i32) -> (i32, i32) {
    %c0_i32 = arith.constant 0 : i32
    return %arg2, %arg1 : i32, i32
  }
  func.func @transform_2(%arg0: i32, %arg1: i32, %arg2: i32) -> (i32, i32) {
    %c0_i32 = arith.constant 0 : i32
    %c0_i32_0 = arith.constant 0 : i32
    return %c0_i32, %arg1 : i32, i32
  }
  func.func @transform_3(%arg0: i32, %arg1: i32, %arg2: i32) -> (i32, i32) {
    %c0_i32 = arith.constant 0 : i32
    return %arg0, %arg1 : i32, i32
  }
}

module attributes {stable_mosaic.version = 11 : i64} {
  func.func @_mm_bias_kernel(%arg0: i32, %arg1: i32, %arg2: i32, %arg3: memref<2x512xbf16, #tpu.memory_space<vmem>>, %arg4: memref<512x512xbf16, #tpu.memory_space<vmem>>, %arg5: memref<1x512xf32, #tpu.memory_space<vmem>>, %arg6: memref<2x512xbf16, #tpu.memory_space<vmem>>, %arg7: memref<2x512xf32, #tpu.memory_space<vmem>>) attributes {dimension_semantics = [#tpu.dimension_semantics<parallel>, #tpu.dimension_semantics<parallel>, #tpu.dimension_semantics<arbitrary>], iteration_bounds = array<i64: 1, 2, 1>, scalar_prefetch = 0 : i64, scratch_operands = 1 : i64, tpu.core_type = #tpu.core_type<tc>, window_params = [{transform_indices = @transform_0, window_bounds = array<i64: 2, 512>}, {transform_indices = @transform_1, window_bounds = array<i64: 512, 512>}, {transform_indices = @transform_2, window_bounds = array<i64: 1, 512>}, {transform_indices = @transform_3, window_bounds = array<i64: 2, 512>}]} {
    %c0_i32 = arith.constant 0 : i32
    %0 = arith.cmpi eq, %arg2, %c0_i32 : i32
    %1 = arith.extui %0 : i1 to i32
    %c0_i32_0 = arith.constant 0 : i32
    %2 = arith.cmpi ne, %1, %c0_i32_0 : i32
    scf.if %2 {
      %cst_10 = arith.constant 0.000000e+00 : f32
      %12 = vector.broadcast %cst_10 : f32 to vector<2x512xf32>
      %c0_11 = arith.constant 0 : index
      %c0_12 = arith.constant 0 : index
      %13 = vector.load %arg7[%c0_11, %c0_12] : memref<2x512xf32, #tpu.memory_space<vmem>>, vector<2x512xf32>
      tpu.vector_store %arg7[%c0_11, %c0_12], %12 {strides = array<i32>} : memref<2x512xf32, #tpu.memory_space<vmem>>, vector<2x512xf32>,
    } else {
    }
    %c0 = arith.constant 0 : index
    %c0_1 = arith.constant 0 : index
    %3 = vector.load %arg7[%c0, %c0_1] : memref<2x512xf32, #tpu.memory_space<vmem>>, vector<2x512xf32>
    %c0_2 = arith.constant 0 : index
    %c0_3 = arith.constant 0 : index
    %4 = vector.load %arg3[%c0_2, %c0_3] : memref<2x512xbf16, #tpu.memory_space<vmem>>, vector<2x512xbf16>
    %c0_4 = arith.constant 0 : index
    %c0_5 = arith.constant 0 : index
    %5 = vector.load %arg4[%c0_4, %c0_5] : memref<512x512xbf16, #tpu.memory_space<vmem>>, vector<512x512xbf16>
    %cst = arith.constant dense<0.000000e+00> : vector<2x512xf32>
    %6 = tpu.matmul %4, %5, %cst {dimension_numbers = #tpu.dot_dimension_numbers<[1], [0], [0], [1], [0, 0, 1, 1], [], []>} : vector<2x512xbf16>, vector<512x512xbf16>, vector<2x512xf32> -> vector<2x512xf32>
    %7 = arith.addf %3, %6 : vector<2x512xf32>
    %c0_6 = arith.constant 0 : index
    %c0_7 = arith.constant 0 : index
    %8 = vector.load %arg7[%c0_6, %c0_7] : memref<2x512xf32, #tpu.memory_space<vmem>>, vector<2x512xf32>
    tpu.vector_store %arg7[%c0_6, %c0_7], %7 {strides = array<i32>} : memref<2x512xf32, #tpu.memory_space<vmem>>, vector<2x512xf32>,
    %c0_i32_8 = arith.constant 0 : i32
    %9 = arith.cmpi eq, %arg2, %c0_i32_8 : i32
    %10 = arith.extui %9 : i1 to i32
    %c0_i32_9 = arith.constant 0 : i32
    %11 = arith.cmpi ne, %10, %c0_i32_9 : i32
    scf.if %11 {
      %c0_10 = arith.constant 0 : index
      %c0_11 = arith.constant 0 : index
      %12 = vector.load %arg7[%c0_10, %c0_11] : memref<2x512xf32, #tpu.memory_space<vmem>>, vector<2x512xf32>
      %c0_12 = arith.constant 0 : index
      %c0_13 = arith.constant 0 : index
      %13 = vector.load %arg5[%c0_12, %c0_13] : memref<1x512xf32, #tpu.memory_space<vmem>>, vector<1x512xf32>
      %14 = vector.broadcast %13 : vector<1x512xf32> to vector<2x512xf32>
      %15 = arith.addf %12, %14 : vector<2x512xf32>
      %16 = arith.truncf %15 : vector<2x512xf32> to vector<2x512xbf16>
      %c0_14 = arith.constant 0 : index
      %c0_15 = arith.constant 0 : index
      %17 = vector.load %arg6[%c0_14, %c0_15] : memref<2x512xbf16, #tpu.memory_space<vmem>>, vector<2x512xbf16>
      tpu.vector_store %arg6[%c0_14, %c0_15], %16 {strides = array<i32>} : memref<2x512xbf16, #tpu.memory_space<vmem>>, vector<2x512xbf16>,
    } else {
    }
    return
  }
  func.func @transform_0(%arg0: i32, %arg1: i32, %arg2: i32) -> (i32, i32) {
    %c0_i32 = arith.constant 0 : i32
    return %arg0, %arg2 : i32, i32
  }
  func.func @transform_1(%arg0: i32, %arg1: i32, %arg2: i32) -> (i32, i32) {
    %c0_i32 = arith.constant 0 : i32
    return %arg2, %arg1 : i32, i32
  }
  func.func @transform_2(%arg0: i32, %arg1: i32, %arg2: i32) -> (i32, i32) {
    %c0_i32 = arith.constant 0 : i32
    %c0_i32_0 = arith.constant 0 : i32
    return %c0_i32, %arg1 : i32, i32
  }
  func.func @transform_3(%arg0: i32, %arg1: i32, %arg2: i32) -> (i32, i32) {
    %c0_i32 = arith.constant 0 : i32
    return %arg0, %arg1 : i32, i32
  }
}

module attributes {stable_mosaic.version = 11 : i64} {
  func.func @_mm_bias_res_relu_kernel(%arg0: i32, %arg1: i32, %arg2: i32, %arg3: memref<2x256xbf16, #tpu.memory_space<vmem>>, %arg4: memref<256x512xbf16, #tpu.memory_space<vmem>>, %arg5: memref<1x512xf32, #tpu.memory_space<vmem>>, %arg6: memref<2x512xbf16, #tpu.memory_space<vmem>>, %arg7: memref<2x512xbf16, #tpu.memory_space<vmem>>, %arg8: memref<2x512xf32, #tpu.memory_space<vmem>>) attributes {dimension_semantics = [#tpu.dimension_semantics<parallel>, #tpu.dimension_semantics<parallel>, #tpu.dimension_semantics<arbitrary>], iteration_bounds = array<i64: 1, 2, 1>, scalar_prefetch = 0 : i64, scratch_operands = 1 : i64, tpu.core_type = #tpu.core_type<tc>, window_params = [{transform_indices = @transform_0, window_bounds = array<i64: 2, 256>}, {transform_indices = @transform_1, window_bounds = array<i64: 256, 512>}, {transform_indices = @transform_2, window_bounds = array<i64: 1, 512>}, {transform_indices = @transform_3, window_bounds = array<i64: 2, 512>}, {transform_indices = @transform_4, window_bounds = array<i64: 2, 512>}]} {
    %c0_i32 = arith.constant 0 : i32
    %0 = arith.cmpi eq, %arg2, %c0_i32 : i32
    %1 = arith.extui %0 : i1 to i32
    %c0_i32_0 = arith.constant 0 : i32
    %2 = arith.cmpi ne, %1, %c0_i32_0 : i32
    scf.if %2 {
      %cst_10 = arith.constant 0.000000e+00 : f32
      %12 = vector.broadcast %cst_10 : f32 to vector<2x512xf32>
      %c0_11 = arith.constant 0 : index
      %c0_12 = arith.constant 0 : index
      %13 = vector.load %arg8[%c0_11, %c0_12] : memref<2x512xf32, #tpu.memory_space<vmem>>, vector<2x512xf32>
      tpu.vector_store %arg8[%c0_11, %c0_12], %12 {strides = array<i32>} : memref<2x512xf32, #tpu.memory_space<vmem>>, vector<2x512xf32>,
    } else {
    }
    %c0 = arith.constant 0 : index
    %c0_1 = arith.constant 0 : index
    %3 = vector.load %arg8[%c0, %c0_1] : memref<2x512xf32, #tpu.memory_space<vmem>>, vector<2x512xf32>
    %c0_2 = arith.constant 0 : index
    %c0_3 = arith.constant 0 : index
    %4 = vector.load %arg3[%c0_2, %c0_3] : memref<2x256xbf16, #tpu.memory_space<vmem>>, vector<2x256xbf16>
    %c0_4 = arith.constant 0 : index
    %c0_5 = arith.constant 0 : index
    %5 = vector.load %arg4[%c0_4, %c0_5] : memref<256x512xbf16, #tpu.memory_space<vmem>>, vector<256x512xbf16>
    %cst = arith.constant dense<0.000000e+00> : vector<2x512xf32>
    %6 = tpu.matmul %4, %5, %cst {dimension_numbers = #tpu.dot_dimension_numbers<[1], [0], [0], [1], [0, 0, 1, 1], [], []>} : vector<2x256xbf16>, vector<256x512xbf16>, vector<2x512xf32> -> vector<2x512xf32>
    %7 = arith.addf %3, %6 : vector<2x512xf32>
    %c0_6 = arith.constant 0 : index
    %c0_7 = arith.constant 0 : index
    %8 = vector.load %arg8[%c0_6, %c0_7] : memref<2x512xf32, #tpu.memory_space<vmem>>, vector<2x512xf32>
    tpu.vector_store %arg8[%c0_6, %c0_7], %7 {strides = array<i32>} : memref<2x512xf32, #tpu.memory_space<vmem>>, vector<2x512xf32>,
    %c0_i32_8 = arith.constant 0 : i32
    %9 = arith.cmpi eq, %arg2, %c0_i32_8 : i32
    %10 = arith.extui %9 : i1 to i32
    %c0_i32_9 = arith.constant 0 : i32
    %11 = arith.cmpi ne, %10, %c0_i32_9 : i32
    scf.if %11 {
      %c0_10 = arith.constant 0 : index
      %c0_11 = arith.constant 0 : index
      %12 = vector.load %arg8[%c0_10, %c0_11] : memref<2x512xf32, #tpu.memory_space<vmem>>, vector<2x512xf32>
      %c0_12 = arith.constant 0 : index
      %c0_13 = arith.constant 0 : index
      %13 = vector.load %arg5[%c0_12, %c0_13] : memref<1x512xf32, #tpu.memory_space<vmem>>, vector<1x512xf32>
      %14 = vector.broadcast %13 : vector<1x512xf32> to vector<2x512xf32>
      %15 = arith.addf %12, %14 : vector<2x512xf32>
      %c0_14 = arith.constant 0 : index
      %c0_15 = arith.constant 0 : index
      %16 = vector.load %arg6[%c0_14, %c0_15] : memref<2x512xbf16, #tpu.memory_space<vmem>>, vector<2x512xbf16>
      %17 = arith.extf %16 : vector<2x512xbf16> to vector<2x512xf32>
      %18 = arith.addf %15, %17 : vector<2x512xf32>
      %cst_16 = arith.constant 0.000000e+00 : f32
      %19 = vector.broadcast %cst_16 : f32 to vector<2x512xf32>
      %20 = arith.maximumf %18, %19 : vector<2x512xf32>
      %21 = arith.truncf %20 : vector<2x512xf32> to vector<2x512xbf16>
      %c0_17 = arith.constant 0 : index
      %c0_18 = arith.constant 0 : index
      %22 = vector.load %arg7[%c0_17, %c0_18] : memref<2x512xbf16, #tpu.memory_space<vmem>>, vector<2x512xbf16>
      tpu.vector_store %arg7[%c0_17, %c0_18], %21 {strides = array<i32>} : memref<2x512xbf16, #tpu.memory_space<vmem>>, vector<2x512xbf16>,
    } else {
    }
    return
  }
  func.func @transform_0(%arg0: i32, %arg1: i32, %arg2: i32) -> (i32, i32) {
    %c0_i32 = arith.constant 0 : i32
    return %arg0, %arg2 : i32, i32
  }
  func.func @transform_1(%arg0: i32, %arg1: i32, %arg2: i32) -> (i32, i32) {
    %c0_i32 = arith.constant 0 : i32
    return %arg2, %arg1 : i32, i32
  }
  func.func @transform_2(%arg0: i32, %arg1: i32, %arg2: i32) -> (i32, i32) {
    %c0_i32 = arith.constant 0 : i32
    %c0_i32_0 = arith.constant 0 : i32
    return %c0_i32, %arg1 : i32, i32
  }
  func.func @transform_3(%arg0: i32, %arg1: i32, %arg2: i32) -> (i32, i32) {
    %c0_i32 = arith.constant 0 : i32
    return %arg0, %arg1 : i32, i32
  }
  func.func @transform_4(%arg0: i32, %arg1: i32, %arg2: i32) -> (i32, i32) {
    %c0_i32 = arith.constant 0 : i32
    return %arg0, %arg1 : i32, i32
  }
}

module attributes {stable_mosaic.version = 11 : i64} {
  func.func @_mm_bias_kernel(%arg0: i32, %arg1: i32, %arg2: i32, %arg3: memref<2x512xbf16, #tpu.memory_space<vmem>>, %arg4: memref<512x512xbf16, #tpu.memory_space<vmem>>, %arg5: memref<1x512xf32, #tpu.memory_space<vmem>>, %arg6: memref<2x512xbf16, #tpu.memory_space<vmem>>, %arg7: memref<2x512xf32, #tpu.memory_space<vmem>>) attributes {dimension_semantics = [#tpu.dimension_semantics<parallel>, #tpu.dimension_semantics<parallel>, #tpu.dimension_semantics<arbitrary>], iteration_bounds = array<i64: 1, 1, 2>, scalar_prefetch = 0 : i64, scratch_operands = 1 : i64, tpu.core_type = #tpu.core_type<tc>, window_params = [{transform_indices = @transform_0, window_bounds = array<i64: 2, 512>}, {transform_indices = @transform_1, window_bounds = array<i64: 512, 512>}, {transform_indices = @transform_2, window_bounds = array<i64: 1, 512>}, {transform_indices = @transform_3, window_bounds = array<i64: 2, 512>}]} {
    %c0_i32 = arith.constant 0 : i32
    %0 = arith.cmpi eq, %arg2, %c0_i32 : i32
    %1 = arith.extui %0 : i1 to i32
    %c0_i32_0 = arith.constant 0 : i32
    %2 = arith.cmpi ne, %1, %c0_i32_0 : i32
    scf.if %2 {
      %cst_9 = arith.constant 0.000000e+00 : f32
      %12 = vector.broadcast %cst_9 : f32 to vector<2x512xf32>
      %c0_10 = arith.constant 0 : index
      %c0_11 = arith.constant 0 : index
      %13 = vector.load %arg7[%c0_10, %c0_11] : memref<2x512xf32, #tpu.memory_space<vmem>>, vector<2x512xf32>
      tpu.vector_store %arg7[%c0_10, %c0_11], %12 {strides = array<i32>} : memref<2x512xf32, #tpu.memory_space<vmem>>, vector<2x512xf32>,
    } else {
    }
    %c0 = arith.constant 0 : index
    %c0_1 = arith.constant 0 : index
    %3 = vector.load %arg7[%c0, %c0_1] : memref<2x512xf32, #tpu.memory_space<vmem>>, vector<2x512xf32>
    %c0_2 = arith.constant 0 : index
    %c0_3 = arith.constant 0 : index
    %4 = vector.load %arg3[%c0_2, %c0_3] : memref<2x512xbf16, #tpu.memory_space<vmem>>, vector<2x512xbf16>
    %c0_4 = arith.constant 0 : index
    %c0_5 = arith.constant 0 : index
    %5 = vector.load %arg4[%c0_4, %c0_5] : memref<512x512xbf16, #tpu.memory_space<vmem>>, vector<512x512xbf16>
    %cst = arith.constant dense<0.000000e+00> : vector<2x512xf32>
    %6 = tpu.matmul %4, %5, %cst {dimension_numbers = #tpu.dot_dimension_numbers<[1], [0], [0], [1], [0, 0, 1, 1], [], []>} : vector<2x512xbf16>, vector<512x512xbf16>, vector<2x512xf32> -> vector<2x512xf32>
    %7 = arith.addf %3, %6 : vector<2x512xf32>
    %c0_6 = arith.constant 0 : index
    %c0_7 = arith.constant 0 : index
    %8 = vector.load %arg7[%c0_6, %c0_7] : memref<2x512xf32, #tpu.memory_space<vmem>>, vector<2x512xf32>
    tpu.vector_store %arg7[%c0_6, %c0_7], %7 {strides = array<i32>} : memref<2x512xf32, #tpu.memory_space<vmem>>, vector<2x512xf32>,
    %c1_i32 = arith.constant 1 : i32
    %9 = arith.cmpi eq, %arg2, %c1_i32 : i32
    %10 = arith.extui %9 : i1 to i32
    %c0_i32_8 = arith.constant 0 : i32
    %11 = arith.cmpi ne, %10, %c0_i32_8 : i32
    scf.if %11 {
      %c0_9 = arith.constant 0 : index
      %c0_10 = arith.constant 0 : index
      %12 = vector.load %arg7[%c0_9, %c0_10] : memref<2x512xf32, #tpu.memory_space<vmem>>, vector<2x512xf32>
      %c0_11 = arith.constant 0 : index
      %c0_12 = arith.constant 0 : index
      %13 = vector.load %arg5[%c0_11, %c0_12] : memref<1x512xf32, #tpu.memory_space<vmem>>, vector<1x512xf32>
      %14 = vector.broadcast %13 : vector<1x512xf32> to vector<2x512xf32>
      %15 = arith.addf %12, %14 : vector<2x512xf32>
      %cst_13 = arith.constant 0.000000e+00 : f32
      %16 = vector.broadcast %cst_13 : f32 to vector<2x512xf32>
      %17 = arith.maximumf %15, %16 : vector<2x512xf32>
      %18 = arith.truncf %17 : vector<2x512xf32> to vector<2x512xbf16>
      %c0_14 = arith.constant 0 : index
      %c0_15 = arith.constant 0 : index
      %19 = vector.load %arg6[%c0_14, %c0_15] : memref<2x512xbf16, #tpu.memory_space<vmem>>, vector<2x512xbf16>
      tpu.vector_store %arg6[%c0_14, %c0_15], %18 {strides = array<i32>} : memref<2x512xbf16, #tpu.memory_space<vmem>>, vector<2x512xbf16>,
    } else {
    }
    return
  }
  func.func @transform_0(%arg0: i32, %arg1: i32, %arg2: i32) -> (i32, i32) {
    %c0_i32 = arith.constant 0 : i32
    return %arg0, %arg2 : i32, i32
  }
  func.func @transform_1(%arg0: i32, %arg1: i32, %arg2: i32) -> (i32, i32) {
    %c0_i32 = arith.constant 0 : i32
    return %arg2, %arg1 : i32, i32
  }
  func.func @transform_2(%arg0: i32, %arg1: i32, %arg2: i32) -> (i32, i32) {
    %c0_i32 = arith.constant 0 : i32
    %c0_i32_0 = arith.constant 0 : i32
    return %c0_i32, %arg1 : i32, i32
  }
  func.func @transform_3(%arg0: i32, %arg1: i32, %arg2: i32) -> (i32, i32) {
    %c0_i32 = arith.constant 0 : i32
    return %arg0, %arg1 : i32, i32
  }
}

module attributes {stable_mosaic.version = 11 : i64} {
  func.func @_mm_bias_kernel(%arg0: i32, %arg1: i32, %arg2: i32, %arg3: memref<2x512xbf16, #tpu.memory_space<vmem>>, %arg4: memref<512x512xbf16, #tpu.memory_space<vmem>>, %arg5: memref<1x512xf32, #tpu.memory_space<vmem>>, %arg6: memref<2x512xbf16, #tpu.memory_space<vmem>>, %arg7: memref<2x512xf32, #tpu.memory_space<vmem>>) attributes {dimension_semantics = [#tpu.dimension_semantics<parallel>, #tpu.dimension_semantics<parallel>, #tpu.dimension_semantics<arbitrary>], iteration_bounds = array<i64: 1, 1, 9>, scalar_prefetch = 0 : i64, scratch_operands = 1 : i64, tpu.core_type = #tpu.core_type<tc>, window_params = [{transform_indices = @transform_0, window_bounds = array<i64: 2, 512>}, {transform_indices = @transform_1, window_bounds = array<i64: 512, 512>}, {transform_indices = @transform_2, window_bounds = array<i64: 1, 512>}, {transform_indices = @transform_3, window_bounds = array<i64: 2, 512>}]} {
    %c0_i32 = arith.constant 0 : i32
    %0 = arith.cmpi eq, %arg2, %c0_i32 : i32
    %1 = arith.extui %0 : i1 to i32
    %c0_i32_0 = arith.constant 0 : i32
    %2 = arith.cmpi ne, %1, %c0_i32_0 : i32
    scf.if %2 {
      %cst_9 = arith.constant 0.000000e+00 : f32
      %12 = vector.broadcast %cst_9 : f32 to vector<2x512xf32>
      %c0_10 = arith.constant 0 : index
      %c0_11 = arith.constant 0 : index
      %13 = vector.load %arg7[%c0_10, %c0_11] : memref<2x512xf32, #tpu.memory_space<vmem>>, vector<2x512xf32>
      tpu.vector_store %arg7[%c0_10, %c0_11], %12 {strides = array<i32>} : memref<2x512xf32, #tpu.memory_space<vmem>>, vector<2x512xf32>,
    } else {
    }
    %c0 = arith.constant 0 : index
    %c0_1 = arith.constant 0 : index
    %3 = vector.load %arg7[%c0, %c0_1] : memref<2x512xf32, #tpu.memory_space<vmem>>, vector<2x512xf32>
    %c0_2 = arith.constant 0 : index
    %c0_3 = arith.constant 0 : index
    %4 = vector.load %arg3[%c0_2, %c0_3] : memref<2x512xbf16, #tpu.memory_space<vmem>>, vector<2x512xbf16>
    %c0_4 = arith.constant 0 : index
    %c0_5 = arith.constant 0 : index
    %5 = vector.load %arg4[%c0_4, %c0_5] : memref<512x512xbf16, #tpu.memory_space<vmem>>, vector<512x512xbf16>
    %cst = arith.constant dense<0.000000e+00> : vector<2x512xf32>
    %6 = tpu.matmul %4, %5, %cst {dimension_numbers = #tpu.dot_dimension_numbers<[1], [0], [0], [1], [0, 0, 1, 1], [], []>} : vector<2x512xbf16>, vector<512x512xbf16>, vector<2x512xf32> -> vector<2x512xf32>
    %7 = arith.addf %3, %6 : vector<2x512xf32>
    %c0_6 = arith.constant 0 : index
    %c0_7 = arith.constant 0 : index
    %8 = vector.load %arg7[%c0_6, %c0_7] : memref<2x512xf32, #tpu.memory_space<vmem>>, vector<2x512xf32>
    tpu.vector_store %arg7[%c0_6, %c0_7], %7 {strides = array<i32>} : memref<2x512xf32, #tpu.memory_space<vmem>>, vector<2x512xf32>,
    %c8_i32 = arith.constant 8 : i32
    %9 = arith.cmpi eq, %arg2, %c8_i32 : i32
    %10 = arith.extui %9 : i1 to i32
    %c0_i32_8 = arith.constant 0 : i32
    %11 = arith.cmpi ne, %10, %c0_i32_8 : i32
    scf.if %11 {
      %c0_9 = arith.constant 0 : index
      %c0_10 = arith.constant 0 : index
      %12 = vector.load %arg7[%c0_9, %c0_10] : memref<2x512xf32, #tpu.memory_space<vmem>>, vector<2x512xf32>
      %c0_11 = arith.constant 0 : index
      %c0_12 = arith.constant 0 : index
      %13 = vector.load %arg5[%c0_11, %c0_12] : memref<1x512xf32, #tpu.memory_space<vmem>>, vector<1x512xf32>
      %14 = vector.broadcast %13 : vector<1x512xf32> to vector<2x512xf32>
      %15 = arith.addf %12, %14 : vector<2x512xf32>
      %cst_13 = arith.constant 0.000000e+00 : f32
      %16 = vector.broadcast %cst_13 : f32 to vector<2x512xf32>
      %17 = arith.maximumf %15, %16 : vector<2x512xf32>
      %18 = arith.truncf %17 : vector<2x512xf32> to vector<2x512xbf16>
      %c0_14 = arith.constant 0 : index
      %c0_15 = arith.constant 0 : index
      %19 = vector.load %arg6[%c0_14, %c0_15] : memref<2x512xbf16, #tpu.memory_space<vmem>>, vector<2x512xbf16>
      tpu.vector_store %arg6[%c0_14, %c0_15], %18 {strides = array<i32>} : memref<2x512xbf16, #tpu.memory_space<vmem>>, vector<2x512xbf16>,
    } else {
    }
    return
  }
  func.func @transform_0(%arg0: i32, %arg1: i32, %arg2: i32) -> (i32, i32) {
    %c0_i32 = arith.constant 0 : i32
    return %arg0, %arg2 : i32, i32
  }
  func.func @transform_1(%arg0: i32, %arg1: i32, %arg2: i32) -> (i32, i32) {
    %c0_i32 = arith.constant 0 : i32
    return %arg2, %arg1 : i32, i32
  }
  func.func @transform_2(%arg0: i32, %arg1: i32, %arg2: i32) -> (i32, i32) {
    %c0_i32 = arith.constant 0 : i32
    %c0_i32_0 = arith.constant 0 : i32
    return %c0_i32, %arg1 : i32, i32
  }
  func.func @transform_3(%arg0: i32, %arg1: i32, %arg2: i32) -> (i32, i32) {
    %c0_i32 = arith.constant 0 : i32
    return %arg0, %arg1 : i32, i32
  }
}

module attributes {stable_mosaic.version = 11 : i64} {
  func.func @_mm_bias_kernel(%arg0: i32, %arg1: i32, %arg2: i32, %arg3: memref<2x512xbf16, #tpu.memory_space<vmem>>, %arg4: memref<512x512xbf16, #tpu.memory_space<vmem>>, %arg5: memref<1x512xf32, #tpu.memory_space<vmem>>, %arg6: memref<2x512xbf16, #tpu.memory_space<vmem>>, %arg7: memref<2x512xf32, #tpu.memory_space<vmem>>) attributes {dimension_semantics = [#tpu.dimension_semantics<parallel>, #tpu.dimension_semantics<parallel>, #tpu.dimension_semantics<arbitrary>], iteration_bounds = array<i64: 1, 4, 2>, scalar_prefetch = 0 : i64, scratch_operands = 1 : i64, tpu.core_type = #tpu.core_type<tc>, window_params = [{transform_indices = @transform_0, window_bounds = array<i64: 2, 512>}, {transform_indices = @transform_1, window_bounds = array<i64: 512, 512>}, {transform_indices = @transform_2, window_bounds = array<i64: 1, 512>}, {transform_indices = @transform_3, window_bounds = array<i64: 2, 512>}]} {
    %c0_i32 = arith.constant 0 : i32
    %0 = arith.cmpi eq, %arg2, %c0_i32 : i32
    %1 = arith.extui %0 : i1 to i32
    %c0_i32_0 = arith.constant 0 : i32
    %2 = arith.cmpi ne, %1, %c0_i32_0 : i32
    scf.if %2 {
      %cst_9 = arith.constant 0.000000e+00 : f32
      %12 = vector.broadcast %cst_9 : f32 to vector<2x512xf32>
      %c0_10 = arith.constant 0 : index
      %c0_11 = arith.constant 0 : index
      %13 = vector.load %arg7[%c0_10, %c0_11] : memref<2x512xf32, #tpu.memory_space<vmem>>, vector<2x512xf32>
      tpu.vector_store %arg7[%c0_10, %c0_11], %12 {strides = array<i32>} : memref<2x512xf32, #tpu.memory_space<vmem>>, vector<2x512xf32>,
    } else {
    }
    %c0 = arith.constant 0 : index
    %c0_1 = arith.constant 0 : index
    %3 = vector.load %arg7[%c0, %c0_1] : memref<2x512xf32, #tpu.memory_space<vmem>>, vector<2x512xf32>
    %c0_2 = arith.constant 0 : index
    %c0_3 = arith.constant 0 : index
    %4 = vector.load %arg3[%c0_2, %c0_3] : memref<2x512xbf16, #tpu.memory_space<vmem>>, vector<2x512xbf16>
    %c0_4 = arith.constant 0 : index
    %c0_5 = arith.constant 0 : index
    %5 = vector.load %arg4[%c0_4, %c0_5] : memref<512x512xbf16, #tpu.memory_space<vmem>>, vector<512x512xbf16>
    %cst = arith.constant dense<0.000000e+00> : vector<2x512xf32>
    %6 = tpu.matmul %4, %5, %cst {dimension_numbers = #tpu.dot_dimension_numbers<[1], [0], [0], [1], [0, 0, 1, 1], [], []>} : vector<2x512xbf16>, vector<512x512xbf16>, vector<2x512xf32> -> vector<2x512xf32>
    %7 = arith.addf %3, %6 : vector<2x512xf32>
    %c0_6 = arith.constant 0 : index
    %c0_7 = arith.constant 0 : index
    %8 = vector.load %arg7[%c0_6, %c0_7] : memref<2x512xf32, #tpu.memory_space<vmem>>, vector<2x512xf32>
    tpu.vector_store %arg7[%c0_6, %c0_7], %7 {strides = array<i32>} : memref<2x512xf32, #tpu.memory_space<vmem>>, vector<2x512xf32>,
    %c1_i32 = arith.constant 1 : i32
    %9 = arith.cmpi eq, %arg2, %c1_i32 : i32
    %10 = arith.extui %9 : i1 to i32
    %c0_i32_8 = arith.constant 0 : i32
    %11 = arith.cmpi ne, %10, %c0_i32_8 : i32
    scf.if %11 {
      %c0_9 = arith.constant 0 : index
      %c0_10 = arith.constant 0 : index
      %12 = vector.load %arg7[%c0_9, %c0_10] : memref<2x512xf32, #tpu.memory_space<vmem>>, vector<2x512xf32>
      %c0_11 = arith.constant 0 : index
      %c0_12 = arith.constant 0 : index
      %13 = vector.load %arg5[%c0_11, %c0_12] : memref<1x512xf32, #tpu.memory_space<vmem>>, vector<1x512xf32>
      %14 = vector.broadcast %13 : vector<1x512xf32> to vector<2x512xf32>
      %15 = arith.addf %12, %14 : vector<2x512xf32>
      %16 = arith.truncf %15 : vector<2x512xf32> to vector<2x512xbf16>
      %c0_13 = arith.constant 0 : index
      %c0_14 = arith.constant 0 : index
      %17 = vector.load %arg6[%c0_13, %c0_14] : memref<2x512xbf16, #tpu.memory_space<vmem>>, vector<2x512xbf16>
      tpu.vector_store %arg6[%c0_13, %c0_14], %16 {strides = array<i32>} : memref<2x512xbf16, #tpu.memory_space<vmem>>, vector<2x512xbf16>,
    } else {
    }
    return
  }
  func.func @transform_0(%arg0: i32, %arg1: i32, %arg2: i32) -> (i32, i32) {
    %c0_i32 = arith.constant 0 : i32
    return %arg0, %arg2 : i32, i32
  }
  func.func @transform_1(%arg0: i32, %arg1: i32, %arg2: i32) -> (i32, i32) {
    %c0_i32 = arith.constant 0 : i32
    return %arg2, %arg1 : i32, i32
  }
  func.func @transform_2(%arg0: i32, %arg1: i32, %arg2: i32) -> (i32, i32) {
    %c0_i32 = arith.constant 0 : i32
    %c0_i32_0 = arith.constant 0 : i32
    return %c0_i32, %arg1 : i32, i32
  }
  func.func @transform_3(%arg0: i32, %arg1: i32, %arg2: i32) -> (i32, i32) {
    %c0_i32 = arith.constant 0 : i32
    return %arg0, %arg1 : i32, i32
  }
}

module attributes {stable_mosaic.version = 11 : i64} {
  func.func @_mm_bias_res_relu_kernel(%arg0: i32, %arg1: i32, %arg2: i32, %arg3: memref<2x512xbf16, #tpu.memory_space<vmem>>, %arg4: memref<512x512xbf16, #tpu.memory_space<vmem>>, %arg5: memref<1x512xf32, #tpu.memory_space<vmem>>, %arg6: memref<2x512xbf16, #tpu.memory_space<vmem>>, %arg7: memref<2x512xbf16, #tpu.memory_space<vmem>>, %arg8: memref<2x512xf32, #tpu.memory_space<vmem>>) attributes {dimension_semantics = [#tpu.dimension_semantics<parallel>, #tpu.dimension_semantics<parallel>, #tpu.dimension_semantics<arbitrary>], iteration_bounds = array<i64: 1, 4, 1>, scalar_prefetch = 0 : i64, scratch_operands = 1 : i64, tpu.core_type = #tpu.core_type<tc>, window_params = [{transform_indices = @transform_0, window_bounds = array<i64: 2, 512>}, {transform_indices = @transform_1, window_bounds = array<i64: 512, 512>}, {transform_indices = @transform_2, window_bounds = array<i64: 1, 512>}, {transform_indices = @transform_3, window_bounds = array<i64: 2, 512>}, {transform_indices = @transform_4, window_bounds = array<i64: 2, 512>}]} {
    %c0_i32 = arith.constant 0 : i32
    %0 = arith.cmpi eq, %arg2, %c0_i32 : i32
    %1 = arith.extui %0 : i1 to i32
    %c0_i32_0 = arith.constant 0 : i32
    %2 = arith.cmpi ne, %1, %c0_i32_0 : i32
    scf.if %2 {
      %cst_10 = arith.constant 0.000000e+00 : f32
      %12 = vector.broadcast %cst_10 : f32 to vector<2x512xf32>
      %c0_11 = arith.constant 0 : index
      %c0_12 = arith.constant 0 : index
      %13 = vector.load %arg8[%c0_11, %c0_12] : memref<2x512xf32, #tpu.memory_space<vmem>>, vector<2x512xf32>
      tpu.vector_store %arg8[%c0_11, %c0_12], %12 {strides = array<i32>} : memref<2x512xf32, #tpu.memory_space<vmem>>, vector<2x512xf32>,
    } else {
    }
    %c0 = arith.constant 0 : index
    %c0_1 = arith.constant 0 : index
    %3 = vector.load %arg8[%c0, %c0_1] : memref<2x512xf32, #tpu.memory_space<vmem>>, vector<2x512xf32>
    %c0_2 = arith.constant 0 : index
    %c0_3 = arith.constant 0 : index
    %4 = vector.load %arg3[%c0_2, %c0_3] : memref<2x512xbf16, #tpu.memory_space<vmem>>, vector<2x512xbf16>
    %c0_4 = arith.constant 0 : index
    %c0_5 = arith.constant 0 : index
    %5 = vector.load %arg4[%c0_4, %c0_5] : memref<512x512xbf16, #tpu.memory_space<vmem>>, vector<512x512xbf16>
    %cst = arith.constant dense<0.000000e+00> : vector<2x512xf32>
    %6 = tpu.matmul %4, %5, %cst {dimension_numbers = #tpu.dot_dimension_numbers<[1], [0], [0], [1], [0, 0, 1, 1], [], []>} : vector<2x512xbf16>, vector<512x512xbf16>, vector<2x512xf32> -> vector<2x512xf32>
    %7 = arith.addf %3, %6 : vector<2x512xf32>
    %c0_6 = arith.constant 0 : index
    %c0_7 = arith.constant 0 : index
    %8 = vector.load %arg8[%c0_6, %c0_7] : memref<2x512xf32, #tpu.memory_space<vmem>>, vector<2x512xf32>
    tpu.vector_store %arg8[%c0_6, %c0_7], %7 {strides = array<i32>} : memref<2x512xf32, #tpu.memory_space<vmem>>, vector<2x512xf32>,
    %c0_i32_8 = arith.constant 0 : i32
    %9 = arith.cmpi eq, %arg2, %c0_i32_8 : i32
    %10 = arith.extui %9 : i1 to i32
    %c0_i32_9 = arith.constant 0 : i32
    %11 = arith.cmpi ne, %10, %c0_i32_9 : i32
    scf.if %11 {
      %c0_10 = arith.constant 0 : index
      %c0_11 = arith.constant 0 : index
      %12 = vector.load %arg8[%c0_10, %c0_11] : memref<2x512xf32, #tpu.memory_space<vmem>>, vector<2x512xf32>
      %c0_12 = arith.constant 0 : index
      %c0_13 = arith.constant 0 : index
      %13 = vector.load %arg5[%c0_12, %c0_13] : memref<1x512xf32, #tpu.memory_space<vmem>>, vector<1x512xf32>
      %14 = vector.broadcast %13 : vector<1x512xf32> to vector<2x512xf32>
      %15 = arith.addf %12, %14 : vector<2x512xf32>
      %c0_14 = arith.constant 0 : index
      %c0_15 = arith.constant 0 : index
      %16 = vector.load %arg6[%c0_14, %c0_15] : memref<2x512xbf16, #tpu.memory_space<vmem>>, vector<2x512xbf16>
      %17 = arith.extf %16 : vector<2x512xbf16> to vector<2x512xf32>
      %18 = arith.addf %15, %17 : vector<2x512xf32>
      %cst_16 = arith.constant 0.000000e+00 : f32
      %19 = vector.broadcast %cst_16 : f32 to vector<2x512xf32>
      %20 = arith.maximumf %18, %19 : vector<2x512xf32>
      %21 = arith.truncf %20 : vector<2x512xf32> to vector<2x512xbf16>
      %c0_17 = arith.constant 0 : index
      %c0_18 = arith.constant 0 : index
      %22 = vector.load %arg7[%c0_17, %c0_18] : memref<2x512xbf16, #tpu.memory_space<vmem>>, vector<2x512xbf16>
      tpu.vector_store %arg7[%c0_17, %c0_18], %21 {strides = array<i32>} : memref<2x512xbf16, #tpu.memory_space<vmem>>, vector<2x512xbf16>,
    } else {
    }
    return
  }
  func.func @transform_0(%arg0: i32, %arg1: i32, %arg2: i32) -> (i32, i32) {
    %c0_i32 = arith.constant 0 : i32
    return %arg0, %arg2 : i32, i32
  }
  func.func @transform_1(%arg0: i32, %arg1: i32, %arg2: i32) -> (i32, i32) {
    %c0_i32 = arith.constant 0 : i32
    return %arg2, %arg1 : i32, i32
  }
  func.func @transform_2(%arg0: i32, %arg1: i32, %arg2: i32) -> (i32, i32) {
    %c0_i32 = arith.constant 0 : i32
    %c0_i32_0 = arith.constant 0 : i32
    return %c0_i32, %arg1 : i32, i32
  }
  func.func @transform_3(%arg0: i32, %arg1: i32, %arg2: i32) -> (i32, i32) {
    %c0_i32 = arith.constant 0 : i32
    return %arg0, %arg1 : i32, i32
  }
  func.func @transform_4(%arg0: i32, %arg1: i32, %arg2: i32) -> (i32, i32) {
    %c0_i32 = arith.constant 0 : i32
    return %arg0, %arg1 : i32, i32
  }
}

module attributes {stable_mosaic.version = 11 : i64} {
  func.func @_mm_bias_kernel(%arg0: i32, %arg1: i32, %arg2: i32, %arg3: memref<2x512xbf16, #tpu.memory_space<vmem>>, %arg4: memref<512x512xbf16, #tpu.memory_space<vmem>>, %arg5: memref<1x512xf32, #tpu.memory_space<vmem>>, %arg6: memref<2x512xbf16, #tpu.memory_space<vmem>>, %arg7: memref<2x512xf32, #tpu.memory_space<vmem>>) attributes {dimension_semantics = [#tpu.dimension_semantics<parallel>, #tpu.dimension_semantics<parallel>, #tpu.dimension_semantics<arbitrary>], iteration_bounds = array<i64: 1, 1, 4>, scalar_prefetch = 0 : i64, scratch_operands = 1 : i64, tpu.core_type = #tpu.core_type<tc>, window_params = [{transform_indices = @transform_0, window_bounds = array<i64: 2, 512>}, {transform_indices = @transform_1, window_bounds = array<i64: 512, 512>}, {transform_indices = @transform_2, window_bounds = array<i64: 1, 512>}, {transform_indices = @transform_3, window_bounds = array<i64: 2, 512>}]} {
    %c0_i32 = arith.constant 0 : i32
    %0 = arith.cmpi eq, %arg2, %c0_i32 : i32
    %1 = arith.extui %0 : i1 to i32
    %c0_i32_0 = arith.constant 0 : i32
    %2 = arith.cmpi ne, %1, %c0_i32_0 : i32
    scf.if %2 {
      %cst_9 = arith.constant 0.000000e+00 : f32
      %12 = vector.broadcast %cst_9 : f32 to vector<2x512xf32>
      %c0_10 = arith.constant 0 : index
      %c0_11 = arith.constant 0 : index
      %13 = vector.load %arg7[%c0_10, %c0_11] : memref<2x512xf32, #tpu.memory_space<vmem>>, vector<2x512xf32>
      tpu.vector_store %arg7[%c0_10, %c0_11], %12 {strides = array<i32>} : memref<2x512xf32, #tpu.memory_space<vmem>>, vector<2x512xf32>,
    } else {
    }
    %c0 = arith.constant 0 : index
    %c0_1 = arith.constant 0 : index
    %3 = vector.load %arg7[%c0, %c0_1] : memref<2x512xf32, #tpu.memory_space<vmem>>, vector<2x512xf32>
    %c0_2 = arith.constant 0 : index
    %c0_3 = arith.constant 0 : index
    %4 = vector.load %arg3[%c0_2, %c0_3] : memref<2x512xbf16, #tpu.memory_space<vmem>>, vector<2x512xbf16>
    %c0_4 = arith.constant 0 : index
    %c0_5 = arith.constant 0 : index
    %5 = vector.load %arg4[%c0_4, %c0_5] : memref<512x512xbf16, #tpu.memory_space<vmem>>, vector<512x512xbf16>
    %cst = arith.constant dense<0.000000e+00> : vector<2x512xf32>
    %6 = tpu.matmul %4, %5, %cst {dimension_numbers = #tpu.dot_dimension_numbers<[1], [0], [0], [1], [0, 0, 1, 1], [], []>} : vector<2x512xbf16>, vector<512x512xbf16>, vector<2x512xf32> -> vector<2x512xf32>
    %7 = arith.addf %3, %6 : vector<2x512xf32>
    %c0_6 = arith.constant 0 : index
    %c0_7 = arith.constant 0 : index
    %8 = vector.load %arg7[%c0_6, %c0_7] : memref<2x512xf32, #tpu.memory_space<vmem>>, vector<2x512xf32>
    tpu.vector_store %arg7[%c0_6, %c0_7], %7 {strides = array<i32>} : memref<2x512xf32, #tpu.memory_space<vmem>>, vector<2x512xf32>,
    %c3_i32 = arith.constant 3 : i32
    %9 = arith.cmpi eq, %arg2, %c3_i32 : i32
    %10 = arith.extui %9 : i1 to i32
    %c0_i32_8 = arith.constant 0 : i32
    %11 = arith.cmpi ne, %10, %c0_i32_8 : i32
    scf.if %11 {
      %c0_9 = arith.constant 0 : index
      %c0_10 = arith.constant 0 : index
      %12 = vector.load %arg7[%c0_9, %c0_10] : memref<2x512xf32, #tpu.memory_space<vmem>>, vector<2x512xf32>
      %c0_11 = arith.constant 0 : index
      %c0_12 = arith.constant 0 : index
      %13 = vector.load %arg5[%c0_11, %c0_12] : memref<1x512xf32, #tpu.memory_space<vmem>>, vector<1x512xf32>
      %14 = vector.broadcast %13 : vector<1x512xf32> to vector<2x512xf32>
      %15 = arith.addf %12, %14 : vector<2x512xf32>
      %cst_13 = arith.constant 0.000000e+00 : f32
      %16 = vector.broadcast %cst_13 : f32 to vector<2x512xf32>
      %17 = arith.maximumf %15, %16 : vector<2x512xf32>
      %18 = arith.truncf %17 : vector<2x512xf32> to vector<2x512xbf16>
      %c0_14 = arith.constant 0 : index
      %c0_15 = arith.constant 0 : index
      %19 = vector.load %arg6[%c0_14, %c0_15] : memref<2x512xbf16, #tpu.memory_space<vmem>>, vector<2x512xbf16>
      tpu.vector_store %arg6[%c0_14, %c0_15], %18 {strides = array<i32>} : memref<2x512xbf16, #tpu.memory_space<vmem>>, vector<2x512xbf16>,
    } else {
    }
    return
  }
  func.func @transform_0(%arg0: i32, %arg1: i32, %arg2: i32) -> (i32, i32) {
    %c0_i32 = arith.constant 0 : i32
    return %arg0, %arg2 : i32, i32
  }
  func.func @transform_1(%arg0: i32, %arg1: i32, %arg2: i32) -> (i32, i32) {
    %c0_i32 = arith.constant 0 : i32
    return %arg2, %arg1 : i32, i32
  }
  func.func @transform_2(%arg0: i32, %arg1: i32, %arg2: i32) -> (i32, i32) {
    %c0_i32 = arith.constant 0 : i32
    %c0_i32_0 = arith.constant 0 : i32
    return %c0_i32, %arg1 : i32, i32
  }
  func.func @transform_3(%arg0: i32, %arg1: i32, %arg2: i32) -> (i32, i32) {
    %c0_i32 = arith.constant 0 : i32
    return %arg0, %arg1 : i32, i32
  }
}

</mosaic_0001>

<bundles_post_ra>
// kernel: depth_aware_resnet_forward.23
= control target key start
LH: loop header
LB: loop body
LE: loop exit
PB: predicated region body
PF: predicated region fallthrough
CT: control target
= control target key end

     0   :  { %v645_v0 = vmov 0   ;;  %vm19_vm0 = vcmask 523264   ;;  %v646_v3 = vmov 0.0   ;;  %vm216_vm1 = vcmask 154624   ;;  %s891_s1 = inlined_call_operand.vmem [shape: bf16[147,64], index: 1, kind: input, shape index: {}]   ;;  %s892_s0 = inlined_call_operand.vmem [shape: bf16[128,147], index: 0, kind: input, shape index: {}]   ;;  %s893_s2 = inlined_call_operand.vmem [shape: f32[1,64], index: 2, kind: input, shape index: {}]   ;;  %s894_s3 = inlined_call_operand.vmem [shape: bf16[128,64], index: 3, kind: output, shape index: {}]  }
   0x1   :  { %248 = vmatprep.subr.bf16.mxu0 %v645_v0  ;;  %588 = vmatprep.subr.bf16.mxu1 %v645_v0  ;;  %v611_v1 = vld [vmem:[%s891_s1 + $0x38] sm:$0xff]   ;;  %v612_v2 = vld [vmem:[%s891_s1 + $0x30] sm:$0xff]   ;;  %20 = vst.msk [vmem:[#allocation2] sm:$0xff] %vm19_vm0, %v646_v3  ;;  %21 = vst.msk [vmem:[#allocation2 + $0x8] sm:$0xff] %vm19_vm0, %v646_v3  ;;  %vm241_vm2 = vcmask 1040384   ;;  %vm242_vm3 = vcmask 1041408  }
   0x2   :  { %249 = vmatpush1.bf16.msra.mxu0 %v611_v1  ;;  %598 = vmatpush1.bf16.msra.mxu1 %v611_v1  ;;  %22 = vst.msk [vmem:[#allocation2 + $0x10] sm:$0xff] %vm19_vm0, %v646_v3  ;;  %23 = vst.msk [vmem:[#allocation2 + $0x18] sm:$0xff] %vm19_vm0, %v646_v3  ;;  %v613_v4 = vld [vmem:[%s891_s1 + $0x28] sm:$0xff]   ;;  %v614_v5 = vld [vmem:[%s891_s1 + $0x20] sm:$0xff]   ;;  %v647_v11 = vmov 65535   ;;  %vm500_vm4 = vcmask 519168  }
   0x3   :  { %250 = vmatprep.subr.bf16.mxu0 %v645_v0  ;;  %589 = vmatprep.subr.bf16.mxu1 %v645_v0  ;;  %24 = vst.msk [vmem:[#allocation2 + $0x20] sm:$0xff] %vm19_vm0, %v646_v3  ;;  %25 = vst.msk [vmem:[#allocation2 + $0x28] sm:$0xff] %vm19_vm0, %v646_v3  ;;  %v623_v6 = vld [vmem:[%s892_s0 + $0x4] ss:$8 sps:$4 sm:$0xff]   ;;  %v615_v8 = vld [vmem:[%s891_s1 + $0x18] sm:$0xff]   ;;  %v243_v12 = vsel %vm241_vm2, 4294967295, %v647_v11 }
   0x4   :  { %26 = vst.msk [vmem:[#allocation2 + $0x30] sm:$0xff] %vm19_vm0, %v646_v3  ;;  %27 = vst.msk [vmem:[#allocation2 + $0x38] sm:$0xff] %vm19_vm0, %v646_v3  ;;  %547 = vmatprep.mubr.msk.bf16.mxu0 %vm216_vm1, %v623_v6  ;;  %v626_v7 = vld [vmem:[%s892_s0 + $0x44] ss:$8 sps:$4 sm:$0xff]   ;;  %v616_v9 = vld [vmem:[%s891_s1 + $0x10] sm:$0xff]   ;;  %v244_v15 = vsel %vm242_vm3, %v243_v12, 0 }
   0x5   :  { %28 = vst.msk [vmem:[#allocation2 + $0x40] sm:$0xff] %vm19_vm0, %v646_v3  ;;  %29 = vst.msk [vmem:[#allocation2 + $0x48] sm:$0xff] %vm19_vm0, %v646_v3  ;;  %551 = vmatprep.mubr.msk.bf16.mxu1 %vm216_vm1, %v626_v7  ;;  %v617_v10 = vld [vmem:[%s891_s1 + $0x8] sm:$0xff]   ;;  %v618_v13 = vld [vmem:[%s891_s1] sm:$0xff]  }
   0x6   :  { %30 = vst.msk [vmem:[#allocation2 + $0x50] sm:$0xff] %vm19_vm0, %v646_v3  ;;  %31 = vst.msk [vmem:[#allocation2 + $0x58] sm:$0xff] %vm19_vm0, %v646_v3  ;;  %251 = vmatpush1.bf16.msra.mxu0 %v612_v2  ;;  %599 = vmatpush1.bf16.msra.mxu1 %v612_v2  ;;  %v619_v14 = vld [vmem:[%s891_s1 + $0x48] ss:$0 sps:$4 sm:$0x33]   ;;  %v620_v17 = vld [vmem:[%s891_s1 + $0x40] sm:$0xff]  }
   0x7   :  { %32 = vst.msk [vmem:[#allocation2 + $0x60] sm:$0xff] %vm19_vm0, %v646_v3  ;;  %33 = vst.msk [vmem:[#allocation2 + $0x68] sm:$0xff] %vm19_vm0, %v646_v3  ;;  %252 = vmatprep.subr.bf16.mxu0 %v645_v0  ;;  %590 = vmatprep.subr.bf16.mxu1 %v645_v0  ;;  %v246_v16 = vand.u32 %v619_v14, %v244_v15  ;;  %v621_v18 = vld [vmem:[%s892_s0] ss:$8 sps:$4 sm:$0xff]   ;;  %v627_v20 = vld [vmem:[%s892_s0 + $0x14] ss:$8 sps:$4 sm:$0xff]  }
   0x8   :  { %34 = vst.msk [vmem:[#allocation2 + $0x70] sm:$0xff] %vm19_vm0, %v646_v3  ;;  %35 = vst.msk [vmem:[#allocation2 + $0x78] sm:$0xff] %vm19_vm0, %v646_v3  ;;  %v624_v19 = vld [vmem:[%s892_s0 + $0x40] ss:$8 sps:$4 sm:$0xff]   ;;  %v629_v21 = vld [vmem:[%s892_s0 + $0x54] ss:$8 sps:$4 sm:$0xff]  }
   0x9   :  { %v631_v22 = vld [vmem:[%s892_s0 + $0x10] ss:$8 sps:$4 sm:$0xff]   ;;  %v633_v24 = vld [vmem:[%s892_s0 + $0x24] ss:$8 sps:$4 sm:$0xff]   ;;  %v637_v26 = vld [vmem:[%s892_s0 + $0x20] ss:$8 sps:$4 sm:$0xff]  }
   0xa   :  { %253 = vmatpush1.bf16.msra.mxu0 %v613_v4  ;;  %600 = vmatpush1.bf16.msra.mxu1 %v613_v4  ;;  %v632_v23 = vld [vmem:[%s892_s0 + $0x50] ss:$8 sps:$4 sm:$0xff]   ;;  %v635_v25 = vld [vmem:[%s892_s0 + $0x64] ss:$8 sps:$4 sm:$0xff]   ;;  %v638_v27 = vld [vmem:[%s892_s0 + $0x60] ss:$8 sps:$4 sm:$0xff]  }
   0xb   :  { %254 = vmatprep.subr.bf16.mxu0 %v645_v0  ;;  %591 = vmatprep.subr.bf16.mxu1 %v645_v0  ;;  %v639_v28 = vld [vmem:[%s892_s0 + $0x34] ss:$8 sps:$4 sm:$0xff]   ;;  %v643_v30 = vld [vmem:[%s892_s0 + $0x30] ss:$8 sps:$4 sm:$0xff]   ;;  %v36_v32 = vld [vmem:[#allocation2] sm:$0xff] }
   0xc   :  { %v641_v29 = vld [vmem:[%s892_s0 + $0x74] ss:$8 sps:$4 sm:$0xff]   ;;  %v644_v31 = vld [vmem:[%s892_s0 + $0x70] ss:$8 sps:$4 sm:$0xff]   ;;  %v44_v33 = vld [vmem:[#allocation2 + $0x40] sm:$0xff] }
   0xd   :  { %v37_v40 = vld [vmem:[#allocation2 + $0x8] sm:$0xff]  ;;  %v38_v48 = vld [vmem:[#allocation2 + $0x10] sm:$0xff]  ;;  %v797_v50 = vld [vmem:[%s893_s2] ss:$0 sm:$0xff] }
   0xe   :  { %255 = vmatpush1.bf16.msra.mxu0 %v614_v5  ;;  %601 = vmatpush1.bf16.msra.mxu1 %v614_v5  ;;  %v45_v41 = vld [vmem:[#allocation2 + $0x48] sm:$0xff]  ;;  %v46_v49 = vld [vmem:[#allocation2 + $0x50] sm:$0xff]  ;;  %v39_v55 = vld [vmem:[#allocation2 + $0x18] sm:$0xff] }
   0xf   :  { %256 = vmatprep.subr.bf16.mxu0 %v645_v0  ;;  %592 = vmatprep.subr.bf16.mxu1 %v645_v0  ;;  %v47_v60 = vld [vmem:[#allocation2 + $0x58] sm:$0xff]  ;;  %v40_v5 = vld [vmem:[#allocation2 + $0x20] sm:$0xff] }
  0x12   :  { %257 = vmatpush1.bf16.msra.mxu0 %v615_v8  ;;  %602 = vmatpush1.bf16.msra.mxu1 %v615_v8 }
  0x13   :  { %258 = vmatprep.subr.bf16.mxu0 %v645_v0  ;;  %593 = vmatprep.subr.bf16.mxu1 %v645_v0 }
  0x16   :  { %259 = vmatpush1.bf16.msra.mxu0 %v616_v9  ;;  %603 = vmatpush1.bf16.msra.mxu1 %v616_v9 }
  0x17   :  { %260 = vmatprep.subr.bf16.mxu0 %v645_v0  ;;  %594 = vmatprep.subr.bf16.mxu1 %v645_v0 }
  0x1a   :  { %261 = vmatpush1.bf16.msra.mxu0 %v617_v10  ;;  %604 = vmatpush1.bf16.msra.mxu1 %v617_v10  ;;  %v48_v10 = vld [vmem:[#allocation2 + $0x60] sm:$0xff] }
  0x1b   :  { %262 = vmatprep.subr.bf16.mxu0 %v645_v0  ;;  %595 = vmatprep.subr.bf16.mxu1 %v645_v0 }
  0x1e   :  { %263 = vmatpush1.bf16.msra.mxu0 %v618_v13  ;;  %605 = vmatpush1.bf16.msra.mxu1 %v618_v13 }
  0x1f   :  { %276 = vmatprep.subr.bf16.mxu0 %v645_v0  ;;  %596 = vmatprep.subr.bf16.mxu1 %v645_v0 }
  0x22   :  { %277 = vmatpush2.bf16.msra.mxu0 %v246_v16  ;;  %606 = vmatpush2.bf16.msra.mxu1 %v246_v16 }
  0x23   :  { %278 = vmatprep.subr.bf16.mxu0 %v645_v0  ;;  %597 = vmatprep.subr.bf16.mxu1 %v645_v0 }
  0x26   :  { %279 = vmatpush2.bf16.msra.mxu0 %v620_v17  ;;  %607 = vmatpush2.bf16.msra.mxu1 %v620_v17 }
  0x29   :  { %281 = vmatmul.mubr.bf16.vlgmr.msra.gmra.mxu0 %v621_v18  ;;  %313 = vmatmul.mubr.bf16.vlgmr.msra.gmra.mxu1 %v624_v19 }
  0x2a   :  { %548 = vmatprep.mubr.msk.bf16.mxu0 %vm216_vm1, %v627_v20  ;;  %552 = vmatprep.mubr.msk.bf16.mxu1 %vm216_vm1, %v629_v21  ;;  %v41_v21 = vld [vmem:[#allocation2 + $0x28] sm:$0xff] }
  0x31   :  { %289 = vmatmul.mubr.bf16.gmra.mxu0 %v631_v22  ;;  %321 = vmatmul.mubr.bf16.gmra.mxu1 %v632_v23 }
  0x32   :  { %549 = vmatprep.mubr.msk.bf16.mxu0 %vm216_vm1, %v633_v24  ;;  %553 = vmatprep.mubr.msk.bf16.mxu1 %vm216_vm1, %v635_v25 }
  0x39   :  { %297 = vmatmul.mubr.bf16.gmra.mxu0 %v637_v26  ;;  %329 = vmatmul.mubr.bf16.gmra.mxu1 %v638_v27  ;;  %v49_v26 = vld [vmem:[#allocation2 + $0x68] sm:$0xff] }
  0x3a   :  { %550 = vmatprep.mubr.msk.bf16.mxu0 %vm216_vm1, %v639_v28  ;;  %554 = vmatprep.mubr.msk.bf16.mxu1 %vm216_vm1, %v641_v29 }
  0x41   :  { %305 = vmatmul.mubr.bf16.gmra.mxu0 %v643_v30  ;;  %337 = vmatmul.mubr.bf16.gmra.mxu1 %v644_v31 }
  0xe9   :  { %v282_v34 = vpop.f32.mrf.mxu0  ;;  %v314_v35 = vpop.f32.mrf.mxu1 }
  0xea   :  { %v345_v36 = vadd.f32 %v282_v34, %v36_v32  ;;  %v353_v37 = vadd.f32 %v314_v35, %v44_v33 }
  0xeb   :  { %v284_v38 = vpop.f32.mrf.mxu0  ;;  %v316_v39 = vpop.f32.mrf.mxu1 }
  0xec   :  { %362 = vst.msk [vmem:[#allocation2] sm:$0xff] %vm19_vm0, %v345_v36  ;;  %370 = vst.msk [vmem:[#allocation2 + $0x40] sm:$0xff] %vm19_vm0, %v353_v37  ;;  %v42_v37 = vld [vmem:[#allocation2 + $0x30] sm:$0xff] }
  0xed   :  { %v285_v42 = vpop.f32.mrf.mxu0  ;;  %v317_v43 = vpop.f32.mrf.mxu1 }
  0xee   :  { %v346_v44 = vadd.f32 %v285_v42, %v37_v40  ;;  %v354_v45 = vadd.f32 %v317_v43, %v45_v41  ;;  %v50_v42 = vld [vmem:[#allocation2 + $0x70] sm:$0xff] }
  0xef   :  { %v287_v46 = vpop.f32.mrf.mxu0  ;;  %v319_v47 = vpop.f32.mrf.mxu1 }
  0xf0   :  { %363 = vst.msk [vmem:[#allocation2 + $0x8] sm:$0xff] %vm19_vm0, %v346_v44  ;;  %371 = vst.msk [vmem:[#allocation2 + $0x48] sm:$0xff] %vm19_vm0, %v354_v45 }
  0xf1   :  { %v290_v51 = vpop.f32.mrf.mxu0  ;;  %v322_v52 = vpop.f32.mrf.mxu1 }
  0xf2   :  { %v347_v53 = vadd.f32 %v290_v51, %v38_v48  ;;  %v355_v54 = vadd.f32 %v322_v52, %v46_v49 }
  0xf3   :  { %v381_v56 = vld [vmem:[#allocation2] sm:$0xff]  ;;  %v292_v58 = vpop.f32.mrf.mxu0  ;;  %v324_v59 = vpop.f32.mrf.mxu1 }
  0xf4   :  { %v389_v57 = vld [vmem:[#allocation2 + $0x40] sm:$0xff]  ;;  %v404_v61 = vadd.f32 %v797_v50, %v381_v56  ;;  %364 = vst.msk [vmem:[#allocation2 + $0x10] sm:$0xff] %vm19_vm0, %v347_v53  ;;  %372 = vst.msk [vmem:[#allocation2 + $0x50] sm:$0xff] %vm19_vm0, %v355_v54  ;;  %v43_v54 = vld [vmem:[#allocation2 + $0x38] sm:$0xff] }
  0xf5   :  { %v412_v62 = vadd.f32 %v797_v50, %v389_v57  ;;  %v293_v63 = vpop.f32.mrf.mxu0  ;;  %v325_v0 = vpop.f32.mrf.mxu1  ;;  %v51_v59 = vld [vmem:[#allocation2 + $0x78] sm:$0xff] }
  0xf6   :  { %v420_v1 = vmax.f32 %v404_v61, 0.0  ;;  %v348_v3 = vadd.f32 %v293_v63, %v39_v55  ;;  %v356_v4 = vadd.f32 %v325_v0, %v47_v60 }
  0xf7   :  { %v428_v2 = vmax.f32 %v412_v62, 0.0  ;;  %v382_v6 = vld [vmem:[#allocation2 + $0x8] sm:$0xff]  ;;  %v295_v8 = vpop.f32.mrf.mxu0  ;;  %v327_v9 = vpop.f32.mrf.mxu1 }
  0xf8   :  { %v390_v7 = vld [vmem:[#allocation2 + $0x48] sm:$0xff]  ;;  %v572_v11 = vpack.c.bf16 %v420_v1, %v420_v1  ;;  %v405_v13 = vadd.f32 %v797_v50, %v382_v6  ;;  %365 = vst.msk [vmem:[#allocation2 + $0x18] sm:$0xff] %vm19_vm0, %v348_v3  ;;  %373 = vst.msk [vmem:[#allocation2 + $0x58] sm:$0xff] %vm19_vm0, %v356_v4 }
  0xf9   :  { %v580_v12 = vpack.c.bf16 %v428_v2, %v428_v2  ;;  %v413_v14 = vadd.f32 %v797_v50, %v390_v7  ;;  %v298_v15 = vpop.f32.mrf.mxu0  ;;  %v330_v16 = vpop.f32.mrf.mxu1 }
  0xfa   :  { %501 = vst.msk [vmem:[%s894_s3] sm:$0xf] %vm500_vm4, %v572_v11  ;;  %v421_v17 = vmax.f32 %v405_v13, 0.0  ;;  %v349_v19 = vadd.f32 %v298_v15, %v40_v5  ;;  %v357_v20 = vadd.f32 %v330_v16, %v48_v10 }
  0xfb   :  { %509 = vst.msk [vmem:[%s894_s3 + $0x20] sm:$0xf] %vm500_vm4, %v580_v12  ;;  %v429_v18 = vmax.f32 %v413_v14, 0.0  ;;  %v383_v22 = vld [vmem:[#allocation2 + $0x10] sm:$0xff]  ;;  %v300_v24 = vpop.f32.mrf.mxu0  ;;  %v332_v25 = vpop.f32.mrf.mxu1 }
  0xfc   :  { %v391_v23 = vld [vmem:[#allocation2 + $0x50] sm:$0xff]  ;;  %v573_v27 = vpack.c.bf16 %v421_v17, %v421_v17  ;;  %v406_v29 = vadd.f32 %v797_v50, %v383_v22  ;;  %366 = vst.msk [vmem:[#allocation2 + $0x20] sm:$0xff] %vm19_vm0, %v349_v19  ;;  %374 = vst.msk [vmem:[#allocation2 + $0x60] sm:$0xff] %vm19_vm0, %v357_v20 }
  0xfd   :  { %v581_v28 = vpack.c.bf16 %v429_v18, %v429_v18  ;;  %v414_v30 = vadd.f32 %v797_v50, %v391_v23  ;;  %v301_v31 = vpop.f32.mrf.mxu0  ;;  %v333_v32 = vpop.f32.mrf.mxu1 }
  0xfe   :  { %502 = vst.msk [vmem:[%s894_s3 + $0x4] sm:$0xf] %vm500_vm4, %v573_v27  ;;  %v422_v33 = vmax.f32 %v406_v29, 0.0  ;;  %v350_v35 = vadd.f32 %v301_v31, %v41_v21  ;;  %v358_v36 = vadd.f32 %v333_v32, %v49_v26 }
  0xff   :  { %510 = vst.msk [vmem:[%s894_s3 + $0x24] sm:$0xf] %vm500_vm4, %v581_v28  ;;  %v430_v34 = vmax.f32 %v414_v30, 0.0  ;;  %v384_v38 = vld [vmem:[#allocation2 + $0x18] sm:$0xff]  ;;  %v303_v40 = vpop.f32.mrf.mxu0  ;;  %v335_v41 = vpop.f32.mrf.mxu1 }
 0x100   :  { %v392_v39 = vld [vmem:[#allocation2 + $0x58] sm:$0xff]  ;;  %v574_v43 = vpack.c.bf16 %v422_v33, %v422_v33  ;;  %v407_v45 = vadd.f32 %v797_v50, %v384_v38  ;;  %367 = vst.msk [vmem:[#allocation2 + $0x28] sm:$0xff] %vm19_vm0, %v350_v35  ;;  %375 = vst.msk [vmem:[#allocation2 + $0x68] sm:$0xff] %vm19_vm0, %v358_v36 }
 0x101   :  { %v582_v44 = vpack.c.bf16 %v430_v34, %v430_v34  ;;  %v415_v46 = vadd.f32 %v797_v50, %v392_v39  ;;  %v306_v47 = vpop.f32.mrf.mxu0  ;;  %v338_v48 = vpop.f32.mrf.mxu1 }
 0x102   :  { %503 = vst.msk [vmem:[%s894_s3 + $0x8] sm:$0xf] %vm500_vm4, %v574_v43  ;;  %v423_v49 = vmax.f32 %v407_v45, 0.0  ;;  %v351_v52 = vadd.f32 %v306_v47, %v42_v37  ;;  %v359_v53 = vadd.f32 %v338_v48, %v50_v42 }
 0x103   :  { %511 = vst.msk [vmem:[%s894_s3 + $0x28] sm:$0xf] %vm500_vm4, %v582_v44  ;;  %v431_v51 = vmax.f32 %v415_v46, 0.0  ;;  %v385_v55 = vld [vmem:[#allocation2 + $0x20] sm:$0xff]  ;;  %v308_v57 = vpop.f32.mrf.mxu0  ;;  %v340_v58 = vpop.f32.mrf.mxu1 }
 0x104   :  { %v393_v56 = vld [vmem:[#allocation2 + $0x60] sm:$0xff]  ;;  %v575_v60 = vpack.c.bf16 %v423_v49, %v423_v49  ;;  %v408_v62 = vadd.f32 %v797_v50, %v385_v55  ;;  %368 = vst.msk [vmem:[#allocation2 + $0x30] sm:$0xff] %vm19_vm0, %v351_v52  ;;  %376 = vst.msk [vmem:[#allocation2 + $0x70] sm:$0xff] %vm19_vm0, %v359_v53 }
 0x105   :  { %v583_v61 = vpack.c.bf16 %v431_v51, %v431_v51  ;;  %v416_v63 = vadd.f32 %v797_v50, %v393_v56  ;;  %v309_v0 = vpop.f32.mrf.mxu0  ;;  %v341_v1 = vpop.f32.mrf.mxu1 }
 0x106   :  { %504 = vst.msk [vmem:[%s894_s3 + $0xc] sm:$0xf] %vm500_vm4, %v575_v60  ;;  %v424_v2 = vmax.f32 %v408_v62, 0.0  ;;  %v352_v4 = vadd.f32 %v309_v0, %v43_v54  ;;  %v360_v5 = vadd.f32 %v341_v1, %v51_v59 }
 0x107   :  { %512 = vst.msk [vmem:[%s894_s3 + $0x2c] sm:$0xf] %vm500_vm4, %v583_v61  ;;  %v432_v3 = vmax.f32 %v416_v63, 0.0  ;;  %v386_v6 = vld [vmem:[#allocation2 + $0x28] sm:$0xff]  ;;  %v311_v8 = vpop.f32.mrf.mxu0  ;;  %v343_v9 = vpop.f32.mrf.mxu1 }
 0x108   :  { %v394_v7 = vld [vmem:[#allocation2 + $0x68] sm:$0xff]  ;;  %v576_v10 = vpack.c.bf16 %v424_v2, %v424_v2  ;;  %v409_v12 = vadd.f32 %v797_v50, %v386_v6  ;;  %369 = vst.msk [vmem:[#allocation2 + $0x38] sm:$0xff] %vm19_vm0, %v352_v4  ;;  %377 = vst.msk [vmem:[#allocation2 + $0x78] sm:$0xff] %vm19_vm0, %v360_v5 }
 0x109   :  { %v584_v11 = vpack.c.bf16 %v432_v3, %v432_v3  ;;  %v417_v13 = vadd.f32 %v797_v50, %v394_v7 }
 0x10a   :  { %505 = vst.msk [vmem:[%s894_s3 + $0x10] sm:$0xf] %vm500_vm4, %v576_v10  ;;  %v425_v14 = vmax.f32 %v409_v12, 0.0 }
 0x10b   :  { %513 = vst.msk [vmem:[%s894_s3 + $0x30] sm:$0xf] %vm500_vm4, %v584_v11  ;;  %v433_v15 = vmax.f32 %v417_v13, 0.0  ;;  %v387_v16 = vld [vmem:[#allocation2 + $0x30] sm:$0xff] }
 0x10c   :  { %v395_v17 = vld [vmem:[#allocation2 + $0x70] sm:$0xff]  ;;  %v577_v18 = vpack.c.bf16 %v425_v14, %v425_v14  ;;  %v410_v20 = vadd.f32 %v797_v50, %v387_v16 }
 0x10d   :  { %v585_v19 = vpack.c.bf16 %v433_v15, %v433_v15  ;;  %v418_v21 = vadd.f32 %v797_v50, %v395_v17 }
 0x10e   :  { %506 = vst.msk [vmem:[%s894_s3 + $0x14] sm:$0xf] %vm500_vm4, %v577_v18  ;;  %v426_v22 = vmax.f32 %v410_v20, 0.0 }
 0x10f   :  { %514 = vst.msk [vmem:[%s894_s3 + $0x34] sm:$0xf] %vm500_vm4, %v585_v19  ;;  %v434_v23 = vmax.f32 %v418_v21, 0.0  ;;  %v388_v24 = vld [vmem:[#allocation2 + $0x38] sm:$0xff] }
 0x110   :  { %v396_v25 = vld [vmem:[#allocation2 + $0x78] sm:$0xff]  ;;  %v578_v26 = vpack.c.bf16 %v426_v22, %v426_v22  ;;  %v411_v28 = vadd.f32 %v797_v50, %v388_v24 }
 0x111   :  { %v586_v27 = vpack.c.bf16 %v434_v23, %v434_v23  ;;  %v419_v29 = vadd.f32 %v797_v50, %v396_v25 }
 0x112   :  { %507 = vst.msk [vmem:[%s894_s3 + $0x18] sm:$0xf] %vm500_vm4, %v578_v26  ;;  %v427_v30 = vmax.f32 %v411_v28, 0.0 }
 0x113   :  { %515 = vst.msk [vmem:[%s894_s3 + $0x38] sm:$0xf] %vm500_vm4, %v586_v27  ;;  %v435_v31 = vmax.f32 %v419_v29, 0.0 }
 0x114   :  { %v579_v32 = vpack.c.bf16 %v427_v30, %v427_v30 }
 0x115   :  { %v587_v33 = vpack.c.bf16 %v435_v31, %v435_v31 }
 0x116   :  { %508 = vst.msk [vmem:[%s894_s3 + $0x1c] sm:$0xf] %vm500_vm4, %v579_v32 }
 0x117   :  { %516 = vst.msk [vmem:[%s894_s3 + $0x3c] sm:$0xf] %vm500_vm4, %v587_v33 }

// kernel: depth_aware_resnet_forward.24
= control target key start
LH: loop header
LB: loop body
LE: loop exit
PB: predicated region body
PF: predicated region fallthrough
CT: control target
= control target key end

     0   :  { %vm19_vm0 = vcmask 523264   ;;  %v227_v1 = vmov 0.0   ;;  %vm176_vm1 = vcmask 519168   ;;  %s291_s1 = inlined_call_operand.vmem [shape: bf16[64,64], index: 1, kind: input, shape index: {}]   ;;  %s292_s0 = inlined_call_operand.vmem [shape: bf16[32,64], index: 0, kind: input, shape index: {}]   ;;  %s293_s2 = inlined_call_operand.vmem [shape: f32[1,64], index: 2, kind: input, shape index: {}]   ;;  %s294_s3 = inlined_call_operand.vmem [shape: bf16[32,64], index: 3, kind: output, shape index: {}]  }
   0x1   :  { %v221_v0 = vld [vmem:[%s291_s1 + $0x18] sm:$0xff]   ;;  %22 = vst.msk [vmem:[#allocation2 + $0x10] sm:$0xff] %vm19_vm0, %v227_v1  ;;  %20 = vst.msk [vmem:[#allocation2] sm:$0xff] %vm19_vm0, %v227_v1  ;;  %v222_v2 = vld [vmem:[%s291_s1 + $0x10] sm:$0xff]  }
   0x2   :  { %21 = vst.msk [vmem:[#allocation2 + $0x8] sm:$0xff] %vm19_vm0, %v227_v1  ;;  %23 = vst.msk [vmem:[#allocation2 + $0x18] sm:$0xff] %vm19_vm0, %v227_v1  ;;  %208 = vmatprep.subr.bf16.mxu0 %v221_v0  ;;  %v223_v3 = vld [vmem:[%s291_s1 + $0x8] sm:$0xff]   ;;  %v225_v4 = vld [vmem:[%s292_s0] sm:$0xff]  }
   0x3   :  { %209 = vmatpush3.bf16.msra.mxu0 %v221_v0  ;;  %216 = vmatprep.mubr.msk.bf16.mxu0 %vm19_vm0, %v225_v4  ;;  %v224_v5 = vld [vmem:[%s291_s1] sm:$0xff]   ;;  %v226_v6 = vld [vmem:[%s292_s0 + $0x8] sm:$0xff]  }
   0x4   :  { %210 = vmatprep.subr.bf16.mxu0 %v222_v2  ;;  %v193_v19 = vld [vmem:[%s293_s2] ss:$0 sm:$0xff] }
   0x7   :  { %211 = vmatpush3.bf16.msra.mxu0 %v222_v2 }
   0x8   :  { %212 = vmatprep.subr.bf16.mxu0 %v223_v3  ;;  %v26_v7 = vld [vmem:[#allocation2 + $0x10] sm:$0xff]  ;;  %v24_v9 = vld [vmem:[#allocation2] sm:$0xff] }
   0x9   :  { %v27_v12 = vld [vmem:[#allocation2 + $0x18] sm:$0xff]  ;;  %v25_v15 = vld [vmem:[#allocation2 + $0x8] sm:$0xff] }
   0xb   :  { %213 = vmatpush3.bf16.msra.mxu0 %v223_v3 }
   0xc   :  { %214 = vmatprep.subr.bf16.mxu0 %v224_v5 }
   0xf   :  { %215 = vmatpush3.bf16.msra.mxu0 %v224_v5 }
  0x12   :  { %217 = vmatmul.mubr.msk.bf16.vlgmr.msra.gmra.mxu0 %vm19_vm0, %v226_v6 }
  0xd2   :  { %v218_v8 = vpop.f32.mrf.mxu0 }
  0xd3   :  { %v132_v10 = vadd.f32 %v218_v8, %v26_v7 }
  0xd4   :  { %v115_v11 = vpop.f32.mrf.mxu0 }
  0xd5   :  { %136 = vst.msk [vmem:[#allocation2 + $0x10] sm:$0xff] %vm19_vm0, %v132_v10  ;;  %v130_v13 = vadd.f32 %v115_v11, %v24_v9 }
  0xd6   :  { %v219_v14 = vpop.f32.mrf.mxu0 }
  0xd7   :  { %134 = vst.msk [vmem:[#allocation2] sm:$0xff] %vm19_vm0, %v130_v13  ;;  %v133_v16 = vadd.f32 %v219_v14, %v27_v12 }
  0xd8   :  { %v118_v17 = vpop.f32.mrf.mxu0 }
  0xd9   :  { %137 = vst.msk [vmem:[#allocation2 + $0x18] sm:$0xff] %vm19_vm0, %v133_v16  ;;  %v131_v18 = vadd.f32 %v118_v17, %v25_v15 }
  0xdb   :  { %135 = vst.msk [vmem:[#allocation2 + $0x8] sm:$0xff] %vm19_vm0, %v131_v18 }
  0xdc   :  { %v143_v20 = vld [vmem:[#allocation2 + $0x10] sm:$0xff] }
  0xdd   :  { %v154_v21 = vadd.f32 %v193_v19, %v143_v20 }
  0xde   :  { %v141_v22 = vld [vmem:[#allocation2] sm:$0xff] }
  0xdf   :  { %v158_v23 = vmax.f32 %v154_v21, 0.0  ;;  %v152_v24 = vadd.f32 %v193_v19, %v141_v22 }
  0xe0   :  { %v144_v25 = vld [vmem:[#allocation2 + $0x18] sm:$0xff] }
  0xe1   :  { %v200_v26 = vpack.c.bf16 %v158_v23, %v158_v23  ;;  %v156_v27 = vmax.f32 %v152_v24, 0.0  ;;  %v155_v28 = vadd.f32 %v193_v19, %v144_v25 }
  0xe2   :  { %v142_v29 = vld [vmem:[#allocation2 + $0x8] sm:$0xff] }
  0xe3   :  { %179 = vst.msk [vmem:[%s294_s3 + $0x8] sm:$0xf] %vm176_vm1, %v200_v26  ;;  %v198_v30 = vpack.c.bf16 %v156_v27, %v156_v27  ;;  %v159_v31 = vmax.f32 %v155_v28, 0.0  ;;  %v153_v32 = vadd.f32 %v193_v19, %v142_v29 }
  0xe5   :  { %177 = vst.msk [vmem:[%s294_s3] sm:$0xf] %vm176_vm1, %v198_v30  ;;  %v201_v33 = vpack.c.bf16 %v159_v31, %v159_v31  ;;  %v157_v34 = vmax.f32 %v153_v32, 0.0 }
  0xe7   :  { %180 = vst.msk [vmem:[%s294_s3 + $0xc] sm:$0xf] %vm176_vm1, %v201_v33  ;;  %v199_v35 = vpack.c.bf16 %v157_v34, %v157_v34 }
  0xe9   :  { %178 = vst.msk [vmem:[%s294_s3 + $0x4] sm:$0xf] %vm176_vm1, %v199_v35 }

// kernel: depth_aware_resnet_forward.25
= control target key start
LH: loop header
LB: loop body
LE: loop exit
PB: predicated region body
PF: predicated region fallthrough
CT: control target
= control target key end

     0   :  { %vm19_vm0 = vcmask 523264   ;;  %v769_v46 = vmov 0.0   ;;  %vm578_vm1 = vcmask 519168   ;;  %s953_s1 = inlined_call_operand.vmem [shape: bf16[576,64], index: 1, kind: input, shape index: {}]   ;;  %s954_s0 = inlined_call_operand.vmem [shape: bf16[32,576], index: 0, kind: input, shape index: {}]   ;;  %s955_s2 = inlined_call_operand.vmem [shape: f32[1,64], index: 2, kind: input, shape index: {}]   ;;  %s956_s3 = inlined_call_operand.vmem [shape: bf16[32,64], index: 3, kind: output, shape index: {}]  }
   0x1   :  { %v719_v0 = vld [vmem:[%s953_s1 + $0x78] sm:$0xff]   ;;  %v723_v4 = vld [vmem:[%s953_s1 + $0x70] sm:$0xff]   ;;  %v727_v8 = vld [vmem:[%s953_s1 + $0x68] sm:$0xff]   ;;  %22 = vst.msk [vmem:[#allocation2 + $0x10] sm:$0xff] %vm19_vm0, %v769_v46 }
   0x2   :  { %v720_v1 = vld [vmem:[%s953_s1 + $0xf8] sm:$0xff]   ;;  %644 = vmatprep.subr.bf16.mxu0 %v719_v0  ;;  %v724_v5 = vld [vmem:[%s953_s1 + $0xf0] sm:$0xff]   ;;  %v728_v9 = vld [vmem:[%s953_s1 + $0xe8] sm:$0xff]   ;;  %20 = vst.msk [vmem:[#allocation2] sm:$0xff] %vm19_vm0, %v769_v46 }
   0x3   :  { %v721_v2 = vld [vmem:[%s953_s1 + $0x38] sm:$0xff]   ;;  %672 = vmatprep.subr.bf16.mxu1 %v720_v1  ;;  %v725_v6 = vld [vmem:[%s953_s1 + $0x30] sm:$0xff]   ;;  %v729_v10 = vld [vmem:[%s953_s1 + $0x28] sm:$0xff]   ;;  %21 = vst.msk [vmem:[#allocation2 + $0x8] sm:$0xff] %vm19_vm0, %v769_v46 }
   0x4   :  { %v722_v3 = vld [vmem:[%s953_s1 + $0xb8] sm:$0xff]   ;;  %645 = vmatpush3.bf16.msra.mxu0 %v721_v2  ;;  %v726_v7 = vld [vmem:[%s953_s1 + $0xb0] sm:$0xff]   ;;  %v730_v11 = vld [vmem:[%s953_s1 + $0xa8] sm:$0xff]   ;;  %23 = vst.msk [vmem:[#allocation2 + $0x18] sm:$0xff] %vm19_vm0, %v769_v46 }
   0x5   :  { %673 = vmatpush3.bf16.msra.mxu1 %v722_v3  ;;  %646 = vmatprep.subr.bf16.mxu0 %v723_v4  ;;  %v731_v12 = vld [vmem:[%s953_s1 + $0x60] sm:$0xff]   ;;  %v735_v16 = vld [vmem:[%s953_s1 + $0x58] sm:$0xff]   ;;  %v739_v20 = vld [vmem:[%s953_s1 + $0x50] sm:$0xff]  }
   0x6   :  { %674 = vmatprep.subr.bf16.mxu1 %v724_v5  ;;  %v732_v13 = vld [vmem:[%s953_s1 + $0xe0] sm:$0xff]   ;;  %v736_v17 = vld [vmem:[%s953_s1 + $0xd8] sm:$0xff]   ;;  %v740_v21 = vld [vmem:[%s953_s1 + $0xd0] sm:$0xff]  }
   0x7   :  { %v733_v14 = vld [vmem:[%s953_s1 + $0x20] sm:$0xff]   ;;  %v737_v18 = vld [vmem:[%s953_s1 + $0x18] sm:$0xff]   ;;  %v741_v22 = vld [vmem:[%s953_s1 + $0x10] sm:$0xff]  }
   0x8   :  { %647 = vmatpush3.bf16.msra.mxu0 %v725_v6  ;;  %v734_v15 = vld [vmem:[%s953_s1 + $0xa0] sm:$0xff]   ;;  %v738_v19 = vld [vmem:[%s953_s1 + $0x98] sm:$0xff]   ;;  %v742_v23 = vld [vmem:[%s953_s1 + $0x90] sm:$0xff]  }
   0x9   :  { %675 = vmatpush3.bf16.msra.mxu1 %v726_v7  ;;  %648 = vmatprep.subr.bf16.mxu0 %v727_v8  ;;  %v743_v24 = vld [vmem:[%s953_s1 + $0x48] sm:$0xff]   ;;  %v747_v28 = vld [vmem:[%s953_s1 + $0x40] sm:$0xff]   ;;  %v757_v36 = vld [vmem:[%s953_s1 + $0x118] sm:$0xff]  }
   0xa   :  { %676 = vmatprep.subr.bf16.mxu1 %v728_v9  ;;  %v744_v25 = vld [vmem:[%s953_s1 + $0xc8] sm:$0xff]   ;;  %v748_v29 = vld [vmem:[%s953_s1 + $0xc0] sm:$0xff]   ;;  %v758_v37 = vld [vmem:[%s953_s1 + $0x110] sm:$0xff]  }
   0xb   :  { %v745_v26 = vld [vmem:[%s953_s1 + $0x8] sm:$0xff]   ;;  %v749_v30 = vld [vmem:[%s953_s1] sm:$0xff]   ;;  %v26_v6 = vld [vmem:[#allocation2 + $0x10] sm:$0xff] }
   0xc   :  { %649 = vmatpush3.bf16.msra.mxu0 %v729_v10  ;;  %v746_v27 = vld [vmem:[%s953_s1 + $0x88] sm:$0xff]   ;;  %v750_v31 = vld [vmem:[%s953_s1 + $0x80] sm:$0xff]  }
   0xd   :  { %677 = vmatpush3.bf16.msra.mxu1 %v730_v11  ;;  %650 = vmatprep.subr.bf16.mxu0 %v731_v12  ;;  %v751_v32 = vld [vmem:[%s954_s0] ss:$20 sps:$4 sm:$0xff]   ;;  %v753_v33 = vld [vmem:[%s954_s0 + $0x4] ss:$20 sps:$4 sm:$0xff]   ;;  %v754_v34 = vld [vmem:[%s954_s0 + $0x8] ss:$20 sps:$4 sm:$0xff]  }
   0xe   :  { %678 = vmatprep.subr.bf16.mxu1 %v732_v13  ;;  %v756_v35 = vld [vmem:[%s954_s0 + $0xc] ss:$20 sps:$4 sm:$0xff]   ;;  %417 = vmatprep.mubr.bf16.mxu0 %v753_v33  ;;  %v761_v39 = vld [vmem:[%s954_s0 + $0x34] ss:$20 sps:$4 sm:$0xff]   ;;  %v764_v42 = vld [vmem:[%s954_s0 + $0x30] ss:$20 sps:$4 sm:$0xff]  }
   0xf   :  { %466 = vmatprep.mubr.bf16.mxu1 %v756_v35  ;;  %v759_v38 = vld [vmem:[%s954_s0 + $0x2c] ss:$20 sps:$4 sm:$0xff]   ;;  %v763_v40 = vld [vmem:[%s954_s0 + $0x28] ss:$20 sps:$4 sm:$0xff]   ;;  %v767_v43 = vld [vmem:[%s954_s0 + $0x10] ss:$20 sps:$4 sm:$0xff]  }
  0x10   :  { %651 = vmatpush3.bf16.msra.mxu0 %v733_v14  ;;  %v765_v41 = vld [vmem:[%s953_s1 + $0x108] sm:$0xff]   ;;  %v766_v44 = vld [vmem:[%s953_s1 + $0x100] sm:$0xff]  }
  0x11   :  { %679 = vmatpush3.bf16.msra.mxu1 %v734_v15  ;;  %652 = vmatprep.subr.bf16.mxu0 %v735_v16  ;;  %v768_v45 = vld [vmem:[%s954_s0 + $0x38] ss:$20 sps:$4 sm:$0xff]   ;;  %v24_v12 = vld [vmem:[#allocation2] sm:$0xff] }
  0x12   :  { %680 = vmatprep.subr.bf16.mxu1 %v736_v17  ;;  %v27_v17 = vld [vmem:[#allocation2 + $0x18] sm:$0xff] }
  0x14   :  { %653 = vmatpush3.bf16.msra.mxu0 %v737_v18 }
  0x15   :  { %681 = vmatpush3.bf16.msra.mxu1 %v738_v19  ;;  %654 = vmatprep.subr.bf16.mxu0 %v739_v20 }
  0x16   :  { %682 = vmatprep.subr.bf16.mxu1 %v740_v21 }
  0x18   :  { %655 = vmatpush3.bf16.msra.mxu0 %v741_v22  ;;  %v25_v22 = vld [vmem:[#allocation2 + $0x8] sm:$0xff] }
  0x19   :  { %683 = vmatpush3.bf16.msra.mxu1 %v742_v23  ;;  %656 = vmatprep.subr.bf16.mxu0 %v743_v24 }
  0x1a   :  { %684 = vmatprep.subr.bf16.mxu1 %v744_v25 }
  0x1c   :  { %657 = vmatpush3.bf16.msra.mxu0 %v745_v26 }
  0x1d   :  { %685 = vmatpush3.bf16.msra.mxu1 %v746_v27  ;;  %658 = vmatprep.subr.bf16.mxu0 %v747_v28  ;;  %v635_v27 = vld [vmem:[%s955_s2] ss:$0 sm:$0xff] }
  0x1e   :  { %686 = vmatprep.subr.bf16.mxu1 %v748_v29 }
  0x20   :  { %659 = vmatpush3.bf16.msra.mxu0 %v749_v30 }
  0x21   :  { %687 = vmatpush3.bf16.msra.mxu1 %v750_v31  ;;  %706 = vmatprep.subr.bf16.mxu0 %v757_v36 }
  0x23   :  { %418 = vmatmul.mubr.bf16.vlgmr.msra.gmra.mxu0 %v751_v32 }
  0x24   :  { %467 = vmatmul.mubr.bf16.vlgmr.msra.gmra.mxu1 %v754_v34  ;;  %707 = vmatpush3.bf16.msra.mxu0 %v757_v36 }
  0x25   :  { %708 = vmatprep.subr.bf16.mxu0 %v758_v37  ;;  %425 = vmatprep.mubr.bf16.mxu0 %v759_v38 }
  0x26   :  { %474 = vmatprep.mubr.bf16.mxu1 %v761_v39 }
  0x28   :  { %709 = vmatpush3.bf16.msra.mxu0 %v758_v37 }
  0x29   :  { %710 = vmatprep.subr.bf16.mxu0 %v765_v41 }
  0x2b   :  { %426 = vmatmul.mubr.bf16.gmra.mxu0 %v763_v40 }
  0x2c   :  { %475 = vmatmul.mubr.bf16.gmra.mxu1 %v764_v42  ;;  %714 = vmatprep.mubr.msk.bf16.mxu0 %vm19_vm0, %v767_v43 }
  0x2d   :  { %711 = vmatpush3.bf16.msra.mxu0 %v765_v41 }
  0x2e   :  { %712 = vmatprep.subr.bf16.mxu0 %v766_v44 }
  0x31   :  { %713 = vmatpush3.bf16.msra.mxu0 %v766_v44 }
  0x34   :  { %715 = vmatmul.mubr.msk.bf16.vlgmr.msra.gmra.mxu0 %vm19_vm0, %v768_v45 }
  0xe3   :  { %v660_v47 = vpop.f32.mrf.mxu0 }
  0xe4   :  { %v688_v48 = vpop.f32.mrf.mxu1 }
  0xe5   :  { %v661_v49 = vpop.f32.mrf.mxu0 }
  0xe6   :  { %v689_v50 = vpop.f32.mrf.mxu1  ;;  %v662_v63 = vadd.f32 %v661_v49, %v660_v47 }
  0xe7   :  { %v663_v51 = vpop.f32.mrf.mxu0  ;;  %v690_v0 = vadd.f32 %v689_v50, %v688_v48 }
  0xe8   :  { %v691_v52 = vpop.f32.mrf.mxu1 }
  0xe9   :  { %v664_v53 = vpop.f32.mrf.mxu0  ;;  %v469_v11 = vadd.f32 %v690_v0, %v662_v63 }
  0xea   :  { %v692_v54 = vpop.f32.mrf.mxu1  ;;  %v665_v8 = vadd.f32 %v664_v53, %v663_v51 }
  0xeb   :  { %v666_v55 = vpop.f32.mrf.mxu0  ;;  %v693_v9 = vadd.f32 %v692_v54, %v691_v52 }
  0xec   :  { %v694_v56 = vpop.f32.mrf.mxu1 }
  0xed   :  { %v667_v57 = vpop.f32.mrf.mxu0  ;;  %v472_v21 = vadd.f32 %v693_v9, %v665_v8 }
  0xee   :  { %v695_v58 = vpop.f32.mrf.mxu1  ;;  %v668_v59 = vadd.f32 %v667_v57, %v666_v55 }
  0xef   :  { %v696_v60 = vadd.f32 %v695_v58, %v694_v56  ;;  %v669_v61 = vpop.f32.mrf.mxu0 }
  0xf0   :  { %v697_v62 = vpop.f32.mrf.mxu1 }
  0xf1   :  { %v670_v1 = vpop.f32.mrf.mxu0  ;;  %v477_v5 = vadd.f32 %v696_v60, %v668_v59 }
  0xf2   :  { %v698_v2 = vpop.f32.mrf.mxu1  ;;  %v671_v3 = vadd.f32 %v670_v1, %v669_v61 }
  0xf3   :  { %v699_v4 = vadd.f32 %v698_v2, %v697_v62 }
  0xf4   :  { %v716_v7 = vpop.f32.mrf.mxu0 }
  0xf5   :  { %v526_v10 = vadd.f32 %v716_v7, %v477_v5  ;;  %v480_v16 = vadd.f32 %v699_v4, %v671_v3 }
  0xf6   :  { %v517_v13 = vpop.f32.mrf.mxu0 }
  0xf7   :  { %v534_v14 = vadd.f32 %v526_v10, %v26_v6  ;;  %v518_v15 = vadd.f32 %v517_v13, %v469_v11 }
  0xf8   :  { %v717_v18 = vpop.f32.mrf.mxu0 }
  0xf9   :  { %538 = vst.msk [vmem:[#allocation2 + $0x10] sm:$0xff] %vm19_vm0, %v534_v14  ;;  %v532_v19 = vadd.f32 %v518_v15, %v24_v12  ;;  %v529_v20 = vadd.f32 %v717_v18, %v480_v16 }
  0xfa   :  { %v520_v23 = vpop.f32.mrf.mxu0 }
  0xfb   :  { %536 = vst.msk [vmem:[#allocation2] sm:$0xff] %vm19_vm0, %v532_v19  ;;  %v535_v24 = vadd.f32 %v529_v20, %v27_v17  ;;  %v521_v25 = vadd.f32 %v520_v23, %v472_v21 }
  0xfd   :  { %539 = vst.msk [vmem:[#allocation2 + $0x18] sm:$0xff] %vm19_vm0, %v535_v24  ;;  %v533_v26 = vadd.f32 %v521_v25, %v25_v22 }
  0xff   :  { %537 = vst.msk [vmem:[#allocation2 + $0x8] sm:$0xff] %vm19_vm0, %v533_v26 }
 0x100   :  { %v545_v28 = vld [vmem:[#allocation2 + $0x10] sm:$0xff] }
 0x101   :  { %v556_v29 = vadd.f32 %v635_v27, %v545_v28 }
 0x102   :  { %v543_v30 = vld [vmem:[#allocation2] sm:$0xff] }
 0x103   :  { %v560_v31 = vmax.f32 %v556_v29, 0.0  ;;  %v554_v32 = vadd.f32 %v635_v27, %v543_v30 }
 0x104   :  { %v546_v33 = vld [vmem:[#allocation2 + $0x18] sm:$0xff] }
 0x105   :  { %v642_v34 = vpack.c.bf16 %v560_v31, %v560_v31  ;;  %v558_v35 = vmax.f32 %v554_v32, 0.0  ;;  %v557_v36 = vadd.f32 %v635_v27, %v546_v33 }
 0x106   :  { %v544_v37 = vld [vmem:[#allocation2 + $0x8] sm:$0xff] }
 0x107   :  { %581 = vst.msk [vmem:[%s956_s3 + $0x8] sm:$0xf] %vm578_vm1, %v642_v34  ;;  %v640_v38 = vpack.c.bf16 %v558_v35, %v558_v35  ;;  %v561_v39 = vmax.f32 %v557_v36, 0.0  ;;  %v555_v40 = vadd.f32 %v635_v27, %v544_v37 }
 0x109   :  { %579 = vst.msk [vmem:[%s956_s3] sm:$0xf] %vm578_vm1, %v640_v38  ;;  %v643_v41 = vpack.c.bf16 %v561_v39, %v561_v39  ;;  %v559_v42 = vmax.f32 %v555_v40, 0.0 }
 0x10b   :  { %582 = vst.msk [vmem:[%s956_s3 + $0xc] sm:$0xf] %vm578_vm1, %v643_v41  ;;  %v641_v43 = vpack.c.bf16 %v559_v42, %v559_v42 }
 0x10d   :  { %580 = vst.msk [vmem:[%s956_s3 + $0x4] sm:$0xf] %vm578_vm1, %v641_v43 }

// kernel: depth_aware_resnet_forward.26
= control target key start
LH: loop header
LB: loop body
LE: loop exit
PB: predicated region body
PF: predicated region fallthrough
CT: control target
= control target key end

     0   :  { %v279_v1 = vmov 0   ;;  %vm97_vm0 = vcmask 523264   ;;  %v186_v11 = vlaneseq  ;;  %s345_s1 = inlined_call_operand.vmem [shape: bf16[64,256], index: 1, kind: input, shape index: {}]   ;;  %s346_s0 = inlined_call_operand.vmem [shape: bf16[32,64], index: 0, kind: input, shape index: {}]   ;;  %s347_s2 = inlined_call_operand.vmem [shape: f32[1,256], index: 2, kind: input, shape index: {}]   ;;  %s348_s3 = inlined_call_operand.vmem [shape: bf16[32,256], index: 3, kind: output, shape index: {}]  }
   0x1   :  { %v265_v0 = vld [vmem:[%s345_s1 + $0x34] ss:$8 sps:$4 sm:$0xff]   ;;  %136 = vmatprep.mubr.bf16.mxu0 %v279_v1  ;;  %146 = vmatprep.mubr.bf16.mxu1 %v279_v1  ;;  %v267_v2 = vld [vmem:[%s345_s1 + $0x30] ss:$8 sps:$4 sm:$0xff]   ;;  %v268_v3 = vld [vmem:[%s345_s1 + $0x24] ss:$8 sps:$4 sm:$0xff]  }
   0x2   :  { %112 = vmatprep.subr.bf16.mxu0 %v265_v0  ;;  %256 = vmatprep.subr.bf16.mxu1 %v265_v0  ;;  %v270_v4 = vld [vmem:[%s345_s1 + $0x20] ss:$8 sps:$4 sm:$0xff]   ;;  %v271_v5 = vld [vmem:[%s345_s1 + $0x14] ss:$8 sps:$4 sm:$0xff]   ;;  %v273_v6 = vld [vmem:[%s345_s1 + $0x10] ss:$8 sps:$4 sm:$0xff]  }
   0x3   :  { %113 = vmatpush1.bf16.msra.mxu0 %v267_v2  ;;  %260 = vmatpush1.bf16.msra.mxu1 %v267_v2  ;;  %v274_v7 = vld [vmem:[%s345_s1 + $0x4] ss:$8 sps:$4 sm:$0xff]   ;;  %v276_v8 = vld [vmem:[%s345_s1] ss:$8 sps:$4 sm:$0xff]   ;;  %v187_v12 = vshrl.u32 %v186_v11, 7 }
   0x4   :  { %114 = vmatprep.subr.bf16.mxu0 %v268_v3  ;;  %257 = vmatprep.subr.bf16.mxu1 %v268_v3  ;;  %v277_v9 = vld [vmem:[%s346_s0] sm:$0xff]   ;;  %v278_v10 = vld [vmem:[%s346_s0 + $0x8] sm:$0xff]  }
   0x5   :  { %v188_v13 = vsub.s32 0, %v187_v12  ;;  %v192_v14 = vsub.s32 1, %v187_v12  ;;  %v184_v15 = vld [vmem:[%s347_s2] sm:$0x3] }
   0x7   :  { %115 = vmatpush1.bf16.msra.mxu0 %v270_v4  ;;  %261 = vmatpush1.bf16.msra.mxu1 %v270_v4  ;;  %v189_v16 = vrot.slane %v184_v15, %v188_v13  ;;  %v193_v17 = vrot.slane %v184_v15, %v192_v14 }
   0x8   :  { %116 = vmatprep.subr.bf16.mxu0 %v271_v5  ;;  %258 = vmatprep.subr.bf16.mxu1 %v271_v5 }
   0xb   :  { %117 = vmatpush1.bf16.msra.mxu0 %v273_v6  ;;  %262 = vmatpush1.bf16.msra.mxu1 %v273_v6 }
   0xc   :  { %118 = vmatprep.subr.bf16.mxu0 %v274_v7  ;;  %259 = vmatprep.subr.bf16.mxu1 %v274_v7 }
   0xf   :  { %119 = vmatpush1.bf16.msra.mxu0 %v276_v8  ;;  %263 = vmatpush1.bf16.msra.mxu1 %v276_v8 }
  0x12   :  { %246 = vmatmul.mubr.msk.bf16.vlgmr.msra.gmra.mxu0 %vm97_vm0, %v277_v9  ;;  %247 = vmatmul.mubr.msk.bf16.vlgmr.msra.gmra.mxu1 %vm97_vm0, %v278_v10 }
  0xd2   :  { %v138_v18 = vpop.f32.mrf.mxu0  ;;  %v148_v19 = vpop.f32.mrf.mxu1 }
  0xd3   :  { %v196_v22 = vadd.f32 %v189_v16, %v138_v18  ;;  %v200_v23 = vadd.f32 %v189_v16, %v148_v19 }
  0xd4   :  { %v140_v20 = vpop.f32.mrf.mxu0  ;;  %v150_v21 = vpop.f32.mrf.mxu1 }
  0xd5   :  { %v197_v24 = vadd.f32 %v193_v17, %v140_v20  ;;  %v201_v25 = vadd.f32 %v193_v17, %v150_v21 }
  0xd6   :  { %v142_v26 = vpop.f32.mrf.mxu0  ;;  %v152_v27 = vpop.f32.mrf.mxu1 }
  0xd7   :  { %v252_v28 = vpack.c.bf16 %v197_v24, %v196_v22  ;;  %v254_v29 = vpack.c.bf16 %v201_v25, %v200_v23  ;;  %v198_v32 = vadd.f32 %v189_v16, %v142_v26  ;;  %v202_v33 = vadd.f32 %v189_v16, %v152_v27 }
  0xd8   :  { %v144_v30 = vpop.f32.mrf.mxu0  ;;  %v154_v31 = vpop.f32.mrf.mxu1 }
  0xd9   :  { %228 = vst [vmem:[%s348_s3] sm:$0xff] %v252_v28  ;;  %230 = vst [vmem:[%s348_s3 + $0x10] sm:$0xff] %v254_v29  ;;  %v199_v34 = vadd.f32 %v193_v17, %v144_v30  ;;  %v203_v35 = vadd.f32 %v193_v17, %v154_v31 }
  0xdb   :  { %v253_v36 = vpack.c.bf16 %v199_v34, %v198_v32  ;;  %v255_v37 = vpack.c.bf16 %v203_v35, %v202_v33 }
  0xdd   :  { %229 = vst [vmem:[%s348_s3 + $0x8] sm:$0xff] %v253_v36  ;;  %231 = vst [vmem:[%s348_s3 + $0x18] sm:$0xff] %v255_v37 }

// kernel: depth_aware_resnet_forward.27
= control target key start
LH: loop header
LB: loop body
LE: loop exit
PB: predicated region body
PF: predicated region fallthrough
CT: control target
= control target key end

     0   :  { %v310_v1 = vmov 0   ;;  %vm100_vm0 = vcmask 523264   ;;  %v189_v11 = vlaneseq  ;;  %s393_s1 = inlined_call_operand.vmem [shape: bf16[64,256], index: 1, kind: input, shape index: {}]   ;;  %s394_s0 = inlined_call_operand.vmem [shape: bf16[32,64], index: 0, kind: input, shape index: {}]   ;;  %s395_s2 = inlined_call_operand.vmem [shape: f32[1,256], index: 2, kind: input, shape index: {}]   ;;  %s396_s3 = inlined_call_operand.vmem [shape: bf16[32,256], index: 3, kind: input, shape index: {}]   ;;  %s397_s4 = inlined_call_operand.vmem [shape: bf16[32,256], index: 4, kind: output, shape index: {}]  }
   0x1   :  { %v296_v0 = vld [vmem:[%s393_s1 + $0x34] ss:$8 sps:$4 sm:$0xff]   ;;  %139 = vmatprep.mubr.bf16.mxu0 %v310_v1  ;;  %149 = vmatprep.mubr.bf16.mxu1 %v310_v1  ;;  %v298_v2 = vld [vmem:[%s393_s1 + $0x30] ss:$8 sps:$4 sm:$0xff]   ;;  %v299_v3 = vld [vmem:[%s393_s1 + $0x24] ss:$8 sps:$4 sm:$0xff]  }
   0x2   :  { %115 = vmatprep.subr.bf16.mxu0 %v296_v0  ;;  %287 = vmatprep.subr.bf16.mxu1 %v296_v0  ;;  %v301_v4 = vld [vmem:[%s393_s1 + $0x20] ss:$8 sps:$4 sm:$0xff]   ;;  %v302_v5 = vld [vmem:[%s393_s1 + $0x14] ss:$8 sps:$4 sm:$0xff]   ;;  %v304_v6 = vld [vmem:[%s393_s1 + $0x10] ss:$8 sps:$4 sm:$0xff]  }
   0x3   :  { %116 = vmatpush1.bf16.msra.mxu0 %v298_v2  ;;  %291 = vmatpush1.bf16.msra.mxu1 %v298_v2  ;;  %v305_v7 = vld [vmem:[%s393_s1 + $0x4] ss:$8 sps:$4 sm:$0xff]   ;;  %v307_v8 = vld [vmem:[%s393_s1] ss:$8 sps:$4 sm:$0xff]   ;;  %v190_v12 = vshrl.u32 %v189_v11, 7  ;;  %v209_v17 = vld [vmem:[%s396_s3 + $0x10] sm:$0xff] }
   0x4   :  { %117 = vmatprep.subr.bf16.mxu0 %v299_v3  ;;  %288 = vmatprep.subr.bf16.mxu1 %v299_v3  ;;  %v308_v9 = vld [vmem:[%s394_s0] sm:$0xff]   ;;  %v309_v10 = vld [vmem:[%s394_s0 + $0x8] sm:$0xff]   ;;  %v215_v20 = vunpack.c.l.bf16 %v209_v17  ;;  %v216_v27 = vunpack.c.h.bf16 %v209_v17  ;;  %v210_v29 = vld [vmem:[%s396_s3 + $0x18] sm:$0xff] }
   0x5   :  { %v191_v13 = vsub.s32 0, %v190_v12  ;;  %v187_v14 = vld [vmem:[%s395_s2] sm:$0x3]  ;;  %v195_v15 = vsub.s32 1, %v190_v12  ;;  %v208_v28 = vld [vmem:[%s396_s3 + $0x8] sm:$0xff]  ;;  %v217_v39 = vunpack.c.l.bf16 %v210_v29  ;;  %v218_v43 = vunpack.c.h.bf16 %v210_v29 }
   0x6   :  { %v207_v16 = vld [vmem:[%s396_s3] sm:$0xff]  ;;  %v213_v37 = vunpack.c.l.bf16 %v208_v28  ;;  %v214_v42 = vunpack.c.h.bf16 %v208_v28 }
   0x7   :  { %118 = vmatpush1.bf16.msra.mxu0 %v301_v4  ;;  %292 = vmatpush1.bf16.msra.mxu1 %v301_v4  ;;  %v192_v18 = vrot.slane %v187_v14, %v191_v13  ;;  %v211_v19 = vunpack.c.l.bf16 %v207_v16  ;;  %v196_v21 = vrot.slane %v187_v14, %v195_v15  ;;  %v212_v26 = vunpack.c.h.bf16 %v207_v16 }
   0x8   :  { %119 = vmatprep.subr.bf16.mxu0 %v302_v5  ;;  %289 = vmatprep.subr.bf16.mxu1 %v302_v5 }
   0xb   :  { %120 = vmatpush1.bf16.msra.mxu0 %v304_v6  ;;  %293 = vmatpush1.bf16.msra.mxu1 %v304_v6 }
   0xc   :  { %121 = vmatprep.subr.bf16.mxu0 %v305_v7  ;;  %290 = vmatprep.subr.bf16.mxu1 %v305_v7 }
   0xf   :  { %122 = vmatpush1.bf16.msra.mxu0 %v307_v8  ;;  %294 = vmatpush1.bf16.msra.mxu1 %v307_v8 }
  0x12   :  { %277 = vmatmul.mubr.msk.bf16.vlgmr.msra.gmra.mxu0 %vm100_vm0, %v308_v9  ;;  %278 = vmatmul.mubr.msk.bf16.vlgmr.msra.gmra.mxu1 %vm100_vm0, %v309_v10 }
  0xd2   :  { %v141_v22 = vpop.f32.mrf.mxu0  ;;  %v151_v23 = vpop.f32.mrf.mxu1 }
  0xd3   :  { %v199_v24 = vadd.f32 %v192_v18, %v141_v22  ;;  %v203_v25 = vadd.f32 %v192_v18, %v151_v23 }
  0xd4   :  { %v143_v30 = vpop.f32.mrf.mxu0  ;;  %v153_v31 = vpop.f32.mrf.mxu1 }
  0xd5   :  { %v219_v32 = vadd.f32 %v211_v19, %v199_v24  ;;  %v223_v33 = vadd.f32 %v215_v20, %v203_v25  ;;  %v200_v34 = vadd.f32 %v196_v21, %v143_v30  ;;  %v204_v35 = vadd.f32 %v196_v21, %v153_v31 }
  0xd6   :  { %v145_v36 = vpop.f32.mrf.mxu0  ;;  %v155_v38 = vpop.f32.mrf.mxu1 }
  0xd7   :  { %v220_v40 = vadd.f32 %v212_v26, %v200_v34  ;;  %v224_v41 = vadd.f32 %v216_v27, %v204_v35  ;;  %v227_v44 = vmax.f32 %v219_v32, 0.0  ;;  %v231_v45 = vmax.f32 %v223_v33, 0.0 }
  0xd8   :  { %v201_v46 = vadd.f32 %v192_v18, %v145_v36  ;;  %v205_v47 = vadd.f32 %v192_v18, %v155_v38  ;;  %v147_v48 = vpop.f32.mrf.mxu0  ;;  %v157_v49 = vpop.f32.mrf.mxu1 }
  0xd9   :  { %v228_v50 = vmax.f32 %v220_v40, 0.0  ;;  %v232_v51 = vmax.f32 %v224_v41, 0.0  ;;  %v202_v52 = vadd.f32 %v196_v21, %v147_v48  ;;  %v206_v53 = vadd.f32 %v196_v21, %v157_v49 }
  0xda   :  { %v221_v54 = vadd.f32 %v213_v37, %v201_v46  ;;  %v225_v55 = vadd.f32 %v217_v39, %v205_v47 }
  0xdb   :  { %v283_v56 = vpack.c.bf16 %v228_v50, %v227_v44  ;;  %v285_v57 = vpack.c.bf16 %v232_v51, %v231_v45  ;;  %v222_v58 = vadd.f32 %v214_v42, %v202_v52  ;;  %v226_v59 = vadd.f32 %v218_v43, %v206_v53 }
  0xdc   :  { %v229_v60 = vmax.f32 %v221_v54, 0.0  ;;  %v233_v61 = vmax.f32 %v225_v55, 0.0 }
  0xdd   :  { %259 = vst [vmem:[%s397_s4] sm:$0xff] %v283_v56  ;;  %261 = vst [vmem:[%s397_s4 + $0x10] sm:$0xff] %v285_v57  ;;  %v230_v62 = vmax.f32 %v222_v58, 0.0  ;;  %v234_v63 = vmax.f32 %v226_v59, 0.0 }
  0xdf   :  { %v284_v0 = vpack.c.bf16 %v230_v62, %v229_v60  ;;  %v286_v1 = vpack.c.bf16 %v234_v63, %v233_v61 }
  0xe1   :  { %260 = vst [vmem:[%s397_s4 + $0x8] sm:$0xff] %v284_v0  ;;  %262 = vst [vmem:[%s397_s4 + $0x18] sm:$0xff] %v286_v1 }

// kernel: depth_aware_resnet_forward.28
= control target key start
LH: loop header
LB: loop body
LE: loop exit
PB: predicated region body
PF: predicated region fallthrough
CT: control target
= control target key end

     0   :  { %s477_s1 = inlined_call_operand.vmem [shape: bf16[256,128], index: 1, kind: input, shape index: {}]   ;;  %s478_s0 = inlined_call_operand.vmem [shape: bf16[32,256], index: 0, kind: input, shape index: {}]   ;;  %s479_s2 = inlined_call_operand.vmem [shape: f32[1,128], index: 2, kind: input, shape index: {}]   ;;  %s480_s3 = inlined_call_operand.vmem [shape: bf16[32,128], index: 3, kind: output, shape index: {}]  }
   0x1   :  { %v366_v0 = vld [vmem:[%s477_s1 + $0x78] sm:$0xff]   ;;  %v368_v2 = vld [vmem:[%s477_s1 + $0x70] sm:$0xff]   ;;  %v370_v4 = vld [vmem:[%s477_s1 + $0x68] sm:$0xff]  }
   0x2   :  { %v367_v1 = vld [vmem:[%s477_s1 + $0x38] sm:$0xff]   ;;  %322 = vmatprep.subr.bf16.mxu0 %v366_v0  ;;  %350 = vmatprep.subr.bf16.mxu1 %v366_v0  ;;  %v369_v3 = vld [vmem:[%s477_s1 + $0x30] sm:$0xff]   ;;  %v371_v5 = vld [vmem:[%s477_s1 + $0x28] sm:$0xff]  }
   0x3   :  { %323 = vmatpush3.bf16.msra.mxu0 %v367_v1  ;;  %358 = vmatpush3.bf16.msra.mxu1 %v367_v1  ;;  %v372_v6 = vld [vmem:[%s477_s1 + $0x60] sm:$0xff]   ;;  %v374_v8 = vld [vmem:[%s477_s1 + $0x58] sm:$0xff]   ;;  %v376_v10 = vld [vmem:[%s477_s1 + $0x50] sm:$0xff]  }
   0x4   :  { %324 = vmatprep.subr.bf16.mxu0 %v368_v2  ;;  %351 = vmatprep.subr.bf16.mxu1 %v368_v2  ;;  %v373_v7 = vld [vmem:[%s477_s1 + $0x20] sm:$0xff]   ;;  %v375_v9 = vld [vmem:[%s477_s1 + $0x18] sm:$0xff]   ;;  %v377_v13 = vld [vmem:[%s477_s1 + $0x10] sm:$0xff]  }
   0x5   :  { %v384_v11 = vld [vmem:[%s478_s0 + $0x4] ss:$8 sps:$4 sm:$0xff]   ;;  %v387_v12 = vld [vmem:[%s478_s0 + $0x14] ss:$8 sps:$4 sm:$0xff]   ;;  %v382_v18 = vld [vmem:[%s478_s0] ss:$8 sps:$4 sm:$0xff]  }
   0x6   :  { %v378_v14 = vld [vmem:[%s477_s1 + $0x48] sm:$0xff]   ;;  %211 = vmatprep.mubr.bf16.mxu0 %v384_v11  ;;  %219 = vmatprep.mubr.bf16.mxu1 %v387_v12  ;;  %v380_v16 = vld [vmem:[%s477_s1 + $0x40] sm:$0xff]   ;;  %v385_v19 = vld [vmem:[%s478_s0 + $0x10] ss:$8 sps:$4 sm:$0xff]  }
   0x7   :  { %325 = vmatpush3.bf16.msra.mxu0 %v369_v3  ;;  %359 = vmatpush3.bf16.msra.mxu1 %v369_v3  ;;  %v379_v15 = vld [vmem:[%s477_s1 + $0x8] sm:$0xff]   ;;  %v381_v17 = vld [vmem:[%s477_s1] sm:$0xff]  }
   0x8   :  { %326 = vmatprep.subr.bf16.mxu0 %v370_v4  ;;  %352 = vmatprep.subr.bf16.mxu1 %v370_v4  ;;  %v302_v26 = vld [vmem:[%s479_s2] ss:$0 sm:$0xff] }
   0xb   :  { %327 = vmatpush3.bf16.msra.mxu0 %v371_v5  ;;  %360 = vmatpush3.bf16.msra.mxu1 %v371_v5 }
   0xc   :  { %328 = vmatprep.subr.bf16.mxu0 %v372_v6  ;;  %353 = vmatprep.subr.bf16.mxu1 %v372_v6 }
   0xf   :  { %329 = vmatpush3.bf16.msra.mxu0 %v373_v7  ;;  %361 = vmatpush3.bf16.msra.mxu1 %v373_v7 }
  0x10   :  { %330 = vmatprep.subr.bf16.mxu0 %v374_v8  ;;  %354 = vmatprep.subr.bf16.mxu1 %v374_v8 }
  0x13   :  { %331 = vmatpush3.bf16.msra.mxu0 %v375_v9  ;;  %362 = vmatpush3.bf16.msra.mxu1 %v375_v9 }
  0x14   :  { %332 = vmatprep.subr.bf16.mxu0 %v376_v10  ;;  %355 = vmatprep.subr.bf16.mxu1 %v376_v10 }
  0x17   :  { %333 = vmatpush3.bf16.msra.mxu0 %v377_v13  ;;  %363 = vmatpush3.bf16.msra.mxu1 %v377_v13 }
  0x18   :  { %334 = vmatprep.subr.bf16.mxu0 %v378_v14  ;;  %356 = vmatprep.subr.bf16.mxu1 %v378_v14 }
  0x1b   :  { %335 = vmatpush3.bf16.msra.mxu0 %v379_v15  ;;  %364 = vmatpush3.bf16.msra.mxu1 %v379_v15 }
  0x1c   :  { %336 = vmatprep.subr.bf16.mxu0 %v380_v16  ;;  %357 = vmatprep.subr.bf16.mxu1 %v380_v16 }
  0x1f   :  { %337 = vmatpush3.bf16.msra.mxu0 %v381_v17  ;;  %365 = vmatpush3.bf16.msra.mxu1 %v381_v17 }
  0x22   :  { %212 = vmatmul.mubr.bf16.vlgmr.msra.gmra.mxu0 %v382_v18  ;;  %220 = vmatmul.mubr.bf16.vlgmr.msra.gmra.mxu1 %v385_v19 }
  0xe2   :  { %v338_v20 = vpop.f32.mrf.mxu0  ;;  %v344_v21 = vpop.f32.mrf.mxu1 }
  0xe4   :  { %v339_v22 = vpop.f32.mrf.mxu0  ;;  %v345_v23 = vpop.f32.mrf.mxu1 }
  0xe5   :  { %v340_v24 = vadd.f32 %v339_v22, %v338_v20  ;;  %v346_v25 = vadd.f32 %v345_v23, %v344_v21 }
  0xe6   :  { %v341_v27 = vpop.f32.mrf.mxu0  ;;  %v347_v28 = vpop.f32.mrf.mxu1 }
  0xe7   :  { %v250_v31 = vadd.f32 %v340_v24, %v302_v26  ;;  %v252_v32 = vadd.f32 %v346_v25, %v302_v26 }
  0xe8   :  { %v342_v29 = vpop.f32.mrf.mxu0  ;;  %v348_v30 = vpop.f32.mrf.mxu1 }
  0xe9   :  { %v343_v33 = vadd.f32 %v342_v29, %v341_v27  ;;  %v349_v34 = vadd.f32 %v348_v30, %v347_v28  ;;  %v254_v37 = vmax.f32 %v250_v31, 0.0  ;;  %v256_v38 = vmax.f32 %v252_v32, 0.0 }
  0xeb   :  { %v251_v35 = vadd.f32 %v343_v33, %v302_v26  ;;  %v253_v36 = vadd.f32 %v349_v34, %v302_v26 }
  0xed   :  { %v255_v39 = vmax.f32 %v251_v35, 0.0  ;;  %v257_v40 = vmax.f32 %v253_v36, 0.0 }
  0xef   :  { %v314_v41 = vpack.c.bf16 %v255_v39, %v254_v37  ;;  %v319_v42 = vpack.c.bf16 %v257_v40, %v256_v38 }
  0xf1   :  { %315 = vst [vmem:[%s480_s3] sm:$0xff] %v314_v41   ;;  %321 = vst [vmem:[%s480_s3 + $0x8] sm:$0xff] %v319_v42  }

// kernel: depth_aware_resnet_forward.29
= control target key start
LH: loop header
LB: loop body
LE: loop exit
PB: predicated region body
PF: predicated region fallthrough
CT: control target
= control target key end

     0   :  { %s866_s12 = smov 0   ;;  %s868_s13 = smov 0   ;;  %s941_s0 = inlined_call_operand.vmem [shape: bf16[8,1152], index: 0, kind: input, shape index: {}]   ;;  %s942_s1 = inlined_call_operand.vmem [shape: bf16[1152,128], index: 1, kind: input, shape index: {}]   ;;  %s943_s2 = inlined_call_operand.vmem [shape: f32[1,128], index: 2, kind: input, shape index: {}]   ;;  %s944_s3 = inlined_call_operand.vmem [shape: bf16[8,128], index: 3, kind: output, shape index: {}]  }
   0x1   :  { %s870_s14 = smov 0  }
   0x2 LB: > { %s25_s15 = sadd.s32 1, %s837_s13  ;;  %p678_p0 = scmp.ge.s32.totalorder %s841_s14, 1  ;;  %s841_s14 = sphi %s870_s14, %s13_s14   ;;  %s837_s13 = sphi %s868_s13, %s946_s13   ;;  %s833_s12 = sphi %s866_s12, %s945_s12  }
   0x3   : > { %p26_p1 = scmp.ge.s32.totalorder %s25_s15, 3  ;;  %p189_p2 = scmp.lt.s32.totalorder %s841_s14, 4 }
   0x5   : > { %s948_s15 = smov (%p26_p1, %s25_s15), 0  ;;  %p190_p3 = pnand %p678_p0, %p189_p2 }
   0x6   : > { %s230_s16 = smul.u32 (!%p190_p3), 3, %s833_s12  ;;  %p681_p6 = scmp.ne.s32.totalorder (!%p190_p3), %s833_s12, 0 }
   0x7   : > { %193 = sbr.rel (%p190_p3) target bundleno = 272 (0x110), region = 32 }
   0x8   : > { %s240_s17 = smul.u32 (!%p190_p3), 48, %s833_s12  ;;  %p233_p4 = scmp.lt.s32.totalorder (!%p190_p3), %s230_s16, 8 }
   0xa   : > { %p241_p5 = scmp.lt.s32.totalorder (!%p190_p3), %s240_s17, 143 }
   0xc   : > { %s950_s16 = smov (!%p233_p4, %s230_s16), 8  ;;  %s952_s17 = smov (!%p241_p5, %s240_s17), 143 }
   0xd   : > { %s679_s18 = sshll.u32 %s950_s16, 2  ;;  %s680_s22 = sshll.u32 %s952_s17, 2 }
   0xe   : > { %s891_s21 = scalar_lea.vmem %s941_s0, %s679_s18  ;;  %s896_s25 = scalar_lea.vmem %s942_s1, %s680_s22 }
   0xf   : > { %263 = sbr.rel (%p681_p6) target bundleno = 22 (0x16), region = 36 }
  0x14   : > { %v843_v0 = vmov 0.0  }
  0x15   : > { %264 = vst [vmem:[#allocation2] sm:$0xff] %v843_v0 }
  0x16 PF: > { %v792_v1 = vld [vmem:[%s896_s25 + $0x78] sm:$0xff]   ;;  %v844_v2 = vmov 0.0   ;;  %vm845_vm0 = vmmov 0   ;;  %v795_v5 = vld [vmem:[%s896_s25 + $0x70] sm:$0xff]   ;;  %v798_v8 = vld [vmem:[%s896_s25 + $0x68] sm:$0xff]   ;;  %p709_p7 = scmp.ne.s32.totalorder %s833_s12, 2 }
  0x17   : > { %745 = vmatprep.subr.bf16.mxu1 %v844_v2  ;;  %v793_v3 = vld [vmem:[%s896_s25 + $0xb8] sm:$0xff]   ;;  %714 = vmatprep.subr.bf16.mxu0 %v792_v1  ;;  %v796_v6 = vld [vmem:[%s896_s25 + $0xb0] sm:$0xff]   ;;  %v799_v9 = vld [vmem:[%s896_s25 + $0xa8] sm:$0xff]  }
  0x18   : > { %v794_v4 = vld [vmem:[%s896_s25 + $0x38] sm:$0xff]   ;;  %761 = vmatprep.mubr.msk.bf16.mxu1 %vm845_vm0, %v844_v2  ;;  %746 = vmatpush3.bf16.msra.mxu1 %v793_v3  ;;  %v797_v7 = vld [vmem:[%s896_s25 + $0x30] sm:$0xff]   ;;  %v800_v10 = vld [vmem:[%s896_s25 + $0x28] sm:$0xff]  }
  0x19   : > { %715 = vmatpush3.bf16.msra.mxu0 %v794_v4  ;;  %747 = vmatprep.subr.bf16.mxu1 %v844_v2  ;;  %v801_v11 = vld [vmem:[%s896_s25 + $0x60] sm:$0xff]   ;;  %v804_v14 = vld [vmem:[%s896_s25 + $0x58] sm:$0xff]   ;;  %v807_v17 = vld [vmem:[%s896_s25 + $0x50] sm:$0xff]  }
  0x1a   : > { %716 = vmatprep.subr.bf16.mxu0 %v795_v5  ;;  %v802_v12 = vld [vmem:[%s896_s25 + $0xa0] sm:$0xff]   ;;  %v805_v15 = vld [vmem:[%s896_s25 + $0x98] sm:$0xff]   ;;  %v808_v18 = vld [vmem:[%s896_s25 + $0x90] sm:$0xff]  }
  0x1b   : > { %v803_v13 = vld [vmem:[%s896_s25 + $0x20] sm:$0xff]   ;;  %v806_v16 = vld [vmem:[%s896_s25 + $0x18] sm:$0xff]   ;;  %v809_v19 = vld [vmem:[%s896_s25 + $0x10] sm:$0xff]  }
  0x1c   : > { %748 = vmatpush3.bf16.msra.mxu1 %v796_v6  ;;  %v810_v20 = vld [vmem:[%s896_s25 + $0x48] sm:$0xff]   ;;  %v266_v23 = vld [vmem:[%s891_s21] sm:$0xff] }
  0x1d   : > { %717 = vmatpush3.bf16.msra.mxu0 %v797_v7  ;;  %749 = vmatprep.subr.bf16.mxu1 %v844_v2  ;;  %v811_v21 = vld [vmem:[%s896_s25 + $0x88] sm:$0xff]   ;;  %v813_v24 = vld [vmem:[%s896_s25 + $0x40] sm:$0xff]   ;;  %v683_v25 = vcombine.high %v266_v23, %v266_v23  ;;  %v682_v29 = vcombine.low %v266_v23, %v266_v23 }
  0x1e   : > { %718 = vmatprep.subr.bf16.mxu0 %v798_v8  ;;  %v812_v22 = vld [vmem:[%s896_s25 + $0x8] sm:$0xff]   ;;  %v814_v26 = vld [vmem:[%s896_s25 + $0x80] sm:$0xff]  }
  0x1f   : > { %503 = vmatprep.mubr.bf16.mxu0 %v683_v25  ;;  %v815_v27 = vld [vmem:[%s896_s25] sm:$0xff]   ;;  %v818_v28 = vld [vmem:[%s891_s21 + $0x8] ss:$0 sps:$4 sm:$0xff]  }
  0x20   : > { %750 = vmatpush3.bf16.msra.mxu1 %v799_v9  ;;  %v265_v36 = vld [vmem:[#allocation2] sm:$0xff] }
  0x21   : > { %719 = vmatpush3.bf16.msra.mxu0 %v800_v10  ;;  %751 = vmatprep.subr.bf16.mxu1 %v844_v2 }
  0x22   : > { %720 = vmatprep.subr.bf16.mxu0 %v801_v11 }
  0x24   : > { %752 = vmatpush3.bf16.msra.mxu1 %v802_v12 }
  0x25   : > { %721 = vmatpush3.bf16.msra.mxu0 %v803_v13  ;;  %753 = vmatprep.subr.bf16.mxu1 %v844_v2 }
  0x26   : > { %722 = vmatprep.subr.bf16.mxu0 %v804_v14 }
  0x28   : > { %754 = vmatpush3.bf16.msra.mxu1 %v805_v15 }
  0x29   : > { %723 = vmatpush3.bf16.msra.mxu0 %v806_v16  ;;  %755 = vmatprep.subr.bf16.mxu1 %v844_v2 }
  0x2a   : > { %724 = vmatprep.subr.bf16.mxu0 %v807_v17 }
  0x2c   : > { %756 = vmatpush3.bf16.msra.mxu1 %v808_v18 }
  0x2d   : > { %725 = vmatpush3.bf16.msra.mxu0 %v809_v19  ;;  %757 = vmatprep.subr.bf16.mxu1 %v844_v2 }
  0x2e   : > { %726 = vmatprep.subr.bf16.mxu0 %v810_v20 }
  0x30   : > { %758 = vmatpush3.bf16.msra.mxu1 %v811_v21 }
  0x31   : > { %727 = vmatpush3.bf16.msra.mxu0 %v812_v22  ;;  %759 = vmatprep.subr.bf16.mxu1 %v844_v2 }
  0x32   : > { %728 = vmatprep.subr.bf16.mxu0 %v813_v24 }
  0x34   : > { %760 = vmatpush3.bf16.msra.mxu1 %v814_v26 }
  0x35   : > { %729 = vmatpush3.bf16.msra.mxu0 %v815_v27 }
  0x37   : > { %762 = vmatmul.mubr.bf16.vlgmr.msra.gmra.mxu1 %v818_v28 }
  0x38   : > { %504 = vmatmul.mubr.bf16.vlgmr.msra.gmra.mxu0 %v682_v29 }
  0xf7   : > { %v545_v30 = vpop.f32.mrf.mxu1 }
  0xf8   : > { %v730_v31 = vpop.f32.mrf.mxu0 }
  0xf9   : > { %v763_v32 = vpop.f32.mrf.mxu1 }
  0xfa   : > { %v731_v33 = vpop.f32.mrf.mxu0 }
  0xfb   : > { %v732_v34 = vadd.f32 %v731_v33, %v730_v31  ;;  %v548_v35 = vpop.f32.mrf.mxu1 }
  0xfc   : > { %v733_v37 = vpop.f32.mrf.mxu0 }
  0xfd   : > { %v546_v38 = vadd.f32 %v732_v34, %v545_v30  ;;  %v764_v39 = vpop.f32.mrf.mxu1  ;;  %556 = sbr.rel (%p709_p7) target bundleno = 272 (0x110), region = 40 }
  0xfe   : > { %v734_v40 = vpop.f32.mrf.mxu0 }
  0xff   : > { %v551_v41 = vadd.f32 %v546_v38, %v265_v36 }
 0x101   : > { %552 = vst [vmem:[#allocation2] sm:$0xff] %v551_v41 }
 0x102   : > { %v710_v43 = vld [vmem:[%s943_s2] ss:$0 sm:$0xff] }
 0x108   : > { %v557_v42 = vld [vmem:[#allocation2] sm:$0xff] }
 0x109   : > { %v565_v44 = vadd.f32 %v710_v43, %v557_v42 }
 0x10b   : > { %v566_v45 = vmax.f32 %v565_v44, 0.0 }
 0x10d   : > { %v567_v46 = vpack.c.bf16 %v566_v45, %v566_v45 }
 0x10f   : > { %568 = vst [vmem:[%s944_s3] sm:$0xf] %v567_v46 }
 0x110 PF: > { %s13_s14 = sadd.s32 1, %s841_s14   ;;  %s945_s12 = smov %s837_s13 }
 0x111   : > { %p10_p8 = scmp.ge.s32.totalorder %s13_s14, 5   ;;  %s946_s13 = smov %s948_s15 }
 0x113   :  { %12 = sbr.rel (!%p10_p8) target bundleno = 2 (0x2), region = 76 }

// kernel: depth_aware_resnet_forward.30
= control target key start
LH: loop header
LB: loop body
LE: loop exit
PB: predicated region body
PF: predicated region fallthrough
CT: control target
= control target key end

     0   :  { %s955_s1 = inlined_call_operand.vmem [shape: bf16[256,512], index: 1, kind: input, shape index: {}]   ;;  %s956_s0 = inlined_call_operand.vmem [shape: bf16[8,256], index: 0, kind: input, shape index: {}]   ;;  %s957_s2 = inlined_call_operand.vmem [shape: f32[1,512], index: 2, kind: input, shape index: {}]   ;;  %s958_s3 = inlined_call_operand.vmem [shape: bf16[8,512], index: 3, kind: output, shape index: {}]  }
   0x1   :  { %v633_v0 = vld [vmem:[%s955_s1 + $0xe4] ss:$16 sps:$4 sm:$0xff]   ;;  %v635_v1 = vld [vmem:[%s955_s1 + $0xec] ss:$16 sps:$4 sm:$0xff]   ;;  %v637_v2 = vld [vmem:[%s955_s1 + $0xe0] ss:$16 sps:$4 sm:$0xff]  }
   0x2   :  { %418 = vmatprep.subr.bf16.mxu0 %v633_v0  ;;  %v638_v3 = vld [vmem:[%s955_s1 + $0xe8] ss:$16 sps:$4 sm:$0xff]   ;;  %459 = vmatprep.subr.bf16.mxu1 %v635_v1  ;;  %v639_v4 = vld [vmem:[%s955_s1 + $0xc4] ss:$16 sps:$4 sm:$0xff]   ;;  %v641_v5 = vld [vmem:[%s955_s1 + $0xcc] ss:$16 sps:$4 sm:$0xff]  }
   0x3   :  { %419 = vmatpush1.bf16.msra.mxu0 %v637_v2  ;;  %460 = vmatpush1.bf16.msra.mxu1 %v638_v3  ;;  %v643_v6 = vld [vmem:[%s955_s1 + $0xc0] ss:$16 sps:$4 sm:$0xff]   ;;  %v644_v7 = vld [vmem:[%s955_s1 + $0xc8] ss:$16 sps:$4 sm:$0xff]   ;;  %v645_v8 = vld [vmem:[%s955_s1 + $0xa4] ss:$16 sps:$4 sm:$0xff]   ;;  %v517_v3 = vlaneseq }
   0x4   :  { %420 = vmatprep.subr.bf16.mxu0 %v639_v4  ;;  %461 = vmatprep.subr.bf16.mxu1 %v641_v5  ;;  %v647_v9 = vld [vmem:[%s955_s1 + $0xac] ss:$16 sps:$4 sm:$0xff]   ;;  %v649_v10 = vld [vmem:[%s955_s1 + $0xa0] ss:$16 sps:$4 sm:$0xff]   ;;  %v650_v11 = vld [vmem:[%s955_s1 + $0xa8] ss:$16 sps:$4 sm:$0xff]  }
   0x5   :  { %v651_v12 = vld [vmem:[%s955_s1 + $0x84] ss:$16 sps:$4 sm:$0xff]   ;;  %v653_v13 = vld [vmem:[%s955_s1 + $0x8c] ss:$16 sps:$4 sm:$0xff]   ;;  %v655_v14 = vld [vmem:[%s955_s1 + $0x80] ss:$16 sps:$4 sm:$0xff]  }
   0x6   :  { %v656_v15 = vld [vmem:[%s955_s1 + $0x88] ss:$16 sps:$4 sm:$0xff]   ;;  %v657_v16 = vld [vmem:[%s955_s1 + $0x64] ss:$16 sps:$4 sm:$0xff]   ;;  %v659_v17 = vld [vmem:[%s955_s1 + $0x6c] ss:$16 sps:$4 sm:$0xff]  }
   0x7   :  { %421 = vmatpush1.bf16.msra.mxu0 %v643_v6  ;;  %462 = vmatpush1.bf16.msra.mxu1 %v644_v7  ;;  %v661_v18 = vld [vmem:[%s955_s1 + $0x60] ss:$16 sps:$4 sm:$0xff]   ;;  %v662_v19 = vld [vmem:[%s955_s1 + $0x68] ss:$16 sps:$4 sm:$0xff]   ;;  %v663_v20 = vld [vmem:[%s955_s1 + $0x44] ss:$16 sps:$4 sm:$0xff]  }
   0x8   :  { %422 = vmatprep.subr.bf16.mxu0 %v645_v8  ;;  %463 = vmatprep.subr.bf16.mxu1 %v647_v9  ;;  %v665_v21 = vld [vmem:[%s955_s1 + $0x4c] ss:$16 sps:$4 sm:$0xff]   ;;  %v667_v22 = vld [vmem:[%s955_s1 + $0x40] ss:$16 sps:$4 sm:$0xff]   ;;  %v668_v23 = vld [vmem:[%s955_s1 + $0x48] ss:$16 sps:$4 sm:$0xff]  }
   0x9   :  { %v669_v24 = vld [vmem:[%s955_s1 + $0x24] ss:$16 sps:$4 sm:$0xff]   ;;  %v671_v25 = vld [vmem:[%s955_s1 + $0x2c] ss:$16 sps:$4 sm:$0xff]   ;;  %v673_v26 = vld [vmem:[%s955_s1 + $0x20] ss:$16 sps:$4 sm:$0xff]  }
   0xa   :  { %v674_v27 = vld [vmem:[%s955_s1 + $0x28] ss:$16 sps:$4 sm:$0xff]   ;;  %v675_v28 = vld [vmem:[%s955_s1 + $0x4] ss:$16 sps:$4 sm:$0xff]   ;;  %v677_v29 = vld [vmem:[%s955_s1 + $0xc] ss:$16 sps:$4 sm:$0xff]  }
   0xb   :  { %423 = vmatpush1.bf16.msra.mxu0 %v649_v10  ;;  %464 = vmatpush1.bf16.msra.mxu1 %v650_v11  ;;  %v679_v30 = vld [vmem:[%s955_s1] ss:$16 sps:$4 sm:$0xff]   ;;  %v680_v31 = vld [vmem:[%s955_s1 + $0x8] ss:$16 sps:$4 sm:$0xff]   ;;  %v681_v32 = vld [vmem:[%s955_s1 + $0x1e4] ss:$16 sps:$4 sm:$0xff]  }
   0xc   :  { %424 = vmatprep.subr.bf16.mxu0 %v651_v12  ;;  %465 = vmatprep.subr.bf16.mxu1 %v653_v13  ;;  %v683_v33 = vld [vmem:[%s955_s1 + $0x1ec] ss:$16 sps:$4 sm:$0xff]   ;;  %v685_v34 = vld [vmem:[%s955_s1 + $0x1e0] ss:$16 sps:$4 sm:$0xff]   ;;  %v686_v35 = vld [vmem:[%s955_s1 + $0x1e8] ss:$16 sps:$4 sm:$0xff]  }
   0xd   :  { %v687_v36 = vld [vmem:[%s955_s1 + $0x1c4] ss:$16 sps:$4 sm:$0xff]   ;;  %v689_v37 = vld [vmem:[%s955_s1 + $0x1cc] ss:$16 sps:$4 sm:$0xff]   ;;  %v691_v38 = vld [vmem:[%s955_s1 + $0x1c0] ss:$16 sps:$4 sm:$0xff]  }
   0xe   :  { %v692_v39 = vld [vmem:[%s955_s1 + $0x1c8] ss:$16 sps:$4 sm:$0xff]   ;;  %v693_v40 = vld [vmem:[%s955_s1 + $0x1a4] ss:$16 sps:$4 sm:$0xff]   ;;  %v695_v41 = vld [vmem:[%s955_s1 + $0x1ac] ss:$16 sps:$4 sm:$0xff]  }
   0xf   :  { %425 = vmatpush1.bf16.msra.mxu0 %v655_v14  ;;  %466 = vmatpush1.bf16.msra.mxu1 %v656_v15  ;;  %v697_v42 = vld [vmem:[%s955_s1 + $0x1a0] ss:$16 sps:$4 sm:$0xff]   ;;  %v698_v43 = vld [vmem:[%s955_s1 + $0x1a8] ss:$16 sps:$4 sm:$0xff]   ;;  %v699_v44 = vld [vmem:[%s955_s1 + $0x184] ss:$16 sps:$4 sm:$0xff]  }
  0x10   :  { %426 = vmatprep.subr.bf16.mxu0 %v657_v16  ;;  %467 = vmatprep.subr.bf16.mxu1 %v659_v17  ;;  %v701_v45 = vld [vmem:[%s955_s1 + $0x18c] ss:$16 sps:$4 sm:$0xff]   ;;  %v26_v46 = vld [vmem:[%s956_s0] sm:$0xff]  ;;  %v704_v49 = vld [vmem:[%s955_s1 + $0x188] ss:$16 sps:$4 sm:$0xff]   ;;  %v518_v4 = vshrl.u32 %v517_v3, 7 }
  0x11   :  { %v564_v47 = vcombine.high %v26_v46, %v26_v46  ;;  %v703_v48 = vld [vmem:[%s955_s1 + $0x180] ss:$16 sps:$4 sm:$0xff]   ;;  %v705_v50 = vld [vmem:[%s955_s1 + $0x164] ss:$16 sps:$4 sm:$0xff]   ;;  %v707_v51 = vld [vmem:[%s955_s1 + $0x16c] ss:$16 sps:$4 sm:$0xff]   ;;  %v563_v2 = vcombine.low %v26_v46, %v26_v46 }
  0x12   :  { %v709_v52 = vld [vmem:[%s955_s1 + $0x160] ss:$16 sps:$4 sm:$0xff]   ;;  %v710_v53 = vld [vmem:[%s955_s1 + $0x168] ss:$16 sps:$4 sm:$0xff]   ;;  %v711_v54 = vld [vmem:[%s955_s1 + $0x144] ss:$16 sps:$4 sm:$0xff]  }
  0x13   :  { %427 = vmatpush1.bf16.msra.mxu0 %v661_v18  ;;  %468 = vmatpush1.bf16.msra.mxu1 %v662_v19  ;;  %v713_v55 = vld [vmem:[%s955_s1 + $0x14c] ss:$16 sps:$4 sm:$0xff]   ;;  %v715_v56 = vld [vmem:[%s955_s1 + $0x140] ss:$16 sps:$4 sm:$0xff]   ;;  %v716_v57 = vld [vmem:[%s955_s1 + $0x148] ss:$16 sps:$4 sm:$0xff]  }
  0x14   :  { %428 = vmatprep.subr.bf16.mxu0 %v663_v20  ;;  %469 = vmatprep.subr.bf16.mxu1 %v665_v21  ;;  %v717_v58 = vld [vmem:[%s955_s1 + $0x124] ss:$16 sps:$4 sm:$0xff]   ;;  %v719_v59 = vld [vmem:[%s955_s1 + $0x12c] ss:$16 sps:$4 sm:$0xff]   ;;  %v721_v60 = vld [vmem:[%s955_s1 + $0x120] ss:$16 sps:$4 sm:$0xff]  }
  0x15   :  { %450 = vmatprep.mubr.bf16.mxu0 %v564_v47  ;;  %491 = vmatprep.mubr.bf16.mxu1 %v564_v47  ;;  %v722_v61 = vld [vmem:[%s955_s1 + $0x128] ss:$16 sps:$4 sm:$0xff]   ;;  %v723_v62 = vld [vmem:[%s955_s1 + $0x104] ss:$16 sps:$4 sm:$0xff]   ;;  %v725_v63 = vld [vmem:[%s955_s1 + $0x10c] ss:$16 sps:$4 sm:$0xff]  }
  0x16   :  { %v727_v0 = vld [vmem:[%s955_s1 + $0x100] ss:$16 sps:$4 sm:$0xff]   ;;  %v728_v1 = vld [vmem:[%s955_s1 + $0x108] ss:$16 sps:$4 sm:$0xff]   ;;  %v519_v5 = vsub.s32 0, %v518_v4  ;;  %v527_v6 = vsub.s32 2, %v518_v4 }
  0x17   :  { %429 = vmatpush1.bf16.msra.mxu0 %v667_v22  ;;  %470 = vmatpush1.bf16.msra.mxu1 %v668_v23  ;;  %v523_v7 = vsub.s32 1, %v518_v4  ;;  %v531_v8 = vsub.s32 3, %v518_v4  ;;  %v515_v9 = vld [vmem:[%s957_s2] sm:$0xf] }
  0x18   :  { %430 = vmatprep.subr.bf16.mxu0 %v669_v24  ;;  %471 = vmatprep.subr.bf16.mxu1 %v671_v25  ;;  %v520_v10 = vrot.slane %v515_v9, %v519_v5  ;;  %v528_v11 = vrot.slane %v515_v9, %v527_v6 }
  0x19   :  { %v524_v12 = vrot.slane %v515_v9, %v523_v7  ;;  %v532_v13 = vrot.slane %v515_v9, %v531_v8 }
  0x1b   :  { %431 = vmatpush1.bf16.msra.mxu0 %v673_v26  ;;  %472 = vmatpush1.bf16.msra.mxu1 %v674_v27 }
  0x1c   :  { %432 = vmatprep.subr.bf16.mxu0 %v675_v28  ;;  %473 = vmatprep.subr.bf16.mxu1 %v677_v29 }
  0x1f   :  { %433 = vmatpush1.bf16.msra.mxu0 %v679_v30  ;;  %474 = vmatpush1.bf16.msra.mxu1 %v680_v31 }
  0x20   :  { %434 = vmatprep.subr.bf16.mxu0 %v681_v32  ;;  %475 = vmatprep.subr.bf16.mxu1 %v683_v33 }
  0x23   :  { %435 = vmatpush2.bf16.msra.mxu0 %v685_v34  ;;  %476 = vmatpush2.bf16.msra.mxu1 %v686_v35 }
  0x24   :  { %436 = vmatprep.subr.bf16.mxu0 %v687_v36  ;;  %477 = vmatprep.subr.bf16.mxu1 %v689_v37 }
  0x27   :  { %437 = vmatpush2.bf16.msra.mxu0 %v691_v38  ;;  %478 = vmatpush2.bf16.msra.mxu1 %v692_v39 }
  0x28   :  { %438 = vmatprep.subr.bf16.mxu0 %v693_v40  ;;  %479 = vmatprep.subr.bf16.mxu1 %v695_v41 }
  0x2b   :  { %439 = vmatpush2.bf16.msra.mxu0 %v697_v42  ;;  %480 = vmatpush2.bf16.msra.mxu1 %v698_v43 }
  0x2c   :  { %440 = vmatprep.subr.bf16.mxu0 %v699_v44  ;;  %481 = vmatprep.subr.bf16.mxu1 %v701_v45 }
  0x2f   :  { %441 = vmatpush2.bf16.msra.mxu0 %v703_v48  ;;  %482 = vmatpush2.bf16.msra.mxu1 %v704_v49 }
  0x30   :  { %442 = vmatprep.subr.bf16.mxu0 %v705_v50  ;;  %483 = vmatprep.subr.bf16.mxu1 %v707_v51 }
  0x33   :  { %443 = vmatpush2.bf16.msra.mxu0 %v709_v52  ;;  %484 = vmatpush2.bf16.msra.mxu1 %v710_v53 }
  0x34   :  { %444 = vmatprep.subr.bf16.mxu0 %v711_v54  ;;  %485 = vmatprep.subr.bf16.mxu1 %v713_v55 }
  0x37   :  { %445 = vmatpush2.bf16.msra.mxu0 %v715_v56  ;;  %486 = vmatpush2.bf16.msra.mxu1 %v716_v57 }
  0x38   :  { %446 = vmatprep.subr.bf16.mxu0 %v717_v58  ;;  %487 = vmatprep.subr.bf16.mxu1 %v719_v59 }
  0x3b   :  { %447 = vmatpush2.bf16.msra.mxu0 %v721_v60  ;;  %488 = vmatpush2.bf16.msra.mxu1 %v722_v61 }
  0x3c   :  { %448 = vmatprep.subr.bf16.mxu0 %v723_v62  ;;  %489 = vmatprep.subr.bf16.mxu1 %v725_v63 }
  0x3f   :  { %449 = vmatpush2.bf16.msra.mxu0 %v727_v0  ;;  %490 = vmatpush2.bf16.msra.mxu1 %v728_v1 }
  0x42   :  { %451 = vmatmul.mubr.bf16.vlgmr.msra.gmra.mxu0 %v563_v2  ;;  %492 = vmatmul.mubr.bf16.vlgmr.msra.gmra.mxu1 %v563_v2 }
 0x102   :  { %v452_v14 = vpop.f32.mrf.mxu0  ;;  %v493_v15 = vpop.f32.mrf.mxu1 }
 0x103   :  { %v537_v18 = vadd.f32 %v520_v10, %v452_v14  ;;  %v539_v19 = vadd.f32 %v528_v11, %v493_v15 }
 0x104   :  { %v454_v16 = vpop.f32.mrf.mxu0  ;;  %v495_v17 = vpop.f32.mrf.mxu1 }
 0x105   :  { %v538_v20 = vadd.f32 %v524_v12, %v454_v16  ;;  %v540_v21 = vadd.f32 %v532_v13, %v495_v17 }
 0x106   :  { %v456_v22 = vpop.f32.mrf.mxu0  ;;  %v497_v23 = vpop.f32.mrf.mxu1 }
 0x107   :  { %v631_v24 = vpack.c.bf16 %v538_v20, %v537_v18  ;;  %v632_v25 = vpack.c.bf16 %v540_v21, %v539_v19 }
 0x108   :  { %v457_v26 = vpop.f32.mrf.mxu0  ;;  %v498_v27 = vpop.f32.mrf.mxu1 }
 0x109   :  { %557 = vst [vmem:[%s958_s3] sm:$0xff] %v631_v24  ;;  %558 = vst [vmem:[%s958_s3 + $0x8] sm:$0xff] %v632_v25 }

// kernel: depth_aware_resnet_forward.32
= control target key start
LH: loop header
LB: loop body
LE: loop exit
PB: predicated region body
PF: predicated region fallthrough
CT: control target
= control target key end

     0   :  { %s936_s1 = inlined_call_operand.vmem [shape: bf16[512,256], index: 1, kind: input, shape index: {}]   ;;  %s937_s0 = inlined_call_operand.vmem [shape: bf16[8,512], index: 0, kind: input, shape index: {}]   ;;  %s938_s2 = inlined_call_operand.vmem [shape: f32[1,256], index: 2, kind: input, shape index: {}]   ;;  %s939_s3 = inlined_call_operand.vmem [shape: bf16[8,256], index: 3, kind: output, shape index: {}]  }
   0x1   :  { %v612_v0 = vld [vmem:[%s936_s1 + $0x74] ss:$8 sps:$4 sm:$0xff]   ;;  %v616_v2 = vld [vmem:[%s936_s1 + $0x70] ss:$8 sps:$4 sm:$0xff]   ;;  %v618_v4 = vld [vmem:[%s936_s1 + $0x64] ss:$8 sps:$4 sm:$0xff]  }
   0x2   :  { %v614_v1 = vld [vmem:[%s936_s1 + $0x174] ss:$8 sps:$4 sm:$0xff]   ;;  %422 = vmatprep.subr.bf16.mxu0 %v612_v0  ;;  %v617_v3 = vld [vmem:[%s936_s1 + $0x170] ss:$8 sps:$4 sm:$0xff]   ;;  %v620_v5 = vld [vmem:[%s936_s1 + $0x164] ss:$8 sps:$4 sm:$0xff]  }
   0x3   :  { %463 = vmatprep.subr.bf16.mxu1 %v614_v1  ;;  %423 = vmatpush1.bf16.msra.mxu0 %v616_v2  ;;  %v622_v6 = vld [vmem:[%s936_s1 + $0x60] ss:$8 sps:$4 sm:$0xff]   ;;  %v624_v8 = vld [vmem:[%s936_s1 + $0x54] ss:$8 sps:$4 sm:$0xff]   ;;  %v628_v10 = vld [vmem:[%s936_s1 + $0x50] ss:$8 sps:$4 sm:$0xff]  }
   0x4   :  { %464 = vmatpush1.bf16.msra.mxu1 %v617_v3  ;;  %424 = vmatprep.subr.bf16.mxu0 %v618_v4  ;;  %v623_v7 = vld [vmem:[%s936_s1 + $0x160] ss:$8 sps:$4 sm:$0xff]   ;;  %v626_v9 = vld [vmem:[%s936_s1 + $0x154] ss:$8 sps:$4 sm:$0xff]   ;;  %v629_v11 = vld [vmem:[%s936_s1 + $0x150] ss:$8 sps:$4 sm:$0xff]  }
   0x5   :  { %465 = vmatprep.subr.bf16.mxu1 %v620_v5  ;;  %v630_v12 = vld [vmem:[%s936_s1 + $0x44] ss:$8 sps:$4 sm:$0xff]   ;;  %v634_v14 = vld [vmem:[%s936_s1 + $0x40] ss:$8 sps:$4 sm:$0xff]   ;;  %v636_v16 = vld [vmem:[%s936_s1 + $0x34] ss:$8 sps:$4 sm:$0xff]  }
   0x6   :  { %v632_v13 = vld [vmem:[%s936_s1 + $0x144] ss:$8 sps:$4 sm:$0xff]   ;;  %v635_v15 = vld [vmem:[%s936_s1 + $0x140] ss:$8 sps:$4 sm:$0xff]   ;;  %v638_v17 = vld [vmem:[%s936_s1 + $0x134] ss:$8 sps:$4 sm:$0xff]  }
   0x7   :  { %425 = vmatpush1.bf16.msra.mxu0 %v622_v6  ;;  %v640_v18 = vld [vmem:[%s936_s1 + $0x30] ss:$8 sps:$4 sm:$0xff]   ;;  %v642_v20 = vld [vmem:[%s936_s1 + $0x24] ss:$8 sps:$4 sm:$0xff]   ;;  %v646_v22 = vld [vmem:[%s936_s1 + $0x20] ss:$8 sps:$4 sm:$0xff]   ;;  %v515_v6 = vlaneseq }
   0x8   :  { %466 = vmatpush1.bf16.msra.mxu1 %v623_v7  ;;  %426 = vmatprep.subr.bf16.mxu0 %v624_v8  ;;  %v641_v19 = vld [vmem:[%s936_s1 + $0x130] ss:$8 sps:$4 sm:$0xff]   ;;  %v644_v21 = vld [vmem:[%s936_s1 + $0x124] ss:$8 sps:$4 sm:$0xff]   ;;  %v647_v23 = vld [vmem:[%s936_s1 + $0x120] ss:$8 sps:$4 sm:$0xff]  }
   0x9   :  { %467 = vmatprep.subr.bf16.mxu1 %v626_v9  ;;  %v648_v24 = vld [vmem:[%s936_s1 + $0x14] ss:$8 sps:$4 sm:$0xff]   ;;  %v652_v26 = vld [vmem:[%s936_s1 + $0x10] ss:$8 sps:$4 sm:$0xff]   ;;  %v654_v28 = vld [vmem:[%s936_s1 + $0x4] ss:$8 sps:$4 sm:$0xff]  }
   0xa   :  { %v650_v25 = vld [vmem:[%s936_s1 + $0x114] ss:$8 sps:$4 sm:$0xff]   ;;  %v653_v27 = vld [vmem:[%s936_s1 + $0x110] ss:$8 sps:$4 sm:$0xff]   ;;  %v656_v29 = vld [vmem:[%s936_s1 + $0x104] ss:$8 sps:$4 sm:$0xff]  }
   0xb   :  { %427 = vmatpush1.bf16.msra.mxu0 %v628_v10  ;;  %v658_v30 = vld [vmem:[%s936_s1] ss:$8 sps:$4 sm:$0xff]   ;;  %v660_v32 = vld [vmem:[%s936_s1 + $0xf4] ss:$8 sps:$4 sm:$0xff]   ;;  %v664_v34 = vld [vmem:[%s936_s1 + $0xf0] ss:$8 sps:$4 sm:$0xff]  }
   0xc   :  { %468 = vmatpush1.bf16.msra.mxu1 %v629_v11  ;;  %428 = vmatprep.subr.bf16.mxu0 %v630_v12  ;;  %v659_v31 = vld [vmem:[%s936_s1 + $0x100] ss:$8 sps:$4 sm:$0xff]   ;;  %v662_v33 = vld [vmem:[%s936_s1 + $0x1f4] ss:$8 sps:$4 sm:$0xff]   ;;  %v665_v35 = vld [vmem:[%s936_s1 + $0x1f0] ss:$8 sps:$4 sm:$0xff]  }
   0xd   :  { %469 = vmatprep.subr.bf16.mxu1 %v632_v13  ;;  %v666_v36 = vld [vmem:[%s936_s1 + $0xe4] ss:$8 sps:$4 sm:$0xff]   ;;  %v670_v38 = vld [vmem:[%s936_s1 + $0xe0] ss:$8 sps:$4 sm:$0xff]   ;;  %v672_v40 = vld [vmem:[%s936_s1 + $0xd4] ss:$8 sps:$4 sm:$0xff]  }
   0xe   :  { %v668_v37 = vld [vmem:[%s936_s1 + $0x1e4] ss:$8 sps:$4 sm:$0xff]   ;;  %v671_v39 = vld [vmem:[%s936_s1 + $0x1e0] ss:$8 sps:$4 sm:$0xff]   ;;  %v674_v41 = vld [vmem:[%s936_s1 + $0x1d4] ss:$8 sps:$4 sm:$0xff]  }
   0xf   :  { %429 = vmatpush1.bf16.msra.mxu0 %v634_v14  ;;  %v676_v42 = vld [vmem:[%s936_s1 + $0xd0] ss:$8 sps:$4 sm:$0xff]   ;;  %v678_v44 = vld [vmem:[%s936_s1 + $0xc4] ss:$8 sps:$4 sm:$0xff]   ;;  %v682_v49 = vld [vmem:[%s936_s1 + $0xc0] ss:$8 sps:$4 sm:$0xff]  }
  0x10   :  { %470 = vmatpush1.bf16.msra.mxu1 %v635_v15  ;;  %430 = vmatprep.subr.bf16.mxu0 %v636_v16  ;;  %v677_v43 = vld [vmem:[%s936_s1 + $0x1d0] ss:$8 sps:$4 sm:$0xff]   ;;  %v680_v45 = vld [vmem:[%s936_s1 + $0x1c4] ss:$8 sps:$4 sm:$0xff]   ;;  %v683_v50 = vld [vmem:[%s936_s1 + $0x1c0] ss:$8 sps:$4 sm:$0xff]  }
  0x11   :  { %471 = vmatprep.subr.bf16.mxu1 %v638_v17  ;;  %v22_v46 = vld [vmem:[%s937_s0] sm:$0xff]  ;;  %v23_v48 = vld [vmem:[%s937_s0 + $0x8] sm:$0xff]  ;;  %v684_v52 = vld [vmem:[%s936_s1 + $0xb4] ss:$8 sps:$4 sm:$0xff]   ;;  %v516_v7 = vshrl.u32 %v515_v6, 7 }
  0x12   :  { %v543_v47 = vcombine.high %v22_v46, %v22_v46  ;;  %v545_v51 = vcombine.high %v23_v48, %v23_v48  ;;  %v686_v53 = vld [vmem:[%s936_s1 + $0x1b4] ss:$8 sps:$4 sm:$0xff]   ;;  %v688_v54 = vld [vmem:[%s936_s1 + $0xb0] ss:$8 sps:$4 sm:$0xff]   ;;  %v690_v56 = vld [vmem:[%s936_s1 + $0xa4] ss:$8 sps:$4 sm:$0xff]   ;;  %v542_v4 = vcombine.low %v22_v46, %v22_v46  ;;  %v544_v5 = vcombine.low %v23_v48, %v23_v48 }
  0x13   :  { %431 = vmatpush1.bf16.msra.mxu0 %v640_v18  ;;  %v689_v55 = vld [vmem:[%s936_s1 + $0x1b0] ss:$8 sps:$4 sm:$0xff]   ;;  %v692_v57 = vld [vmem:[%s936_s1 + $0x1a4] ss:$8 sps:$4 sm:$0xff]   ;;  %v694_v58 = vld [vmem:[%s936_s1 + $0xa0] ss:$8 sps:$4 sm:$0xff]  }
  0x14   :  { %472 = vmatpush1.bf16.msra.mxu1 %v641_v19  ;;  %432 = vmatprep.subr.bf16.mxu0 %v642_v20  ;;  %v695_v59 = vld [vmem:[%s936_s1 + $0x1a0] ss:$8 sps:$4 sm:$0xff]   ;;  %v696_v60 = vld [vmem:[%s936_s1 + $0x94] ss:$8 sps:$4 sm:$0xff]   ;;  %v700_v62 = vld [vmem:[%s936_s1 + $0x90] ss:$8 sps:$4 sm:$0xff]  }
  0x15   :  { %473 = vmatprep.subr.bf16.mxu1 %v644_v21  ;;  %454 = vmatprep.mubr.bf16.mxu0 %v543_v47  ;;  %v698_v61 = vld [vmem:[%s936_s1 + $0x194] ss:$8 sps:$4 sm:$0xff]   ;;  %v701_v63 = vld [vmem:[%s936_s1 + $0x190] ss:$8 sps:$4 sm:$0xff]   ;;  %v702_v0 = vld [vmem:[%s936_s1 + $0x84] ss:$8 sps:$4 sm:$0xff]  }
  0x16   :  { %495 = vmatprep.mubr.bf16.mxu1 %v545_v51  ;;  %v704_v1 = vld [vmem:[%s936_s1 + $0x184] ss:$8 sps:$4 sm:$0xff]   ;;  %v706_v2 = vld [vmem:[%s936_s1 + $0x80] ss:$8 sps:$4 sm:$0xff]   ;;  %v517_v8 = vsub.s32 0, %v516_v7  ;;  %v521_v10 = vsub.s32 1, %v516_v7 }
  0x17   :  { %433 = vmatpush1.bf16.msra.mxu0 %v646_v22  ;;  %v707_v3 = vld [vmem:[%s936_s1 + $0x180] ss:$8 sps:$4 sm:$0xff]  }
  0x18   :  { %474 = vmatpush1.bf16.msra.mxu1 %v647_v23  ;;  %434 = vmatprep.subr.bf16.mxu0 %v648_v24  ;;  %v513_v9 = vld [vmem:[%s938_s2] sm:$0x3] }
  0x19   :  { %475 = vmatprep.subr.bf16.mxu1 %v650_v25  ;;  %v518_v11 = vrot.slane %v513_v9, %v517_v8  ;;  %v522_v15 = vrot.slane %v513_v9, %v521_v10 }
  0x1b   :  { %435 = vmatpush1.bf16.msra.mxu0 %v652_v26 }
  0x1c   :  { %476 = vmatpush1.bf16.msra.mxu1 %v653_v27  ;;  %436 = vmatprep.subr.bf16.mxu0 %v654_v28 }
  0x1d   :  { %477 = vmatprep.subr.bf16.mxu1 %v656_v29 }
  0x1f   :  { %437 = vmatpush1.bf16.msra.mxu0 %v658_v30 }
  0x20   :  { %478 = vmatpush1.bf16.msra.mxu1 %v659_v31  ;;  %438 = vmatprep.subr.bf16.mxu0 %v660_v32 }
  0x21   :  { %479 = vmatprep.subr.bf16.mxu1 %v662_v33 }
  0x23   :  { %439 = vmatpush2.bf16.msra.mxu0 %v664_v34 }
  0x24   :  { %480 = vmatpush2.bf16.msra.mxu1 %v665_v35  ;;  %440 = vmatprep.subr.bf16.mxu0 %v666_v36 }
  0x25   :  { %481 = vmatprep.subr.bf16.mxu1 %v668_v37 }
  0x27   :  { %441 = vmatpush2.bf16.msra.mxu0 %v670_v38 }
  0x28   :  { %482 = vmatpush2.bf16.msra.mxu1 %v671_v39  ;;  %442 = vmatprep.subr.bf16.mxu0 %v672_v40 }
  0x29   :  { %483 = vmatprep.subr.bf16.mxu1 %v674_v41 }
  0x2b   :  { %443 = vmatpush2.bf16.msra.mxu0 %v676_v42 }
  0x2c   :  { %484 = vmatpush2.bf16.msra.mxu1 %v677_v43  ;;  %444 = vmatprep.subr.bf16.mxu0 %v678_v44 }
  0x2d   :  { %485 = vmatprep.subr.bf16.mxu1 %v680_v45 }
  0x2f   :  { %445 = vmatpush2.bf16.msra.mxu0 %v682_v49 }
  0x30   :  { %486 = vmatpush2.bf16.msra.mxu1 %v683_v50  ;;  %446 = vmatprep.subr.bf16.mxu0 %v684_v52 }
  0x31   :  { %487 = vmatprep.subr.bf16.mxu1 %v686_v53 }
  0x33   :  { %447 = vmatpush2.bf16.msra.mxu0 %v688_v54 }
  0x34   :  { %488 = vmatpush2.bf16.msra.mxu1 %v689_v55  ;;  %448 = vmatprep.subr.bf16.mxu0 %v690_v56 }
  0x35   :  { %489 = vmatprep.subr.bf16.mxu1 %v692_v57 }
  0x37   :  { %449 = vmatpush2.bf16.msra.mxu0 %v694_v58 }
  0x38   :  { %490 = vmatpush2.bf16.msra.mxu1 %v695_v59  ;;  %450 = vmatprep.subr.bf16.mxu0 %v696_v60 }
  0x39   :  { %491 = vmatprep.subr.bf16.mxu1 %v698_v61 }
  0x3b   :  { %451 = vmatpush2.bf16.msra.mxu0 %v700_v62 }
  0x3c   :  { %492 = vmatpush2.bf16.msra.mxu1 %v701_v63  ;;  %452 = vmatprep.subr.bf16.mxu0 %v702_v0 }
  0x3d   :  { %493 = vmatprep.subr.bf16.mxu1 %v704_v1 }
  0x3f   :  { %453 = vmatpush2.bf16.msra.mxu0 %v706_v2 }
  0x40   :  { %494 = vmatpush2.bf16.msra.mxu1 %v707_v3 }
  0x42   :  { %455 = vmatmul.mubr.bf16.vlgmr.msra.gmra.mxu0 %v542_v4 }
  0x43   :  { %496 = vmatmul.mubr.bf16.vlgmr.msra.gmra.mxu1 %v544_v5 }
 0x102   :  { %v456_v12 = vpop.f32.mrf.mxu0 }
 0x103   :  { %v497_v13 = vpop.f32.mrf.mxu1 }
 0x104   :  { %v498_v14 = vadd.f32 %v497_v13, %v456_v12  ;;  %v458_v16 = vpop.f32.mrf.mxu0 }
 0x105   :  { %v499_v17 = vpop.f32.mrf.mxu1 }
 0x106   :  { %v525_v18 = vadd.f32 %v518_v11, %v498_v14  ;;  %v500_v19 = vadd.f32 %v499_v17, %v458_v16  ;;  %v460_v20 = vpop.f32.mrf.mxu0 }
 0x107   :  { %v501_v21 = vpop.f32.mrf.mxu1 }
 0x108   :  { %v526_v22 = vadd.f32 %v522_v15, %v500_v19  ;;  %v461_v23 = vpop.f32.mrf.mxu0  ;;  %v527_v25 = vmax.f32 %v525_v18, 0.0 }
 0x109   :  { %v502_v24 = vpop.f32.mrf.mxu1 }
 0x10a   :  { %v528_v26 = vmax.f32 %v526_v22, 0.0 }
 0x10c   :  { %v611_v27 = vpack.c.bf16 %v528_v26, %v527_v25 }
 0x10e   :  { %537 = vst [vmem:[%s939_s3] sm:$0xff] %v611_v27 }

// kernel: depth_aware_resnet_forward.31
= control target key start
LH: loop header
LB: loop body
LE: loop exit
PB: predicated region body
PF: predicated region fallthrough
CT: control target
= control target key end

     0   :  { %v467_v1 = vmov 0   ;;  %v322_v34 = vlaneseq  ;;  %s607_s1 = inlined_call_operand.vmem [shape: bf16[128,512], index: 1, kind: input, shape index: {}]   ;;  %s608_s0 = inlined_call_operand.vmem [shape: bf16[8,128], index: 0, kind: input, shape index: {}]   ;;  %s609_s2 = inlined_call_operand.vmem [shape: f32[1,512], index: 2, kind: input, shape index: {}]   ;;  %s610_s3 = inlined_call_operand.vmem [shape: bf16[8,512], index: 3, kind: input, shape index: {}]   ;;  %s611_s4 = inlined_call_operand.vmem [shape: bf16[8,512], index: 4, kind: output, shape index: {}]  }
   0x1   :  { %v419_v0 = vld [vmem:[%s607_s1 + $0xe4] ss:$16 sps:$4 sm:$0xff]   ;;  %255 = vmatprep.mubr.bf16.mxu0 %v467_v1  ;;  %296 = vmatprep.mubr.bf16.mxu1 %v467_v1  ;;  %v421_v2 = vld [vmem:[%s607_s1 + $0xec] ss:$16 sps:$4 sm:$0xff]   ;;  %v423_v3 = vld [vmem:[%s607_s1 + $0xe0] ss:$16 sps:$4 sm:$0xff]  }
   0x2   :  { %223 = vmatprep.subr.bf16.mxu0 %v419_v0  ;;  %v424_v4 = vld [vmem:[%s607_s1 + $0xe8] ss:$16 sps:$4 sm:$0xff]   ;;  %264 = vmatprep.subr.bf16.mxu1 %v421_v2  ;;  %v425_v5 = vld [vmem:[%s607_s1 + $0xc4] ss:$16 sps:$4 sm:$0xff]   ;;  %v427_v6 = vld [vmem:[%s607_s1 + $0xcc] ss:$16 sps:$4 sm:$0xff]  }
   0x3   :  { %224 = vmatpush1.bf16.msra.mxu0 %v423_v3  ;;  %265 = vmatpush1.bf16.msra.mxu1 %v424_v4  ;;  %v429_v7 = vld [vmem:[%s607_s1 + $0xc0] ss:$16 sps:$4 sm:$0xff]   ;;  %v430_v8 = vld [vmem:[%s607_s1 + $0xc8] ss:$16 sps:$4 sm:$0xff]   ;;  %v431_v9 = vld [vmem:[%s607_s1 + $0xa4] ss:$16 sps:$4 sm:$0xff]  }
   0x4   :  { %225 = vmatprep.subr.bf16.mxu0 %v425_v5  ;;  %266 = vmatprep.subr.bf16.mxu1 %v427_v6  ;;  %v433_v10 = vld [vmem:[%s607_s1 + $0xac] ss:$16 sps:$4 sm:$0xff]   ;;  %v435_v11 = vld [vmem:[%s607_s1 + $0xa0] ss:$16 sps:$4 sm:$0xff]   ;;  %v436_v12 = vld [vmem:[%s607_s1 + $0xa8] ss:$16 sps:$4 sm:$0xff]  }
   0x5   :  { %v437_v13 = vld [vmem:[%s607_s1 + $0x84] ss:$16 sps:$4 sm:$0xff]   ;;  %v439_v14 = vld [vmem:[%s607_s1 + $0x8c] ss:$16 sps:$4 sm:$0xff]   ;;  %v441_v15 = vld [vmem:[%s607_s1 + $0x80] ss:$16 sps:$4 sm:$0xff]  }
   0x6   :  { %v442_v16 = vld [vmem:[%s607_s1 + $0x88] ss:$16 sps:$4 sm:$0xff]   ;;  %v443_v17 = vld [vmem:[%s607_s1 + $0x64] ss:$16 sps:$4 sm:$0xff]   ;;  %v445_v18 = vld [vmem:[%s607_s1 + $0x6c] ss:$16 sps:$4 sm:$0xff]  }
   0x7   :  { %226 = vmatpush1.bf16.msra.mxu0 %v429_v7  ;;  %267 = vmatpush1.bf16.msra.mxu1 %v430_v8  ;;  %v447_v19 = vld [vmem:[%s607_s1 + $0x60] ss:$16 sps:$4 sm:$0xff]   ;;  %v448_v20 = vld [vmem:[%s607_s1 + $0x68] ss:$16 sps:$4 sm:$0xff]   ;;  %v449_v21 = vld [vmem:[%s607_s1 + $0x44] ss:$16 sps:$4 sm:$0xff]  }
   0x8   :  { %227 = vmatprep.subr.bf16.mxu0 %v431_v9  ;;  %268 = vmatprep.subr.bf16.mxu1 %v433_v10  ;;  %v451_v22 = vld [vmem:[%s607_s1 + $0x4c] ss:$16 sps:$4 sm:$0xff]   ;;  %v453_v23 = vld [vmem:[%s607_s1 + $0x40] ss:$16 sps:$4 sm:$0xff]   ;;  %v454_v24 = vld [vmem:[%s607_s1 + $0x48] ss:$16 sps:$4 sm:$0xff]  }
   0x9   :  { %v455_v25 = vld [vmem:[%s607_s1 + $0x24] ss:$16 sps:$4 sm:$0xff]   ;;  %v457_v26 = vld [vmem:[%s607_s1 + $0x2c] ss:$16 sps:$4 sm:$0xff]   ;;  %v459_v27 = vld [vmem:[%s607_s1 + $0x20] ss:$16 sps:$4 sm:$0xff]  }
   0xa   :  { %v460_v28 = vld [vmem:[%s607_s1 + $0x28] ss:$16 sps:$4 sm:$0xff]   ;;  %v461_v29 = vld [vmem:[%s607_s1 + $0x4] ss:$16 sps:$4 sm:$0xff]   ;;  %v463_v30 = vld [vmem:[%s607_s1 + $0xc] ss:$16 sps:$4 sm:$0xff]  }
   0xb   :  { %228 = vmatpush1.bf16.msra.mxu0 %v435_v11  ;;  %269 = vmatpush1.bf16.msra.mxu1 %v436_v12  ;;  %v465_v31 = vld [vmem:[%s607_s1] ss:$16 sps:$4 sm:$0xff]   ;;  %v466_v32 = vld [vmem:[%s607_s1 + $0x8] ss:$16 sps:$4 sm:$0xff]   ;;  %v323_v35 = vshrl.u32 %v322_v34, 7 }
   0xc   :  { %229 = vmatprep.subr.bf16.mxu0 %v437_v13  ;;  %270 = vmatprep.subr.bf16.mxu1 %v439_v14  ;;  %v30_v33 = vld [vmem:[%s608_s0] sm:$0xf]  ;;  %v347_v42 = vld [vmem:[%s610_s3 + $0x8] sm:$0xff] }
   0xd   :  { %v324_v36 = vsub.s32 0, %v323_v35  ;;  %v332_v37 = vsub.s32 2, %v323_v35  ;;  %v320_v38 = vld [vmem:[%s609_s2] sm:$0xf]  ;;  %v328_v39 = vsub.s32 1, %v323_v35  ;;  %v336_v40 = vsub.s32 3, %v323_v35 }
   0xe   :  { %v346_v41 = vld [vmem:[%s610_s3] sm:$0xff]  ;;  %v350_v46 = vunpack.c.l.bf16 %v347_v42  ;;  %v351_v54 = vunpack.c.h.bf16 %v347_v42 }
   0xf   :  { %230 = vmatpush1.bf16.msra.mxu0 %v441_v15  ;;  %271 = vmatpush1.bf16.msra.mxu1 %v442_v16  ;;  %v325_v43 = vrot.slane %v320_v38, %v324_v36  ;;  %v333_v44 = vrot.slane %v320_v38, %v332_v37  ;;  %v348_v45 = vunpack.c.l.bf16 %v346_v41  ;;  %v329_v47 = vrot.slane %v320_v38, %v328_v39 }
  0x10   :  { %231 = vmatprep.subr.bf16.mxu0 %v443_v17  ;;  %272 = vmatprep.subr.bf16.mxu1 %v445_v18  ;;  %v337_v48 = vrot.slane %v320_v38, %v336_v40  ;;  %v349_v53 = vunpack.c.h.bf16 %v346_v41 }
  0x13   :  { %232 = vmatpush1.bf16.msra.mxu0 %v447_v19  ;;  %273 = vmatpush1.bf16.msra.mxu1 %v448_v20 }
  0x14   :  { %233 = vmatprep.subr.bf16.mxu0 %v449_v21  ;;  %274 = vmatprep.subr.bf16.mxu1 %v451_v22 }
  0x17   :  { %234 = vmatpush1.bf16.msra.mxu0 %v453_v23  ;;  %275 = vmatpush1.bf16.msra.mxu1 %v454_v24 }
  0x18   :  { %235 = vmatprep.subr.bf16.mxu0 %v455_v25  ;;  %276 = vmatprep.subr.bf16.mxu1 %v457_v26 }
  0x1b   :  { %236 = vmatpush1.bf16.msra.mxu0 %v459_v27  ;;  %277 = vmatpush1.bf16.msra.mxu1 %v460_v28 }
  0x1c   :  { %237 = vmatprep.subr.bf16.mxu0 %v461_v29  ;;  %278 = vmatprep.subr.bf16.mxu1 %v463_v30 }
  0x1f   :  { %238 = vmatpush1.bf16.msra.mxu0 %v465_v31  ;;  %279 = vmatpush1.bf16.msra.mxu1 %v466_v32 }
  0x22   :  { %256 = vmatmul.mubr.bf16.vlgmr.msra.gmra.mxu0 %v30_v33  ;;  %297 = vmatmul.mubr.bf16.vlgmr.msra.gmra.mxu1 %v30_v33 }
  0xe2   :  { %v257_v49 = vpop.f32.mrf.mxu0  ;;  %v298_v50 = vpop.f32.mrf.mxu1 }
  0xe3   :  { %v342_v51 = vadd.f32 %v325_v43, %v257_v49  ;;  %v344_v52 = vadd.f32 %v333_v44, %v298_v50 }
  0xe4   :  { %v259_v55 = vpop.f32.mrf.mxu0  ;;  %v300_v56 = vpop.f32.mrf.mxu1 }
  0xe5   :  { %v352_v57 = vadd.f32 %v348_v45, %v342_v51  ;;  %v354_v58 = vadd.f32 %v350_v46, %v344_v52  ;;  %v343_v59 = vadd.f32 %v329_v47, %v259_v55  ;;  %v345_v60 = vadd.f32 %v337_v48, %v300_v56 }
  0xe6   :  { %v261_v61 = vpop.f32.mrf.mxu0  ;;  %v302_v62 = vpop.f32.mrf.mxu1 }
  0xe7   :  { %v353_v63 = vadd.f32 %v349_v53, %v343_v59  ;;  %v355_v0 = vadd.f32 %v351_v54, %v345_v60  ;;  %v356_v3 = vmax.f32 %v352_v57, 0.0  ;;  %v358_v4 = vmax.f32 %v354_v58, 0.0 }
  0xe8   :  { %v262_v1 = vpop.f32.mrf.mxu0  ;;  %v303_v2 = vpop.f32.mrf.mxu1 }
  0xe9   :  { %v357_v5 = vmax.f32 %v353_v63, 0.0  ;;  %v359_v6 = vmax.f32 %v355_v0, 0.0 }
  0xeb   :  { %v416_v7 = vpack.c.bf16 %v357_v5, %v356_v3  ;;  %v417_v8 = vpack.c.bf16 %v359_v6, %v358_v4 }
  0xed   :  { %376 = vst [vmem:[%s611_s4] sm:$0xff] %v416_v7  ;;  %377 = vst [vmem:[%s611_s4 + $0x8] sm:$0xff] %v417_v8 }

// kernel: depth_aware_resnet_forward.33
= control target key start
LH: loop header
LB: loop body
LE: loop exit
PB: predicated region body
PF: predicated region fallthrough
CT: control target
= control target key end

     0   :  { %s1069_s12 = smov 0   ;;  %s1071_s13 = smov 0   ;;  %s1183_s0 = inlined_call_operand.vmem [shape: bf16[2,2304], index: 0, kind: input, shape index: {}]   ;;  %s1184_s1 = inlined_call_operand.vmem [shape: bf16[2304,256], index: 1, kind: input, shape index: {}]   ;;  %s1185_s2 = inlined_call_operand.vmem [shape: f32[1,256], index: 2, kind: input, shape index: {}]   ;;  %s1186_s3 = inlined_call_operand.vmem [shape: bf16[2,256], index: 3, kind: output, shape index: {}]  }
   0x1   :  { %s1073_s14 = smov 0  }
   0x2 LB: > { %s25_s15 = sadd.s32 1, %s1039_s13  ;;  %p860_p0 = scmp.ge.s32.totalorder %s1043_s14, 1  ;;  %s1043_s14 = sphi %s1073_s14, %s13_s14   ;;  %s1039_s13 = sphi %s1071_s13, %s1188_s13   ;;  %s1035_s12 = sphi %s1069_s12, %s1187_s12  }
   0x3   : > { %p26_p1 = scmp.ge.s32.totalorder %s25_s15, 6  ;;  %p193_p2 = scmp.lt.s32.totalorder %s1043_s14, 7 }
   0x5   : > { %s1190_s15 = smov (%p26_p1, %s25_s15), 0  ;;  %p194_p3 = pnand %p860_p0, %p193_p2 }
   0x6   : > { %s237_s16 = smul.u32 (!%p194_p3), 3, %s1035_s12  ;;  %p863_p6 = scmp.ne.s32.totalorder (!%p194_p3), %s1035_s12, 0 }
   0x7   : > { %197 = sbr.rel (%p194_p3) target bundleno = 311 (0x137), region = 32 }
   0x8   : > { %s246_s17 = smul.u32 (!%p194_p3), 48, %s1035_s12  ;;  %p240_p4 = scmp.lt.s32.totalorder (!%p194_p3), %s237_s16, 17 }
   0xa   : > { %p248_p5 = scmp.lt.s32.totalorder (!%p194_p3), %s246_s17, 287 }
   0xc   : > { %s1192_s16 = smov (!%p240_p4, %s237_s16), 17  ;;  %s1194_s17 = smov (!%p248_p5, %s246_s17), 287 }
   0xd   : > { %s244_s20 = scalar_lea.vmem %s1183_s0, %s1192_s16  ;;  %s920_s21 = sshll.u32 %s1194_s17, 3 }
   0xe   : > { %s1100_s24 = scalar_lea.vmem %s1184_s1, %s920_s21  ;;  %276 = sbr.rel (%p863_p6) target bundleno = 21 (0x15), region = 36 }
  0x13   : > { %v1045_v0 = vmov 0.0  }
  0x14   : > { %277 = vst [vmem:[#allocation2] sm:$0xf] %v1045_v0 }
  0x15 PF: > { %v949_v1 = vld [vmem:[%s1100_s24 + $0x74] ss:$8 sps:$4 sm:$0xff]   ;;  %v951_v2 = vld [vmem:[%s1100_s24 + $0x70] ss:$8 sps:$4 sm:$0xff]   ;;  %v1046_v3 = vmov 0   ;;  %v340_v28 = vlaneseq  ;;  %p913_p7 = scmp.ne.s32.totalorder %s1035_s12, 5 }
  0x16   : > { %668 = vmatprep.mubr.bf16.mxu1 %v1046_v3  ;;  %595 = vmatprep.subr.bf16.mxu0 %v949_v1  ;;  %v952_v4 = vld [vmem:[%s1100_s24 + $0x64] ss:$8 sps:$4 sm:$0xff]   ;;  %v954_v5 = vld [vmem:[%s1100_s24 + $0x60] ss:$8 sps:$4 sm:$0xff]   ;;  %v955_v6 = vld [vmem:[%s1100_s24 + $0x54] ss:$8 sps:$4 sm:$0xff]  }
  0x17   : > { %596 = vmatpush1.bf16.msra.mxu0 %v951_v2  ;;  %v957_v7 = vld [vmem:[%s1100_s24 + $0x50] ss:$8 sps:$4 sm:$0xff]   ;;  %v958_v8 = vld [vmem:[%s1100_s24 + $0x44] ss:$8 sps:$4 sm:$0xff]   ;;  %v970_v9 = vld [vmem:[%s1100_s24 + $0x174] ss:$8 sps:$4 sm:$0xff]  }
  0x18   : > { %597 = vmatprep.subr.bf16.mxu0 %v952_v4  ;;  %v972_v10 = vld [vmem:[%s1100_s24 + $0x170] ss:$8 sps:$4 sm:$0xff]   ;;  %v960_v11 = vld [vmem:[%s1100_s24 + $0x40] ss:$8 sps:$4 sm:$0xff]   ;;  %v961_v12 = vld [vmem:[%s1100_s24 + $0x34] ss:$8 sps:$4 sm:$0xff]   ;;  %636 = vmatprep.subr.bf16.mxu1 %v970_v9 }
  0x19   : > { %v976_v13 = vld [vmem:[%s1100_s24 + $0x164] ss:$8 sps:$4 sm:$0xff]   ;;  %637 = vmatpush1.bf16.msra.mxu1 %v972_v10  ;;  %v978_v14 = vld [vmem:[%s1100_s24 + $0x160] ss:$8 sps:$4 sm:$0xff]   ;;  %v963_v15 = vld [vmem:[%s1100_s24 + $0x30] ss:$8 sps:$4 sm:$0xff]  }
  0x1a   : > { %638 = vmatprep.subr.bf16.mxu1 %v976_v13  ;;  %v982_v16 = vld [vmem:[%s1100_s24 + $0x154] ss:$8 sps:$4 sm:$0xff]   ;;  %v964_v17 = vld [vmem:[%s1100_s24 + $0x24] ss:$8 sps:$4 sm:$0xff]   ;;  %v984_v18 = vld [vmem:[%s1100_s24 + $0x150] ss:$8 sps:$4 sm:$0xff]  }
  0x1b   : > { %598 = vmatpush1.bf16.msra.mxu0 %v954_v5  ;;  %v988_v19 = vld [vmem:[%s1100_s24 + $0x144] ss:$8 sps:$4 sm:$0xff]   ;;  %v966_v20 = vld [vmem:[%s1100_s24 + $0x20] ss:$8 sps:$4 sm:$0xff]   ;;  %v967_v21 = vld [vmem:[%s1100_s24 + $0x14] ss:$8 sps:$4 sm:$0xff]  }
  0x1c   : > { %599 = vmatprep.subr.bf16.mxu0 %v955_v6  ;;  %v990_v22 = vld [vmem:[%s1100_s24 + $0x140] ss:$8 sps:$4 sm:$0xff]   ;;  %v994_v23 = vld [vmem:[%s1100_s24 + $0x134] ss:$8 sps:$4 sm:$0xff]   ;;  %v969_v24 = vld [vmem:[%s1100_s24 + $0x10] ss:$8 sps:$4 sm:$0xff]  }
  0x1d   : > { %639 = vmatpush1.bf16.msra.mxu1 %v978_v14  ;;  %v973_v25 = vld [vmem:[%s1100_s24 + $0x4] ss:$8 sps:$4 sm:$0xff]   ;;  %v1047_v26 = vmov 1966171168   ;;  %v996_v29 = vld [vmem:[%s1100_s24 + $0x130] ss:$8 sps:$4 sm:$0xff]  }
  0x1e   : > { %640 = vmatprep.subr.bf16.mxu1 %v982_v16  ;;  %v338_v27 = vunpack.c.l.s4 %v1047_v26  ;;  %v1000_v30 = vld [vmem:[%s1100_s24 + $0x124] ss:$8 sps:$4 sm:$0xff]   ;;  %v975_v31 = vld [vmem:[%s1100_s24] ss:$8 sps:$4 sm:$0xff]   ;;  %v979_v32 = vld [vmem:[%s1100_s24 + $0xf4] ss:$8 sps:$4 sm:$0xff]  }
  0x1f   : > { %600 = vmatpush1.bf16.msra.mxu0 %v957_v7  ;;  %v1131_v34 = vshrl.u32 %v340_v28, 7  ;;  %v1002_v35 = vld [vmem:[%s1100_s24 + $0x120] ss:$8 sps:$4 sm:$0xff]   ;;  %v981_v36 = vld [vmem:[%s1100_s24 + $0xf0] ss:$8 sps:$4 sm:$0xff]  }
  0x20   : > { %601 = vmatprep.subr.bf16.mxu0 %v958_v8  ;;  %v339_v33 = vunpack.c.0.s8 %v338_v27  ;;  %v1006_v37 = vld [vmem:[%s1100_s24 + $0x114] ss:$8 sps:$4 sm:$0xff]   ;;  %v864_v38 = vld.sshfl [vmem:[%s244_s20] sm:$0x13 pattern:$0x75316420] }
  0x21   : > { %641 = vmatpush1.bf16.msra.mxu1 %v984_v18  ;;  %v985_v39 = vld [vmem:[%s1100_s24 + $0xe4] ss:$8 sps:$4 sm:$0xff]   ;;  %v336_v41 = vcombine.high %v864_v38, %v864_v38  ;;  %v1008_v42 = vld [vmem:[%s1100_s24 + $0x110] ss:$8 sps:$4 sm:$0xff]   ;;  %v987_v45 = vld [vmem:[%s1100_s24 + $0xe0] ss:$8 sps:$4 sm:$0xff]  }
  0x22   : > { %642 = vmatprep.subr.bf16.mxu1 %v988_v19  ;;  %v1143_v40 = vsub.s32 %v339_v33, %v1131_v34  ;;  %v1012_v43 = vld [vmem:[%s1100_s24 + $0x104] ss:$8 sps:$4 sm:$0xff]   ;;  %v991_v46 = vld [vmem:[%s1100_s24 + $0xd4] ss:$8 sps:$4 sm:$0xff]   ;;  %v1014_v48 = vld [vmem:[%s1100_s24 + $0x100] ss:$8 sps:$4 sm:$0xff]  }
  0x23   : > { %602 = vmatpush1.bf16.msra.mxu0 %v960_v11  ;;  %v993_v49 = vld [vmem:[%s1100_s24 + $0xd0] ss:$8 sps:$4 sm:$0xff]   ;;  %v997_v50 = vld [vmem:[%s1100_s24 + $0xc4] ss:$8 sps:$4 sm:$0xff]   ;;  %v999_v52 = vld [vmem:[%s1100_s24 + $0xc0] ss:$8 sps:$4 sm:$0xff]  }
  0x24   : > { %603 = vmatprep.subr.bf16.mxu0 %v961_v12  ;;  %v350_v44 = vrot.slane %v336_v41, %v1143_v40  ;;  %v343_v47 = vrot.slane %v864_v38, %v1143_v40  ;;  %v1003_v53 = vld [vmem:[%s1100_s24 + $0xb4] ss:$8 sps:$4 sm:$0xff]   ;;  %v1005_v54 = vld [vmem:[%s1100_s24 + $0xb0] ss:$8 sps:$4 sm:$0xff]   ;;  %v1009_v55 = vld [vmem:[%s1100_s24 + $0xa4] ss:$8 sps:$4 sm:$0xff]  }
  0x25   : > { %643 = vmatpush1.bf16.msra.mxu1 %v990_v22  ;;  %v1011_v56 = vld [vmem:[%s1100_s24 + $0xa0] ss:$8 sps:$4 sm:$0xff]   ;;  %v1015_v57 = vld [vmem:[%s1100_s24 + $0x94] ss:$8 sps:$4 sm:$0xff]   ;;  %v1017_v58 = vld [vmem:[%s1100_s24 + $0x90] ss:$8 sps:$4 sm:$0xff]  }
  0x26   : > { %644 = vmatprep.subr.bf16.mxu1 %v994_v23  ;;  %627 = vmatprep.mubr.bf16.mxu0 %v350_v44  ;;  %v351_v51 = vcombine.high %v343_v47, %v343_v47  ;;  %v1018_v59 = vld [vmem:[%s1100_s24 + $0x84] ss:$8 sps:$4 sm:$0xff]   ;;  %v1020_v60 = vld [vmem:[%s1100_s24 + $0x80] ss:$8 sps:$4 sm:$0xff]   ;;  %v1048_v1 = vmov 1983009808  }
  0x27   : > { %604 = vmatpush1.bf16.msra.mxu0 %v963_v15  ;;  %v681_v2 = vunpack.c.l.s4 %v1048_v1  ;;  %v278_v11 = vld [vmem:[#allocation2] sm:$0xf] }
  0x28   : > { %605 = vmatprep.subr.bf16.mxu0 %v964_v17 }
  0x29   : > { %645 = vmatpush1.bf16.msra.mxu1 %v996_v29  ;;  %v682_v3 = vunpack.c.0.s8 %v681_v2 }
  0x2a   : > { %646 = vmatprep.subr.bf16.mxu1 %v1000_v30 }
  0x2b   : > { %606 = vmatpush1.bf16.msra.mxu0 %v966_v20  ;;  %v685_v8 = vsub.s32 %v682_v3, %v1131_v34 }
  0x2c   : > { %607 = vmatprep.subr.bf16.mxu0 %v967_v21 }
  0x2d   : > { %647 = vmatpush1.bf16.msra.mxu1 %v1002_v35 }
  0x2e   : > { %648 = vmatprep.subr.bf16.mxu1 %v1006_v37 }
  0x2f   : > { %608 = vmatpush1.bf16.msra.mxu0 %v969_v24 }
  0x30   : > { %609 = vmatprep.subr.bf16.mxu0 %v973_v25 }
  0x31   : > { %649 = vmatpush1.bf16.msra.mxu1 %v1008_v42 }
  0x32   : > { %650 = vmatprep.subr.bf16.mxu1 %v1012_v43 }
  0x33   : > { %610 = vmatpush1.bf16.msra.mxu0 %v975_v31 }
  0x34   : > { %611 = vmatprep.subr.bf16.mxu0 %v979_v32 }
  0x35   : > { %651 = vmatpush1.bf16.msra.mxu1 %v1014_v48 }
  0x37   : > { %612 = vmatpush2.bf16.msra.mxu0 %v981_v36 }
  0x38   : > { %613 = vmatprep.subr.bf16.mxu0 %v985_v39  ;;  %669 = vmatmul.mubr.bf16.vlgmr.msra.gmra.mxu1 %v351_v51 }
  0x3b   : > { %614 = vmatpush2.bf16.msra.mxu0 %v987_v45 }
  0x3c   : > { %615 = vmatprep.subr.bf16.mxu0 %v991_v46 }
  0x3f   : > { %616 = vmatpush2.bf16.msra.mxu0 %v993_v49 }
  0x40   : > { %617 = vmatprep.subr.bf16.mxu0 %v997_v50 }
  0x43   : > { %618 = vmatpush2.bf16.msra.mxu0 %v999_v52 }
  0x44   : > { %619 = vmatprep.subr.bf16.mxu0 %v1003_v53 }
  0x47   : > { %620 = vmatpush2.bf16.msra.mxu0 %v1005_v54 }
  0x48   : > { %621 = vmatprep.subr.bf16.mxu0 %v1009_v55 }
  0x4b   : > { %622 = vmatpush2.bf16.msra.mxu0 %v1011_v56 }
  0x4c   : > { %623 = vmatprep.subr.bf16.mxu0 %v1015_v57 }
  0x4f   : > { %624 = vmatpush2.bf16.msra.mxu0 %v1017_v58 }
  0x50   : > { %625 = vmatprep.subr.bf16.mxu0 %v1018_v59 }
  0x53   : > { %626 = vmatpush2.bf16.msra.mxu0 %v1020_v60 }
  0x56   : > { %628 = vmatmul.mubr.bf16.vlgmr.msra.gmra.mxu0 %v343_v47 }
  0xf8   : > { %v670_v61 = vpop.f32.mrf.mxu1 }
  0xfa   : > { %v672_v62 = vpop.f32.mrf.mxu1 }
  0xfc   : > { %v674_v63 = vpop.f32.mrf.mxu1 }
  0xfe   : > { %v675_v0 = vpop.f32.mrf.mxu1 }
 0x116   : > { %v629_v4 = vpop.f32.mrf.mxu0 }
 0x117   : > { %v671_v6 = vadd.f32 %v670_v61, %v629_v4 }
 0x118   : > { %v631_v5 = vpop.f32.mrf.mxu0 }
 0x119   : > { %v673_v7 = vadd.f32 %v672_v62, %v631_v5 }
 0x11a   : > { %v633_v9 = vpop.f32.mrf.mxu0 }
 0x11b   : > { %v679_v10 = vcombine.low %v671_v6, %v673_v7 }
 0x11c   : > { %v634_v12 = vpop.f32.mrf.mxu0 }
 0x11d   : > { %v686_v13 = vrot.slane %v679_v10, %v685_v8  ;;  %693 = sbr.rel (%p913_p7) target bundleno = 311 (0x137), region = 40 }
 0x11f   : > { %v688_v14 = vadd.f32 %v686_v13, %v278_v11 }
 0x121   : > { %689 = vst [vmem:[#allocation2] sm:$0xf] %v688_v14 }
 0x122   : > { %v695_v15 = vld [vmem:[%s1185_s2] sm:$0x3]  ;;  %v699_v16 = vsub.s32 0, %v1131_v34  ;;  %v703_v17 = vsub.s32 1, %v1131_v34 }
 0x124   : > { %v700_v18 = vrot.slane %v695_v15, %v699_v16  ;;  %v704_v19 = vrot.slane %v695_v15, %v703_v17 }
 0x126   : > { %v705_v20 = vcombine.low %v700_v18, %v704_v19 }
 0x128   : > { %v694_v21 = vld [vmem:[#allocation2] sm:$0xf]  ;;  %v712_v22 = vrot.slane %v705_v20, %v685_v8 }
 0x12a   : > { %v714_v23 = vadd.f32 %v712_v22, %v694_v21 }
 0x12c   : > { %v715_v24 = vmax.f32 %v714_v23, 0.0 }
 0x12e   : > { %v723_v25 = vrot.slane %v715_v24, %v685_v8 }
 0x130   : > { %v724_v26 = vcombine.high %v723_v25, %v723_v25 }
 0x132   : > { %v914_v27 = vpack.c.bf16 %v724_v26, %v723_v25 }
 0x134   : > { %v738_v28 = vrot.slane %v914_v27, %v1143_v40 }
 0x136   : > { %915 = vst.sshfl [vmem:[%s1186_s3] sm:$0x5 pattern:$0x73625140] %v738_v28 }
 0x137 PF: > { %s13_s14 = sadd.s32 1, %s1043_s14   ;;  %s1187_s12 = smov %s1039_s13 }
 0x138   : > { %p10_p8 = scmp.ge.s32.totalorder %s13_s14, 8   ;;  %s1188_s13 = smov %s1190_s15 }
 0x13a   :  { %12 = sbr.rel (!%p10_p8) target bundleno = 2 (0x2), region = 76 }

// kernel: depth_aware_resnet_forward.35
= control target key start
LH: loop header
LB: loop body
LE: loop exit
PB: predicated region body
PF: predicated region fallthrough
CT: control target
= control target key end

     0   :  { %s1505_s15 = smov 0   ;;  %s1507_s16 = smov 0   ;;  %s1801_s0 = inlined_call_operand.vmem [shape: bf16[2,256], index: 0, kind: input, shape index: {}]   ;;  %s1802_s1 = inlined_call_operand.vmem [shape: bf16[256,1024], index: 1, kind: input, shape index: {}]   ;;  %s1803_s2 = inlined_call_operand.vmem [shape: f32[1,1024], index: 2, kind: input, shape index: {}]   ;;  %s1804_s3 = inlined_call_operand.vmem [shape: bf16[2,1024], index: 3, kind: input, shape index: {}]   ;;  %s1805_s4 = inlined_call_operand.vmem [shape: bf16[2,1024], index: 4, kind: output, shape index: {}]  }
   0x1   :  { %s1509_s17 = smov 0   ;;  %s1511_s18 = smov 0  }
   0x2   :  { %s1513_s19 = smov 0  }
   0x3 LB: > { %s29_s20 = sadd.s32 1, %s1472_s18  ;;  %p77_p1 = scmp.ne.s32.totalorder %s1464_s16, %s1460_s15  ;;  %s1476_s19 = sphi %s1513_s19, %s14_s19   ;;  %s1472_s18 = sphi %s1511_s18, %s1809_s18   ;;  %s1468_s17 = sphi %s1509_s17, %s1808_s17   ;;  %s1464_s16 = sphi %s1507_s16, %s1807_s16   ;;  %s1460_s15 = sphi %s1505_s15, %s1806_s15  }
   0x4   : > { %p31_p0 = scmp.ge.s32.totalorder %s29_s20, 2  ;;  %p78_p2 = scmp.eq.s32.totalorder %s1476_s19, 0 }
   0x5   : > { %s70_s22 = sadd.s32 1, %s1464_s16  ;;  %p1220_p5 = scmp.ge.s32.totalorder %s1476_s19, 2 }
   0x6   : > { %s1811_s20 = smov (%p31_p0, %s29_s20), 0  ;;  %p79_p3 = por %p78_p2, %p77_p1 }
   0x7   : > { %s66_s21 = ssub.s32 %s1472_s18, %s1811_s20  ;;  %197 = sbr.rel (%p1220_p5) target bundleno = 48 (0x30), region = 20 }
   0x8   : > { %p68_p4 = scmp.eq.s32.totalorder %s66_s21, 0 }
   0xa   : > { %s1540_s23 = scalar_select %p68_p4, %s1464_s16, %s70_s22  }
   0xc   : > { %200 = sbr.rel (!%p79_p3) target bundleno = 48 (0x30), region = 24  ;;  %s202_s24 = sand.u32 (%p79_p3), 1, %s1464_s16  }
   0xd   : > { %s1299_s25 = sshll.u32 (%p79_p3), %s1472_s18, 4  ;;  %s1221_s26 = sshll.u32 (%p79_p3), %s202_s24, 9 }
   0xe   : > { %s1548_s29 = scalar_lea.vmem (%p79_p3), %s1802_s1, %s1299_s25  ;;  %s1553_s30 = scalar_lea.vmem (%p79_p3), [#allocation3], %s1221_s26 }
   0xf   : > { %v223_v0 = vld [vmem:[%s1548_s29] sm:$0xff] (%p79_p3)  ;;  %v225_v1 = vld [vmem:[%s1548_s29 + $0x8] sm:$0xff] (%p79_p3) }
  0x10   : > { %v227_v2 = vld [vmem:[%s1548_s29 + $0x20] sm:$0xff] (%p79_p3)  ;;  %224 = vst [vmem:[%s1553_s30] sm:$0xff] (%p79_p3), %v223_v0  ;;  %226 = vst [vmem:[%s1553_s30 + $0x8] sm:$0xff] (%p79_p3), %v225_v1  ;;  %v229_v3 = vld [vmem:[%s1548_s29 + $0x28] sm:$0xff] (%p79_p3) }
  0x11   : > { %228 = vst [vmem:[%s1553_s30 + $0x10] sm:$0xff] %v227_v2  ;;  %v231_v4 = vld [vmem:[%s1548_s29 + $0x40] sm:$0xff]  ;;  %v233_v5 = vld [vmem:[%s1548_s29 + $0x48] sm:$0xff]  ;;  %230 = vst [vmem:[%s1553_s30 + $0x18] sm:$0xff] %v229_v3 }
  0x12   : > { %232 = vst [vmem:[%s1553_s30 + $0x20] sm:$0xff] %v231_v4  ;;  %234 = vst [vmem:[%s1553_s30 + $0x28] sm:$0xff] %v233_v5  ;;  %v235_v6 = vld [vmem:[%s1548_s29 + $0x60] sm:$0xff]  ;;  %v237_v7 = vld [vmem:[%s1548_s29 + $0x68] sm:$0xff] }
  0x13   : > { %v239_v8 = vld [vmem:[%s1548_s29 + $0x80] sm:$0xff]  ;;  %236 = vst [vmem:[%s1553_s30 + $0x30] sm:$0xff] %v235_v6  ;;  %238 = vst [vmem:[%s1553_s30 + $0x38] sm:$0xff] %v237_v7  ;;  %v241_v9 = vld [vmem:[%s1548_s29 + $0x88] sm:$0xff] }
  0x14   : > { %240 = vst [vmem:[%s1553_s30 + $0x40] sm:$0xff] %v239_v8  ;;  %v243_v10 = vld [vmem:[%s1548_s29 + $0xa0] sm:$0xff]  ;;  %v245_v11 = vld [vmem:[%s1548_s29 + $0xa8] sm:$0xff]  ;;  %242 = vst [vmem:[%s1553_s30 + $0x48] sm:$0xff] %v241_v9 }
  0x15   : > { %244 = vst [vmem:[%s1553_s30 + $0x50] sm:$0xff] %v243_v10  ;;  %246 = vst [vmem:[%s1553_s30 + $0x58] sm:$0xff] %v245_v11  ;;  %v247_v12 = vld [vmem:[%s1548_s29 + $0xc0] sm:$0xff]  ;;  %v249_v13 = vld [vmem:[%s1548_s29 + $0xc8] sm:$0xff] }
  0x16   : > { %v251_v14 = vld [vmem:[%s1548_s29 + $0xe0] sm:$0xff]  ;;  %248 = vst [vmem:[%s1553_s30 + $0x60] sm:$0xff] %v247_v12  ;;  %250 = vst [vmem:[%s1553_s30 + $0x68] sm:$0xff] %v249_v13  ;;  %v253_v15 = vld [vmem:[%s1548_s29 + $0xe8] sm:$0xff] }
  0x17   : > { %252 = vst [vmem:[%s1553_s30 + $0x70] sm:$0xff] %v251_v14  ;;  %v255_v16 = vld [vmem:[%s1548_s29 + $0x100] sm:$0xff]  ;;  %v257_v17 = vld [vmem:[%s1548_s29 + $0x108] sm:$0xff]  ;;  %254 = vst [vmem:[%s1553_s30 + $0x78] sm:$0xff] %v253_v15 }
  0x18   : > { %256 = vst [vmem:[%s1553_s30 + $0x80] sm:$0xff] %v255_v16  ;;  %258 = vst [vmem:[%s1553_s30 + $0x88] sm:$0xff] %v257_v17  ;;  %v259_v18 = vld [vmem:[%s1548_s29 + $0x120] sm:$0xff]  ;;  %v261_v19 = vld [vmem:[%s1548_s29 + $0x128] sm:$0xff] }
  0x19   : > { %v263_v20 = vld [vmem:[%s1548_s29 + $0x140] sm:$0xff]  ;;  %260 = vst [vmem:[%s1553_s30 + $0x90] sm:$0xff] %v259_v18  ;;  %262 = vst [vmem:[%s1553_s30 + $0x98] sm:$0xff] %v261_v19  ;;  %v265_v21 = vld [vmem:[%s1548_s29 + $0x148] sm:$0xff] }
  0x1a   : > { %264 = vst [vmem:[%s1553_s30 + $0xa0] sm:$0xff] %v263_v20  ;;  %v267_v22 = vld [vmem:[%s1548_s29 + $0x160] sm:$0xff]  ;;  %v269_v23 = vld [vmem:[%s1548_s29 + $0x168] sm:$0xff]  ;;  %266 = vst [vmem:[%s1553_s30 + $0xa8] sm:$0xff] %v265_v21 }
  0x1b   : > { %268 = vst [vmem:[%s1553_s30 + $0xb0] sm:$0xff] %v267_v22  ;;  %270 = vst [vmem:[%s1553_s30 + $0xb8] sm:$0xff] %v269_v23  ;;  %v271_v24 = vld [vmem:[%s1548_s29 + $0x180] sm:$0xff]  ;;  %v273_v25 = vld [vmem:[%s1548_s29 + $0x188] sm:$0xff] }
  0x1c   : > { %v275_v26 = vld [vmem:[%s1548_s29 + $0x1a0] sm:$0xff]  ;;  %272 = vst [vmem:[%s1553_s30 + $0xc0] sm:$0xff] %v271_v24  ;;  %274 = vst [vmem:[%s1553_s30 + $0xc8] sm:$0xff] %v273_v25  ;;  %v277_v27 = vld [vmem:[%s1548_s29 + $0x1a8] sm:$0xff] }
  0x1d   : > { %276 = vst [vmem:[%s1553_s30 + $0xd0] sm:$0xff] %v275_v26  ;;  %v279_v28 = vld [vmem:[%s1548_s29 + $0x1c0] sm:$0xff]  ;;  %v281_v29 = vld [vmem:[%s1548_s29 + $0x1c8] sm:$0xff]  ;;  %278 = vst [vmem:[%s1553_s30 + $0xd8] sm:$0xff] %v277_v27 }
  0x1e   : > { %280 = vst [vmem:[%s1553_s30 + $0xe0] sm:$0xff] %v279_v28  ;;  %282 = vst [vmem:[%s1553_s30 + $0xe8] sm:$0xff] %v281_v29  ;;  %v283_v30 = vld [vmem:[%s1548_s29 + $0x1e0] sm:$0xff]  ;;  %v285_v31 = vld [vmem:[%s1548_s29 + $0x1e8] sm:$0xff] }
  0x1f   : > { %v287_v32 = vld [vmem:[%s1548_s29 + $0x200] sm:$0xff]  ;;  %284 = vst [vmem:[%s1553_s30 + $0xf0] sm:$0xff] %v283_v30  ;;  %286 = vst [vmem:[%s1553_s30 + $0xf8] sm:$0xff] %v285_v31  ;;  %v289_v33 = vld [vmem:[%s1548_s29 + $0x208] sm:$0xff] }
  0x20   : > { %288 = vst [vmem:[%s1553_s30 + $0x100] sm:$0xff] %v287_v32  ;;  %v291_v34 = vld [vmem:[%s1548_s29 + $0x220] sm:$0xff]  ;;  %v293_v35 = vld [vmem:[%s1548_s29 + $0x228] sm:$0xff]  ;;  %290 = vst [vmem:[%s1553_s30 + $0x108] sm:$0xff] %v289_v33 }
  0x21   : > { %292 = vst [vmem:[%s1553_s30 + $0x110] sm:$0xff] %v291_v34  ;;  %294 = vst [vmem:[%s1553_s30 + $0x118] sm:$0xff] %v293_v35  ;;  %v295_v36 = vld [vmem:[%s1548_s29 + $0x240] sm:$0xff]  ;;  %v297_v37 = vld [vmem:[%s1548_s29 + $0x248] sm:$0xff] }
  0x22   : > { %v299_v38 = vld [vmem:[%s1548_s29 + $0x260] sm:$0xff]  ;;  %296 = vst [vmem:[%s1553_s30 + $0x120] sm:$0xff] %v295_v36  ;;  %298 = vst [vmem:[%s1553_s30 + $0x128] sm:$0xff] %v297_v37  ;;  %v301_v39 = vld [vmem:[%s1548_s29 + $0x268] sm:$0xff] }
  0x23   : > { %300 = vst [vmem:[%s1553_s30 + $0x130] sm:$0xff] %v299_v38  ;;  %v303_v40 = vld [vmem:[%s1548_s29 + $0x280] sm:$0xff]  ;;  %v305_v41 = vld [vmem:[%s1548_s29 + $0x288] sm:$0xff]  ;;  %302 = vst [vmem:[%s1553_s30 + $0x138] sm:$0xff] %v301_v39 }
  0x24   : > { %304 = vst [vmem:[%s1553_s30 + $0x140] sm:$0xff] %v303_v40  ;;  %306 = vst [vmem:[%s1553_s30 + $0x148] sm:$0xff] %v305_v41  ;;  %v307_v42 = vld [vmem:[%s1548_s29 + $0x2a0] sm:$0xff]  ;;  %v309_v43 = vld [vmem:[%s1548_s29 + $0x2a8] sm:$0xff] }
  0x25   : > { %v311_v44 = vld [vmem:[%s1548_s29 + $0x2c0] sm:$0xff]  ;;  %308 = vst [vmem:[%s1553_s30 + $0x150] sm:$0xff] %v307_v42  ;;  %310 = vst [vmem:[%s1553_s30 + $0x158] sm:$0xff] %v309_v43  ;;  %v313_v45 = vld [vmem:[%s1548_s29 + $0x2c8] sm:$0xff] }
  0x26   : > { %312 = vst [vmem:[%s1553_s30 + $0x160] sm:$0xff] %v311_v44  ;;  %v315_v46 = vld [vmem:[%s1548_s29 + $0x2e0] sm:$0xff]  ;;  %v317_v47 = vld [vmem:[%s1548_s29 + $0x2e8] sm:$0xff]  ;;  %314 = vst [vmem:[%s1553_s30 + $0x168] sm:$0xff] %v313_v45 }
  0x27   : > { %316 = vst [vmem:[%s1553_s30 + $0x170] sm:$0xff] %v315_v46  ;;  %318 = vst [vmem:[%s1553_s30 + $0x178] sm:$0xff] %v317_v47  ;;  %v319_v48 = vld [vmem:[%s1548_s29 + $0x300] sm:$0xff]  ;;  %v321_v49 = vld [vmem:[%s1548_s29 + $0x308] sm:$0xff] }
  0x28   : > { %v323_v50 = vld [vmem:[%s1548_s29 + $0x320] sm:$0xff]  ;;  %320 = vst [vmem:[%s1553_s30 + $0x180] sm:$0xff] %v319_v48  ;;  %322 = vst [vmem:[%s1553_s30 + $0x188] sm:$0xff] %v321_v49  ;;  %v325_v51 = vld [vmem:[%s1548_s29 + $0x328] sm:$0xff] }
  0x29   : > { %324 = vst [vmem:[%s1553_s30 + $0x190] sm:$0xff] %v323_v50  ;;  %v327_v52 = vld [vmem:[%s1548_s29 + $0x340] sm:$0xff]  ;;  %v329_v53 = vld [vmem:[%s1548_s29 + $0x348] sm:$0xff]  ;;  %326 = vst [vmem:[%s1553_s30 + $0x198] sm:$0xff] %v325_v51 }
  0x2a   : > { %328 = vst [vmem:[%s1553_s30 + $0x1a0] sm:$0xff] %v327_v52  ;;  %330 = vst [vmem:[%s1553_s30 + $0x1a8] sm:$0xff] %v329_v53  ;;  %v331_v54 = vld [vmem:[%s1548_s29 + $0x360] sm:$0xff]  ;;  %v333_v55 = vld [vmem:[%s1548_s29 + $0x368] sm:$0xff] }
  0x2b   : > { %v335_v56 = vld [vmem:[%s1548_s29 + $0x380] sm:$0xff]  ;;  %332 = vst [vmem:[%s1553_s30 + $0x1b0] sm:$0xff] %v331_v54  ;;  %334 = vst [vmem:[%s1553_s30 + $0x1b8] sm:$0xff] %v333_v55  ;;  %v337_v57 = vld [vmem:[%s1548_s29 + $0x388] sm:$0xff] }
  0x2c   : > { %336 = vst [vmem:[%s1553_s30 + $0x1c0] sm:$0xff] %v335_v56  ;;  %v339_v58 = vld [vmem:[%s1548_s29 + $0x3a0] sm:$0xff]  ;;  %v341_v59 = vld [vmem:[%s1548_s29 + $0x3a8] sm:$0xff]  ;;  %338 = vst [vmem:[%s1553_s30 + $0x1c8] sm:$0xff] %v337_v57 }
  0x2d   : > { %340 = vst [vmem:[%s1553_s30 + $0x1d0] sm:$0xff] %v339_v58  ;;  %342 = vst [vmem:[%s1553_s30 + $0x1d8] sm:$0xff] %v341_v59  ;;  %v343_v60 = vld [vmem:[%s1548_s29 + $0x3c0] sm:$0xff]  ;;  %v345_v61 = vld [vmem:[%s1548_s29 + $0x3c8] sm:$0xff] }
  0x2e   : > { %v347_v62 = vld [vmem:[%s1548_s29 + $0x3e0] sm:$0xff]  ;;  %344 = vst [vmem:[%s1553_s30 + $0x1e0] sm:$0xff] %v343_v60  ;;  %346 = vst [vmem:[%s1553_s30 + $0x1e8] sm:$0xff] %v345_v61  ;;  %v349_v63 = vld [vmem:[%s1548_s29 + $0x3e8] sm:$0xff] }
  0x2f   : > { %348 = vst [vmem:[%s1553_s30 + $0x1f0] sm:$0xff] %v347_v62  ;;  %350 = vst [vmem:[%s1553_s30 + $0x1f8] sm:$0xff] %v349_v63 }
  0x30 PF: > { %p1224_p6 = scmp.ge.s32.totalorder %s1476_s19, 1  ;;  %p375_p7 = scmp.lt.s32.totalorder %s1476_s19, 3 }
  0x32   : > { %p376_p8 = pnand %p1224_p6, %p375_p7 }
  0x33   : > { %s382_s5 = sand.u32 (!%p376_p8), 1, %s1460_s15   ;;  %s1226_s10 = sshll.u32 (!%p376_p8), %s1468_s17, 2 }
  0x34   : > { %379 = sbr.rel (%p376_p8) target bundleno = 343 (0x157), region = 55  ;;  %s1225_s8 = sshll.u32 (!%p376_p8), %s382_s5, 9 }
  0x35   : > { %s1690_s9 = scalar_lea.vmem (!%p376_p8), [#allocation3], %s1225_s8  ;;  %p442_p9 = scmp.lt.s32.totalorder (!%p376_p8), %s1226_s10, 7 }
  0x39   : > { %v1686_v0 = vld.sshfl [vmem:[%s1801_s0] sm:$0x11 pattern:$0x75316420]  ;;  %v547_v1 = vlaneseq  ;;  %v1478_v2 = vmov 1966171168  }
  0x3a   : > { %v545_v3 = vunpack.c.l.s4 %v1478_v2  ;;  %v1342_v5 = vld [vmem:[%s1690_s9 + $0xe4] ss:$16 sps:$4 sm:$0xff]   ;;  %v1344_v6 = vld [vmem:[%s1690_s9 + $0xec] ss:$16 sps:$4 sm:$0xff]   ;;  %v543_v7 = vcombine.high %v1686_v0, %v1686_v0  ;;  %v1346_v9 = vld [vmem:[%s1690_s9 + $0xe0] ss:$16 sps:$4 sm:$0xff]  }
  0x3b   : > { %v1688_v4 = vshrl.u32 %v547_v1, 7  ;;  %880 = vmatprep.subr.bf16.mxu0 %v1342_v5  ;;  %v1347_v10 = vld [vmem:[%s1690_s9 + $0xe8] ss:$16 sps:$4 sm:$0xff]   ;;  %921 = vmatprep.subr.bf16.mxu1 %v1344_v6  ;;  %v1348_v11 = vld [vmem:[%s1690_s9 + $0xc4] ss:$16 sps:$4 sm:$0xff]   ;;  %s1813_s10 = smov (!%p442_p9, %s1226_s10), 7 }
  0x3c   : > { %v546_v8 = vunpack.c.0.s8 %v545_v3  ;;  %881 = vmatpush1.bf16.msra.mxu0 %v1346_v9  ;;  %922 = vmatpush1.bf16.msra.mxu1 %v1347_v10  ;;  %v1350_v13 = vld [vmem:[%s1690_s9 + $0xcc] ss:$16 sps:$4 sm:$0xff]   ;;  %v1352_v14 = vld [vmem:[%s1690_s9 + $0xc0] ss:$16 sps:$4 sm:$0xff]   ;;  %v1353_v15 = vld [vmem:[%s1690_s9 + $0xc8] ss:$16 sps:$4 sm:$0xff]   ;;  %s444_s13 = scalar_lea.vmem %s1803_s2, %s1813_s10  ;;  %s453_s17 = scalar_lea.vmem %s1804_s3, %s1813_s10 }
  0x3d   : > { %882 = vmatprep.subr.bf16.mxu0 %v1348_v11  ;;  %923 = vmatprep.subr.bf16.mxu1 %v1350_v13  ;;  %v1354_v17 = vld [vmem:[%s1690_s9 + $0xa4] ss:$16 sps:$4 sm:$0xff]   ;;  %v1356_v18 = vld [vmem:[%s1690_s9 + $0xac] ss:$16 sps:$4 sm:$0xff]   ;;  %v1358_v19 = vld [vmem:[%s1690_s9 + $0xa0] ss:$16 sps:$4 sm:$0xff]   ;;  %s462_s24 = scalar_lea.vmem %s1805_s4, %s1813_s10 }
  0x3e   : > { %v1700_v12 = vsub.s32 %v546_v8, %v1688_v4  ;;  %v1359_v20 = vld [vmem:[%s1690_s9 + $0xa8] ss:$16 sps:$4 sm:$0xff]   ;;  %v1360_v21 = vld [vmem:[%s1690_s9 + $0x84] ss:$16 sps:$4 sm:$0xff]   ;;  %v1362_v22 = vld [vmem:[%s1690_s9 + $0x8c] ss:$16 sps:$4 sm:$0xff]  }
  0x3f   : > { %v1364_v23 = vld [vmem:[%s1690_s9 + $0x80] ss:$16 sps:$4 sm:$0xff]   ;;  %v1365_v24 = vld [vmem:[%s1690_s9 + $0x88] ss:$16 sps:$4 sm:$0xff]   ;;  %v1366_v25 = vld [vmem:[%s1690_s9 + $0x64] ss:$16 sps:$4 sm:$0xff]  }
  0x40   : > { %v557_v16 = vrot.slane %v543_v7, %v1700_v12  ;;  %883 = vmatpush1.bf16.msra.mxu0 %v1352_v14  ;;  %924 = vmatpush1.bf16.msra.mxu1 %v1353_v15  ;;  %v1368_v26 = vld [vmem:[%s1690_s9 + $0x6c] ss:$16 sps:$4 sm:$0xff]   ;;  %v1370_v27 = vld [vmem:[%s1690_s9 + $0x60] ss:$16 sps:$4 sm:$0xff]   ;;  %v1371_v28 = vld [vmem:[%s1690_s9 + $0x68] ss:$16 sps:$4 sm:$0xff]   ;;  %v550_v11 = vrot.slane %v1686_v0, %v1700_v12 }
  0x41   : > { %884 = vmatprep.subr.bf16.mxu0 %v1354_v17  ;;  %925 = vmatprep.subr.bf16.mxu1 %v1356_v18  ;;  %v1372_v29 = vld [vmem:[%s1690_s9 + $0x44] ss:$16 sps:$4 sm:$0xff]   ;;  %v1374_v30 = vld [vmem:[%s1690_s9 + $0x4c] ss:$16 sps:$4 sm:$0xff]   ;;  %v1376_v31 = vld [vmem:[%s1690_s9 + $0x40] ss:$16 sps:$4 sm:$0xff]  }
  0x42   : > { %912 = vmatprep.mubr.bf16.mxu0 %v557_v16  ;;  %953 = vmatprep.mubr.bf16.mxu1 %v557_v16  ;;  %v1377_v32 = vld [vmem:[%s1690_s9 + $0x48] ss:$16 sps:$4 sm:$0xff]   ;;  %v1378_v33 = vld [vmem:[%s1690_s9 + $0x24] ss:$16 sps:$4 sm:$0xff]   ;;  %v1380_v34 = vld [vmem:[%s1690_s9 + $0x2c] ss:$16 sps:$4 sm:$0xff]  }
  0x43   : > { %v1382_v35 = vld [vmem:[%s1690_s9 + $0x20] ss:$16 sps:$4 sm:$0xff]   ;;  %v1383_v36 = vld [vmem:[%s1690_s9 + $0x28] ss:$16 sps:$4 sm:$0xff]   ;;  %v1384_v37 = vld [vmem:[%s1690_s9 + $0x4] ss:$16 sps:$4 sm:$0xff]  }
  0x44   : > { %885 = vmatpush1.bf16.msra.mxu0 %v1358_v19  ;;  %926 = vmatpush1.bf16.msra.mxu1 %v1359_v20  ;;  %v1386_v38 = vld [vmem:[%s1690_s9 + $0xc] ss:$16 sps:$4 sm:$0xff]   ;;  %v1388_v39 = vld [vmem:[%s1690_s9] ss:$16 sps:$4 sm:$0xff]   ;;  %v1389_v40 = vld [vmem:[%s1690_s9 + $0x8] ss:$16 sps:$4 sm:$0xff]  }
  0x45   : > { %886 = vmatprep.subr.bf16.mxu0 %v1360_v21  ;;  %927 = vmatprep.subr.bf16.mxu1 %v1362_v22  ;;  %v1390_v41 = vld [vmem:[%s1690_s9 + $0x1e4] ss:$16 sps:$4 sm:$0xff]   ;;  %v1392_v42 = vld [vmem:[%s1690_s9 + $0x1ec] ss:$16 sps:$4 sm:$0xff]   ;;  %v1394_v43 = vld [vmem:[%s1690_s9 + $0x1e0] ss:$16 sps:$4 sm:$0xff]  }
  0x46   : > { %v1395_v44 = vld [vmem:[%s1690_s9 + $0x1e8] ss:$16 sps:$4 sm:$0xff]   ;;  %v1396_v45 = vld [vmem:[%s1690_s9 + $0x1c4] ss:$16 sps:$4 sm:$0xff]   ;;  %v1398_v46 = vld [vmem:[%s1690_s9 + $0x1cc] ss:$16 sps:$4 sm:$0xff]  }
  0x47   : > { %v1400_v47 = vld [vmem:[%s1690_s9 + $0x1c0] ss:$16 sps:$4 sm:$0xff]   ;;  %v1401_v48 = vld [vmem:[%s1690_s9 + $0x1c8] ss:$16 sps:$4 sm:$0xff]   ;;  %v1402_v49 = vld [vmem:[%s1690_s9 + $0x1a4] ss:$16 sps:$4 sm:$0xff]  }
  0x48   : > { %887 = vmatpush1.bf16.msra.mxu0 %v1364_v23  ;;  %928 = vmatpush1.bf16.msra.mxu1 %v1365_v24  ;;  %v1404_v50 = vld [vmem:[%s1690_s9 + $0x1ac] ss:$16 sps:$4 sm:$0xff]   ;;  %v1406_v51 = vld [vmem:[%s1690_s9 + $0x1a0] ss:$16 sps:$4 sm:$0xff]   ;;  %v1407_v52 = vld [vmem:[%s1690_s9 + $0x1a8] ss:$16 sps:$4 sm:$0xff]  }
  0x49   : > { %888 = vmatprep.subr.bf16.mxu0 %v1366_v25  ;;  %929 = vmatprep.subr.bf16.mxu1 %v1368_v26  ;;  %v1408_v53 = vld [vmem:[%s1690_s9 + $0x184] ss:$16 sps:$4 sm:$0xff]   ;;  %v1410_v54 = vld [vmem:[%s1690_s9 + $0x18c] ss:$16 sps:$4 sm:$0xff]   ;;  %v1412_v55 = vld [vmem:[%s1690_s9 + $0x180] ss:$16 sps:$4 sm:$0xff]  }
  0x4a   : > { %v1413_v56 = vld [vmem:[%s1690_s9 + $0x188] ss:$16 sps:$4 sm:$0xff]   ;;  %v1414_v57 = vld [vmem:[%s1690_s9 + $0x164] ss:$16 sps:$4 sm:$0xff]   ;;  %v1416_v58 = vld [vmem:[%s1690_s9 + $0x16c] ss:$16 sps:$4 sm:$0xff]  }
  0x4b   : > { %v1418_v59 = vld [vmem:[%s1690_s9 + $0x160] ss:$16 sps:$4 sm:$0xff]   ;;  %v1419_v60 = vld [vmem:[%s1690_s9 + $0x168] ss:$16 sps:$4 sm:$0xff]   ;;  %v1420_v61 = vld [vmem:[%s1690_s9 + $0x144] ss:$16 sps:$4 sm:$0xff]  }
  0x4c   : > { %889 = vmatpush1.bf16.msra.mxu0 %v1370_v27  ;;  %930 = vmatpush1.bf16.msra.mxu1 %v1371_v28  ;;  %v1422_v62 = vld [vmem:[%s1690_s9 + $0x14c] ss:$16 sps:$4 sm:$0xff]   ;;  %v1424_v63 = vld [vmem:[%s1690_s9 + $0x140] ss:$16 sps:$4 sm:$0xff]   ;;  %v1425_v1 = vld [vmem:[%s1690_s9 + $0x148] ss:$16 sps:$4 sm:$0xff]  }
  0x4d   : > { %890 = vmatprep.subr.bf16.mxu0 %v1372_v29  ;;  %931 = vmatprep.subr.bf16.mxu1 %v1374_v30  ;;  %v1426_v2 = vld [vmem:[%s1690_s9 + $0x124] ss:$16 sps:$4 sm:$0xff]   ;;  %v1428_v3 = vld [vmem:[%s1690_s9 + $0x12c] ss:$16 sps:$4 sm:$0xff]   ;;  %v1430_v5 = vld [vmem:[%s1690_s9 + $0x120] ss:$16 sps:$4 sm:$0xff]  }
  0x4e   : > { %v1431_v6 = vld [vmem:[%s1690_s9 + $0x128] ss:$16 sps:$4 sm:$0xff]   ;;  %v1432_v7 = vld [vmem:[%s1690_s9 + $0x104] ss:$16 sps:$4 sm:$0xff]   ;;  %v1434_v8 = vld [vmem:[%s1690_s9 + $0x10c] ss:$16 sps:$4 sm:$0xff]  }
  0x4f   : > { %v1436_v9 = vld [vmem:[%s1690_s9 + $0x100] ss:$16 sps:$4 sm:$0xff]   ;;  %v1437_v10 = vld [vmem:[%s1690_s9 + $0x108] ss:$16 sps:$4 sm:$0xff]   ;;  %v1479_v13 = vmov 1983009808  }
  0x50   : > { %891 = vmatpush1.bf16.msra.mxu0 %v1376_v31  ;;  %932 = vmatpush1.bf16.msra.mxu1 %v1377_v32  ;;  %v969_v14 = vunpack.c.l.s4 %v1479_v13  ;;  %v994_v15 = vsub.s32 0, %v1688_v4  ;;  %v998_v0 = vsub.s32 1, %v1688_v4  ;;  %v1002_v16 = vsub.s32 2, %v1688_v4  ;;  %v990_v18 = vld [vmem:[%s444_s13] sm:$0xf] }
  0x51   : > { %892 = vmatprep.subr.bf16.mxu0 %v1378_v33  ;;  %933 = vmatprep.subr.bf16.mxu1 %v1380_v34  ;;  %v1006_v17 = vsub.s32 3, %v1688_v4 }
  0x52   : > { %v970_v19 = vunpack.c.0.s8 %v969_v14  ;;  %v995_v20 = vrot.slane %v990_v18, %v994_v15  ;;  %v999_v21 = vrot.slane %v990_v18, %v998_v0  ;;  %v1003_v22 = vrot.slane %v990_v18, %v1002_v16 }
  0x53   : > { %v1007_v23 = vrot.slane %v990_v18, %v1006_v17 }
  0x54   : > { %893 = vmatpush1.bf16.msra.mxu0 %v1382_v35  ;;  %934 = vmatpush1.bf16.msra.mxu1 %v1383_v36  ;;  %v973_v24 = vsub.s32 %v970_v19, %v1688_v4  ;;  %v1008_v25 = vcombine.low %v995_v20, %v999_v21  ;;  %v1027_v35 = vld [vmem:[%s453_s17] sm:$0xf] }
  0x55   : > { %894 = vmatprep.subr.bf16.mxu0 %v1384_v37  ;;  %935 = vmatprep.subr.bf16.mxu1 %v1386_v38  ;;  %v1009_v26 = vcombine.low %v1003_v22, %v1007_v23 }
  0x56   : > { %v1016_v29 = vrot.slane %v1008_v25, %v973_v24 }
  0x57   : > { %v1023_v30 = vrot.slane %v1009_v26, %v973_v24 }
  0x58   : > { %895 = vmatpush1.bf16.msra.mxu0 %v1388_v39  ;;  %936 = vmatpush1.bf16.msra.mxu1 %v1389_v40 }
  0x59   : > { %896 = vmatprep.subr.bf16.mxu0 %v1390_v41  ;;  %937 = vmatprep.subr.bf16.mxu1 %v1392_v42  ;;  %v1024_v4 = vcombine.low %v1016_v29, %v1023_v30 }
  0x5c   : > { %897 = vmatpush2.bf16.msra.mxu0 %v1394_v43  ;;  %938 = vmatpush2.bf16.msra.mxu1 %v1395_v44  ;;  %v1028_v43 = vunpack.c.l.bf16 %v1027_v35 }
  0x5d   : > { %898 = vmatprep.subr.bf16.mxu0 %v1396_v45  ;;  %939 = vmatprep.subr.bf16.mxu1 %v1398_v46 }
  0x60   : > { %899 = vmatpush2.bf16.msra.mxu0 %v1400_v47  ;;  %940 = vmatpush2.bf16.msra.mxu1 %v1401_v48 }
  0x61   : > { %900 = vmatprep.subr.bf16.mxu0 %v1402_v49  ;;  %941 = vmatprep.subr.bf16.mxu1 %v1404_v50 }
  0x64   : > { %901 = vmatpush2.bf16.msra.mxu0 %v1406_v51  ;;  %942 = vmatpush2.bf16.msra.mxu1 %v1407_v52 }
  0x65   : > { %902 = vmatprep.subr.bf16.mxu0 %v1408_v53  ;;  %943 = vmatprep.subr.bf16.mxu1 %v1410_v54 }
  0x68   : > { %903 = vmatpush2.bf16.msra.mxu0 %v1412_v55  ;;  %944 = vmatpush2.bf16.msra.mxu1 %v1413_v56 }
  0x69   : > { %904 = vmatprep.subr.bf16.mxu0 %v1414_v57  ;;  %945 = vmatprep.subr.bf16.mxu1 %v1416_v58 }
  0x6c   : > { %905 = vmatpush2.bf16.msra.mxu0 %v1418_v59  ;;  %946 = vmatpush2.bf16.msra.mxu1 %v1419_v60 }
  0x6d   : > { %906 = vmatprep.subr.bf16.mxu0 %v1420_v61  ;;  %947 = vmatprep.subr.bf16.mxu1 %v1422_v62 }
  0x70   : > { %907 = vmatpush2.bf16.msra.mxu0 %v1424_v63  ;;  %948 = vmatpush2.bf16.msra.mxu1 %v1425_v1 }
  0x71   : > { %908 = vmatprep.subr.bf16.mxu0 %v1426_v2  ;;  %949 = vmatprep.subr.bf16.mxu1 %v1428_v3 }
  0x74   : > { %909 = vmatpush2.bf16.msra.mxu0 %v1430_v5  ;;  %950 = vmatpush2.bf16.msra.mxu1 %v1431_v6 }
  0x75   : > { %910 = vmatprep.subr.bf16.mxu0 %v1432_v7  ;;  %951 = vmatprep.subr.bf16.mxu1 %v1434_v8 }
  0x78   : > { %911 = vmatpush2.bf16.msra.mxu0 %v1436_v9  ;;  %952 = vmatpush2.bf16.msra.mxu1 %v1437_v10 }
  0x7b   : > { %913 = vmatmul.mubr.bf16.vlgmr.msra.gmra.mxu0 %v550_v11  ;;  %954 = vmatmul.mubr.bf16.vlgmr.msra.gmra.mxu1 %v550_v11 }
 0x13b   : > { %v914_v27 = vpop.f32.mrf.mxu0  ;;  %v955_v28 = vpop.f32.mrf.mxu1 }
 0x13d   : > { %v916_v31 = vpop.f32.mrf.mxu0  ;;  %v957_v32 = vpop.f32.mrf.mxu1 }
 0x13e   : > { %v966_v33 = vcombine.low %v914_v27, %v916_v31  ;;  %v967_v34 = vcombine.low %v955_v28, %v957_v32 }
 0x13f   : > { %v918_v36 = vpop.f32.mrf.mxu0  ;;  %v959_v37 = vpop.f32.mrf.mxu1 }
 0x140   : > { %v974_v38 = vrot.slane %v966_v33, %v973_v24  ;;  %v981_v39 = vrot.slane %v967_v34, %v973_v24 }
 0x141   : > { %v919_v40 = vpop.f32.mrf.mxu0  ;;  %v960_v41 = vpop.f32.mrf.mxu1 }
 0x142   : > { %v982_v42 = vcombine.low %v974_v38, %v981_v39 }
 0x144   : > { %v1026_v44 = vadd.f32 %v1024_v4, %v982_v42 }
 0x146   : > { %v1029_v45 = vadd.f32 %v1028_v43, %v1026_v44 }
 0x148   : > { %v1030_v46 = vmax.f32 %v1029_v45, 0.0 }
 0x14a   : > { %v1032_v47 = vcombine.high %v1030_v46, %v1030_v46  ;;  %v1039_v48 = vrot.slane %v1030_v46, %v973_v24 }
 0x14c   : > { %v1046_v49 = vrot.slane %v1032_v47, %v973_v24  ;;  %v1047_v50 = vcombine.high %v1039_v48, %v1039_v48 }
 0x14e   : > { %v1048_v51 = vcombine.high %v1046_v49, %v1046_v49  ;;  %v1294_v52 = vpack.c.bf16 %v1047_v50, %v1039_v48 }
 0x150   : > { %v1295_v53 = vpack.c.bf16 %v1048_v51, %v1046_v49  ;;  %v1069_v54 = vrot.slane %v1294_v52, %v1700_v12 }
 0x152   : > { %v1076_v55 = vrot.slane %v1295_v53, %v1700_v12 }
 0x154   : > { %v1077_v56 = vcombine.low %v1069_v54, %v1076_v55 }
 0x156   : > { %1296 = vst.sshfl [vmem:[%s462_s24] sm:$0x55 pattern:$0x73625140] %v1077_v56 }
 0x157 PF: > { %s14_s19 = sadd.s32 1, %s1476_s19   ;;  %s1806_s15 = smov %s1464_s16 }
 0x158   : > { %p11_p10 = scmp.ge.s32.totalorder %s14_s19, 4   ;;  %s1807_s16 = smov %s1540_s23 }
 0x159   : > { %s1808_s17 = smov %s1472_s18  ;;  %s1809_s18 = smov %s1811_s20 }
 0x15a   :  { %13 = sbr.rel (!%p11_p10) target bundleno = 3 (0x3), region = 111 }

// kernel: depth_aware_resnet_forward.36
= control target key start
LH: loop header
LB: loop body
LE: loop exit
PB: predicated region body
PF: predicated region fallthrough
CT: control target
= control target key end

     0   :  { %s1885_s12 = smov 0   ;;  %s1887_s13 = smov 0   ;;  %s2092_s0 = inlined_call_operand.vmem [shape: bf16[2,1024], index: 0, kind: input, shape index: {}]   ;;  %s2093_s1 = inlined_call_operand.vmem [shape: bf16[1024,512], index: 1, kind: input, shape index: {}]   ;;  %s2094_s2 = inlined_call_operand.vmem [shape: f32[1,512], index: 2, kind: input, shape index: {}]   ;;  %s2095_s3 = inlined_call_operand.vmem [shape: bf16[2,512], index: 3, kind: output, shape index: {}]  }
   0x1   :  { %s1889_s14 = smov 0  }
   0x2 LB: > { %s25_s15 = sadd.s32 1, %s1856_s13  ;;  %p1475_p0 = scmp.ge.s32.totalorder %s1860_s14, 1  ;;  %s1860_s14 = sphi %s1889_s14, %s13_s14   ;;  %s1856_s13 = sphi %s1887_s13, %s2097_s13   ;;  %s1852_s12 = sphi %s1885_s12, %s2096_s12  }
   0x3   : > { %p26_p1 = scmp.ge.s32.totalorder %s25_s15, 2  ;;  %p193_p2 = scmp.lt.s32.totalorder %s1860_s14, 3 }
   0x5   : > { %s2099_s15 = smov (%p26_p1, %s25_s15), 0  ;;  %p194_p3 = pnand %p1475_p0, %p193_p2 }
   0x6   : > { %s1476_s16 = sshll.u32 (!%p194_p3), %s1852_s12, 2  ;;  %s1477_s17 = sshll.u32 (!%p194_p3), %s1852_s12, 6 }
   0x7   : > { %197 = sbr.rel (%p194_p3) target bundleno = 384 (0x180), region = 32  ;;  %p240_p4 = scmp.lt.s32.totalorder (!%p194_p3), %s1476_s16, 7 }
   0x8   : > { %p248_p5 = scmp.lt.s32.totalorder (!%p194_p3), %s1477_s17, 127  ;;  %p1480_p6 = scmp.ne.s32.totalorder (!%p194_p3), %s1852_s12, 0 }
   0xc   : > { %s2101_s16 = smov (!%p240_p4, %s1476_s16), 7  ;;  %s2103_s17 = smov (!%p248_p5, %s1477_s17), 127 }
   0xd   : > { %s244_s20 = scalar_lea.vmem %s2092_s0, %s2101_s16  ;;  %s1618_s21 = sshll.u32 %s2103_s17, 4 }
   0xe   : > { %s1916_s24 = scalar_lea.vmem %s2093_s1, %s1618_s21  ;;  %275 = sbr.rel (%p1480_p6) target bundleno = 21 (0x15), region = 36 }
  0x13   : > { %v1862_v0 = vmov 0.0  }
  0x14   : > { %276 = vst [vmem:[#allocation2] sm:$0xff] %v1862_v0 }
  0x15 PF: > { %v1646_v1 = vld [vmem:[%s1916_s24 + $0xe4] ss:$16 sps:$4 sm:$0xff]   ;;  %v1650_v3 = vld [vmem:[%s1916_s24 + $0xe0] ss:$16 sps:$4 sm:$0xff]   ;;  %v1863_v39 = vmov 1966171168   ;;  %v419_v41 = vlaneseq }
  0x16   : > { %v1648_v2 = vld [vmem:[%s1916_s24 + $0x2e4] ss:$16 sps:$4 sm:$0xff]   ;;  %1076 = vmatprep.subr.bf16.mxu0 %v1646_v1  ;;  %v1651_v4 = vld [vmem:[%s1916_s24 + $0x2e0] ss:$16 sps:$4 sm:$0xff]   ;;  %v417_v40 = vunpack.c.l.s4 %v1863_v39  ;;  %v1778_v39 = vld [vmem:[%s1916_s24 + $0x28] ss:$16 sps:$4 sm:$0xff]  }
  0x17   : > { %1117 = vmatprep.subr.bf16.mxu1 %v1648_v2  ;;  %v1652_v5 = vld [vmem:[%s1916_s24 + $0xc4] ss:$16 sps:$4 sm:$0xff]   ;;  %1077 = vmatpush1.bf16.msra.mxu0 %v1650_v3  ;;  %v1656_v7 = vld [vmem:[%s1916_s24 + $0xc0] ss:$16 sps:$4 sm:$0xff]   ;;  %v1961_v47 = vshrl.u32 %v419_v41, 7  ;;  %p1610_p7 = scmp.ne.s32.totalorder %s1852_s12, 1 }
  0x18   : > { %1118 = vmatpush1.bf16.msra.mxu1 %v1651_v4  ;;  %v1654_v6 = vld [vmem:[%s1916_s24 + $0x2c4] ss:$16 sps:$4 sm:$0xff]   ;;  %1078 = vmatprep.subr.bf16.mxu0 %v1652_v5  ;;  %v1657_v8 = vld [vmem:[%s1916_s24 + $0x2c0] ss:$16 sps:$4 sm:$0xff]   ;;  %v418_v46 = vunpack.c.0.s8 %v417_v40  ;;  %v1781_v40 = vld [vmem:[%s1916_s24 + $0x228] ss:$16 sps:$4 sm:$0xff]  }
  0x19   : > { %1119 = vmatprep.subr.bf16.mxu1 %v1654_v6  ;;  %v1658_v9 = vld [vmem:[%s1916_s24 + $0xa4] ss:$16 sps:$4 sm:$0xff]   ;;  %v1662_v11 = vld [vmem:[%s1916_s24 + $0xa0] ss:$16 sps:$4 sm:$0xff]   ;;  %v1786_v41 = vld [vmem:[%s1916_s24 + $0xc] ss:$16 sps:$4 sm:$0xff]  }
  0x1a   : > { %v1660_v10 = vld [vmem:[%s1916_s24 + $0x2a4] ss:$16 sps:$4 sm:$0xff]   ;;  %v1663_v12 = vld [vmem:[%s1916_s24 + $0x2a0] ss:$16 sps:$4 sm:$0xff]   ;;  %v1968_v52 = vsub.s32 %v418_v46, %v1961_v47  ;;  %v1795_v46 = vld [vmem:[%s1916_s24 + $0x3ec] ss:$16 sps:$4 sm:$0xff]  }
  0x1b   : > { %1079 = vmatpush1.bf16.msra.mxu0 %v1656_v7  ;;  %v1664_v13 = vld [vmem:[%s1916_s24 + $0x84] ss:$16 sps:$4 sm:$0xff]   ;;  %v1668_v15 = vld [vmem:[%s1916_s24 + $0x80] ss:$16 sps:$4 sm:$0xff]  }
  0x1c   : > { %1120 = vmatpush1.bf16.msra.mxu1 %v1657_v8  ;;  %1080 = vmatprep.subr.bf16.mxu0 %v1658_v9  ;;  %v1666_v14 = vld [vmem:[%s1916_s24 + $0x284] ss:$16 sps:$4 sm:$0xff]   ;;  %v1669_v16 = vld [vmem:[%s1916_s24 + $0x280] ss:$16 sps:$4 sm:$0xff]  }
  0x1d   : > { %1121 = vmatprep.subr.bf16.mxu1 %v1660_v10  ;;  %v1670_v17 = vld [vmem:[%s1916_s24 + $0x64] ss:$16 sps:$4 sm:$0xff]   ;;  %v1674_v19 = vld [vmem:[%s1916_s24 + $0x60] ss:$16 sps:$4 sm:$0xff]  }
  0x1e   : > { %v1672_v18 = vld [vmem:[%s1916_s24 + $0x264] ss:$16 sps:$4 sm:$0xff]   ;;  %v1675_v20 = vld [vmem:[%s1916_s24 + $0x260] ss:$16 sps:$4 sm:$0xff]  }
  0x1f   : > { %1081 = vmatpush1.bf16.msra.mxu0 %v1662_v11  ;;  %v1676_v21 = vld [vmem:[%s1916_s24 + $0x44] ss:$16 sps:$4 sm:$0xff]   ;;  %v1680_v23 = vld [vmem:[%s1916_s24 + $0x40] ss:$16 sps:$4 sm:$0xff]  }
  0x20   : > { %1122 = vmatpush1.bf16.msra.mxu1 %v1663_v12  ;;  %1082 = vmatprep.subr.bf16.mxu0 %v1664_v13  ;;  %v1678_v22 = vld [vmem:[%s1916_s24 + $0x244] ss:$16 sps:$4 sm:$0xff]   ;;  %v1681_v24 = vld [vmem:[%s1916_s24 + $0x240] ss:$16 sps:$4 sm:$0xff]   ;;  %v1744_v12 = vld [vmem:[%s1916_s24 + $0xec] ss:$16 sps:$4 sm:$0xff]  }
  0x21   : > { %1123 = vmatprep.subr.bf16.mxu1 %v1666_v14  ;;  %v1682_v25 = vld [vmem:[%s1916_s24 + $0x24] ss:$16 sps:$4 sm:$0xff]   ;;  %v1686_v27 = vld [vmem:[%s1916_s24 + $0x20] ss:$16 sps:$4 sm:$0xff]   ;;  %v1747_v13 = vld [vmem:[%s1916_s24 + $0x2ec] ss:$16 sps:$4 sm:$0xff]  }
  0x22   : > { %v1684_v26 = vld [vmem:[%s1916_s24 + $0x224] ss:$16 sps:$4 sm:$0xff]   ;;  %v1687_v28 = vld [vmem:[%s1916_s24 + $0x220] ss:$16 sps:$4 sm:$0xff]  }
  0x23   : > { %1083 = vmatpush1.bf16.msra.mxu0 %v1668_v15  ;;  %v1688_v29 = vld [vmem:[%s1916_s24 + $0x4] ss:$16 sps:$4 sm:$0xff]   ;;  %v1692_v31 = vld [vmem:[%s1916_s24] ss:$16 sps:$4 sm:$0xff]   ;;  %v1742_v15 = vld [vmem:[%s1916_s24 + $0xe8] ss:$16 sps:$4 sm:$0xff]  }
  0x24   : > { %1124 = vmatpush1.bf16.msra.mxu1 %v1669_v16  ;;  %1084 = vmatprep.subr.bf16.mxu0 %v1670_v17  ;;  %v1690_v30 = vld [vmem:[%s1916_s24 + $0x204] ss:$16 sps:$4 sm:$0xff]   ;;  %v1693_v32 = vld [vmem:[%s1916_s24 + $0x200] ss:$16 sps:$4 sm:$0xff]   ;;  %v1745_v16 = vld [vmem:[%s1916_s24 + $0x2e8] ss:$16 sps:$4 sm:$0xff]  }
  0x25   : > { %1125 = vmatprep.subr.bf16.mxu1 %v1672_v18  ;;  %v1694_v33 = vld [vmem:[%s1916_s24 + $0x1e4] ss:$16 sps:$4 sm:$0xff]   ;;  %v1698_v35 = vld [vmem:[%s1916_s24 + $0x1e0] ss:$16 sps:$4 sm:$0xff]   ;;  %v1750_v17 = vld [vmem:[%s1916_s24 + $0xcc] ss:$16 sps:$4 sm:$0xff]  }
  0x26   : > { %v1696_v34 = vld [vmem:[%s1916_s24 + $0x3e4] ss:$16 sps:$4 sm:$0xff]   ;;  %v1699_v36 = vld [vmem:[%s1916_s24 + $0x3e0] ss:$16 sps:$4 sm:$0xff]   ;;  %v1753_v18 = vld [vmem:[%s1916_s24 + $0x2cc] ss:$16 sps:$4 sm:$0xff]  }
  0x27   : > { %1085 = vmatpush1.bf16.msra.mxu0 %v1674_v19  ;;  %v1700_v37 = vld [vmem:[%s1916_s24 + $0x1c4] ss:$16 sps:$4 sm:$0xff]   ;;  %v1704_v42 = vld [vmem:[%s1916_s24 + $0x1c0] ss:$16 sps:$4 sm:$0xff]   ;;  %v1748_v19 = vld [vmem:[%s1916_s24 + $0xc8] ss:$16 sps:$4 sm:$0xff]  }
  0x28   : > { %1126 = vmatpush1.bf16.msra.mxu1 %v1675_v20  ;;  %1086 = vmatprep.subr.bf16.mxu0 %v1676_v21  ;;  %v1702_v38 = vld [vmem:[%s1916_s24 + $0x3c4] ss:$16 sps:$4 sm:$0xff]   ;;  %v1705_v43 = vld [vmem:[%s1916_s24 + $0x3c0] ss:$16 sps:$4 sm:$0xff]   ;;  %v1751_v20 = vld [vmem:[%s1916_s24 + $0x2c8] ss:$16 sps:$4 sm:$0xff]  }
  0x29   : > { %1127 = vmatprep.subr.bf16.mxu1 %v1678_v22  ;;  %v1706_v44 = vld [vmem:[%s1916_s24 + $0x1a4] ss:$16 sps:$4 sm:$0xff]   ;;  %v1710_v48 = vld [vmem:[%s1916_s24 + $0x1a0] ss:$16 sps:$4 sm:$0xff]   ;;  %v1756_v21 = vld [vmem:[%s1916_s24 + $0xac] ss:$16 sps:$4 sm:$0xff]  }
  0x2a   : > { %v1708_v45 = vld [vmem:[%s1916_s24 + $0x3a4] ss:$16 sps:$4 sm:$0xff]   ;;  %v1711_v49 = vld [vmem:[%s1916_s24 + $0x3a0] ss:$16 sps:$4 sm:$0xff]   ;;  %v1759_v22 = vld [vmem:[%s1916_s24 + $0x2ac] ss:$16 sps:$4 sm:$0xff]  }
  0x2b   : > { %1087 = vmatpush1.bf16.msra.mxu0 %v1680_v23  ;;  %v1712_v50 = vld [vmem:[%s1916_s24 + $0x184] ss:$16 sps:$4 sm:$0xff]   ;;  %v1481_v53 = vld.sshfl [vmem:[%s244_s20] sm:$0x33 pattern:$0x75316420] }
  0x2c   : > { %1128 = vmatpush1.bf16.msra.mxu1 %v1681_v24  ;;  %1088 = vmatprep.subr.bf16.mxu0 %v1682_v25  ;;  %v1714_v51 = vld [vmem:[%s1916_s24 + $0x384] ss:$16 sps:$4 sm:$0xff]   ;;  %v1716_v54 = vld [vmem:[%s1916_s24 + $0x180] ss:$16 sps:$4 sm:$0xff]   ;;  %v415_v56 = vcombine.high %v1481_v53, %v1481_v53  ;;  %v1994_v10 = vrot.slane %v1481_v53, %v1968_v52  ;;  %v1754_v23 = vld [vmem:[%s1916_s24 + $0xa8] ss:$16 sps:$4 sm:$0xff]  }
  0x2d   : > { %1129 = vmatprep.subr.bf16.mxu1 %v1684_v26  ;;  %v1717_v55 = vld [vmem:[%s1916_s24 + $0x380] ss:$16 sps:$4 sm:$0xff]   ;;  %v1718_v57 = vld [vmem:[%s1916_s24 + $0x164] ss:$16 sps:$4 sm:$0xff]   ;;  %v1757_v24 = vld [vmem:[%s1916_s24 + $0x2a8] ss:$16 sps:$4 sm:$0xff]  }
  0x2e   : > { %v1720_v58 = vld [vmem:[%s1916_s24 + $0x364] ss:$16 sps:$4 sm:$0xff]   ;;  %v429_v59 = vrot.slane %v415_v56, %v1968_v52  ;;  %v1722_v60 = vld [vmem:[%s1916_s24 + $0x160] ss:$16 sps:$4 sm:$0xff]   ;;  %v2001_v14 = vcombine.high %v1994_v10, %v1994_v10  ;;  %v1762_v25 = vld [vmem:[%s1916_s24 + $0x8c] ss:$16 sps:$4 sm:$0xff]  }
  0x2f   : > { %1089 = vmatpush1.bf16.msra.mxu0 %v1686_v27  ;;  %v1723_v61 = vld [vmem:[%s1916_s24 + $0x360] ss:$16 sps:$4 sm:$0xff]   ;;  %v1724_v63 = vld [vmem:[%s1916_s24 + $0x144] ss:$16 sps:$4 sm:$0xff]   ;;  %v1765_v26 = vld [vmem:[%s1916_s24 + $0x28c] ss:$16 sps:$4 sm:$0xff]  }
  0x30   : > { %1130 = vmatpush1.bf16.msra.mxu1 %v1687_v28  ;;  %1090 = vmatprep.subr.bf16.mxu0 %v1688_v29  ;;  %v431_v62 = vcombine.high %v429_v59, %v429_v59  ;;  %v1726_v0 = vld [vmem:[%s1916_s24 + $0x344] ss:$16 sps:$4 sm:$0xff]   ;;  %v1728_v1 = vld [vmem:[%s1916_s24 + $0x140] ss:$16 sps:$4 sm:$0xff]   ;;  %v1760_v27 = vld [vmem:[%s1916_s24 + $0x88] ss:$16 sps:$4 sm:$0xff]  }
  0x31   : > { %1131 = vmatprep.subr.bf16.mxu1 %v1690_v30  ;;  %1108 = vmatprep.mubr.bf16.mxu0 %v429_v59  ;;  %v1729_v2 = vld [vmem:[%s1916_s24 + $0x340] ss:$16 sps:$4 sm:$0xff]   ;;  %v1730_v3 = vld [vmem:[%s1916_s24 + $0x124] ss:$16 sps:$4 sm:$0xff]   ;;  %v1763_v28 = vld [vmem:[%s1916_s24 + $0x288] ss:$16 sps:$4 sm:$0xff]  }
  0x32   : > { %1149 = vmatprep.mubr.bf16.mxu1 %v431_v62  ;;  %v1732_v4 = vld [vmem:[%s1916_s24 + $0x324] ss:$16 sps:$4 sm:$0xff]   ;;  %v1734_v5 = vld [vmem:[%s1916_s24 + $0x120] ss:$16 sps:$4 sm:$0xff]   ;;  %v1768_v29 = vld [vmem:[%s1916_s24 + $0x6c] ss:$16 sps:$4 sm:$0xff]  }
  0x33   : > { %1091 = vmatpush1.bf16.msra.mxu0 %v1692_v31  ;;  %v1735_v6 = vld [vmem:[%s1916_s24 + $0x320] ss:$16 sps:$4 sm:$0xff]   ;;  %v1736_v7 = vld [vmem:[%s1916_s24 + $0x104] ss:$16 sps:$4 sm:$0xff]   ;;  %v1771_v30 = vld [vmem:[%s1916_s24 + $0x26c] ss:$16 sps:$4 sm:$0xff]  }
  0x34   : > { %1132 = vmatpush1.bf16.msra.mxu1 %v1693_v32  ;;  %1092 = vmatprep.subr.bf16.mxu0 %v1694_v33  ;;  %v1738_v8 = vld [vmem:[%s1916_s24 + $0x304] ss:$16 sps:$4 sm:$0xff]   ;;  %v1740_v9 = vld [vmem:[%s1916_s24 + $0x100] ss:$16 sps:$4 sm:$0xff]   ;;  %v1766_v31 = vld [vmem:[%s1916_s24 + $0x68] ss:$16 sps:$4 sm:$0xff]  }
  0x35   : > { %1133 = vmatprep.subr.bf16.mxu1 %v1696_v34  ;;  %v1741_v11 = vld [vmem:[%s1916_s24 + $0x300] ss:$16 sps:$4 sm:$0xff]   ;;  %v1769_v32 = vld [vmem:[%s1916_s24 + $0x268] ss:$16 sps:$4 sm:$0xff]   ;;  %v1774_v33 = vld [vmem:[%s1916_s24 + $0x4c] ss:$16 sps:$4 sm:$0xff]  }
  0x36   : > { %v1777_v34 = vld [vmem:[%s1916_s24 + $0x24c] ss:$16 sps:$4 sm:$0xff]   ;;  %v1796_v53 = vld [vmem:[%s1916_s24 + $0x1c8] ss:$16 sps:$4 sm:$0xff]  }
  0x37   : > { %1093 = vmatpush2.bf16.msra.mxu0 %v1698_v35  ;;  %v1772_v35 = vld [vmem:[%s1916_s24 + $0x48] ss:$16 sps:$4 sm:$0xff]   ;;  %v1807_v56 = vld [vmem:[%s1916_s24 + $0x3ac] ss:$16 sps:$4 sm:$0xff]  }
  0x38   : > { %1134 = vmatpush2.bf16.msra.mxu1 %v1699_v36  ;;  %1094 = vmatprep.subr.bf16.mxu0 %v1700_v37  ;;  %v1775_v36 = vld [vmem:[%s1916_s24 + $0x248] ss:$16 sps:$4 sm:$0xff]   ;;  %v1780_v37 = vld [vmem:[%s1916_s24 + $0x2c] ss:$16 sps:$4 sm:$0xff]  }
  0x39   : > { %1135 = vmatprep.subr.bf16.mxu1 %v1702_v38  ;;  %v1783_v38 = vld [vmem:[%s1916_s24 + $0x22c] ss:$16 sps:$4 sm:$0xff]  }
  0x3b   : > { %1095 = vmatpush2.bf16.msra.mxu0 %v1704_v42  ;;  %v1789_v42 = vld [vmem:[%s1916_s24 + $0x20c] ss:$16 sps:$4 sm:$0xff]  }
  0x3c   : > { %1136 = vmatpush2.bf16.msra.mxu1 %v1705_v43  ;;  %1096 = vmatprep.subr.bf16.mxu0 %v1706_v44  ;;  %v1784_v43 = vld [vmem:[%s1916_s24 + $0x8] ss:$16 sps:$4 sm:$0xff]  }
  0x3d   : > { %1137 = vmatprep.subr.bf16.mxu1 %v1708_v45  ;;  %v1787_v44 = vld [vmem:[%s1916_s24 + $0x208] ss:$16 sps:$4 sm:$0xff]   ;;  %v1792_v45 = vld [vmem:[%s1916_s24 + $0x1ec] ss:$16 sps:$4 sm:$0xff]  }
  0x3f   : > { %1097 = vmatpush2.bf16.msra.mxu0 %v1710_v48  ;;  %v1790_v48 = vld [vmem:[%s1916_s24 + $0x1e8] ss:$16 sps:$4 sm:$0xff]  }
  0x40   : > { %1138 = vmatpush2.bf16.msra.mxu1 %v1711_v49  ;;  %1098 = vmatprep.subr.bf16.mxu0 %v1712_v50  ;;  %v1793_v49 = vld [vmem:[%s1916_s24 + $0x3e8] ss:$16 sps:$4 sm:$0xff]   ;;  %v1798_v50 = vld [vmem:[%s1916_s24 + $0x1cc] ss:$16 sps:$4 sm:$0xff]  }
  0x41   : > { %1139 = vmatprep.subr.bf16.mxu1 %v1714_v51  ;;  %v1801_v51 = vld [vmem:[%s1916_s24 + $0x3cc] ss:$16 sps:$4 sm:$0xff]  }
  0x43   : > { %1099 = vmatpush2.bf16.msra.mxu0 %v1716_v54  ;;  %v1799_v54 = vld [vmem:[%s1916_s24 + $0x3c8] ss:$16 sps:$4 sm:$0xff]  }
  0x44   : > { %1140 = vmatpush2.bf16.msra.mxu1 %v1717_v55  ;;  %1100 = vmatprep.subr.bf16.mxu0 %v1718_v57  ;;  %v1804_v55 = vld [vmem:[%s1916_s24 + $0x1ac] ss:$16 sps:$4 sm:$0xff]   ;;  %v1802_v57 = vld [vmem:[%s1916_s24 + $0x1a8] ss:$16 sps:$4 sm:$0xff]  }
  0x45   : > { %1141 = vmatprep.subr.bf16.mxu1 %v1720_v58  ;;  %v1805_v58 = vld [vmem:[%s1916_s24 + $0x3a8] ss:$16 sps:$4 sm:$0xff]  }
  0x47   : > { %1101 = vmatpush2.bf16.msra.mxu0 %v1722_v60  ;;  %v1813_v60 = vld [vmem:[%s1916_s24 + $0x38c] ss:$16 sps:$4 sm:$0xff]  }
  0x48   : > { %1142 = vmatpush2.bf16.msra.mxu1 %v1723_v61  ;;  %1102 = vmatprep.subr.bf16.mxu0 %v1724_v63  ;;  %v1808_v61 = vld [vmem:[%s1916_s24 + $0x188] ss:$16 sps:$4 sm:$0xff]   ;;  %v1816_v63 = vld [vmem:[%s1916_s24 + $0x16c] ss:$16 sps:$4 sm:$0xff]  }
  0x49   : > { %1143 = vmatprep.subr.bf16.mxu1 %v1726_v0  ;;  %v1819_v0 = vld [vmem:[%s1916_s24 + $0x36c] ss:$16 sps:$4 sm:$0xff]  }
  0x4b   : > { %1103 = vmatpush2.bf16.msra.mxu0 %v1728_v1  ;;  %v1814_v1 = vld [vmem:[%s1916_s24 + $0x168] ss:$16 sps:$4 sm:$0xff]  }
  0x4c   : > { %1144 = vmatpush2.bf16.msra.mxu1 %v1729_v2  ;;  %1104 = vmatprep.subr.bf16.mxu0 %v1730_v3  ;;  %v1817_v2 = vld [vmem:[%s1916_s24 + $0x368] ss:$16 sps:$4 sm:$0xff]   ;;  %v1822_v3 = vld [vmem:[%s1916_s24 + $0x14c] ss:$16 sps:$4 sm:$0xff]  }
  0x4d   : > { %1145 = vmatprep.subr.bf16.mxu1 %v1732_v4  ;;  %v1825_v4 = vld [vmem:[%s1916_s24 + $0x34c] ss:$16 sps:$4 sm:$0xff]  }
  0x4f   : > { %1105 = vmatpush2.bf16.msra.mxu0 %v1734_v5  ;;  %v1820_v5 = vld [vmem:[%s1916_s24 + $0x148] ss:$16 sps:$4 sm:$0xff]  }
  0x50   : > { %1146 = vmatpush2.bf16.msra.mxu1 %v1735_v6  ;;  %1106 = vmatprep.subr.bf16.mxu0 %v1736_v7  ;;  %v1823_v6 = vld [vmem:[%s1916_s24 + $0x348] ss:$16 sps:$4 sm:$0xff]   ;;  %v1828_v7 = vld [vmem:[%s1916_s24 + $0x12c] ss:$16 sps:$4 sm:$0xff]  }
  0x51   : > { %1147 = vmatprep.subr.bf16.mxu1 %v1738_v8  ;;  %v1831_v8 = vld [vmem:[%s1916_s24 + $0x32c] ss:$16 sps:$4 sm:$0xff]  }
  0x53   : > { %1107 = vmatpush2.bf16.msra.mxu0 %v1740_v9  ;;  %v1826_v9 = vld [vmem:[%s1916_s24 + $0x128] ss:$16 sps:$4 sm:$0xff]  }
  0x54   : > { %1148 = vmatpush2.bf16.msra.mxu1 %v1741_v11  ;;  %1158 = vmatprep.subr.bf16.mxu0 %v1744_v12  ;;  %v1829_v11 = vld [vmem:[%s1916_s24 + $0x328] ss:$16 sps:$4 sm:$0xff]   ;;  %v1834_v12 = vld [vmem:[%s1916_s24 + $0x10c] ss:$16 sps:$4 sm:$0xff]  }
  0x55   : > { %1199 = vmatprep.subr.bf16.mxu1 %v1747_v13  ;;  %v1837_v13 = vld [vmem:[%s1916_s24 + $0x30c] ss:$16 sps:$4 sm:$0xff]  }
  0x56   : > { %1109 = vmatmul.mubr.bf16.vlgmr.msra.gmra.mxu0 %v1994_v10 }
  0x57   : > { %1150 = vmatmul.mubr.bf16.vlgmr.msra.gmra.mxu1 %v2001_v14  ;;  %1159 = vmatpush1.bf16.msra.mxu0 %v1742_v15  ;;  %v1832_v15 = vld [vmem:[%s1916_s24 + $0x108] ss:$16 sps:$4 sm:$0xff]  }
  0x58   : > { %1200 = vmatpush1.bf16.msra.mxu1 %v1745_v16  ;;  %1160 = vmatprep.subr.bf16.mxu0 %v1750_v17  ;;  %v1835_v16 = vld [vmem:[%s1916_s24 + $0x308] ss:$16 sps:$4 sm:$0xff]  }
  0x59   : > { %1201 = vmatprep.subr.bf16.mxu1 %v1753_v18  ;;  %1190 = vmatprep.mubr.bf16.mxu0 %v429_v59  ;;  %v1810_v59 = vld [vmem:[%s1916_s24 + $0x18c] ss:$16 sps:$4 sm:$0xff]  }
  0x5a   : > { %1231 = vmatprep.mubr.bf16.mxu1 %v431_v62  ;;  %v1811_v62 = vld [vmem:[%s1916_s24 + $0x388] ss:$16 sps:$4 sm:$0xff]  }
  0x5b   : > { %1161 = vmatpush1.bf16.msra.mxu0 %v1748_v19 }
  0x5c   : > { %1202 = vmatpush1.bf16.msra.mxu1 %v1751_v20  ;;  %1162 = vmatprep.subr.bf16.mxu0 %v1756_v21 }
  0x5d   : > { %1203 = vmatprep.subr.bf16.mxu1 %v1759_v22 }
  0x5f   : > { %1163 = vmatpush1.bf16.msra.mxu0 %v1754_v23 }
  0x60   : > { %1204 = vmatpush1.bf16.msra.mxu1 %v1757_v24  ;;  %1164 = vmatprep.subr.bf16.mxu0 %v1762_v25 }
  0x61   : > { %1205 = vmatprep.subr.bf16.mxu1 %v1765_v26 }
  0x63   : > { %1165 = vmatpush1.bf16.msra.mxu0 %v1760_v27 }
  0x64   : > { %1206 = vmatpush1.bf16.msra.mxu1 %v1763_v28  ;;  %1166 = vmatprep.subr.bf16.mxu0 %v1768_v29  ;;  %v1864_v28 = vmov 1983009808  }
  0x65   : > { %1207 = vmatprep.subr.bf16.mxu1 %v1771_v30  ;;  %v1247_v29 = vunpack.c.l.s4 %v1864_v28 }
  0x67   : > { %1167 = vmatpush1.bf16.msra.mxu0 %v1766_v31  ;;  %v1248_v30 = vunpack.c.0.s8 %v1247_v29 }
  0x68   : > { %1208 = vmatpush1.bf16.msra.mxu1 %v1769_v32  ;;  %1168 = vmatprep.subr.bf16.mxu0 %v1774_v33 }
  0x69   : > { %1209 = vmatprep.subr.bf16.mxu1 %v1777_v34 }
  0x6b   : > { %1169 = vmatpush1.bf16.msra.mxu0 %v1772_v35 }
  0x6c   : > { %1210 = vmatpush1.bf16.msra.mxu1 %v1775_v36  ;;  %1170 = vmatprep.subr.bf16.mxu0 %v1780_v37 }
  0x6d   : > { %1211 = vmatprep.subr.bf16.mxu1 %v1783_v38 }
  0x6f   : > { %1171 = vmatpush1.bf16.msra.mxu0 %v1778_v39 }
  0x70   : > { %1212 = vmatpush1.bf16.msra.mxu1 %v1781_v40  ;;  %1172 = vmatprep.subr.bf16.mxu0 %v1786_v41 }
  0x71   : > { %1213 = vmatprep.subr.bf16.mxu1 %v1789_v42 }
  0x73   : > { %1173 = vmatpush1.bf16.msra.mxu0 %v1784_v43  ;;  %v277_v43 = vld [vmem:[#allocation2] sm:$0xff] }
  0x74   : > { %1214 = vmatpush1.bf16.msra.mxu1 %v1787_v44  ;;  %1174 = vmatprep.subr.bf16.mxu0 %v1792_v45 }
  0x75   : > { %1215 = vmatprep.subr.bf16.mxu1 %v1795_v46 }
  0x77   : > { %1175 = vmatpush2.bf16.msra.mxu0 %v1790_v48 }
  0x78   : > { %1216 = vmatpush2.bf16.msra.mxu1 %v1793_v49  ;;  %1176 = vmatprep.subr.bf16.mxu0 %v1798_v50 }
  0x79   : > { %1217 = vmatprep.subr.bf16.mxu1 %v1801_v51 }
  0x7b   : > { %1177 = vmatpush2.bf16.msra.mxu0 %v1796_v53 }
  0x7c   : > { %1218 = vmatpush2.bf16.msra.mxu1 %v1799_v54  ;;  %1178 = vmatprep.subr.bf16.mxu0 %v1804_v55 }
  0x7d   : > { %1219 = vmatprep.subr.bf16.mxu1 %v1807_v56 }
  0x7f   : > { %1179 = vmatpush2.bf16.msra.mxu0 %v1802_v57 }
  0x80   : > { %1220 = vmatpush2.bf16.msra.mxu1 %v1805_v58  ;;  %1180 = vmatprep.subr.bf16.mxu0 %v1810_v59 }
  0x81   : > { %1221 = vmatprep.subr.bf16.mxu1 %v1813_v60 }
  0x83   : > { %1181 = vmatpush2.bf16.msra.mxu0 %v1808_v61 }
  0x84   : > { %1222 = vmatpush2.bf16.msra.mxu1 %v1811_v62  ;;  %1182 = vmatprep.subr.bf16.mxu0 %v1816_v63 }
  0x85   : > { %1223 = vmatprep.subr.bf16.mxu1 %v1819_v0 }
  0x87   : > { %1183 = vmatpush2.bf16.msra.mxu0 %v1814_v1 }
  0x88   : > { %1224 = vmatpush2.bf16.msra.mxu1 %v1817_v2  ;;  %1184 = vmatprep.subr.bf16.mxu0 %v1822_v3 }
  0x89   : > { %1225 = vmatprep.subr.bf16.mxu1 %v1825_v4 }
  0x8b   : > { %1185 = vmatpush2.bf16.msra.mxu0 %v1820_v5 }
  0x8c   : > { %1226 = vmatpush2.bf16.msra.mxu1 %v1823_v6  ;;  %1186 = vmatprep.subr.bf16.mxu0 %v1828_v7 }
  0x8d   : > { %1227 = vmatprep.subr.bf16.mxu1 %v1831_v8 }
  0x8f   : > { %1187 = vmatpush2.bf16.msra.mxu0 %v1826_v9 }
  0x90   : > { %1228 = vmatpush2.bf16.msra.mxu1 %v1829_v11  ;;  %1188 = vmatprep.subr.bf16.mxu0 %v1834_v12 }
  0x91   : > { %1229 = vmatprep.subr.bf16.mxu1 %v1837_v13 }
  0x93   : > { %1189 = vmatpush2.bf16.msra.mxu0 %v1832_v15 }
  0x94   : > { %1230 = vmatpush2.bf16.msra.mxu1 %v1835_v16 }
  0x96   : > { %1191 = vmatmul.mubr.bf16.vlgmr.msra.gmra.mxu0 %v1994_v10 }
  0x97   : > { %1232 = vmatmul.mubr.bf16.vlgmr.msra.gmra.mxu1 %v2001_v14  ;;  %v1251_v14 = vsub.s32 %v1248_v30, %v1961_v47 }
 0x116   : > { %v1110_v17 = vpop.f32.mrf.mxu0 }
 0x117   : > { %v1151_v18 = vpop.f32.mrf.mxu1 }
 0x118   : > { %v1152_v19 = vadd.f32 %v1151_v18, %v1110_v17  ;;  %v1112_v20 = vpop.f32.mrf.mxu0 }
 0x119   : > { %v1153_v21 = vpop.f32.mrf.mxu1 }
 0x11a   : > { %v1154_v22 = vadd.f32 %v1153_v21, %v1112_v20  ;;  %v1114_v23 = vpop.f32.mrf.mxu0 }
 0x11b   : > { %v1155_v24 = vpop.f32.mrf.mxu1 }
 0x11c   : > { %v1244_v25 = vcombine.low %v1152_v19, %v1154_v22  ;;  %v1115_v26 = vpop.f32.mrf.mxu0 }
 0x11d   : > { %v1156_v27 = vpop.f32.mrf.mxu1 }
 0x11e   : > { %v1252_v41 = vrot.slane %v1244_v25, %v1251_v14 }
 0x156   : > { %v1192_v31 = vpop.f32.mrf.mxu0 }
 0x157   : > { %v1233_v32 = vpop.f32.mrf.mxu1 }
 0x158   : > { %v1194_v33 = vpop.f32.mrf.mxu0  ;;  %v1234_v34 = vadd.f32 %v1233_v32, %v1192_v31 }
 0x159   : > { %v1235_v10 = vpop.f32.mrf.mxu1 }
 0x15a   : > { %v1236_v35 = vadd.f32 %v1235_v10, %v1194_v33  ;;  %v1196_v36 = vpop.f32.mrf.mxu0 }
 0x15b   : > { %v1237_v37 = vpop.f32.mrf.mxu1 }
 0x15c   : > { %v1245_v38 = vcombine.low %v1234_v34, %v1236_v35  ;;  %v1197_v39 = vpop.f32.mrf.mxu0 }
 0x15d   : > { %v1238_v40 = vpop.f32.mrf.mxu1 }
 0x15e   : > { %v1259_v42 = vrot.slane %v1245_v38, %v1251_v14 }
 0x160   : > { %v1260_v44 = vcombine.low %v1252_v41, %v1259_v42  ;;  %1267 = sbr.rel (%p1610_p7) target bundleno = 384 (0x180), region = 40 }
 0x162   : > { %v1262_v45 = vadd.f32 %v1260_v44, %v277_v43 }
 0x164   : > { %1263 = vst [vmem:[#allocation2] sm:$0xff] %v1262_v45 }
 0x165   : > { %v1269_v46 = vld [vmem:[%s2094_s2] sm:$0xf]  ;;  %v1273_v48 = vsub.s32 0, %v1961_v47  ;;  %v1277_v49 = vsub.s32 1, %v1961_v47  ;;  %v1281_v50 = vsub.s32 2, %v1961_v47  ;;  %v1285_v51 = vsub.s32 3, %v1961_v47 }
 0x167   : > { %v1274_v53 = vrot.slane %v1269_v46, %v1273_v48  ;;  %v1278_v54 = vrot.slane %v1269_v46, %v1277_v49  ;;  %v1282_v55 = vrot.slane %v1269_v46, %v1281_v50  ;;  %v1286_v56 = vrot.slane %v1269_v46, %v1285_v51 }
 0x169   : > { %v1287_v57 = vcombine.low %v1274_v53, %v1278_v54  ;;  %v1288_v58 = vcombine.low %v1282_v55, %v1286_v56 }
 0x16b   : > { %v1295_v59 = vrot.slane %v1287_v57, %v1251_v14  ;;  %v1302_v60 = vrot.slane %v1288_v58, %v1251_v14  ;;  %v1268_v61 = vld [vmem:[#allocation2] sm:$0xff] }
 0x16d   : > { %v1303_v62 = vcombine.low %v1295_v59, %v1302_v60 }
 0x16f   : > { %v1305_v63 = vadd.f32 %v1303_v62, %v1268_v61 }
 0x171   : > { %v1306_v0 = vmax.f32 %v1305_v63, 0.0 }
 0x173   : > { %v1308_v1 = vcombine.high %v1306_v0, %v1306_v0  ;;  %v1315_v2 = vrot.slane %v1306_v0, %v1251_v14 }
 0x175   : > { %v1322_v3 = vrot.slane %v1308_v1, %v1251_v14  ;;  %v1323_v4 = vcombine.high %v1315_v2, %v1315_v2 }
 0x177   : > { %v1324_v5 = vcombine.high %v1322_v3, %v1322_v3  ;;  %v1611_v6 = vpack.c.bf16 %v1323_v4, %v1315_v2 }
 0x179   : > { %v1612_v7 = vpack.c.bf16 %v1324_v5, %v1322_v3  ;;  %v1345_v47 = vrot.slane %v1611_v6, %v1968_v52 }
 0x17b   : > { %v1352_v8 = vrot.slane %v1612_v7, %v1968_v52 }
 0x17d   : > { %v1353_v9 = vcombine.low %v1345_v47, %v1352_v8 }
 0x17f   : > { %1613 = vst.sshfl [vmem:[%s2095_s3] sm:$0x55 pattern:$0x73625140] %v1353_v9 }
 0x180 PF: > { %s13_s14 = sadd.s32 1, %s1860_s14   ;;  %s2096_s12 = smov %s1856_s13 }
 0x181   : > { %p10_p8 = scmp.ge.s32.totalorder %s13_s14, 4   ;;  %s2097_s13 = smov %s2099_s15 }
 0x183   :  { %12 = sbr.rel (!%p10_p8) target bundleno = 2 (0x2), region = 76 }

// kernel: depth_aware_resnet_forward.34
= control target key start
LH: loop header
LB: loop body
LE: loop exit
PB: predicated region body
PF: predicated region fallthrough
CT: control target
= control target key end

     0   :  { %s2178_s12 = smov 0   ;;  %s2180_s13 = smov 0   ;;  %s2682_s0 = inlined_call_operand.vmem [shape: bf16[2,512], index: 0, kind: input, shape index: {}]   ;;  %s2683_s1 = inlined_call_operand.vmem [shape: bf16[512,1024], index: 1, kind: input, shape index: {}]   ;;  %s2684_s2 = inlined_call_operand.vmem [shape: f32[1,1024], index: 2, kind: input, shape index: {}]   ;;  %s2685_s3 = inlined_call_operand.vmem [shape: bf16[2,1024], index: 3, kind: output, shape index: {}]  }
   0x1   :  { %s2182_s14 = smov 0   ;;  %s2184_s15 = smov 0  }
   0x2   :  { %s2186_s16 = smov 0  }
   0x3 LB: > { %s28_s17 = sadd.s32 1, %s2150_s15  ;;  %p76_p1 = scmp.ne.s32.totalorder %s2142_s13, %s2138_s12  ;;  %s2154_s16 = sphi %s2186_s16, %s13_s16   ;;  %s2150_s15 = sphi %s2184_s15, %s2689_s15   ;;  %s2146_s14 = sphi %s2182_s14, %s2688_s14   ;;  %s2142_s13 = sphi %s2180_s13, %s2687_s13   ;;  %s2138_s12 = sphi %s2178_s12, %s2686_s12  }
   0x4   : > { %p30_p0 = scmp.ge.s32.totalorder %s28_s17, 2  ;;  %p77_p2 = scmp.eq.s32.totalorder %s2154_s16, 0 }
   0x5   : > { %s69_s19 = sadd.s32 1, %s2142_s13  ;;  %p1739_p5 = scmp.ge.s32.totalorder %s2154_s16, 2 }
   0x6   : > { %s2691_s17 = smov (%p30_p0, %s28_s17), 0  ;;  %p78_p3 = por %p77_p2, %p76_p1 }
   0x7   : > { %s65_s18 = ssub.s32 %s2150_s15, %s2691_s17  ;;  %168 = sbr.rel (%p1739_p5) target bundleno = 80 (0x50), region = 20 }
   0x8   : > { %p67_p4 = scmp.eq.s32.totalorder %s65_s18, 0 }
   0xa   : > { %s2213_s20 = scalar_select %p67_p4, %s2142_s13, %s69_s19  }
   0xc   : > { %171 = sbr.rel (!%p78_p3) target bundleno = 80 (0x50), region = 24  ;;  %s173_s21 = sand.u32 (%p78_p3), 1, %s2142_s13  }
   0xd   : > { %s1881_s22 = sshll.u32 (%p78_p3), %s2150_s15, 4  ;;  %s1740_s23 = sshll.u32 (%p78_p3), %s173_s21, 10 }
   0xe   : > { %s2221_s26 = scalar_lea.vmem (%p78_p3), %s2683_s1, %s1881_s22  ;;  %s2226_s27 = scalar_lea.vmem (%p78_p3), [#allocation3], %s1740_s23 }
   0xf   : > { %v194_v0 = vld [vmem:[%s2221_s26] sm:$0xff] (%p78_p3)  ;;  %v196_v1 = vld [vmem:[%s2221_s26 + $0x8] sm:$0xff] (%p78_p3) }
  0x10   : > { %v198_v2 = vld [vmem:[%s2221_s26 + $0x20] sm:$0xff] (%p78_p3)  ;;  %195 = vst [vmem:[%s2226_s27] sm:$0xff] (%p78_p3), %v194_v0  ;;  %197 = vst [vmem:[%s2226_s27 + $0x8] sm:$0xff] (%p78_p3), %v196_v1  ;;  %v200_v3 = vld [vmem:[%s2221_s26 + $0x28] sm:$0xff] (%p78_p3) }
  0x11   : > { %199 = vst [vmem:[%s2226_s27 + $0x10] sm:$0xff] %v198_v2  ;;  %v202_v4 = vld [vmem:[%s2221_s26 + $0x40] sm:$0xff]  ;;  %v204_v5 = vld [vmem:[%s2221_s26 + $0x48] sm:$0xff]  ;;  %201 = vst [vmem:[%s2226_s27 + $0x18] sm:$0xff] %v200_v3 }
  0x12   : > { %203 = vst [vmem:[%s2226_s27 + $0x20] sm:$0xff] %v202_v4  ;;  %205 = vst [vmem:[%s2226_s27 + $0x28] sm:$0xff] %v204_v5  ;;  %v206_v6 = vld [vmem:[%s2221_s26 + $0x60] sm:$0xff]  ;;  %v208_v7 = vld [vmem:[%s2221_s26 + $0x68] sm:$0xff] }
  0x13   : > { %v210_v8 = vld [vmem:[%s2221_s26 + $0x80] sm:$0xff]  ;;  %207 = vst [vmem:[%s2226_s27 + $0x30] sm:$0xff] %v206_v6  ;;  %209 = vst [vmem:[%s2226_s27 + $0x38] sm:$0xff] %v208_v7  ;;  %v212_v9 = vld [vmem:[%s2221_s26 + $0x88] sm:$0xff] }
  0x14   : > { %211 = vst [vmem:[%s2226_s27 + $0x40] sm:$0xff] %v210_v8  ;;  %v214_v10 = vld [vmem:[%s2221_s26 + $0xa0] sm:$0xff]  ;;  %v216_v11 = vld [vmem:[%s2221_s26 + $0xa8] sm:$0xff]  ;;  %213 = vst [vmem:[%s2226_s27 + $0x48] sm:$0xff] %v212_v9 }
  0x15   : > { %215 = vst [vmem:[%s2226_s27 + $0x50] sm:$0xff] %v214_v10  ;;  %217 = vst [vmem:[%s2226_s27 + $0x58] sm:$0xff] %v216_v11  ;;  %v218_v12 = vld [vmem:[%s2221_s26 + $0xc0] sm:$0xff]  ;;  %v220_v13 = vld [vmem:[%s2221_s26 + $0xc8] sm:$0xff] }
  0x16   : > { %v222_v14 = vld [vmem:[%s2221_s26 + $0xe0] sm:$0xff]  ;;  %219 = vst [vmem:[%s2226_s27 + $0x60] sm:$0xff] %v218_v12  ;;  %221 = vst [vmem:[%s2226_s27 + $0x68] sm:$0xff] %v220_v13  ;;  %v224_v15 = vld [vmem:[%s2221_s26 + $0xe8] sm:$0xff] }
  0x17   : > { %223 = vst [vmem:[%s2226_s27 + $0x70] sm:$0xff] %v222_v14  ;;  %v226_v16 = vld [vmem:[%s2221_s26 + $0x100] sm:$0xff]  ;;  %v228_v17 = vld [vmem:[%s2221_s26 + $0x108] sm:$0xff]  ;;  %225 = vst [vmem:[%s2226_s27 + $0x78] sm:$0xff] %v224_v15 }
  0x18   : > { %227 = vst [vmem:[%s2226_s27 + $0x80] sm:$0xff] %v226_v16  ;;  %229 = vst [vmem:[%s2226_s27 + $0x88] sm:$0xff] %v228_v17  ;;  %v230_v18 = vld [vmem:[%s2221_s26 + $0x120] sm:$0xff]  ;;  %v232_v19 = vld [vmem:[%s2221_s26 + $0x128] sm:$0xff] }
  0x19   : > { %v234_v20 = vld [vmem:[%s2221_s26 + $0x140] sm:$0xff]  ;;  %231 = vst [vmem:[%s2226_s27 + $0x90] sm:$0xff] %v230_v18  ;;  %233 = vst [vmem:[%s2226_s27 + $0x98] sm:$0xff] %v232_v19  ;;  %v236_v21 = vld [vmem:[%s2221_s26 + $0x148] sm:$0xff] }
  0x1a   : > { %235 = vst [vmem:[%s2226_s27 + $0xa0] sm:$0xff] %v234_v20  ;;  %v238_v22 = vld [vmem:[%s2221_s26 + $0x160] sm:$0xff]  ;;  %v240_v23 = vld [vmem:[%s2221_s26 + $0x168] sm:$0xff]  ;;  %237 = vst [vmem:[%s2226_s27 + $0xa8] sm:$0xff] %v236_v21 }
  0x1b   : > { %239 = vst [vmem:[%s2226_s27 + $0xb0] sm:$0xff] %v238_v22  ;;  %241 = vst [vmem:[%s2226_s27 + $0xb8] sm:$0xff] %v240_v23  ;;  %v242_v24 = vld [vmem:[%s2221_s26 + $0x180] sm:$0xff]  ;;  %v244_v25 = vld [vmem:[%s2221_s26 + $0x188] sm:$0xff] }
  0x1c   : > { %v246_v26 = vld [vmem:[%s2221_s26 + $0x1a0] sm:$0xff]  ;;  %243 = vst [vmem:[%s2226_s27 + $0xc0] sm:$0xff] %v242_v24  ;;  %245 = vst [vmem:[%s2226_s27 + $0xc8] sm:$0xff] %v244_v25  ;;  %v248_v27 = vld [vmem:[%s2221_s26 + $0x1a8] sm:$0xff] }
  0x1d   : > { %247 = vst [vmem:[%s2226_s27 + $0xd0] sm:$0xff] %v246_v26  ;;  %v250_v28 = vld [vmem:[%s2221_s26 + $0x1c0] sm:$0xff]  ;;  %v252_v29 = vld [vmem:[%s2221_s26 + $0x1c8] sm:$0xff]  ;;  %249 = vst [vmem:[%s2226_s27 + $0xd8] sm:$0xff] %v248_v27 }
  0x1e   : > { %251 = vst [vmem:[%s2226_s27 + $0xe0] sm:$0xff] %v250_v28  ;;  %253 = vst [vmem:[%s2226_s27 + $0xe8] sm:$0xff] %v252_v29  ;;  %v254_v30 = vld [vmem:[%s2221_s26 + $0x1e0] sm:$0xff]  ;;  %v256_v31 = vld [vmem:[%s2221_s26 + $0x1e8] sm:$0xff] }
  0x1f   : > { %v258_v32 = vld [vmem:[%s2221_s26 + $0x200] sm:$0xff]  ;;  %255 = vst [vmem:[%s2226_s27 + $0xf0] sm:$0xff] %v254_v30  ;;  %257 = vst [vmem:[%s2226_s27 + $0xf8] sm:$0xff] %v256_v31  ;;  %v260_v33 = vld [vmem:[%s2221_s26 + $0x208] sm:$0xff] }
  0x20   : > { %259 = vst [vmem:[%s2226_s27 + $0x100] sm:$0xff] %v258_v32  ;;  %v262_v34 = vld [vmem:[%s2221_s26 + $0x220] sm:$0xff]  ;;  %v264_v35 = vld [vmem:[%s2221_s26 + $0x228] sm:$0xff]  ;;  %261 = vst [vmem:[%s2226_s27 + $0x108] sm:$0xff] %v260_v33 }
  0x21   : > { %263 = vst [vmem:[%s2226_s27 + $0x110] sm:$0xff] %v262_v34  ;;  %265 = vst [vmem:[%s2226_s27 + $0x118] sm:$0xff] %v264_v35  ;;  %v266_v36 = vld [vmem:[%s2221_s26 + $0x240] sm:$0xff]  ;;  %v268_v37 = vld [vmem:[%s2221_s26 + $0x248] sm:$0xff] }
  0x22   : > { %v270_v38 = vld [vmem:[%s2221_s26 + $0x260] sm:$0xff]  ;;  %267 = vst [vmem:[%s2226_s27 + $0x120] sm:$0xff] %v266_v36  ;;  %269 = vst [vmem:[%s2226_s27 + $0x128] sm:$0xff] %v268_v37  ;;  %v272_v39 = vld [vmem:[%s2221_s26 + $0x268] sm:$0xff] }
  0x23   : > { %271 = vst [vmem:[%s2226_s27 + $0x130] sm:$0xff] %v270_v38  ;;  %v274_v40 = vld [vmem:[%s2221_s26 + $0x280] sm:$0xff]  ;;  %v276_v41 = vld [vmem:[%s2221_s26 + $0x288] sm:$0xff]  ;;  %273 = vst [vmem:[%s2226_s27 + $0x138] sm:$0xff] %v272_v39 }
  0x24   : > { %275 = vst [vmem:[%s2226_s27 + $0x140] sm:$0xff] %v274_v40  ;;  %277 = vst [vmem:[%s2226_s27 + $0x148] sm:$0xff] %v276_v41  ;;  %v278_v42 = vld [vmem:[%s2221_s26 + $0x2a0] sm:$0xff]  ;;  %v280_v43 = vld [vmem:[%s2221_s26 + $0x2a8] sm:$0xff] }
  0x25   : > { %v282_v44 = vld [vmem:[%s2221_s26 + $0x2c0] sm:$0xff]  ;;  %279 = vst [vmem:[%s2226_s27 + $0x150] sm:$0xff] %v278_v42  ;;  %281 = vst [vmem:[%s2226_s27 + $0x158] sm:$0xff] %v280_v43  ;;  %v284_v45 = vld [vmem:[%s2221_s26 + $0x2c8] sm:$0xff] }
  0x26   : > { %283 = vst [vmem:[%s2226_s27 + $0x160] sm:$0xff] %v282_v44  ;;  %v286_v46 = vld [vmem:[%s2221_s26 + $0x2e0] sm:$0xff]  ;;  %v288_v47 = vld [vmem:[%s2221_s26 + $0x2e8] sm:$0xff]  ;;  %285 = vst [vmem:[%s2226_s27 + $0x168] sm:$0xff] %v284_v45 }
  0x27   : > { %287 = vst [vmem:[%s2226_s27 + $0x170] sm:$0xff] %v286_v46  ;;  %289 = vst [vmem:[%s2226_s27 + $0x178] sm:$0xff] %v288_v47  ;;  %v290_v48 = vld [vmem:[%s2221_s26 + $0x300] sm:$0xff]  ;;  %v292_v49 = vld [vmem:[%s2221_s26 + $0x308] sm:$0xff] }
  0x28   : > { %v294_v50 = vld [vmem:[%s2221_s26 + $0x320] sm:$0xff]  ;;  %291 = vst [vmem:[%s2226_s27 + $0x180] sm:$0xff] %v290_v48  ;;  %293 = vst [vmem:[%s2226_s27 + $0x188] sm:$0xff] %v292_v49  ;;  %v296_v51 = vld [vmem:[%s2221_s26 + $0x328] sm:$0xff] }
  0x29   : > { %295 = vst [vmem:[%s2226_s27 + $0x190] sm:$0xff] %v294_v50  ;;  %v298_v52 = vld [vmem:[%s2221_s26 + $0x340] sm:$0xff]  ;;  %v300_v53 = vld [vmem:[%s2221_s26 + $0x348] sm:$0xff]  ;;  %297 = vst [vmem:[%s2226_s27 + $0x198] sm:$0xff] %v296_v51 }
  0x2a   : > { %299 = vst [vmem:[%s2226_s27 + $0x1a0] sm:$0xff] %v298_v52  ;;  %301 = vst [vmem:[%s2226_s27 + $0x1a8] sm:$0xff] %v300_v53  ;;  %v302_v54 = vld [vmem:[%s2221_s26 + $0x360] sm:$0xff]  ;;  %v304_v55 = vld [vmem:[%s2221_s26 + $0x368] sm:$0xff] }
  0x2b   : > { %v306_v56 = vld [vmem:[%s2221_s26 + $0x380] sm:$0xff]  ;;  %303 = vst [vmem:[%s2226_s27 + $0x1b0] sm:$0xff] %v302_v54  ;;  %305 = vst [vmem:[%s2226_s27 + $0x1b8] sm:$0xff] %v304_v55  ;;  %v308_v57 = vld [vmem:[%s2221_s26 + $0x388] sm:$0xff] }
  0x2c   : > { %307 = vst [vmem:[%s2226_s27 + $0x1c0] sm:$0xff] %v306_v56  ;;  %v310_v58 = vld [vmem:[%s2221_s26 + $0x3a0] sm:$0xff]  ;;  %v312_v59 = vld [vmem:[%s2221_s26 + $0x3a8] sm:$0xff]  ;;  %309 = vst [vmem:[%s2226_s27 + $0x1c8] sm:$0xff] %v308_v57 }
  0x2d   : > { %311 = vst [vmem:[%s2226_s27 + $0x1d0] sm:$0xff] %v310_v58  ;;  %313 = vst [vmem:[%s2226_s27 + $0x1d8] sm:$0xff] %v312_v59  ;;  %v314_v60 = vld [vmem:[%s2221_s26 + $0x3c0] sm:$0xff]  ;;  %v316_v61 = vld [vmem:[%s2221_s26 + $0x3c8] sm:$0xff] }
  0x2e   : > { %v318_v62 = vld [vmem:[%s2221_s26 + $0x3e0] sm:$0xff]  ;;  %315 = vst [vmem:[%s2226_s27 + $0x1e0] sm:$0xff] %v314_v60  ;;  %317 = vst [vmem:[%s2226_s27 + $0x1e8] sm:$0xff] %v316_v61  ;;  %v320_v63 = vld [vmem:[%s2221_s26 + $0x3e8] sm:$0xff] }
  0x2f   : > { %319 = vst [vmem:[%s2226_s27 + $0x1f0] sm:$0xff] %v318_v62  ;;  %v322_v0 = vld [vmem:[%s2221_s26 + $0x400] sm:$0xff]  ;;  %v324_v1 = vld [vmem:[%s2221_s26 + $0x408] sm:$0xff]  ;;  %321 = vst [vmem:[%s2226_s27 + $0x1f8] sm:$0xff] %v320_v63 }
  0x30   : > { %323 = vst [vmem:[%s2226_s27 + $0x200] sm:$0xff] %v322_v0  ;;  %325 = vst [vmem:[%s2226_s27 + $0x208] sm:$0xff] %v324_v1  ;;  %v326_v2 = vld [vmem:[%s2221_s26 + $0x420] sm:$0xff]  ;;  %v328_v3 = vld [vmem:[%s2221_s26 + $0x428] sm:$0xff] }
  0x31   : > { %v330_v4 = vld [vmem:[%s2221_s26 + $0x440] sm:$0xff]  ;;  %327 = vst [vmem:[%s2226_s27 + $0x210] sm:$0xff] %v326_v2  ;;  %329 = vst [vmem:[%s2226_s27 + $0x218] sm:$0xff] %v328_v3  ;;  %v332_v5 = vld [vmem:[%s2221_s26 + $0x448] sm:$0xff] }
  0x32   : > { %331 = vst [vmem:[%s2226_s27 + $0x220] sm:$0xff] %v330_v4  ;;  %v334_v6 = vld [vmem:[%s2221_s26 + $0x460] sm:$0xff]  ;;  %v336_v7 = vld [vmem:[%s2221_s26 + $0x468] sm:$0xff]  ;;  %333 = vst [vmem:[%s2226_s27 + $0x228] sm:$0xff] %v332_v5 }
  0x33   : > { %335 = vst [vmem:[%s2226_s27 + $0x230] sm:$0xff] %v334_v6  ;;  %337 = vst [vmem:[%s2226_s27 + $0x238] sm:$0xff] %v336_v7  ;;  %v338_v8 = vld [vmem:[%s2221_s26 + $0x480] sm:$0xff]  ;;  %v340_v9 = vld [vmem:[%s2221_s26 + $0x488] sm:$0xff] }
  0x34   : > { %v342_v10 = vld [vmem:[%s2221_s26 + $0x4a0] sm:$0xff]  ;;  %339 = vst [vmem:[%s2226_s27 + $0x240] sm:$0xff] %v338_v8  ;;  %341 = vst [vmem:[%s2226_s27 + $0x248] sm:$0xff] %v340_v9  ;;  %v344_v11 = vld [vmem:[%s2221_s26 + $0x4a8] sm:$0xff] }
  0x35   : > { %343 = vst [vmem:[%s2226_s27 + $0x250] sm:$0xff] %v342_v10  ;;  %v346_v12 = vld [vmem:[%s2221_s26 + $0x4c0] sm:$0xff]  ;;  %v348_v13 = vld [vmem:[%s2221_s26 + $0x4c8] sm:$0xff]  ;;  %345 = vst [vmem:[%s2226_s27 + $0x258] sm:$0xff] %v344_v11 }
  0x36   : > { %347 = vst [vmem:[%s2226_s27 + $0x260] sm:$0xff] %v346_v12  ;;  %349 = vst [vmem:[%s2226_s27 + $0x268] sm:$0xff] %v348_v13  ;;  %v350_v14 = vld [vmem:[%s2221_s26 + $0x4e0] sm:$0xff]  ;;  %v352_v15 = vld [vmem:[%s2221_s26 + $0x4e8] sm:$0xff] }
  0x37   : > { %v354_v16 = vld [vmem:[%s2221_s26 + $0x500] sm:$0xff]  ;;  %351 = vst [vmem:[%s2226_s27 + $0x270] sm:$0xff] %v350_v14  ;;  %353 = vst [vmem:[%s2226_s27 + $0x278] sm:$0xff] %v352_v15  ;;  %v356_v17 = vld [vmem:[%s2221_s26 + $0x508] sm:$0xff] }
  0x38   : > { %355 = vst [vmem:[%s2226_s27 + $0x280] sm:$0xff] %v354_v16  ;;  %v358_v18 = vld [vmem:[%s2221_s26 + $0x520] sm:$0xff]  ;;  %v360_v19 = vld [vmem:[%s2221_s26 + $0x528] sm:$0xff]  ;;  %357 = vst [vmem:[%s2226_s27 + $0x288] sm:$0xff] %v356_v17 }
  0x39   : > { %359 = vst [vmem:[%s2226_s27 + $0x290] sm:$0xff] %v358_v18  ;;  %361 = vst [vmem:[%s2226_s27 + $0x298] sm:$0xff] %v360_v19  ;;  %v362_v20 = vld [vmem:[%s2221_s26 + $0x540] sm:$0xff]  ;;  %v364_v21 = vld [vmem:[%s2221_s26 + $0x548] sm:$0xff] }
  0x3a   : > { %v366_v22 = vld [vmem:[%s2221_s26 + $0x560] sm:$0xff]  ;;  %363 = vst [vmem:[%s2226_s27 + $0x2a0] sm:$0xff] %v362_v20  ;;  %365 = vst [vmem:[%s2226_s27 + $0x2a8] sm:$0xff] %v364_v21  ;;  %v368_v23 = vld [vmem:[%s2221_s26 + $0x568] sm:$0xff] }
  0x3b   : > { %367 = vst [vmem:[%s2226_s27 + $0x2b0] sm:$0xff] %v366_v22  ;;  %v370_v24 = vld [vmem:[%s2221_s26 + $0x580] sm:$0xff]  ;;  %v372_v25 = vld [vmem:[%s2221_s26 + $0x588] sm:$0xff]  ;;  %369 = vst [vmem:[%s2226_s27 + $0x2b8] sm:$0xff] %v368_v23 }
  0x3c   : > { %371 = vst [vmem:[%s2226_s27 + $0x2c0] sm:$0xff] %v370_v24  ;;  %373 = vst [vmem:[%s2226_s27 + $0x2c8] sm:$0xff] %v372_v25  ;;  %v374_v26 = vld [vmem:[%s2221_s26 + $0x5a0] sm:$0xff]  ;;  %v376_v27 = vld [vmem:[%s2221_s26 + $0x5a8] sm:$0xff] }
  0x3d   : > { %v378_v28 = vld [vmem:[%s2221_s26 + $0x5c0] sm:$0xff]  ;;  %375 = vst [vmem:[%s2226_s27 + $0x2d0] sm:$0xff] %v374_v26  ;;  %377 = vst [vmem:[%s2226_s27 + $0x2d8] sm:$0xff] %v376_v27  ;;  %v380_v29 = vld [vmem:[%s2221_s26 + $0x5c8] sm:$0xff] }
  0x3e   : > { %379 = vst [vmem:[%s2226_s27 + $0x2e0] sm:$0xff] %v378_v28  ;;  %v382_v30 = vld [vmem:[%s2221_s26 + $0x5e0] sm:$0xff]  ;;  %v384_v31 = vld [vmem:[%s2221_s26 + $0x5e8] sm:$0xff]  ;;  %381 = vst [vmem:[%s2226_s27 + $0x2e8] sm:$0xff] %v380_v29 }
  0x3f   : > { %383 = vst [vmem:[%s2226_s27 + $0x2f0] sm:$0xff] %v382_v30  ;;  %385 = vst [vmem:[%s2226_s27 + $0x2f8] sm:$0xff] %v384_v31  ;;  %v386_v32 = vld [vmem:[%s2221_s26 + $0x600] sm:$0xff]  ;;  %v388_v33 = vld [vmem:[%s2221_s26 + $0x608] sm:$0xff] }
  0x40   : > { %v390_v34 = vld [vmem:[%s2221_s26 + $0x620] sm:$0xff]  ;;  %387 = vst [vmem:[%s2226_s27 + $0x300] sm:$0xff] %v386_v32  ;;  %389 = vst [vmem:[%s2226_s27 + $0x308] sm:$0xff] %v388_v33  ;;  %v392_v35 = vld [vmem:[%s2221_s26 + $0x628] sm:$0xff] }
  0x41   : > { %391 = vst [vmem:[%s2226_s27 + $0x310] sm:$0xff] %v390_v34  ;;  %v394_v36 = vld [vmem:[%s2221_s26 + $0x640] sm:$0xff]  ;;  %v396_v37 = vld [vmem:[%s2221_s26 + $0x648] sm:$0xff]  ;;  %393 = vst [vmem:[%s2226_s27 + $0x318] sm:$0xff] %v392_v35 }
  0x42   : > { %395 = vst [vmem:[%s2226_s27 + $0x320] sm:$0xff] %v394_v36  ;;  %397 = vst [vmem:[%s2226_s27 + $0x328] sm:$0xff] %v396_v37  ;;  %v398_v38 = vld [vmem:[%s2221_s26 + $0x660] sm:$0xff]  ;;  %v400_v39 = vld [vmem:[%s2221_s26 + $0x668] sm:$0xff] }
  0x43   : > { %v402_v40 = vld [vmem:[%s2221_s26 + $0x680] sm:$0xff]  ;;  %399 = vst [vmem:[%s2226_s27 + $0x330] sm:$0xff] %v398_v38  ;;  %401 = vst [vmem:[%s2226_s27 + $0x338] sm:$0xff] %v400_v39  ;;  %v404_v41 = vld [vmem:[%s2221_s26 + $0x688] sm:$0xff] }
  0x44   : > { %403 = vst [vmem:[%s2226_s27 + $0x340] sm:$0xff] %v402_v40  ;;  %v406_v42 = vld [vmem:[%s2221_s26 + $0x6a0] sm:$0xff]  ;;  %v408_v43 = vld [vmem:[%s2221_s26 + $0x6a8] sm:$0xff]  ;;  %405 = vst [vmem:[%s2226_s27 + $0x348] sm:$0xff] %v404_v41 }
  0x45   : > { %407 = vst [vmem:[%s2226_s27 + $0x350] sm:$0xff] %v406_v42  ;;  %409 = vst [vmem:[%s2226_s27 + $0x358] sm:$0xff] %v408_v43  ;;  %v410_v44 = vld [vmem:[%s2221_s26 + $0x6c0] sm:$0xff]  ;;  %v412_v45 = vld [vmem:[%s2221_s26 + $0x6c8] sm:$0xff] }
  0x46   : > { %v414_v46 = vld [vmem:[%s2221_s26 + $0x6e0] sm:$0xff]  ;;  %411 = vst [vmem:[%s2226_s27 + $0x360] sm:$0xff] %v410_v44  ;;  %413 = vst [vmem:[%s2226_s27 + $0x368] sm:$0xff] %v412_v45  ;;  %v416_v47 = vld [vmem:[%s2221_s26 + $0x6e8] sm:$0xff] }
  0x47   : > { %415 = vst [vmem:[%s2226_s27 + $0x370] sm:$0xff] %v414_v46  ;;  %v418_v48 = vld [vmem:[%s2221_s26 + $0x700] sm:$0xff]  ;;  %v420_v49 = vld [vmem:[%s2221_s26 + $0x708] sm:$0xff]  ;;  %417 = vst [vmem:[%s2226_s27 + $0x378] sm:$0xff] %v416_v47 }
  0x48   : > { %419 = vst [vmem:[%s2226_s27 + $0x380] sm:$0xff] %v418_v48  ;;  %421 = vst [vmem:[%s2226_s27 + $0x388] sm:$0xff] %v420_v49  ;;  %v422_v50 = vld [vmem:[%s2221_s26 + $0x720] sm:$0xff]  ;;  %v424_v51 = vld [vmem:[%s2221_s26 + $0x728] sm:$0xff] }
  0x49   : > { %v426_v52 = vld [vmem:[%s2221_s26 + $0x740] sm:$0xff]  ;;  %423 = vst [vmem:[%s2226_s27 + $0x390] sm:$0xff] %v422_v50  ;;  %425 = vst [vmem:[%s2226_s27 + $0x398] sm:$0xff] %v424_v51  ;;  %v428_v53 = vld [vmem:[%s2221_s26 + $0x748] sm:$0xff] }
  0x4a   : > { %427 = vst [vmem:[%s2226_s27 + $0x3a0] sm:$0xff] %v426_v52  ;;  %v430_v54 = vld [vmem:[%s2221_s26 + $0x760] sm:$0xff]  ;;  %v432_v55 = vld [vmem:[%s2221_s26 + $0x768] sm:$0xff]  ;;  %429 = vst [vmem:[%s2226_s27 + $0x3a8] sm:$0xff] %v428_v53 }
  0x4b   : > { %431 = vst [vmem:[%s2226_s27 + $0x3b0] sm:$0xff] %v430_v54  ;;  %433 = vst [vmem:[%s2226_s27 + $0x3b8] sm:$0xff] %v432_v55  ;;  %v434_v56 = vld [vmem:[%s2221_s26 + $0x780] sm:$0xff]  ;;  %v436_v57 = vld [vmem:[%s2221_s26 + $0x788] sm:$0xff] }
  0x4c   : > { %v438_v58 = vld [vmem:[%s2221_s26 + $0x7a0] sm:$0xff]  ;;  %435 = vst [vmem:[%s2226_s27 + $0x3c0] sm:$0xff] %v434_v56  ;;  %437 = vst [vmem:[%s2226_s27 + $0x3c8] sm:$0xff] %v436_v57  ;;  %v440_v59 = vld [vmem:[%s2221_s26 + $0x7a8] sm:$0xff] }
  0x4d   : > { %439 = vst [vmem:[%s2226_s27 + $0x3d0] sm:$0xff] %v438_v58  ;;  %v442_v60 = vld [vmem:[%s2221_s26 + $0x7c0] sm:$0xff]  ;;  %v444_v61 = vld [vmem:[%s2221_s26 + $0x7c8] sm:$0xff]  ;;  %441 = vst [vmem:[%s2226_s27 + $0x3d8] sm:$0xff] %v440_v59 }
  0x4e   : > { %443 = vst [vmem:[%s2226_s27 + $0x3e0] sm:$0xff] %v442_v60  ;;  %445 = vst [vmem:[%s2226_s27 + $0x3e8] sm:$0xff] %v444_v61  ;;  %v446_v62 = vld [vmem:[%s2221_s26 + $0x7e0] sm:$0xff]  ;;  %v448_v63 = vld [vmem:[%s2221_s26 + $0x7e8] sm:$0xff] }
  0x4f   : > { %447 = vst [vmem:[%s2226_s27 + $0x3f0] sm:$0xff] %v446_v62  ;;  %449 = vst [vmem:[%s2226_s27 + $0x3f8] sm:$0xff] %v448_v63 }
  0x50 PF: > { %p1743_p6 = scmp.ge.s32.totalorder %s2154_s16, 1  ;;  %p462_p7 = scmp.lt.s32.totalorder %s2154_s16, 3 }
  0x52   : > { %p463_p8 = pnand %p1743_p6, %p462_p7 }
  0x53   : > { %s469_s28 = sand.u32 (!%p463_p8), 1, %s2138_s12   ;;  %s1745_s6 = sshll.u32 (!%p463_p8), %s2146_s14, 2 }
  0x54   : > { %466 = sbr.rel (%p463_p8) target bundleno = 438 (0x1b6), region = 51  ;;  %s1744_s4 = sshll.u32 (!%p463_p8), %s469_s28, 10 }
  0x55   : > { %s2491_s5 = scalar_lea.vmem (!%p463_p8), [#allocation3], %s1744_s4  ;;  %p519_p9 = scmp.lt.s32.totalorder (!%p463_p8), %s1745_s6, 7 }
  0x59   : > { %v2487_v0 = vld.sshfl [vmem:[%s2682_s0] sm:$0x33 pattern:$0x75316420]  ;;  %v679_v1 = vlaneseq  ;;  %v2156_v2 = vmov 1966171168  }
  0x5a   : > { %v677_v3 = vunpack.c.l.s4 %v2156_v2  ;;  %v1924_v5 = vld [vmem:[%s2491_s5 + $0xe4] ss:$16 sps:$4 sm:$0xff]   ;;  %v675_v7 = vcombine.high %v2487_v0, %v2487_v0  ;;  %v1928_v9 = vld [vmem:[%s2491_s5 + $0xe0] ss:$16 sps:$4 sm:$0xff]   ;;  %s2693_s6 = smov (!%p519_p9, %s1745_s6), 7 }
  0x5b   : > { %v2489_v4 = vshrl.u32 %v679_v1, 7  ;;  %v1926_v6 = vld [vmem:[%s2491_s5 + $0x2e4] ss:$16 sps:$4 sm:$0xff]   ;;  %1336 = vmatprep.subr.bf16.mxu0 %v1924_v5  ;;  %v1929_v10 = vld [vmem:[%s2491_s5 + $0x2e0] ss:$16 sps:$4 sm:$0xff]   ;;  %s521_s9 = scalar_lea.vmem %s2684_s2, %s2693_s6  ;;  %s530_s12 = scalar_lea.vmem %s2685_s3, %s2693_s6 }
  0x5c   : > { %v678_v8 = vunpack.c.0.s8 %v677_v3  ;;  %1377 = vmatprep.subr.bf16.mxu1 %v1926_v6  ;;  %v1930_v11 = vld [vmem:[%s2491_s5 + $0xc4] ss:$16 sps:$4 sm:$0xff]   ;;  %1337 = vmatpush1.bf16.msra.mxu0 %v1928_v9  ;;  %v1934_v14 = vld [vmem:[%s2491_s5 + $0xc0] ss:$16 sps:$4 sm:$0xff]  }
  0x5d   : > { %1378 = vmatpush1.bf16.msra.mxu1 %v1929_v10  ;;  %v1932_v13 = vld [vmem:[%s2491_s5 + $0x2c4] ss:$16 sps:$4 sm:$0xff]   ;;  %1338 = vmatprep.subr.bf16.mxu0 %v1930_v11  ;;  %v1935_v15 = vld [vmem:[%s2491_s5 + $0x2c0] ss:$16 sps:$4 sm:$0xff]  }
  0x5e   : > { %v2501_v12 = vsub.s32 %v678_v8, %v2489_v4  ;;  %1379 = vmatprep.subr.bf16.mxu1 %v1932_v13  ;;  %v1936_v17 = vld [vmem:[%s2491_s5 + $0xa4] ss:$16 sps:$4 sm:$0xff]   ;;  %v1940_v19 = vld [vmem:[%s2491_s5 + $0xa0] ss:$16 sps:$4 sm:$0xff]  }
  0x5f   : > { %v1938_v18 = vld [vmem:[%s2491_s5 + $0x2a4] ss:$16 sps:$4 sm:$0xff]   ;;  %v1941_v20 = vld [vmem:[%s2491_s5 + $0x2a0] ss:$16 sps:$4 sm:$0xff]  }
  0x60   : > { %v2507_v16 = vrot.slane %v675_v7, %v2501_v12  ;;  %1339 = vmatpush1.bf16.msra.mxu0 %v1934_v14  ;;  %v1942_v22 = vld [vmem:[%s2491_s5 + $0x84] ss:$16 sps:$4 sm:$0xff]   ;;  %v1946_v24 = vld [vmem:[%s2491_s5 + $0x80] ss:$16 sps:$4 sm:$0xff]   ;;  %v2573_v13 = vrot.slane %v2487_v0, %v2501_v12  ;;  %v2022_v14 = vld [vmem:[%s2491_s5 + $0xec] ss:$16 sps:$4 sm:$0xff]  }
  0x61   : > { %1380 = vmatpush1.bf16.msra.mxu1 %v1935_v15  ;;  %1340 = vmatprep.subr.bf16.mxu0 %v1936_v17  ;;  %v1944_v23 = vld [vmem:[%s2491_s5 + $0x284] ss:$16 sps:$4 sm:$0xff]   ;;  %v1947_v25 = vld [vmem:[%s2491_s5 + $0x280] ss:$16 sps:$4 sm:$0xff]   ;;  %v2025_v15 = vld [vmem:[%s2491_s5 + $0x2ec] ss:$16 sps:$4 sm:$0xff]  }
  0x62   : > { %1368 = vmatprep.mubr.bf16.mxu0 %v2507_v16  ;;  %v2516_v21 = vcombine.high %v2507_v16, %v2507_v16  ;;  %1381 = vmatprep.subr.bf16.mxu1 %v1938_v18  ;;  %v1948_v26 = vld [vmem:[%s2491_s5 + $0x64] ss:$16 sps:$4 sm:$0xff]   ;;  %v1952_v28 = vld [vmem:[%s2491_s5 + $0x60] ss:$16 sps:$4 sm:$0xff]   ;;  %v2579_v17 = vcombine.high %v2573_v13, %v2573_v13  ;;  %v2020_v18 = vld [vmem:[%s2491_s5 + $0xe8] ss:$16 sps:$4 sm:$0xff]  }
  0x63   : > { %v1950_v27 = vld [vmem:[%s2491_s5 + $0x264] ss:$16 sps:$4 sm:$0xff]   ;;  %v1953_v29 = vld [vmem:[%s2491_s5 + $0x260] ss:$16 sps:$4 sm:$0xff]   ;;  %v2028_v0 = vld [vmem:[%s2491_s5 + $0xcc] ss:$16 sps:$4 sm:$0xff]  }
  0x64   : > { %1409 = vmatprep.mubr.bf16.mxu1 %v2516_v21  ;;  %1341 = vmatpush1.bf16.msra.mxu0 %v1940_v19  ;;  %v1954_v30 = vld [vmem:[%s2491_s5 + $0x44] ss:$16 sps:$4 sm:$0xff]   ;;  %v1958_v32 = vld [vmem:[%s2491_s5 + $0x40] ss:$16 sps:$4 sm:$0xff]   ;;  %v2023_v19 = vld [vmem:[%s2491_s5 + $0x2e8] ss:$16 sps:$4 sm:$0xff]  }
  0x65   : > { %1382 = vmatpush1.bf16.msra.mxu1 %v1941_v20  ;;  %1342 = vmatprep.subr.bf16.mxu0 %v1942_v22  ;;  %v1956_v31 = vld [vmem:[%s2491_s5 + $0x244] ss:$16 sps:$4 sm:$0xff]   ;;  %v1959_v33 = vld [vmem:[%s2491_s5 + $0x240] ss:$16 sps:$4 sm:$0xff]   ;;  %v2031_v20 = vld [vmem:[%s2491_s5 + $0x2cc] ss:$16 sps:$4 sm:$0xff]  }
  0x66   : > { %1383 = vmatprep.subr.bf16.mxu1 %v1944_v23  ;;  %v1960_v34 = vld [vmem:[%s2491_s5 + $0x24] ss:$16 sps:$4 sm:$0xff]   ;;  %v1964_v36 = vld [vmem:[%s2491_s5 + $0x20] ss:$16 sps:$4 sm:$0xff]   ;;  %v2026_v22 = vld [vmem:[%s2491_s5 + $0xc8] ss:$16 sps:$4 sm:$0xff]  }
  0x67   : > { %v1962_v35 = vld [vmem:[%s2491_s5 + $0x224] ss:$16 sps:$4 sm:$0xff]   ;;  %v1965_v37 = vld [vmem:[%s2491_s5 + $0x220] ss:$16 sps:$4 sm:$0xff]   ;;  %v2029_v23 = vld [vmem:[%s2491_s5 + $0x2c8] ss:$16 sps:$4 sm:$0xff]  }
  0x68   : > { %1343 = vmatpush1.bf16.msra.mxu0 %v1946_v24  ;;  %v1966_v38 = vld [vmem:[%s2491_s5 + $0x4] ss:$16 sps:$4 sm:$0xff]   ;;  %v1970_v40 = vld [vmem:[%s2491_s5] ss:$16 sps:$4 sm:$0xff]   ;;  %v2034_v24 = vld [vmem:[%s2491_s5 + $0xac] ss:$16 sps:$4 sm:$0xff]  }
  0x69   : > { %1384 = vmatpush1.bf16.msra.mxu1 %v1947_v25  ;;  %1344 = vmatprep.subr.bf16.mxu0 %v1948_v26  ;;  %v1968_v39 = vld [vmem:[%s2491_s5 + $0x204] ss:$16 sps:$4 sm:$0xff]   ;;  %v1971_v41 = vld [vmem:[%s2491_s5 + $0x200] ss:$16 sps:$4 sm:$0xff]   ;;  %v2037_v25 = vld [vmem:[%s2491_s5 + $0x2ac] ss:$16 sps:$4 sm:$0xff]  }
  0x6a   : > { %1385 = vmatprep.subr.bf16.mxu1 %v1950_v27  ;;  %v1972_v42 = vld [vmem:[%s2491_s5 + $0x1e4] ss:$16 sps:$4 sm:$0xff]   ;;  %v1976_v44 = vld [vmem:[%s2491_s5 + $0x1e0] ss:$16 sps:$4 sm:$0xff]   ;;  %v2032_v26 = vld [vmem:[%s2491_s5 + $0xa8] ss:$16 sps:$4 sm:$0xff]  }
  0x6b   : > { %v1974_v43 = vld [vmem:[%s2491_s5 + $0x3e4] ss:$16 sps:$4 sm:$0xff]   ;;  %v1977_v45 = vld [vmem:[%s2491_s5 + $0x3e0] ss:$16 sps:$4 sm:$0xff]   ;;  %v2035_v27 = vld [vmem:[%s2491_s5 + $0x2a8] ss:$16 sps:$4 sm:$0xff]  }
  0x6c   : > { %1345 = vmatpush1.bf16.msra.mxu0 %v1952_v28  ;;  %v1978_v46 = vld [vmem:[%s2491_s5 + $0x1c4] ss:$16 sps:$4 sm:$0xff]   ;;  %v1982_v48 = vld [vmem:[%s2491_s5 + $0x1c0] ss:$16 sps:$4 sm:$0xff]   ;;  %v2040_v28 = vld [vmem:[%s2491_s5 + $0x8c] ss:$16 sps:$4 sm:$0xff]  }
  0x6d   : > { %1386 = vmatpush1.bf16.msra.mxu1 %v1953_v29  ;;  %1346 = vmatprep.subr.bf16.mxu0 %v1954_v30  ;;  %v1980_v47 = vld [vmem:[%s2491_s5 + $0x3c4] ss:$16 sps:$4 sm:$0xff]   ;;  %v1983_v49 = vld [vmem:[%s2491_s5 + $0x3c0] ss:$16 sps:$4 sm:$0xff]   ;;  %v2043_v29 = vld [vmem:[%s2491_s5 + $0x28c] ss:$16 sps:$4 sm:$0xff]  }
  0x6e   : > { %1387 = vmatprep.subr.bf16.mxu1 %v1956_v31  ;;  %v1984_v50 = vld [vmem:[%s2491_s5 + $0x1a4] ss:$16 sps:$4 sm:$0xff]   ;;  %v1988_v52 = vld [vmem:[%s2491_s5 + $0x1a0] ss:$16 sps:$4 sm:$0xff]   ;;  %v2038_v30 = vld [vmem:[%s2491_s5 + $0x88] ss:$16 sps:$4 sm:$0xff]  }
  0x6f   : > { %v1986_v51 = vld [vmem:[%s2491_s5 + $0x3a4] ss:$16 sps:$4 sm:$0xff]   ;;  %v1989_v53 = vld [vmem:[%s2491_s5 + $0x3a0] ss:$16 sps:$4 sm:$0xff]   ;;  %v2041_v31 = vld [vmem:[%s2491_s5 + $0x288] ss:$16 sps:$4 sm:$0xff]  }
  0x70   : > { %1347 = vmatpush1.bf16.msra.mxu0 %v1958_v32  ;;  %v1990_v54 = vld [vmem:[%s2491_s5 + $0x184] ss:$16 sps:$4 sm:$0xff]   ;;  %v1994_v56 = vld [vmem:[%s2491_s5 + $0x180] ss:$16 sps:$4 sm:$0xff]   ;;  %v2044_v32 = vld [vmem:[%s2491_s5 + $0x68] ss:$16 sps:$4 sm:$0xff]  }
  0x71   : > { %1388 = vmatpush1.bf16.msra.mxu1 %v1959_v33  ;;  %1348 = vmatprep.subr.bf16.mxu0 %v1960_v34  ;;  %v1992_v55 = vld [vmem:[%s2491_s5 + $0x384] ss:$16 sps:$4 sm:$0xff]   ;;  %v1995_v57 = vld [vmem:[%s2491_s5 + $0x380] ss:$16 sps:$4 sm:$0xff]   ;;  %v2047_v33 = vld [vmem:[%s2491_s5 + $0x268] ss:$16 sps:$4 sm:$0xff]  }
  0x72   : > { %1389 = vmatprep.subr.bf16.mxu1 %v1962_v35  ;;  %v1996_v58 = vld [vmem:[%s2491_s5 + $0x164] ss:$16 sps:$4 sm:$0xff]   ;;  %v2000_v60 = vld [vmem:[%s2491_s5 + $0x160] ss:$16 sps:$4 sm:$0xff]   ;;  %v2052_v34 = vld [vmem:[%s2491_s5 + $0x4c] ss:$16 sps:$4 sm:$0xff]  }
  0x73   : > { %v1998_v59 = vld [vmem:[%s2491_s5 + $0x364] ss:$16 sps:$4 sm:$0xff]   ;;  %v2001_v61 = vld [vmem:[%s2491_s5 + $0x360] ss:$16 sps:$4 sm:$0xff]   ;;  %v2055_v35 = vld [vmem:[%s2491_s5 + $0x24c] ss:$16 sps:$4 sm:$0xff]  }
  0x74   : > { %1349 = vmatpush1.bf16.msra.mxu0 %v1964_v36  ;;  %v2002_v62 = vld [vmem:[%s2491_s5 + $0x144] ss:$16 sps:$4 sm:$0xff]   ;;  %v2006_v1 = vld [vmem:[%s2491_s5 + $0x140] ss:$16 sps:$4 sm:$0xff]   ;;  %v2050_v36 = vld [vmem:[%s2491_s5 + $0x48] ss:$16 sps:$4 sm:$0xff]  }
  0x75   : > { %1390 = vmatpush1.bf16.msra.mxu1 %v1965_v37  ;;  %1350 = vmatprep.subr.bf16.mxu0 %v1966_v38  ;;  %v2004_v63 = vld [vmem:[%s2491_s5 + $0x344] ss:$16 sps:$4 sm:$0xff]   ;;  %v2007_v2 = vld [vmem:[%s2491_s5 + $0x340] ss:$16 sps:$4 sm:$0xff]   ;;  %v2053_v37 = vld [vmem:[%s2491_s5 + $0x248] ss:$16 sps:$4 sm:$0xff]  }
  0x76   : > { %1391 = vmatprep.subr.bf16.mxu1 %v1968_v39  ;;  %v2008_v3 = vld [vmem:[%s2491_s5 + $0x124] ss:$16 sps:$4 sm:$0xff]   ;;  %v2012_v6 = vld [vmem:[%s2491_s5 + $0x120] ss:$16 sps:$4 sm:$0xff]   ;;  %v2058_v38 = vld [vmem:[%s2491_s5 + $0x2c] ss:$16 sps:$4 sm:$0xff]  }
  0x77   : > { %v2010_v5 = vld [vmem:[%s2491_s5 + $0x324] ss:$16 sps:$4 sm:$0xff]   ;;  %v2013_v7 = vld [vmem:[%s2491_s5 + $0x320] ss:$16 sps:$4 sm:$0xff]   ;;  %v2061_v39 = vld [vmem:[%s2491_s5 + $0x22c] ss:$16 sps:$4 sm:$0xff]  }
  0x78   : > { %1351 = vmatpush1.bf16.msra.mxu0 %v1970_v40  ;;  %v2014_v8 = vld [vmem:[%s2491_s5 + $0x104] ss:$16 sps:$4 sm:$0xff]   ;;  %v2018_v10 = vld [vmem:[%s2491_s5 + $0x100] ss:$16 sps:$4 sm:$0xff]   ;;  %v2056_v40 = vld [vmem:[%s2491_s5 + $0x28] ss:$16 sps:$4 sm:$0xff]  }
  0x79   : > { %1392 = vmatpush1.bf16.msra.mxu1 %v1971_v41  ;;  %1352 = vmatprep.subr.bf16.mxu0 %v1972_v42  ;;  %v2016_v9 = vld [vmem:[%s2491_s5 + $0x304] ss:$16 sps:$4 sm:$0xff]   ;;  %v2019_v11 = vld [vmem:[%s2491_s5 + $0x300] ss:$16 sps:$4 sm:$0xff]   ;;  %v2059_v41 = vld [vmem:[%s2491_s5 + $0x228] ss:$16 sps:$4 sm:$0xff]  }
  0x7a   : > { %1393 = vmatprep.subr.bf16.mxu1 %v1974_v43  ;;  %v2064_v42 = vld [vmem:[%s2491_s5 + $0xc] ss:$16 sps:$4 sm:$0xff]  }
  0x7b   : > { %v2067_v43 = vld [vmem:[%s2491_s5 + $0x20c] ss:$16 sps:$4 sm:$0xff]  }
  0x7c   : > { %1353 = vmatpush2.bf16.msra.mxu0 %v1976_v44  ;;  %v2062_v44 = vld [vmem:[%s2491_s5 + $0x8] ss:$16 sps:$4 sm:$0xff]  }
  0x7d   : > { %1394 = vmatpush2.bf16.msra.mxu1 %v1977_v45  ;;  %1354 = vmatprep.subr.bf16.mxu0 %v1978_v46  ;;  %v2065_v45 = vld [vmem:[%s2491_s5 + $0x208] ss:$16 sps:$4 sm:$0xff]   ;;  %v2070_v46 = vld [vmem:[%s2491_s5 + $0x1ec] ss:$16 sps:$4 sm:$0xff]  }
  0x7e   : > { %1395 = vmatprep.subr.bf16.mxu1 %v1980_v47  ;;  %v2073_v47 = vld [vmem:[%s2491_s5 + $0x3ec] ss:$16 sps:$4 sm:$0xff]  }
  0x80   : > { %1355 = vmatpush2.bf16.msra.mxu0 %v1982_v48  ;;  %v2068_v48 = vld [vmem:[%s2491_s5 + $0x1e8] ss:$16 sps:$4 sm:$0xff]  }
  0x81   : > { %1396 = vmatpush2.bf16.msra.mxu1 %v1983_v49  ;;  %1356 = vmatprep.subr.bf16.mxu0 %v1984_v50  ;;  %v2071_v49 = vld [vmem:[%s2491_s5 + $0x3e8] ss:$16 sps:$4 sm:$0xff]   ;;  %v2076_v50 = vld [vmem:[%s2491_s5 + $0x1cc] ss:$16 sps:$4 sm:$0xff]  }
  0x82   : > { %1397 = vmatprep.subr.bf16.mxu1 %v1986_v51  ;;  %v2079_v51 = vld [vmem:[%s2491_s5 + $0x3cc] ss:$16 sps:$4 sm:$0xff]  }
  0x84   : > { %1357 = vmatpush2.bf16.msra.mxu0 %v1988_v52  ;;  %v2074_v52 = vld [vmem:[%s2491_s5 + $0x1c8] ss:$16 sps:$4 sm:$0xff]  }
  0x85   : > { %1398 = vmatpush2.bf16.msra.mxu1 %v1989_v53  ;;  %1358 = vmatprep.subr.bf16.mxu0 %v1990_v54  ;;  %v2077_v53 = vld [vmem:[%s2491_s5 + $0x3c8] ss:$16 sps:$4 sm:$0xff]   ;;  %v2082_v54 = vld [vmem:[%s2491_s5 + $0x1ac] ss:$16 sps:$4 sm:$0xff]  }
  0x86   : > { %1399 = vmatprep.subr.bf16.mxu1 %v1992_v55  ;;  %v2085_v55 = vld [vmem:[%s2491_s5 + $0x3ac] ss:$16 sps:$4 sm:$0xff]  }
  0x88   : > { %1359 = vmatpush2.bf16.msra.mxu0 %v1994_v56  ;;  %v2080_v56 = vld [vmem:[%s2491_s5 + $0x1a8] ss:$16 sps:$4 sm:$0xff]  }
  0x89   : > { %1400 = vmatpush2.bf16.msra.mxu1 %v1995_v57  ;;  %1360 = vmatprep.subr.bf16.mxu0 %v1996_v58  ;;  %v2083_v57 = vld [vmem:[%s2491_s5 + $0x3a8] ss:$16 sps:$4 sm:$0xff]   ;;  %v2088_v58 = vld [vmem:[%s2491_s5 + $0x18c] ss:$16 sps:$4 sm:$0xff]  }
  0x8a   : > { %1401 = vmatprep.subr.bf16.mxu1 %v1998_v59  ;;  %v2091_v59 = vld [vmem:[%s2491_s5 + $0x38c] ss:$16 sps:$4 sm:$0xff]  }
  0x8c   : > { %1361 = vmatpush2.bf16.msra.mxu0 %v2000_v60  ;;  %v2086_v60 = vld [vmem:[%s2491_s5 + $0x188] ss:$16 sps:$4 sm:$0xff]  }
  0x8d   : > { %1402 = vmatpush2.bf16.msra.mxu1 %v2001_v61  ;;  %1362 = vmatprep.subr.bf16.mxu0 %v2002_v62  ;;  %v2089_v61 = vld [vmem:[%s2491_s5 + $0x388] ss:$16 sps:$4 sm:$0xff]   ;;  %v2094_v62 = vld [vmem:[%s2491_s5 + $0x16c] ss:$16 sps:$4 sm:$0xff]  }
  0x8e   : > { %1403 = vmatprep.subr.bf16.mxu1 %v2004_v63  ;;  %v2097_v63 = vld [vmem:[%s2491_s5 + $0x36c] ss:$16 sps:$4 sm:$0xff]  }
  0x90   : > { %1363 = vmatpush2.bf16.msra.mxu0 %v2006_v1  ;;  %v2092_v1 = vld [vmem:[%s2491_s5 + $0x168] ss:$16 sps:$4 sm:$0xff]  }
  0x91   : > { %1404 = vmatpush2.bf16.msra.mxu1 %v2007_v2  ;;  %1364 = vmatprep.subr.bf16.mxu0 %v2008_v3  ;;  %v2095_v2 = vld [vmem:[%s2491_s5 + $0x368] ss:$16 sps:$4 sm:$0xff]   ;;  %v2100_v3 = vld [vmem:[%s2491_s5 + $0x14c] ss:$16 sps:$4 sm:$0xff]  }
  0x92   : > { %1405 = vmatprep.subr.bf16.mxu1 %v2010_v5  ;;  %v2103_v5 = vld [vmem:[%s2491_s5 + $0x34c] ss:$16 sps:$4 sm:$0xff]  }
  0x94   : > { %1365 = vmatpush2.bf16.msra.mxu0 %v2012_v6  ;;  %v2098_v6 = vld [vmem:[%s2491_s5 + $0x148] ss:$16 sps:$4 sm:$0xff]  }
  0x95   : > { %1406 = vmatpush2.bf16.msra.mxu1 %v2013_v7  ;;  %1366 = vmatprep.subr.bf16.mxu0 %v2014_v8  ;;  %v2101_v7 = vld [vmem:[%s2491_s5 + $0x348] ss:$16 sps:$4 sm:$0xff]   ;;  %v2106_v8 = vld [vmem:[%s2491_s5 + $0x12c] ss:$16 sps:$4 sm:$0xff]  }
  0x96   : > { %1407 = vmatprep.subr.bf16.mxu1 %v2016_v9  ;;  %v2109_v9 = vld [vmem:[%s2491_s5 + $0x32c] ss:$16 sps:$4 sm:$0xff]  }
  0x98   : > { %1367 = vmatpush2.bf16.msra.mxu0 %v2018_v10  ;;  %v2104_v10 = vld [vmem:[%s2491_s5 + $0x128] ss:$16 sps:$4 sm:$0xff]  }
  0x99   : > { %1408 = vmatpush2.bf16.msra.mxu1 %v2019_v11  ;;  %1418 = vmatprep.subr.bf16.mxu0 %v2022_v14  ;;  %v2107_v11 = vld [vmem:[%s2491_s5 + $0x328] ss:$16 sps:$4 sm:$0xff]   ;;  %v2112_v14 = vld [vmem:[%s2491_s5 + $0x10c] ss:$16 sps:$4 sm:$0xff]  }
  0x9a   : > { %1459 = vmatprep.subr.bf16.mxu1 %v2025_v15  ;;  %v2115_v15 = vld [vmem:[%s2491_s5 + $0x30c] ss:$16 sps:$4 sm:$0xff]  }
  0x9b   : > { %1369 = vmatmul.mubr.bf16.vlgmr.msra.gmra.mxu0 %v2573_v13 }
  0x9c   : > { %1410 = vmatmul.mubr.bf16.vlgmr.msra.gmra.mxu1 %v2579_v17  ;;  %1419 = vmatpush1.bf16.msra.mxu0 %v2020_v18  ;;  %v2110_v18 = vld [vmem:[%s2491_s5 + $0x108] ss:$16 sps:$4 sm:$0xff]  }
  0x9d   : > { %1460 = vmatpush1.bf16.msra.mxu1 %v2023_v19  ;;  %1420 = vmatprep.subr.bf16.mxu0 %v2028_v0  ;;  %v2113_v19 = vld [vmem:[%s2491_s5 + $0x308] ss:$16 sps:$4 sm:$0xff]  }
  0x9e   : > { %1461 = vmatprep.subr.bf16.mxu1 %v2031_v20  ;;  %1450 = vmatprep.mubr.bf16.mxu0 %v2507_v16  ;;  %v2046_v16 = vld [vmem:[%s2491_s5 + $0x6c] ss:$16 sps:$4 sm:$0xff]  }
  0x9f   : > { %1491 = vmatprep.mubr.bf16.mxu1 %v2516_v21  ;;  %v2049_v21 = vld [vmem:[%s2491_s5 + $0x26c] ss:$16 sps:$4 sm:$0xff]  }
  0xa0   : > { %1421 = vmatpush1.bf16.msra.mxu0 %v2026_v22 }
  0xa1   : > { %1462 = vmatpush1.bf16.msra.mxu1 %v2029_v23  ;;  %1422 = vmatprep.subr.bf16.mxu0 %v2034_v24 }
  0xa2   : > { %1463 = vmatprep.subr.bf16.mxu1 %v2037_v25 }
  0xa4   : > { %1423 = vmatpush1.bf16.msra.mxu0 %v2032_v26 }
  0xa5   : > { %1464 = vmatpush1.bf16.msra.mxu1 %v2035_v27  ;;  %1424 = vmatprep.subr.bf16.mxu0 %v2040_v28 }
  0xa6   : > { %1465 = vmatprep.subr.bf16.mxu1 %v2043_v29 }
  0xa8   : > { %1425 = vmatpush1.bf16.msra.mxu0 %v2038_v30 }
  0xa9   : > { %1466 = vmatpush1.bf16.msra.mxu1 %v2041_v31  ;;  %1426 = vmatprep.subr.bf16.mxu0 %v2046_v16  ;;  %v1540_v31 = vsub.s32 2, %v2489_v4  ;;  %v1544_v16 = vsub.s32 3, %v2489_v4 }
  0xaa   : > { %1467 = vmatprep.subr.bf16.mxu1 %v2049_v21  ;;  %v1528_v21 = vld [vmem:[%s521_s9] sm:$0xf] }
  0xac   : > { %1427 = vmatpush1.bf16.msra.mxu0 %v2044_v32  ;;  %v2157_v32 = vmov 1983009808  }
  0xad   : > { %1468 = vmatpush1.bf16.msra.mxu1 %v2047_v33  ;;  %1428 = vmatprep.subr.bf16.mxu0 %v2052_v34  ;;  %v1507_v33 = vunpack.c.l.s4 %v2157_v32 }
  0xae   : > { %1469 = vmatprep.subr.bf16.mxu1 %v2055_v35 }
  0xb0   : > { %1429 = vmatpush1.bf16.msra.mxu0 %v2050_v36  ;;  %v1541_v36 = vrot.slane %v1528_v21, %v1540_v31 }
  0xb1   : > { %1470 = vmatpush1.bf16.msra.mxu1 %v2053_v37  ;;  %1430 = vmatprep.subr.bf16.mxu0 %v2058_v38  ;;  %v1545_v37 = vrot.slane %v1528_v21, %v1544_v16  ;;  %v1508_v38 = vunpack.c.0.s8 %v1507_v33 }
  0xb2   : > { %1471 = vmatprep.subr.bf16.mxu1 %v2061_v39 }
  0xb4   : > { %1431 = vmatpush1.bf16.msra.mxu0 %v2056_v40  ;;  %v1547_v40 = vcombine.low %v1541_v36, %v1545_v37 }
  0xb5   : > { %1472 = vmatpush1.bf16.msra.mxu1 %v2059_v41  ;;  %1432 = vmatprep.subr.bf16.mxu0 %v2064_v42 }
  0xb6   : > { %1473 = vmatprep.subr.bf16.mxu1 %v2067_v43  ;;  %v1511_v43 = vsub.s32 %v1508_v38, %v2489_v4 }
  0xb8   : > { %1433 = vmatpush1.bf16.msra.mxu0 %v2062_v44 }
  0xb9   : > { %1474 = vmatpush1.bf16.msra.mxu1 %v2065_v45  ;;  %1434 = vmatprep.subr.bf16.mxu0 %v2070_v46 }
  0xba   : > { %1475 = vmatprep.subr.bf16.mxu1 %v2073_v47 }
  0xbc   : > { %1435 = vmatpush2.bf16.msra.mxu0 %v2068_v48 }
  0xbd   : > { %1476 = vmatpush2.bf16.msra.mxu1 %v2071_v49  ;;  %1436 = vmatprep.subr.bf16.mxu0 %v2076_v50  ;;  %v1561_v49 = vrot.slane %v1547_v40, %v1511_v43 }
  0xbe   : > { %1477 = vmatprep.subr.bf16.mxu1 %v2079_v51 }
  0xc0   : > { %1437 = vmatpush2.bf16.msra.mxu0 %v2074_v52 }
  0xc1   : > { %1478 = vmatpush2.bf16.msra.mxu1 %v2077_v53  ;;  %1438 = vmatprep.subr.bf16.mxu0 %v2082_v54 }
  0xc2   : > { %1479 = vmatprep.subr.bf16.mxu1 %v2085_v55 }
  0xc4   : > { %1439 = vmatpush2.bf16.msra.mxu0 %v2080_v56 }
  0xc5   : > { %1480 = vmatpush2.bf16.msra.mxu1 %v2083_v57  ;;  %1440 = vmatprep.subr.bf16.mxu0 %v2088_v58 }
  0xc6   : > { %1481 = vmatprep.subr.bf16.mxu1 %v2091_v59 }
  0xc8   : > { %1441 = vmatpush2.bf16.msra.mxu0 %v2086_v60 }
  0xc9   : > { %1482 = vmatpush2.bf16.msra.mxu1 %v2089_v61  ;;  %1442 = vmatprep.subr.bf16.mxu0 %v2094_v62 }
  0xca   : > { %1483 = vmatprep.subr.bf16.mxu1 %v2097_v63 }
  0xcc   : > { %1443 = vmatpush2.bf16.msra.mxu0 %v2092_v1 }
  0xcd   : > { %1484 = vmatpush2.bf16.msra.mxu1 %v2095_v2  ;;  %1444 = vmatprep.subr.bf16.mxu0 %v2100_v3 }
  0xce   : > { %1485 = vmatprep.subr.bf16.mxu1 %v2103_v5 }
  0xd0   : > { %1445 = vmatpush2.bf16.msra.mxu0 %v2098_v6 }
  0xd1   : > { %1486 = vmatpush2.bf16.msra.mxu1 %v2101_v7  ;;  %1446 = vmatprep.subr.bf16.mxu0 %v2106_v8 }
  0xd2   : > { %1487 = vmatprep.subr.bf16.mxu1 %v2109_v9 }
  0xd4   : > { %1447 = vmatpush2.bf16.msra.mxu0 %v2104_v10 }
  0xd5   : > { %1488 = vmatpush2.bf16.msra.mxu1 %v2107_v11  ;;  %1448 = vmatprep.subr.bf16.mxu0 %v2112_v14 }
  0xd6   : > { %1489 = vmatprep.subr.bf16.mxu1 %v2115_v15 }
  0xd8   : > { %1449 = vmatpush2.bf16.msra.mxu0 %v2110_v18 }
  0xd9   : > { %1490 = vmatpush2.bf16.msra.mxu1 %v2113_v19 }
  0xdb   : > { %1451 = vmatmul.mubr.bf16.vlgmr.msra.gmra.mxu0 %v2573_v13  ;;  %v1532_v13 = vsub.s32 0, %v2489_v4 }
  0xdc   : > { %1492 = vmatmul.mubr.bf16.vlgmr.msra.gmra.mxu1 %v2579_v17  ;;  %v1536_v17 = vsub.s32 1, %v2489_v4 }
  0xdd   : > { %v1533_v34 = vrot.slane %v1528_v21, %v1532_v13 }
  0xde   : > { %v1537_v35 = vrot.slane %v1528_v21, %v1536_v17 }
  0xe0   : > { %v1546_v39 = vcombine.low %v1533_v34, %v1537_v35 }
  0xe2   : > { %v1554_v48 = vrot.slane %v1546_v39, %v1511_v43 }
  0xe4   : > { %v1562_v57 = vcombine.low %v1554_v48, %v1561_v49 }
 0x15b   : > { %v1370_v0 = vpop.f32.mrf.mxu0 }
 0x15c   : > { %v1411_v20 = vpop.f32.mrf.mxu1 }
 0x15d   : > { %v1412_v22 = vadd.f32 %v1411_v20, %v1370_v0  ;;  %v1372_v23 = vpop.f32.mrf.mxu0 }
 0x15e   : > { %v1413_v24 = vpop.f32.mrf.mxu1 }
 0x15f   : > { %v1414_v25 = vadd.f32 %v1413_v24, %v1372_v23  ;;  %v1374_v26 = vpop.f32.mrf.mxu0 }
 0x160   : > { %v1415_v27 = vpop.f32.mrf.mxu1 }
 0x161   : > { %v1504_v28 = vcombine.low %v1412_v22, %v1414_v25  ;;  %v1375_v29 = vpop.f32.mrf.mxu0 }
 0x162   : > { %v1416_v30 = vpop.f32.mrf.mxu1 }
 0x163   : > { %v1512_v55 = vrot.slane %v1504_v28, %v1511_v43 }
 0x19b   : > { %v1452_v41 = vpop.f32.mrf.mxu0 }
 0x19c   : > { %v1493_v42 = vpop.f32.mrf.mxu1 }
 0x19d   : > { %v1454_v44 = vpop.f32.mrf.mxu0  ;;  %v1494_v46 = vadd.f32 %v1493_v42, %v1452_v41 }
 0x19e   : > { %v1495_v45 = vpop.f32.mrf.mxu1 }
 0x19f   : > { %v1496_v47 = vadd.f32 %v1495_v45, %v1454_v44  ;;  %v1456_v50 = vpop.f32.mrf.mxu0 }
 0x1a0   : > { %v1497_v51 = vpop.f32.mrf.mxu1 }
 0x1a1   : > { %v1505_v52 = vcombine.low %v1494_v46, %v1496_v47  ;;  %v1457_v53 = vpop.f32.mrf.mxu0 }
 0x1a2   : > { %v1498_v54 = vpop.f32.mrf.mxu1 }
 0x1a3   : > { %v1519_v56 = vrot.slane %v1505_v52, %v1511_v43 }
 0x1a5   : > { %v1520_v58 = vcombine.low %v1512_v55, %v1519_v56 }
 0x1a7   : > { %v1564_v59 = vadd.f32 %v1562_v57, %v1520_v58 }
 0x1a9   : > { %v1566_v60 = vcombine.high %v1564_v59, %v1564_v59  ;;  %v1573_v61 = vrot.slane %v1564_v59, %v1511_v43 }
 0x1ab   : > { %v1580_v4 = vrot.slane %v1566_v60, %v1511_v43  ;;  %v1581_v62 = vcombine.high %v1573_v61, %v1573_v61 }
 0x1ad   : > { %v1582_v63 = vcombine.high %v1580_v4, %v1580_v4  ;;  %v1876_v1 = vpack.c.bf16 %v1581_v62, %v1573_v61 }
 0x1af   : > { %v1877_v2 = vpack.c.bf16 %v1582_v63, %v1580_v4  ;;  %v1603_v3 = vrot.slane %v1876_v1, %v2501_v12 }
 0x1b1   : > { %v1610_v5 = vrot.slane %v1877_v2, %v2501_v12 }
 0x1b3   : > { %v1611_v6 = vcombine.low %v1603_v3, %v1610_v5 }
 0x1b5   : > { %1878 = vst.sshfl [vmem:[%s530_s12] sm:$0x55 pattern:$0x73625140] %v1611_v6 }
 0x1b6 PF: > { %s13_s16 = sadd.s32 1, %s2154_s16   ;;  %s2686_s12 = smov %s2142_s13 }
 0x1b7   : > { %p10_p10 = scmp.ge.s32.totalorder %s13_s16, 4   ;;  %s2687_s13 = smov %s2213_s20 }
 0x1b8   : > { %s2688_s14 = smov %s2150_s15  ;;  %s2689_s15 = smov %s2691_s17 }
 0x1b9   :  { %12 = sbr.rel (!%p10_p10) target bundleno = 3 (0x3), region = 104 }

// kernel: depth_aware_resnet_forward.37
= control target key start
LH: loop header
LB: loop body
LE: loop exit
PB: predicated region body
PF: predicated region fallthrough
CT: control target
= control target key end

     0   :  { %s1885_s12 = smov 0   ;;  %s1887_s13 = smov 0   ;;  %s2092_s0 = inlined_call_operand.vmem [shape: bf16[2,4608], index: 0, kind: input, shape index: {}]   ;;  %s2093_s1 = inlined_call_operand.vmem [shape: bf16[4608,512], index: 1, kind: input, shape index: {}]   ;;  %s2094_s2 = inlined_call_operand.vmem [shape: f32[1,512], index: 2, kind: input, shape index: {}]   ;;  %s2095_s3 = inlined_call_operand.vmem [shape: bf16[2,512], index: 3, kind: output, shape index: {}]  }
   0x1   :  { %s1889_s14 = smov 0  }
   0x2 LB: > { %s25_s15 = sadd.s32 1, %s1856_s13  ;;  %p1475_p0 = scmp.ge.s32.totalorder %s1860_s14, 1  ;;  %s1860_s14 = sphi %s1889_s14, %s13_s14   ;;  %s1856_s13 = sphi %s1887_s13, %s2097_s13   ;;  %s1852_s12 = sphi %s1885_s12, %s2096_s12  }
   0x3   : > { %p26_p1 = scmp.ge.s32.totalorder %s25_s15, 9  ;;  %p193_p2 = scmp.lt.s32.totalorder %s1860_s14, 10 }
   0x5   : > { %s2099_s15 = smov (%p26_p1, %s25_s15), 0  ;;  %p194_p3 = pnand %p1475_p0, %p193_p2 }
   0x6   : > { %s1476_s16 = sshll.u32 (!%p194_p3), %s1852_s12, 2  ;;  %s1477_s17 = sshll.u32 (!%p194_p3), %s1852_s12, 6 }
   0x7   : > { %197 = sbr.rel (%p194_p3) target bundleno = 384 (0x180), region = 32  ;;  %p240_p4 = scmp.lt.s32.totalorder (!%p194_p3), %s1476_s16, 35 }
   0x8   : > { %p248_p5 = scmp.lt.s32.totalorder (!%p194_p3), %s1477_s17, 575  ;;  %p1480_p6 = scmp.ne.s32.totalorder (!%p194_p3), %s1852_s12, 0 }
   0xc   : > { %s2101_s16 = smov (!%p240_p4, %s1476_s16), 35  ;;  %s2103_s17 = smov (!%p248_p5, %s1477_s17), 575 }
   0xd   : > { %s244_s20 = scalar_lea.vmem %s2092_s0, %s2101_s16  ;;  %s1618_s21 = sshll.u32 %s2103_s17, 4 }
   0xe   : > { %s1916_s24 = scalar_lea.vmem %s2093_s1, %s1618_s21  ;;  %275 = sbr.rel (%p1480_p6) target bundleno = 21 (0x15), region = 36 }
  0x13   : > { %v1862_v0 = vmov 0.0  }
  0x14   : > { %276 = vst [vmem:[#allocation2] sm:$0xff] %v1862_v0 }
  0x15 PF: > { %v1646_v1 = vld [vmem:[%s1916_s24 + $0xe4] ss:$16 sps:$4 sm:$0xff]   ;;  %v1650_v3 = vld [vmem:[%s1916_s24 + $0xe0] ss:$16 sps:$4 sm:$0xff]   ;;  %v1863_v39 = vmov 1966171168   ;;  %v419_v41 = vlaneseq }
  0x16   : > { %v1648_v2 = vld [vmem:[%s1916_s24 + $0x2e4] ss:$16 sps:$4 sm:$0xff]   ;;  %1076 = vmatprep.subr.bf16.mxu0 %v1646_v1  ;;  %v1651_v4 = vld [vmem:[%s1916_s24 + $0x2e0] ss:$16 sps:$4 sm:$0xff]   ;;  %v417_v40 = vunpack.c.l.s4 %v1863_v39  ;;  %v1778_v39 = vld [vmem:[%s1916_s24 + $0x28] ss:$16 sps:$4 sm:$0xff]  }
  0x17   : > { %1117 = vmatprep.subr.bf16.mxu1 %v1648_v2  ;;  %v1652_v5 = vld [vmem:[%s1916_s24 + $0xc4] ss:$16 sps:$4 sm:$0xff]   ;;  %1077 = vmatpush1.bf16.msra.mxu0 %v1650_v3  ;;  %v1656_v7 = vld [vmem:[%s1916_s24 + $0xc0] ss:$16 sps:$4 sm:$0xff]   ;;  %v1961_v47 = vshrl.u32 %v419_v41, 7  ;;  %p1610_p7 = scmp.ne.s32.totalorder %s1852_s12, 8 }
  0x18   : > { %1118 = vmatpush1.bf16.msra.mxu1 %v1651_v4  ;;  %v1654_v6 = vld [vmem:[%s1916_s24 + $0x2c4] ss:$16 sps:$4 sm:$0xff]   ;;  %1078 = vmatprep.subr.bf16.mxu0 %v1652_v5  ;;  %v1657_v8 = vld [vmem:[%s1916_s24 + $0x2c0] ss:$16 sps:$4 sm:$0xff]   ;;  %v418_v46 = vunpack.c.0.s8 %v417_v40  ;;  %v1781_v40 = vld [vmem:[%s1916_s24 + $0x228] ss:$16 sps:$4 sm:$0xff]  }
  0x19   : > { %1119 = vmatprep.subr.bf16.mxu1 %v1654_v6  ;;  %v1658_v9 = vld [vmem:[%s1916_s24 + $0xa4] ss:$16 sps:$4 sm:$0xff]   ;;  %v1662_v11 = vld [vmem:[%s1916_s24 + $0xa0] ss:$16 sps:$4 sm:$0xff]   ;;  %v1786_v41 = vld [vmem:[%s1916_s24 + $0xc] ss:$16 sps:$4 sm:$0xff]  }
  0x1a   : > { %v1660_v10 = vld [vmem:[%s1916_s24 + $0x2a4] ss:$16 sps:$4 sm:$0xff]   ;;  %v1663_v12 = vld [vmem:[%s1916_s24 + $0x2a0] ss:$16 sps:$4 sm:$0xff]   ;;  %v1968_v52 = vsub.s32 %v418_v46, %v1961_v47  ;;  %v1795_v46 = vld [vmem:[%s1916_s24 + $0x3ec] ss:$16 sps:$4 sm:$0xff]  }
  0x1b   : > { %1079 = vmatpush1.bf16.msra.mxu0 %v1656_v7  ;;  %v1664_v13 = vld [vmem:[%s1916_s24 + $0x84] ss:$16 sps:$4 sm:$0xff]   ;;  %v1668_v15 = vld [vmem:[%s1916_s24 + $0x80] ss:$16 sps:$4 sm:$0xff]  }
  0x1c   : > { %1120 = vmatpush1.bf16.msra.mxu1 %v1657_v8  ;;  %1080 = vmatprep.subr.bf16.mxu0 %v1658_v9  ;;  %v1666_v14 = vld [vmem:[%s1916_s24 + $0x284] ss:$16 sps:$4 sm:$0xff]   ;;  %v1669_v16 = vld [vmem:[%s1916_s24 + $0x280] ss:$16 sps:$4 sm:$0xff]  }
  0x1d   : > { %1121 = vmatprep.subr.bf16.mxu1 %v1660_v10  ;;  %v1670_v17 = vld [vmem:[%s1916_s24 + $0x64] ss:$16 sps:$4 sm:$0xff]   ;;  %v1674_v19 = vld [vmem:[%s1916_s24 + $0x60] ss:$16 sps:$4 sm:$0xff]  }
  0x1e   : > { %v1672_v18 = vld [vmem:[%s1916_s24 + $0x264] ss:$16 sps:$4 sm:$0xff]   ;;  %v1675_v20 = vld [vmem:[%s1916_s24 + $0x260] ss:$16 sps:$4 sm:$0xff]  }
  0x1f   : > { %1081 = vmatpush1.bf16.msra.mxu0 %v1662_v11  ;;  %v1676_v21 = vld [vmem:[%s1916_s24 + $0x44] ss:$16 sps:$4 sm:$0xff]   ;;  %v1680_v23 = vld [vmem:[%s1916_s24 + $0x40] ss:$16 sps:$4 sm:$0xff]  }
  0x20   : > { %1122 = vmatpush1.bf16.msra.mxu1 %v1663_v12  ;;  %1082 = vmatprep.subr.bf16.mxu0 %v1664_v13  ;;  %v1678_v22 = vld [vmem:[%s1916_s24 + $0x244] ss:$16 sps:$4 sm:$0xff]   ;;  %v1681_v24 = vld [vmem:[%s1916_s24 + $0x240] ss:$16 sps:$4 sm:$0xff]   ;;  %v1744_v12 = vld [vmem:[%s1916_s24 + $0xec] ss:$16 sps:$4 sm:$0xff]  }
  0x21   : > { %1123 = vmatprep.subr.bf16.mxu1 %v1666_v14  ;;  %v1682_v25 = vld [vmem:[%s1916_s24 + $0x24] ss:$16 sps:$4 sm:$0xff]   ;;  %v1686_v27 = vld [vmem:[%s1916_s24 + $0x20] ss:$16 sps:$4 sm:$0xff]   ;;  %v1747_v13 = vld [vmem:[%s1916_s24 + $0x2ec] ss:$16 sps:$4 sm:$0xff]  }
  0x22   : > { %v1684_v26 = vld [vmem:[%s1916_s24 + $0x224] ss:$16 sps:$4 sm:$0xff]   ;;  %v1687_v28 = vld [vmem:[%s1916_s24 + $0x220] ss:$16 sps:$4 sm:$0xff]  }
  0x23   : > { %1083 = vmatpush1.bf16.msra.mxu0 %v1668_v15  ;;  %v1688_v29 = vld [vmem:[%s1916_s24 + $0x4] ss:$16 sps:$4 sm:$0xff]   ;;  %v1692_v31 = vld [vmem:[%s1916_s24] ss:$16 sps:$4 sm:$0xff]   ;;  %v1742_v15 = vld [vmem:[%s1916_s24 + $0xe8] ss:$16 sps:$4 sm:$0xff]  }
  0x24   : > { %1124 = vmatpush1.bf16.msra.mxu1 %v1669_v16  ;;  %1084 = vmatprep.subr.bf16.mxu0 %v1670_v17  ;;  %v1690_v30 = vld [vmem:[%s1916_s24 + $0x204] ss:$16 sps:$4 sm:$0xff]   ;;  %v1693_v32 = vld [vmem:[%s1916_s24 + $0x200] ss:$16 sps:$4 sm:$0xff]   ;;  %v1745_v16 = vld [vmem:[%s1916_s24 + $0x2e8] ss:$16 sps:$4 sm:$0xff]  }
  0x25   : > { %1125 = vmatprep.subr.bf16.mxu1 %v1672_v18  ;;  %v1694_v33 = vld [vmem:[%s1916_s24 + $0x1e4] ss:$16 sps:$4 sm:$0xff]   ;;  %v1698_v35 = vld [vmem:[%s1916_s24 + $0x1e0] ss:$16 sps:$4 sm:$0xff]   ;;  %v1750_v17 = vld [vmem:[%s1916_s24 + $0xcc] ss:$16 sps:$4 sm:$0xff]  }
  0x26   : > { %v1696_v34 = vld [vmem:[%s1916_s24 + $0x3e4] ss:$16 sps:$4 sm:$0xff]   ;;  %v1699_v36 = vld [vmem:[%s1916_s24 + $0x3e0] ss:$16 sps:$4 sm:$0xff]   ;;  %v1753_v18 = vld [vmem:[%s1916_s24 + $0x2cc] ss:$16 sps:$4 sm:$0xff]  }
  0x27   : > { %1085 = vmatpush1.bf16.msra.mxu0 %v1674_v19  ;;  %v1700_v37 = vld [vmem:[%s1916_s24 + $0x1c4] ss:$16 sps:$4 sm:$0xff]   ;;  %v1704_v42 = vld [vmem:[%s1916_s24 + $0x1c0] ss:$16 sps:$4 sm:$0xff]   ;;  %v1748_v19 = vld [vmem:[%s1916_s24 + $0xc8] ss:$16 sps:$4 sm:$0xff]  }
  0x28   : > { %1126 = vmatpush1.bf16.msra.mxu1 %v1675_v20  ;;  %1086 = vmatprep.subr.bf16.mxu0 %v1676_v21  ;;  %v1702_v38 = vld [vmem:[%s1916_s24 + $0x3c4] ss:$16 sps:$4 sm:$0xff]   ;;  %v1705_v43 = vld [vmem:[%s1916_s24 + $0x3c0] ss:$16 sps:$4 sm:$0xff]   ;;  %v1751_v20 = vld [vmem:[%s1916_s24 + $0x2c8] ss:$16 sps:$4 sm:$0xff]  }
  0x29   : > { %1127 = vmatprep.subr.bf16.mxu1 %v1678_v22  ;;  %v1706_v44 = vld [vmem:[%s1916_s24 + $0x1a4] ss:$16 sps:$4 sm:$0xff]   ;;  %v1710_v48 = vld [vmem:[%s1916_s24 + $0x1a0] ss:$16 sps:$4 sm:$0xff]   ;;  %v1756_v21 = vld [vmem:[%s1916_s24 + $0xac] ss:$16 sps:$4 sm:$0xff]  }
  0x2a   : > { %v1708_v45 = vld [vmem:[%s1916_s24 + $0x3a4] ss:$16 sps:$4 sm:$0xff]   ;;  %v1711_v49 = vld [vmem:[%s1916_s24 + $0x3a0] ss:$16 sps:$4 sm:$0xff]   ;;  %v1759_v22 = vld [vmem:[%s1916_s24 + $0x2ac] ss:$16 sps:$4 sm:$0xff]  }
  0x2b   : > { %1087 = vmatpush1.bf16.msra.mxu0 %v1680_v23  ;;  %v1712_v50 = vld [vmem:[%s1916_s24 + $0x184] ss:$16 sps:$4 sm:$0xff]   ;;  %v1481_v53 = vld.sshfl [vmem:[%s244_s20] sm:$0x33 pattern:$0x75316420] }
  0x2c   : > { %1128 = vmatpush1.bf16.msra.mxu1 %v1681_v24  ;;  %1088 = vmatprep.subr.bf16.mxu0 %v1682_v25  ;;  %v1714_v51 = vld [vmem:[%s1916_s24 + $0x384] ss:$16 sps:$4 sm:$0xff]   ;;  %v1716_v54 = vld [vmem:[%s1916_s24 + $0x180] ss:$16 sps:$4 sm:$0xff]   ;;  %v415_v56 = vcombine.high %v1481_v53, %v1481_v53  ;;  %v1994_v10 = vrot.slane %v1481_v53, %v1968_v52  ;;  %v1754_v23 = vld [vmem:[%s1916_s24 + $0xa8] ss:$16 sps:$4 sm:$0xff]  }
  0x2d   : > { %1129 = vmatprep.subr.bf16.mxu1 %v1684_v26  ;;  %v1717_v55 = vld [vmem:[%s1916_s24 + $0x380] ss:$16 sps:$4 sm:$0xff]   ;;  %v1718_v57 = vld [vmem:[%s1916_s24 + $0x164] ss:$16 sps:$4 sm:$0xff]   ;;  %v1757_v24 = vld [vmem:[%s1916_s24 + $0x2a8] ss:$16 sps:$4 sm:$0xff]  }
  0x2e   : > { %v1720_v58 = vld [vmem:[%s1916_s24 + $0x364] ss:$16 sps:$4 sm:$0xff]   ;;  %v429_v59 = vrot.slane %v415_v56, %v1968_v52  ;;  %v1722_v60 = vld [vmem:[%s1916_s24 + $0x160] ss:$16 sps:$4 sm:$0xff]   ;;  %v2001_v14 = vcombine.high %v1994_v10, %v1994_v10  ;;  %v1762_v25 = vld [vmem:[%s1916_s24 + $0x8c] ss:$16 sps:$4 sm:$0xff]  }
  0x2f   : > { %1089 = vmatpush1.bf16.msra.mxu0 %v1686_v27  ;;  %v1723_v61 = vld [vmem:[%s1916_s24 + $0x360] ss:$16 sps:$4 sm:$0xff]   ;;  %v1724_v63 = vld [vmem:[%s1916_s24 + $0x144] ss:$16 sps:$4 sm:$0xff]   ;;  %v1765_v26 = vld [vmem:[%s1916_s24 + $0x28c] ss:$16 sps:$4 sm:$0xff]  }
  0x30   : > { %1130 = vmatpush1.bf16.msra.mxu1 %v1687_v28  ;;  %1090 = vmatprep.subr.bf16.mxu0 %v1688_v29  ;;  %v431_v62 = vcombine.high %v429_v59, %v429_v59  ;;  %v1726_v0 = vld [vmem:[%s1916_s24 + $0x344] ss:$16 sps:$4 sm:$0xff]   ;;  %v1728_v1 = vld [vmem:[%s1916_s24 + $0x140] ss:$16 sps:$4 sm:$0xff]   ;;  %v1760_v27 = vld [vmem:[%s1916_s24 + $0x88] ss:$16 sps:$4 sm:$0xff]  }
  0x31   : > { %1131 = vmatprep.subr.bf16.mxu1 %v1690_v30  ;;  %1108 = vmatprep.mubr.bf16.mxu0 %v429_v59  ;;  %v1729_v2 = vld [vmem:[%s1916_s24 + $0x340] ss:$16 sps:$4 sm:$0xff]   ;;  %v1730_v3 = vld [vmem:[%s1916_s24 + $0x124] ss:$16 sps:$4 sm:$0xff]   ;;  %v1763_v28 = vld [vmem:[%s1916_s24 + $0x288] ss:$16 sps:$4 sm:$0xff]  }
  0x32   : > { %1149 = vmatprep.mubr.bf16.mxu1 %v431_v62  ;;  %v1732_v4 = vld [vmem:[%s1916_s24 + $0x324] ss:$16 sps:$4 sm:$0xff]   ;;  %v1734_v5 = vld [vmem:[%s1916_s24 + $0x120] ss:$16 sps:$4 sm:$0xff]   ;;  %v1768_v29 = vld [vmem:[%s1916_s24 + $0x6c] ss:$16 sps:$4 sm:$0xff]  }
  0x33   : > { %1091 = vmatpush1.bf16.msra.mxu0 %v1692_v31  ;;  %v1735_v6 = vld [vmem:[%s1916_s24 + $0x320] ss:$16 sps:$4 sm:$0xff]   ;;  %v1736_v7 = vld [vmem:[%s1916_s24 + $0x104] ss:$16 sps:$4 sm:$0xff]   ;;  %v1771_v30 = vld [vmem:[%s1916_s24 + $0x26c] ss:$16 sps:$4 sm:$0xff]  }
  0x34   : > { %1132 = vmatpush1.bf16.msra.mxu1 %v1693_v32  ;;  %1092 = vmatprep.subr.bf16.mxu0 %v1694_v33  ;;  %v1738_v8 = vld [vmem:[%s1916_s24 + $0x304] ss:$16 sps:$4 sm:$0xff]   ;;  %v1740_v9 = vld [vmem:[%s1916_s24 + $0x100] ss:$16 sps:$4 sm:$0xff]   ;;  %v1766_v31 = vld [vmem:[%s1916_s24 + $0x68] ss:$16 sps:$4 sm:$0xff]  }
  0x35   : > { %1133 = vmatprep.subr.bf16.mxu1 %v1696_v34  ;;  %v1741_v11 = vld [vmem:[%s1916_s24 + $0x300] ss:$16 sps:$4 sm:$0xff]   ;;  %v1769_v32 = vld [vmem:[%s1916_s24 + $0x268] ss:$16 sps:$4 sm:$0xff]   ;;  %v1774_v33 = vld [vmem:[%s1916_s24 + $0x4c] ss:$16 sps:$4 sm:$0xff]  }
  0x36   : > { %v1777_v34 = vld [vmem:[%s1916_s24 + $0x24c] ss:$16 sps:$4 sm:$0xff]   ;;  %v1796_v53 = vld [vmem:[%s1916_s24 + $0x1c8] ss:$16 sps:$4 sm:$0xff]  }
  0x37   : > { %1093 = vmatpush2.bf16.msra.mxu0 %v1698_v35  ;;  %v1772_v35 = vld [vmem:[%s1916_s24 + $0x48] ss:$16 sps:$4 sm:$0xff]   ;;  %v1807_v56 = vld [vmem:[%s1916_s24 + $0x3ac] ss:$16 sps:$4 sm:$0xff]  }
  0x38   : > { %1134 = vmatpush2.bf16.msra.mxu1 %v1699_v36  ;;  %1094 = vmatprep.subr.bf16.mxu0 %v1700_v37  ;;  %v1775_v36 = vld [vmem:[%s1916_s24 + $0x248] ss:$16 sps:$4 sm:$0xff]   ;;  %v1780_v37 = vld [vmem:[%s1916_s24 + $0x2c] ss:$16 sps:$4 sm:$0xff]  }
  0x39   : > { %1135 = vmatprep.subr.bf16.mxu1 %v1702_v38  ;;  %v1783_v38 = vld [vmem:[%s1916_s24 + $0x22c] ss:$16 sps:$4 sm:$0xff]  }
  0x3b   : > { %1095 = vmatpush2.bf16.msra.mxu0 %v1704_v42  ;;  %v1789_v42 = vld [vmem:[%s1916_s24 + $0x20c] ss:$16 sps:$4 sm:$0xff]  }
  0x3c   : > { %1136 = vmatpush2.bf16.msra.mxu1 %v1705_v43  ;;  %1096 = vmatprep.subr.bf16.mxu0 %v1706_v44  ;;  %v1784_v43 = vld [vmem:[%s1916_s24 + $0x8] ss:$16 sps:$4 sm:$0xff]  }
  0x3d   : > { %1137 = vmatprep.subr.bf16.mxu1 %v1708_v45  ;;  %v1787_v44 = vld [vmem:[%s1916_s24 + $0x208] ss:$16 sps:$4 sm:$0xff]   ;;  %v1792_v45 = vld [vmem:[%s1916_s24 + $0x1ec] ss:$16 sps:$4 sm:$0xff]  }
  0x3f   : > { %1097 = vmatpush2.bf16.msra.mxu0 %v1710_v48  ;;  %v1790_v48 = vld [vmem:[%s1916_s24 + $0x1e8] ss:$16 sps:$4 sm:$0xff]  }
  0x40   : > { %1138 = vmatpush2.bf16.msra.mxu1 %v1711_v49  ;;  %1098 = vmatprep.subr.bf16.mxu0 %v1712_v50  ;;  %v1793_v49 = vld [vmem:[%s1916_s24 + $0x3e8] ss:$16 sps:$4 sm:$0xff]   ;;  %v1798_v50 = vld [vmem:[%s1916_s24 + $0x1cc] ss:$16 sps:$4 sm:$0xff]  }
  0x41   : > { %1139 = vmatprep.subr.bf16.mxu1 %v1714_v51  ;;  %v1801_v51 = vld [vmem:[%s1916_s24 + $0x3cc] ss:$16 sps:$4 sm:$0xff]  }
  0x43   : > { %1099 = vmatpush2.bf16.msra.mxu0 %v1716_v54  ;;  %v1799_v54 = vld [vmem:[%s1916_s24 + $0x3c8] ss:$16 sps:$4 sm:$0xff]  }
  0x44   : > { %1140 = vmatpush2.bf16.msra.mxu1 %v1717_v55  ;;  %1100 = vmatprep.subr.bf16.mxu0 %v1718_v57  ;;  %v1804_v55 = vld [vmem:[%s1916_s24 + $0x1ac] ss:$16 sps:$4 sm:$0xff]   ;;  %v1802_v57 = vld [vmem:[%s1916_s24 + $0x1a8] ss:$16 sps:$4 sm:$0xff]  }
  0x45   : > { %1141 = vmatprep.subr.bf16.mxu1 %v1720_v58  ;;  %v1805_v58 = vld [vmem:[%s1916_s24 + $0x3a8] ss:$16 sps:$4 sm:$0xff]  }
  0x47   : > { %1101 = vmatpush2.bf16.msra.mxu0 %v1722_v60  ;;  %v1813_v60 = vld [vmem:[%s1916_s24 + $0x38c] ss:$16 sps:$4 sm:$0xff]  }
  0x48   : > { %1142 = vmatpush2.bf16.msra.mxu1 %v1723_v61  ;;  %1102 = vmatprep.subr.bf16.mxu0 %v1724_v63  ;;  %v1808_v61 = vld [vmem:[%s1916_s24 + $0x188] ss:$16 sps:$4 sm:$0xff]   ;;  %v1816_v63 = vld [vmem:[%s1916_s24 + $0x16c] ss:$16 sps:$4 sm:$0xff]  }
  0x49   : > { %1143 = vmatprep.subr.bf16.mxu1 %v1726_v0  ;;  %v1819_v0 = vld [vmem:[%s1916_s24 + $0x36c] ss:$16 sps:$4 sm:$0xff]  }
  0x4b   : > { %1103 = vmatpush2.bf16.msra.mxu0 %v1728_v1  ;;  %v1814_v1 = vld [vmem:[%s1916_s24 + $0x168] ss:$16 sps:$4 sm:$0xff]  }
  0x4c   : > { %1144 = vmatpush2.bf16.msra.mxu1 %v1729_v2  ;;  %1104 = vmatprep.subr.bf16.mxu0 %v1730_v3  ;;  %v1817_v2 = vld [vmem:[%s1916_s24 + $0x368] ss:$16 sps:$4 sm:$0xff]   ;;  %v1822_v3 = vld [vmem:[%s1916_s24 + $0x14c] ss:$16 sps:$4 sm:$0xff]  }
  0x4d   : > { %1145 = vmatprep.subr.bf16.mxu1 %v1732_v4  ;;  %v1825_v4 = vld [vmem:[%s1916_s24 + $0x34c] ss:$16 sps:$4 sm:$0xff]  }
  0x4f   : > { %1105 = vmatpush2.bf16.msra.mxu0 %v1734_v5  ;;  %v1820_v5 = vld [vmem:[%s1916_s24 + $0x148] ss:$16 sps:$4 sm:$0xff]  }
  0x50   : > { %1146 = vmatpush2.bf16.msra.mxu1 %v1735_v6  ;;  %1106 = vmatprep.subr.bf16.mxu0 %v1736_v7  ;;  %v1823_v6 = vld [vmem:[%s1916_s24 + $0x348] ss:$16 sps:$4 sm:$0xff]   ;;  %v1828_v7 = vld [vmem:[%s1916_s24 + $0x12c] ss:$16 sps:$4 sm:$0xff]  }
  0x51   : > { %1147 = vmatprep.subr.bf16.mxu1 %v1738_v8  ;;  %v1831_v8 = vld [vmem:[%s1916_s24 + $0x32c] ss:$16 sps:$4 sm:$0xff]  }
  0x53   : > { %1107 = vmatpush2.bf16.msra.mxu0 %v1740_v9  ;;  %v1826_v9 = vld [vmem:[%s1916_s24 + $0x128] ss:$16 sps:$4 sm:$0xff]  }
  0x54   : > { %1148 = vmatpush2.bf16.msra.mxu1 %v1741_v11  ;;  %1158 = vmatprep.subr.bf16.mxu0 %v1744_v12  ;;  %v1829_v11 = vld [vmem:[%s1916_s24 + $0x328] ss:$16 sps:$4 sm:$0xff]   ;;  %v1834_v12 = vld [vmem:[%s1916_s24 + $0x10c] ss:$16 sps:$4 sm:$0xff]  }
  0x55   : > { %1199 = vmatprep.subr.bf16.mxu1 %v1747_v13  ;;  %v1837_v13 = vld [vmem:[%s1916_s24 + $0x30c] ss:$16 sps:$4 sm:$0xff]  }
  0x56   : > { %1109 = vmatmul.mubr.bf16.vlgmr.msra.gmra.mxu0 %v1994_v10 }
  0x57   : > { %1150 = vmatmul.mubr.bf16.vlgmr.msra.gmra.mxu1 %v2001_v14  ;;  %1159 = vmatpush1.bf16.msra.mxu0 %v1742_v15  ;;  %v1832_v15 = vld [vmem:[%s1916_s24 + $0x108] ss:$16 sps:$4 sm:$0xff]  }
  0x58   : > { %1200 = vmatpush1.bf16.msra.mxu1 %v1745_v16  ;;  %1160 = vmatprep.subr.bf16.mxu0 %v1750_v17  ;;  %v1835_v16 = vld [vmem:[%s1916_s24 + $0x308] ss:$16 sps:$4 sm:$0xff]  }
  0x59   : > { %1201 = vmatprep.subr.bf16.mxu1 %v1753_v18  ;;  %1190 = vmatprep.mubr.bf16.mxu0 %v429_v59  ;;  %v1810_v59 = vld [vmem:[%s1916_s24 + $0x18c] ss:$16 sps:$4 sm:$0xff]  }
  0x5a   : > { %1231 = vmatprep.mubr.bf16.mxu1 %v431_v62  ;;  %v1811_v62 = vld [vmem:[%s1916_s24 + $0x388] ss:$16 sps:$4 sm:$0xff]  }
  0x5b   : > { %1161 = vmatpush1.bf16.msra.mxu0 %v1748_v19 }
  0x5c   : > { %1202 = vmatpush1.bf16.msra.mxu1 %v1751_v20  ;;  %1162 = vmatprep.subr.bf16.mxu0 %v1756_v21 }
  0x5d   : > { %1203 = vmatprep.subr.bf16.mxu1 %v1759_v22 }
  0x5f   : > { %1163 = vmatpush1.bf16.msra.mxu0 %v1754_v23 }
  0x60   : > { %1204 = vmatpush1.bf16.msra.mxu1 %v1757_v24  ;;  %1164 = vmatprep.subr.bf16.mxu0 %v1762_v25 }
  0x61   : > { %1205 = vmatprep.subr.bf16.mxu1 %v1765_v26 }
  0x63   : > { %1165 = vmatpush1.bf16.msra.mxu0 %v1760_v27 }
  0x64   : > { %1206 = vmatpush1.bf16.msra.mxu1 %v1763_v28  ;;  %1166 = vmatprep.subr.bf16.mxu0 %v1768_v29  ;;  %v1864_v28 = vmov 1983009808  }
  0x65   : > { %1207 = vmatprep.subr.bf16.mxu1 %v1771_v30  ;;  %v1247_v29 = vunpack.c.l.s4 %v1864_v28 }
  0x67   : > { %1167 = vmatpush1.bf16.msra.mxu0 %v1766_v31  ;;  %v1248_v30 = vunpack.c.0.s8 %v1247_v29 }
  0x68   : > { %1208 = vmatpush1.bf16.msra.mxu1 %v1769_v32  ;;  %1168 = vmatprep.subr.bf16.mxu0 %v1774_v33 }
  0x69   : > { %1209 = vmatprep.subr.bf16.mxu1 %v1777_v34 }
  0x6b   : > { %1169 = vmatpush1.bf16.msra.mxu0 %v1772_v35 }
  0x6c   : > { %1210 = vmatpush1.bf16.msra.mxu1 %v1775_v36  ;;  %1170 = vmatprep.subr.bf16.mxu0 %v1780_v37 }
  0x6d   : > { %1211 = vmatprep.subr.bf16.mxu1 %v1783_v38 }
  0x6f   : > { %1171 = vmatpush1.bf16.msra.mxu0 %v1778_v39 }
  0x70   : > { %1212 = vmatpush1.bf16.msra.mxu1 %v1781_v40  ;;  %1172 = vmatprep.subr.bf16.mxu0 %v1786_v41 }
  0x71   : > { %1213 = vmatprep.subr.bf16.mxu1 %v1789_v42 }
  0x73   : > { %1173 = vmatpush1.bf16.msra.mxu0 %v1784_v43  ;;  %v277_v43 = vld [vmem:[#allocation2] sm:$0xff] }
  0x74   : > { %1214 = vmatpush1.bf16.msra.mxu1 %v1787_v44  ;;  %1174 = vmatprep.subr.bf16.mxu0 %v1792_v45 }
  0x75   : > { %1215 = vmatprep.subr.bf16.mxu1 %v1795_v46 }
  0x77   : > { %1175 = vmatpush2.bf16.msra.mxu0 %v1790_v48 }
  0x78   : > { %1216 = vmatpush2.bf16.msra.mxu1 %v1793_v49  ;;  %1176 = vmatprep.subr.bf16.mxu0 %v1798_v50 }
  0x79   : > { %1217 = vmatprep.subr.bf16.mxu1 %v1801_v51 }
  0x7b   : > { %1177 = vmatpush2.bf16.msra.mxu0 %v1796_v53 }
  0x7c   : > { %1218 = vmatpush2.bf16.msra.mxu1 %v1799_v54  ;;  %1178 = vmatprep.subr.bf16.mxu0 %v1804_v55 }
  0x7d   : > { %1219 = vmatprep.subr.bf16.mxu1 %v1807_v56 }
  0x7f   : > { %1179 = vmatpush2.bf16.msra.mxu0 %v1802_v57 }
  0x80   : > { %1220 = vmatpush2.bf16.msra.mxu1 %v1805_v58  ;;  %1180 = vmatprep.subr.bf16.mxu0 %v1810_v59 }
  0x81   : > { %1221 = vmatprep.subr.bf16.mxu1 %v1813_v60 }
  0x83   : > { %1181 = vmatpush2.bf16.msra.mxu0 %v1808_v61 }
  0x84   : > { %1222 = vmatpush2.bf16.msra.mxu1 %v1811_v62  ;;  %1182 = vmatprep.subr.bf16.mxu0 %v1816_v63 }
  0x85   : > { %1223 = vmatprep.subr.bf16.mxu1 %v1819_v0 }
  0x87   : > { %1183 = vmatpush2.bf16.msra.mxu0 %v1814_v1 }
  0x88   : > { %1224 = vmatpush2.bf16.msra.mxu1 %v1817_v2  ;;  %1184 = vmatprep.subr.bf16.mxu0 %v1822_v3 }
  0x89   : > { %1225 = vmatprep.subr.bf16.mxu1 %v1825_v4 }
  0x8b   : > { %1185 = vmatpush2.bf16.msra.mxu0 %v1820_v5 }
  0x8c   : > { %1226 = vmatpush2.bf16.msra.mxu1 %v1823_v6  ;;  %1186 = vmatprep.subr.bf16.mxu0 %v1828_v7 }
  0x8d   : > { %1227 = vmatprep.subr.bf16.mxu1 %v1831_v8 }
  0x8f   : > { %1187 = vmatpush2.bf16.msra.mxu0 %v1826_v9 }
  0x90   : > { %1228 = vmatpush2.bf16.msra.mxu1 %v1829_v11  ;;  %1188 = vmatprep.subr.bf16.mxu0 %v1834_v12 }
  0x91   : > { %1229 = vmatprep.subr.bf16.mxu1 %v1837_v13 }
  0x93   : > { %1189 = vmatpush2.bf16.msra.mxu0 %v1832_v15 }
  0x94   : > { %1230 = vmatpush2.bf16.msra.mxu1 %v1835_v16 }
  0x96   : > { %1191 = vmatmul.mubr.bf16.vlgmr.msra.gmra.mxu0 %v1994_v10 }
  0x97   : > { %1232 = vmatmul.mubr.bf16.vlgmr.msra.gmra.mxu1 %v2001_v14  ;;  %v1251_v14 = vsub.s32 %v1248_v30, %v1961_v47 }
 0x116   : > { %v1110_v17 = vpop.f32.mrf.mxu0 }
 0x117   : > { %v1151_v18 = vpop.f32.mrf.mxu1 }
 0x118   : > { %v1152_v19 = vadd.f32 %v1151_v18, %v1110_v17  ;;  %v1112_v20 = vpop.f32.mrf.mxu0 }
 0x119   : > { %v1153_v21 = vpop.f32.mrf.mxu1 }
 0x11a   : > { %v1154_v22 = vadd.f32 %v1153_v21, %v1112_v20  ;;  %v1114_v23 = vpop.f32.mrf.mxu0 }
 0x11b   : > { %v1155_v24 = vpop.f32.mrf.mxu1 }
 0x11c   : > { %v1244_v25 = vcombine.low %v1152_v19, %v1154_v22  ;;  %v1115_v26 = vpop.f32.mrf.mxu0 }
 0x11d   : > { %v1156_v27 = vpop.f32.mrf.mxu1 }
 0x11e   : > { %v1252_v41 = vrot.slane %v1244_v25, %v1251_v14 }
 0x156   : > { %v1192_v31 = vpop.f32.mrf.mxu0 }
 0x157   : > { %v1233_v32 = vpop.f32.mrf.mxu1 }
 0x158   : > { %v1194_v33 = vpop.f32.mrf.mxu0  ;;  %v1234_v34 = vadd.f32 %v1233_v32, %v1192_v31 }
 0x159   : > { %v1235_v10 = vpop.f32.mrf.mxu1 }
 0x15a   : > { %v1236_v35 = vadd.f32 %v1235_v10, %v1194_v33  ;;  %v1196_v36 = vpop.f32.mrf.mxu0 }
 0x15b   : > { %v1237_v37 = vpop.f32.mrf.mxu1 }
 0x15c   : > { %v1245_v38 = vcombine.low %v1234_v34, %v1236_v35  ;;  %v1197_v39 = vpop.f32.mrf.mxu0 }
 0x15d   : > { %v1238_v40 = vpop.f32.mrf.mxu1 }
 0x15e   : > { %v1259_v42 = vrot.slane %v1245_v38, %v1251_v14 }
 0x160   : > { %v1260_v44 = vcombine.low %v1252_v41, %v1259_v42  ;;  %1267 = sbr.rel (%p1610_p7) target bundleno = 384 (0x180), region = 40 }
 0x162   : > { %v1262_v45 = vadd.f32 %v1260_v44, %v277_v43 }
 0x164   : > { %1263 = vst [vmem:[#allocation2] sm:$0xff] %v1262_v45 }
 0x165   : > { %v1269_v46 = vld [vmem:[%s2094_s2] sm:$0xf]  ;;  %v1273_v48 = vsub.s32 0, %v1961_v47  ;;  %v1277_v49 = vsub.s32 1, %v1961_v47  ;;  %v1281_v50 = vsub.s32 2, %v1961_v47  ;;  %v1285_v51 = vsub.s32 3, %v1961_v47 }
 0x167   : > { %v1274_v53 = vrot.slane %v1269_v46, %v1273_v48  ;;  %v1278_v54 = vrot.slane %v1269_v46, %v1277_v49  ;;  %v1282_v55 = vrot.slane %v1269_v46, %v1281_v50  ;;  %v1286_v56 = vrot.slane %v1269_v46, %v1285_v51 }
 0x169   : > { %v1287_v57 = vcombine.low %v1274_v53, %v1278_v54  ;;  %v1288_v58 = vcombine.low %v1282_v55, %v1286_v56 }
 0x16b   : > { %v1295_v59 = vrot.slane %v1287_v57, %v1251_v14  ;;  %v1302_v60 = vrot.slane %v1288_v58, %v1251_v14  ;;  %v1268_v61 = vld [vmem:[#allocation2] sm:$0xff] }
 0x16d   : > { %v1303_v62 = vcombine.low %v1295_v59, %v1302_v60 }
 0x16f   : > { %v1305_v63 = vadd.f32 %v1303_v62, %v1268_v61 }
 0x171   : > { %v1306_v0 = vmax.f32 %v1305_v63, 0.0 }
 0x173   : > { %v1308_v1 = vcombine.high %v1306_v0, %v1306_v0  ;;  %v1315_v2 = vrot.slane %v1306_v0, %v1251_v14 }
 0x175   : > { %v1322_v3 = vrot.slane %v1308_v1, %v1251_v14  ;;  %v1323_v4 = vcombine.high %v1315_v2, %v1315_v2 }
 0x177   : > { %v1324_v5 = vcombine.high %v1322_v3, %v1322_v3  ;;  %v1611_v6 = vpack.c.bf16 %v1323_v4, %v1315_v2 }
 0x179   : > { %v1612_v7 = vpack.c.bf16 %v1324_v5, %v1322_v3  ;;  %v1345_v47 = vrot.slane %v1611_v6, %v1968_v52 }
 0x17b   : > { %v1352_v8 = vrot.slane %v1612_v7, %v1968_v52 }
 0x17d   : > { %v1353_v9 = vcombine.low %v1345_v47, %v1352_v8 }
 0x17f   : > { %1613 = vst.sshfl [vmem:[%s2095_s3] sm:$0x55 pattern:$0x73625140] %v1353_v9 }
 0x180 PF: > { %s13_s14 = sadd.s32 1, %s1860_s14   ;;  %s2096_s12 = smov %s1856_s13 }
 0x181   : > { %p10_p8 = scmp.ge.s32.totalorder %s13_s14, 11   ;;  %s2097_s13 = smov %s2099_s15 }
 0x183   :  { %12 = sbr.rel (!%p10_p8) target bundleno = 2 (0x2), region = 76 }

// kernel: depth_aware_resnet_forward.39
= control target key start
LH: loop header
LB: loop body
LE: loop exit
PB: predicated region body
PF: predicated region fallthrough
CT: control target
= control target key end

     0   :  { %s2263_s15 = smov 0   ;;  %s2265_s16 = smov 0   ;;  %s2771_s0 = inlined_call_operand.vmem [shape: bf16[2,512], index: 0, kind: input, shape index: {}]   ;;  %s2772_s1 = inlined_call_operand.vmem [shape: bf16[512,2048], index: 1, kind: input, shape index: {}]   ;;  %s2773_s2 = inlined_call_operand.vmem [shape: f32[1,2048], index: 2, kind: input, shape index: {}]   ;;  %s2774_s3 = inlined_call_operand.vmem [shape: bf16[2,2048], index: 3, kind: input, shape index: {}]   ;;  %s2775_s4 = inlined_call_operand.vmem [shape: bf16[2,2048], index: 4, kind: output, shape index: {}]  }
   0x1   :  { %s2267_s17 = smov 0   ;;  %s2269_s18 = smov 0  }
   0x2   :  { %s2271_s19 = smov 0  }
   0x3 LB: > { %s29_s20 = sadd.s32 1, %s2230_s18  ;;  %p77_p1 = scmp.ne.s32.totalorder %s2222_s16, %s2218_s15  ;;  %s2234_s19 = sphi %s2271_s19, %s14_s19   ;;  %s2230_s18 = sphi %s2269_s18, %s2779_s18   ;;  %s2226_s17 = sphi %s2267_s17, %s2778_s17   ;;  %s2222_s16 = sphi %s2265_s16, %s2777_s16   ;;  %s2218_s15 = sphi %s2263_s15, %s2776_s15  }
   0x4   : > { %p31_p0 = scmp.ge.s32.totalorder %s29_s20, 4  ;;  %p78_p2 = scmp.eq.s32.totalorder %s2234_s19, 0 }
   0x5   : > { %s70_s22 = sadd.s32 1, %s2222_s16  ;;  %p1818_p5 = scmp.ge.s32.totalorder %s2234_s19, 4 }
   0x6   : > { %s2781_s20 = smov (%p31_p0, %s29_s20), 0  ;;  %p79_p3 = por %p78_p2, %p77_p1 }
   0x7   : > { %s66_s21 = ssub.s32 %s2230_s18, %s2781_s20  ;;  %197 = sbr.rel (%p1818_p5) target bundleno = 80 (0x50), region = 20 }
   0x8   : > { %p68_p4 = scmp.eq.s32.totalorder %s66_s21, 0 }
   0xa   : > { %s2298_s23 = scalar_select %p68_p4, %s2222_s16, %s70_s22  }
   0xc   : > { %200 = sbr.rel (!%p79_p3) target bundleno = 80 (0x50), region = 24  ;;  %s202_s24 = sand.u32 (%p79_p3), 1, %s2222_s16  }
   0xd   : > { %s1961_s25 = sshll.u32 (%p79_p3), %s2230_s18, 4  ;;  %s1819_s26 = sshll.u32 (%p79_p3), %s202_s24, 10 }
   0xe   : > { %s2306_s29 = scalar_lea.vmem (%p79_p3), %s2772_s1, %s1961_s25  ;;  %s2311_s30 = scalar_lea.vmem (%p79_p3), [#allocation3], %s1819_s26 }
   0xf   : > { %v223_v0 = vld [vmem:[%s2306_s29] sm:$0xff] (%p79_p3)  ;;  %v225_v1 = vld [vmem:[%s2306_s29 + $0x8] sm:$0xff] (%p79_p3) }
  0x10   : > { %v227_v2 = vld [vmem:[%s2306_s29 + $0x40] sm:$0xff] (%p79_p3)  ;;  %224 = vst [vmem:[%s2311_s30] sm:$0xff] (%p79_p3), %v223_v0  ;;  %226 = vst [vmem:[%s2311_s30 + $0x8] sm:$0xff] (%p79_p3), %v225_v1  ;;  %v229_v3 = vld [vmem:[%s2306_s29 + $0x48] sm:$0xff] (%p79_p3) }
  0x11   : > { %228 = vst [vmem:[%s2311_s30 + $0x10] sm:$0xff] %v227_v2  ;;  %v231_v4 = vld [vmem:[%s2306_s29 + $0x80] sm:$0xff]  ;;  %v233_v5 = vld [vmem:[%s2306_s29 + $0x88] sm:$0xff]  ;;  %230 = vst [vmem:[%s2311_s30 + $0x18] sm:$0xff] %v229_v3 }
  0x12   : > { %232 = vst [vmem:[%s2311_s30 + $0x20] sm:$0xff] %v231_v4  ;;  %234 = vst [vmem:[%s2311_s30 + $0x28] sm:$0xff] %v233_v5  ;;  %v235_v6 = vld [vmem:[%s2306_s29 + $0xc0] sm:$0xff]  ;;  %v237_v7 = vld [vmem:[%s2306_s29 + $0xc8] sm:$0xff] }
  0x13   : > { %v239_v8 = vld [vmem:[%s2306_s29 + $0x100] sm:$0xff]  ;;  %236 = vst [vmem:[%s2311_s30 + $0x30] sm:$0xff] %v235_v6  ;;  %238 = vst [vmem:[%s2311_s30 + $0x38] sm:$0xff] %v237_v7  ;;  %v241_v9 = vld [vmem:[%s2306_s29 + $0x108] sm:$0xff] }
  0x14   : > { %240 = vst [vmem:[%s2311_s30 + $0x40] sm:$0xff] %v239_v8  ;;  %v243_v10 = vld [vmem:[%s2306_s29 + $0x140] sm:$0xff]  ;;  %v245_v11 = vld [vmem:[%s2306_s29 + $0x148] sm:$0xff]  ;;  %242 = vst [vmem:[%s2311_s30 + $0x48] sm:$0xff] %v241_v9 }
  0x15   : > { %244 = vst [vmem:[%s2311_s30 + $0x50] sm:$0xff] %v243_v10  ;;  %246 = vst [vmem:[%s2311_s30 + $0x58] sm:$0xff] %v245_v11  ;;  %v247_v12 = vld [vmem:[%s2306_s29 + $0x180] sm:$0xff]  ;;  %v249_v13 = vld [vmem:[%s2306_s29 + $0x188] sm:$0xff] }
  0x16   : > { %v251_v14 = vld [vmem:[%s2306_s29 + $0x1c0] sm:$0xff]  ;;  %248 = vst [vmem:[%s2311_s30 + $0x60] sm:$0xff] %v247_v12  ;;  %250 = vst [vmem:[%s2311_s30 + $0x68] sm:$0xff] %v249_v13  ;;  %v253_v15 = vld [vmem:[%s2306_s29 + $0x1c8] sm:$0xff] }
  0x17   : > { %252 = vst [vmem:[%s2311_s30 + $0x70] sm:$0xff] %v251_v14  ;;  %v255_v16 = vld [vmem:[%s2306_s29 + $0x200] sm:$0xff]  ;;  %v257_v17 = vld [vmem:[%s2306_s29 + $0x208] sm:$0xff]  ;;  %254 = vst [vmem:[%s2311_s30 + $0x78] sm:$0xff] %v253_v15 }
  0x18   : > { %256 = vst [vmem:[%s2311_s30 + $0x80] sm:$0xff] %v255_v16  ;;  %258 = vst [vmem:[%s2311_s30 + $0x88] sm:$0xff] %v257_v17  ;;  %v259_v18 = vld [vmem:[%s2306_s29 + $0x240] sm:$0xff]  ;;  %v261_v19 = vld [vmem:[%s2306_s29 + $0x248] sm:$0xff] }
  0x19   : > { %v263_v20 = vld [vmem:[%s2306_s29 + $0x280] sm:$0xff]  ;;  %260 = vst [vmem:[%s2311_s30 + $0x90] sm:$0xff] %v259_v18  ;;  %262 = vst [vmem:[%s2311_s30 + $0x98] sm:$0xff] %v261_v19  ;;  %v265_v21 = vld [vmem:[%s2306_s29 + $0x288] sm:$0xff] }
  0x1a   : > { %264 = vst [vmem:[%s2311_s30 + $0xa0] sm:$0xff] %v263_v20  ;;  %v267_v22 = vld [vmem:[%s2306_s29 + $0x2c0] sm:$0xff]  ;;  %v269_v23 = vld [vmem:[%s2306_s29 + $0x2c8] sm:$0xff]  ;;  %266 = vst [vmem:[%s2311_s30 + $0xa8] sm:$0xff] %v265_v21 }
  0x1b   : > { %268 = vst [vmem:[%s2311_s30 + $0xb0] sm:$0xff] %v267_v22  ;;  %270 = vst [vmem:[%s2311_s30 + $0xb8] sm:$0xff] %v269_v23  ;;  %v271_v24 = vld [vmem:[%s2306_s29 + $0x300] sm:$0xff]  ;;  %v273_v25 = vld [vmem:[%s2306_s29 + $0x308] sm:$0xff] }
  0x1c   : > { %v275_v26 = vld [vmem:[%s2306_s29 + $0x340] sm:$0xff]  ;;  %272 = vst [vmem:[%s2311_s30 + $0xc0] sm:$0xff] %v271_v24  ;;  %274 = vst [vmem:[%s2311_s30 + $0xc8] sm:$0xff] %v273_v25  ;;  %v277_v27 = vld [vmem:[%s2306_s29 + $0x348] sm:$0xff] }
  0x1d   : > { %276 = vst [vmem:[%s2311_s30 + $0xd0] sm:$0xff] %v275_v26  ;;  %v279_v28 = vld [vmem:[%s2306_s29 + $0x380] sm:$0xff]  ;;  %v281_v29 = vld [vmem:[%s2306_s29 + $0x388] sm:$0xff]  ;;  %278 = vst [vmem:[%s2311_s30 + $0xd8] sm:$0xff] %v277_v27 }
  0x1e   : > { %280 = vst [vmem:[%s2311_s30 + $0xe0] sm:$0xff] %v279_v28  ;;  %282 = vst [vmem:[%s2311_s30 + $0xe8] sm:$0xff] %v281_v29  ;;  %v283_v30 = vld [vmem:[%s2306_s29 + $0x3c0] sm:$0xff]  ;;  %v285_v31 = vld [vmem:[%s2306_s29 + $0x3c8] sm:$0xff] }
  0x1f   : > { %v287_v32 = vld [vmem:[%s2306_s29 + $0x400] sm:$0xff]  ;;  %284 = vst [vmem:[%s2311_s30 + $0xf0] sm:$0xff] %v283_v30  ;;  %286 = vst [vmem:[%s2311_s30 + $0xf8] sm:$0xff] %v285_v31  ;;  %v289_v33 = vld [vmem:[%s2306_s29 + $0x408] sm:$0xff] }
  0x20   : > { %288 = vst [vmem:[%s2311_s30 + $0x100] sm:$0xff] %v287_v32  ;;  %v291_v34 = vld [vmem:[%s2306_s29 + $0x440] sm:$0xff]  ;;  %v293_v35 = vld [vmem:[%s2306_s29 + $0x448] sm:$0xff]  ;;  %290 = vst [vmem:[%s2311_s30 + $0x108] sm:$0xff] %v289_v33 }
  0x21   : > { %292 = vst [vmem:[%s2311_s30 + $0x110] sm:$0xff] %v291_v34  ;;  %294 = vst [vmem:[%s2311_s30 + $0x118] sm:$0xff] %v293_v35  ;;  %v295_v36 = vld [vmem:[%s2306_s29 + $0x480] sm:$0xff]  ;;  %v297_v37 = vld [vmem:[%s2306_s29 + $0x488] sm:$0xff] }
  0x22   : > { %v299_v38 = vld [vmem:[%s2306_s29 + $0x4c0] sm:$0xff]  ;;  %296 = vst [vmem:[%s2311_s30 + $0x120] sm:$0xff] %v295_v36  ;;  %298 = vst [vmem:[%s2311_s30 + $0x128] sm:$0xff] %v297_v37  ;;  %v301_v39 = vld [vmem:[%s2306_s29 + $0x4c8] sm:$0xff] }
  0x23   : > { %300 = vst [vmem:[%s2311_s30 + $0x130] sm:$0xff] %v299_v38  ;;  %v303_v40 = vld [vmem:[%s2306_s29 + $0x500] sm:$0xff]  ;;  %v305_v41 = vld [vmem:[%s2306_s29 + $0x508] sm:$0xff]  ;;  %302 = vst [vmem:[%s2311_s30 + $0x138] sm:$0xff] %v301_v39 }
  0x24   : > { %304 = vst [vmem:[%s2311_s30 + $0x140] sm:$0xff] %v303_v40  ;;  %306 = vst [vmem:[%s2311_s30 + $0x148] sm:$0xff] %v305_v41  ;;  %v307_v42 = vld [vmem:[%s2306_s29 + $0x540] sm:$0xff]  ;;  %v309_v43 = vld [vmem:[%s2306_s29 + $0x548] sm:$0xff] }
  0x25   : > { %v311_v44 = vld [vmem:[%s2306_s29 + $0x580] sm:$0xff]  ;;  %308 = vst [vmem:[%s2311_s30 + $0x150] sm:$0xff] %v307_v42  ;;  %310 = vst [vmem:[%s2311_s30 + $0x158] sm:$0xff] %v309_v43  ;;  %v313_v45 = vld [vmem:[%s2306_s29 + $0x588] sm:$0xff] }
  0x26   : > { %312 = vst [vmem:[%s2311_s30 + $0x160] sm:$0xff] %v311_v44  ;;  %v315_v46 = vld [vmem:[%s2306_s29 + $0x5c0] sm:$0xff]  ;;  %v317_v47 = vld [vmem:[%s2306_s29 + $0x5c8] sm:$0xff]  ;;  %314 = vst [vmem:[%s2311_s30 + $0x168] sm:$0xff] %v313_v45 }
  0x27   : > { %316 = vst [vmem:[%s2311_s30 + $0x170] sm:$0xff] %v315_v46  ;;  %318 = vst [vmem:[%s2311_s30 + $0x178] sm:$0xff] %v317_v47  ;;  %v319_v48 = vld [vmem:[%s2306_s29 + $0x600] sm:$0xff]  ;;  %v321_v49 = vld [vmem:[%s2306_s29 + $0x608] sm:$0xff] }
  0x28   : > { %v323_v50 = vld [vmem:[%s2306_s29 + $0x640] sm:$0xff]  ;;  %320 = vst [vmem:[%s2311_s30 + $0x180] sm:$0xff] %v319_v48  ;;  %322 = vst [vmem:[%s2311_s30 + $0x188] sm:$0xff] %v321_v49  ;;  %v325_v51 = vld [vmem:[%s2306_s29 + $0x648] sm:$0xff] }
  0x29   : > { %324 = vst [vmem:[%s2311_s30 + $0x190] sm:$0xff] %v323_v50  ;;  %v327_v52 = vld [vmem:[%s2306_s29 + $0x680] sm:$0xff]  ;;  %v329_v53 = vld [vmem:[%s2306_s29 + $0x688] sm:$0xff]  ;;  %326 = vst [vmem:[%s2311_s30 + $0x198] sm:$0xff] %v325_v51 }
  0x2a   : > { %328 = vst [vmem:[%s2311_s30 + $0x1a0] sm:$0xff] %v327_v52  ;;  %330 = vst [vmem:[%s2311_s30 + $0x1a8] sm:$0xff] %v329_v53  ;;  %v331_v54 = vld [vmem:[%s2306_s29 + $0x6c0] sm:$0xff]  ;;  %v333_v55 = vld [vmem:[%s2306_s29 + $0x6c8] sm:$0xff] }
  0x2b   : > { %v335_v56 = vld [vmem:[%s2306_s29 + $0x700] sm:$0xff]  ;;  %332 = vst [vmem:[%s2311_s30 + $0x1b0] sm:$0xff] %v331_v54  ;;  %334 = vst [vmem:[%s2311_s30 + $0x1b8] sm:$0xff] %v333_v55  ;;  %v337_v57 = vld [vmem:[%s2306_s29 + $0x708] sm:$0xff] }
  0x2c   : > { %336 = vst [vmem:[%s2311_s30 + $0x1c0] sm:$0xff] %v335_v56  ;;  %v339_v58 = vld [vmem:[%s2306_s29 + $0x740] sm:$0xff]  ;;  %v341_v59 = vld [vmem:[%s2306_s29 + $0x748] sm:$0xff]  ;;  %338 = vst [vmem:[%s2311_s30 + $0x1c8] sm:$0xff] %v337_v57 }
  0x2d   : > { %340 = vst [vmem:[%s2311_s30 + $0x1d0] sm:$0xff] %v339_v58  ;;  %342 = vst [vmem:[%s2311_s30 + $0x1d8] sm:$0xff] %v341_v59  ;;  %v343_v60 = vld [vmem:[%s2306_s29 + $0x780] sm:$0xff]  ;;  %v345_v61 = vld [vmem:[%s2306_s29 + $0x788] sm:$0xff] }
  0x2e   : > { %v347_v62 = vld [vmem:[%s2306_s29 + $0x7c0] sm:$0xff]  ;;  %344 = vst [vmem:[%s2311_s30 + $0x1e0] sm:$0xff] %v343_v60  ;;  %346 = vst [vmem:[%s2311_s30 + $0x1e8] sm:$0xff] %v345_v61  ;;  %v349_v63 = vld [vmem:[%s2306_s29 + $0x7c8] sm:$0xff] }
  0x2f   : > { %348 = vst [vmem:[%s2311_s30 + $0x1f0] sm:$0xff] %v347_v62  ;;  %v351_v0 = vld [vmem:[%s2306_s29 + $0x800] sm:$0xff]  ;;  %v353_v1 = vld [vmem:[%s2306_s29 + $0x808] sm:$0xff]  ;;  %350 = vst [vmem:[%s2311_s30 + $0x1f8] sm:$0xff] %v349_v63 }
  0x30   : > { %352 = vst [vmem:[%s2311_s30 + $0x200] sm:$0xff] %v351_v0  ;;  %354 = vst [vmem:[%s2311_s30 + $0x208] sm:$0xff] %v353_v1  ;;  %v355_v2 = vld [vmem:[%s2306_s29 + $0x840] sm:$0xff]  ;;  %v357_v3 = vld [vmem:[%s2306_s29 + $0x848] sm:$0xff] }
  0x31   : > { %v359_v4 = vld [vmem:[%s2306_s29 + $0x880] sm:$0xff]  ;;  %356 = vst [vmem:[%s2311_s30 + $0x210] sm:$0xff] %v355_v2  ;;  %358 = vst [vmem:[%s2311_s30 + $0x218] sm:$0xff] %v357_v3  ;;  %v361_v5 = vld [vmem:[%s2306_s29 + $0x888] sm:$0xff] }
  0x32   : > { %360 = vst [vmem:[%s2311_s30 + $0x220] sm:$0xff] %v359_v4  ;;  %v363_v6 = vld [vmem:[%s2306_s29 + $0x8c0] sm:$0xff]  ;;  %v365_v7 = vld [vmem:[%s2306_s29 + $0x8c8] sm:$0xff]  ;;  %362 = vst [vmem:[%s2311_s30 + $0x228] sm:$0xff] %v361_v5 }
  0x33   : > { %364 = vst [vmem:[%s2311_s30 + $0x230] sm:$0xff] %v363_v6  ;;  %366 = vst [vmem:[%s2311_s30 + $0x238] sm:$0xff] %v365_v7  ;;  %v367_v8 = vld [vmem:[%s2306_s29 + $0x900] sm:$0xff]  ;;  %v369_v9 = vld [vmem:[%s2306_s29 + $0x908] sm:$0xff] }
  0x34   : > { %v371_v10 = vld [vmem:[%s2306_s29 + $0x940] sm:$0xff]  ;;  %368 = vst [vmem:[%s2311_s30 + $0x240] sm:$0xff] %v367_v8  ;;  %370 = vst [vmem:[%s2311_s30 + $0x248] sm:$0xff] %v369_v9  ;;  %v373_v11 = vld [vmem:[%s2306_s29 + $0x948] sm:$0xff] }
  0x35   : > { %372 = vst [vmem:[%s2311_s30 + $0x250] sm:$0xff] %v371_v10  ;;  %v375_v12 = vld [vmem:[%s2306_s29 + $0x980] sm:$0xff]  ;;  %v377_v13 = vld [vmem:[%s2306_s29 + $0x988] sm:$0xff]  ;;  %374 = vst [vmem:[%s2311_s30 + $0x258] sm:$0xff] %v373_v11 }
  0x36   : > { %376 = vst [vmem:[%s2311_s30 + $0x260] sm:$0xff] %v375_v12  ;;  %378 = vst [vmem:[%s2311_s30 + $0x268] sm:$0xff] %v377_v13  ;;  %v379_v14 = vld [vmem:[%s2306_s29 + $0x9c0] sm:$0xff]  ;;  %v381_v15 = vld [vmem:[%s2306_s29 + $0x9c8] sm:$0xff] }
  0x37   : > { %v383_v16 = vld [vmem:[%s2306_s29 + $0xa00] sm:$0xff]  ;;  %380 = vst [vmem:[%s2311_s30 + $0x270] sm:$0xff] %v379_v14  ;;  %382 = vst [vmem:[%s2311_s30 + $0x278] sm:$0xff] %v381_v15  ;;  %v385_v17 = vld [vmem:[%s2306_s29 + $0xa08] sm:$0xff] }
  0x38   : > { %384 = vst [vmem:[%s2311_s30 + $0x280] sm:$0xff] %v383_v16  ;;  %v387_v18 = vld [vmem:[%s2306_s29 + $0xa40] sm:$0xff]  ;;  %v389_v19 = vld [vmem:[%s2306_s29 + $0xa48] sm:$0xff]  ;;  %386 = vst [vmem:[%s2311_s30 + $0x288] sm:$0xff] %v385_v17 }
  0x39   : > { %388 = vst [vmem:[%s2311_s30 + $0x290] sm:$0xff] %v387_v18  ;;  %390 = vst [vmem:[%s2311_s30 + $0x298] sm:$0xff] %v389_v19  ;;  %v391_v20 = vld [vmem:[%s2306_s29 + $0xa80] sm:$0xff]  ;;  %v393_v21 = vld [vmem:[%s2306_s29 + $0xa88] sm:$0xff] }
  0x3a   : > { %v395_v22 = vld [vmem:[%s2306_s29 + $0xac0] sm:$0xff]  ;;  %392 = vst [vmem:[%s2311_s30 + $0x2a0] sm:$0xff] %v391_v20  ;;  %394 = vst [vmem:[%s2311_s30 + $0x2a8] sm:$0xff] %v393_v21  ;;  %v397_v23 = vld [vmem:[%s2306_s29 + $0xac8] sm:$0xff] }
  0x3b   : > { %396 = vst [vmem:[%s2311_s30 + $0x2b0] sm:$0xff] %v395_v22  ;;  %v399_v24 = vld [vmem:[%s2306_s29 + $0xb00] sm:$0xff]  ;;  %v401_v25 = vld [vmem:[%s2306_s29 + $0xb08] sm:$0xff]  ;;  %398 = vst [vmem:[%s2311_s30 + $0x2b8] sm:$0xff] %v397_v23 }
  0x3c   : > { %400 = vst [vmem:[%s2311_s30 + $0x2c0] sm:$0xff] %v399_v24  ;;  %402 = vst [vmem:[%s2311_s30 + $0x2c8] sm:$0xff] %v401_v25  ;;  %v403_v26 = vld [vmem:[%s2306_s29 + $0xb40] sm:$0xff]  ;;  %v405_v27 = vld [vmem:[%s2306_s29 + $0xb48] sm:$0xff] }
  0x3d   : > { %v407_v28 = vld [vmem:[%s2306_s29 + $0xb80] sm:$0xff]  ;;  %404 = vst [vmem:[%s2311_s30 + $0x2d0] sm:$0xff] %v403_v26  ;;  %406 = vst [vmem:[%s2311_s30 + $0x2d8] sm:$0xff] %v405_v27  ;;  %v409_v29 = vld [vmem:[%s2306_s29 + $0xb88] sm:$0xff] }
  0x3e   : > { %408 = vst [vmem:[%s2311_s30 + $0x2e0] sm:$0xff] %v407_v28  ;;  %v411_v30 = vld [vmem:[%s2306_s29 + $0xbc0] sm:$0xff]  ;;  %v413_v31 = vld [vmem:[%s2306_s29 + $0xbc8] sm:$0xff]  ;;  %410 = vst [vmem:[%s2311_s30 + $0x2e8] sm:$0xff] %v409_v29 }
  0x3f   : > { %412 = vst [vmem:[%s2311_s30 + $0x2f0] sm:$0xff] %v411_v30  ;;  %414 = vst [vmem:[%s2311_s30 + $0x2f8] sm:$0xff] %v413_v31  ;;  %v415_v32 = vld [vmem:[%s2306_s29 + $0xc00] sm:$0xff]  ;;  %v417_v33 = vld [vmem:[%s2306_s29 + $0xc08] sm:$0xff] }
  0x40   : > { %v419_v34 = vld [vmem:[%s2306_s29 + $0xc40] sm:$0xff]  ;;  %416 = vst [vmem:[%s2311_s30 + $0x300] sm:$0xff] %v415_v32  ;;  %418 = vst [vmem:[%s2311_s30 + $0x308] sm:$0xff] %v417_v33  ;;  %v421_v35 = vld [vmem:[%s2306_s29 + $0xc48] sm:$0xff] }
  0x41   : > { %420 = vst [vmem:[%s2311_s30 + $0x310] sm:$0xff] %v419_v34  ;;  %v423_v36 = vld [vmem:[%s2306_s29 + $0xc80] sm:$0xff]  ;;  %v425_v37 = vld [vmem:[%s2306_s29 + $0xc88] sm:$0xff]  ;;  %422 = vst [vmem:[%s2311_s30 + $0x318] sm:$0xff] %v421_v35 }
  0x42   : > { %424 = vst [vmem:[%s2311_s30 + $0x320] sm:$0xff] %v423_v36  ;;  %426 = vst [vmem:[%s2311_s30 + $0x328] sm:$0xff] %v425_v37  ;;  %v427_v38 = vld [vmem:[%s2306_s29 + $0xcc0] sm:$0xff]  ;;  %v429_v39 = vld [vmem:[%s2306_s29 + $0xcc8] sm:$0xff] }
  0x43   : > { %v431_v40 = vld [vmem:[%s2306_s29 + $0xd00] sm:$0xff]  ;;  %428 = vst [vmem:[%s2311_s30 + $0x330] sm:$0xff] %v427_v38  ;;  %430 = vst [vmem:[%s2311_s30 + $0x338] sm:$0xff] %v429_v39  ;;  %v433_v41 = vld [vmem:[%s2306_s29 + $0xd08] sm:$0xff] }
  0x44   : > { %432 = vst [vmem:[%s2311_s30 + $0x340] sm:$0xff] %v431_v40  ;;  %v435_v42 = vld [vmem:[%s2306_s29 + $0xd40] sm:$0xff]  ;;  %v437_v43 = vld [vmem:[%s2306_s29 + $0xd48] sm:$0xff]  ;;  %434 = vst [vmem:[%s2311_s30 + $0x348] sm:$0xff] %v433_v41 }
  0x45   : > { %436 = vst [vmem:[%s2311_s30 + $0x350] sm:$0xff] %v435_v42  ;;  %438 = vst [vmem:[%s2311_s30 + $0x358] sm:$0xff] %v437_v43  ;;  %v439_v44 = vld [vmem:[%s2306_s29 + $0xd80] sm:$0xff]  ;;  %v441_v45 = vld [vmem:[%s2306_s29 + $0xd88] sm:$0xff] }
  0x46   : > { %v443_v46 = vld [vmem:[%s2306_s29 + $0xdc0] sm:$0xff]  ;;  %440 = vst [vmem:[%s2311_s30 + $0x360] sm:$0xff] %v439_v44  ;;  %442 = vst [vmem:[%s2311_s30 + $0x368] sm:$0xff] %v441_v45  ;;  %v445_v47 = vld [vmem:[%s2306_s29 + $0xdc8] sm:$0xff] }
  0x47   : > { %444 = vst [vmem:[%s2311_s30 + $0x370] sm:$0xff] %v443_v46  ;;  %v447_v48 = vld [vmem:[%s2306_s29 + $0xe00] sm:$0xff]  ;;  %v449_v49 = vld [vmem:[%s2306_s29 + $0xe08] sm:$0xff]  ;;  %446 = vst [vmem:[%s2311_s30 + $0x378] sm:$0xff] %v445_v47 }
  0x48   : > { %448 = vst [vmem:[%s2311_s30 + $0x380] sm:$0xff] %v447_v48  ;;  %450 = vst [vmem:[%s2311_s30 + $0x388] sm:$0xff] %v449_v49  ;;  %v451_v50 = vld [vmem:[%s2306_s29 + $0xe40] sm:$0xff]  ;;  %v453_v51 = vld [vmem:[%s2306_s29 + $0xe48] sm:$0xff] }
  0x49   : > { %v455_v52 = vld [vmem:[%s2306_s29 + $0xe80] sm:$0xff]  ;;  %452 = vst [vmem:[%s2311_s30 + $0x390] sm:$0xff] %v451_v50  ;;  %454 = vst [vmem:[%s2311_s30 + $0x398] sm:$0xff] %v453_v51  ;;  %v457_v53 = vld [vmem:[%s2306_s29 + $0xe88] sm:$0xff] }
  0x4a   : > { %456 = vst [vmem:[%s2311_s30 + $0x3a0] sm:$0xff] %v455_v52  ;;  %v459_v54 = vld [vmem:[%s2306_s29 + $0xec0] sm:$0xff]  ;;  %v461_v55 = vld [vmem:[%s2306_s29 + $0xec8] sm:$0xff]  ;;  %458 = vst [vmem:[%s2311_s30 + $0x3a8] sm:$0xff] %v457_v53 }
  0x4b   : > { %460 = vst [vmem:[%s2311_s30 + $0x3b0] sm:$0xff] %v459_v54  ;;  %462 = vst [vmem:[%s2311_s30 + $0x3b8] sm:$0xff] %v461_v55  ;;  %v463_v56 = vld [vmem:[%s2306_s29 + $0xf00] sm:$0xff]  ;;  %v465_v57 = vld [vmem:[%s2306_s29 + $0xf08] sm:$0xff] }
  0x4c   : > { %v467_v58 = vld [vmem:[%s2306_s29 + $0xf40] sm:$0xff]  ;;  %464 = vst [vmem:[%s2311_s30 + $0x3c0] sm:$0xff] %v463_v56  ;;  %466 = vst [vmem:[%s2311_s30 + $0x3c8] sm:$0xff] %v465_v57  ;;  %v469_v59 = vld [vmem:[%s2306_s29 + $0xf48] sm:$0xff] }
  0x4d   : > { %468 = vst [vmem:[%s2311_s30 + $0x3d0] sm:$0xff] %v467_v58  ;;  %v471_v60 = vld [vmem:[%s2306_s29 + $0xf80] sm:$0xff]  ;;  %v473_v61 = vld [vmem:[%s2306_s29 + $0xf88] sm:$0xff]  ;;  %470 = vst [vmem:[%s2311_s30 + $0x3d8] sm:$0xff] %v469_v59 }
  0x4e   : > { %472 = vst [vmem:[%s2311_s30 + $0x3e0] sm:$0xff] %v471_v60  ;;  %474 = vst [vmem:[%s2311_s30 + $0x3e8] sm:$0xff] %v473_v61  ;;  %v475_v62 = vld [vmem:[%s2306_s29 + $0xfc0] sm:$0xff]  ;;  %v477_v63 = vld [vmem:[%s2306_s29 + $0xfc8] sm:$0xff] }
  0x4f   : > { %476 = vst [vmem:[%s2311_s30 + $0x3f0] sm:$0xff] %v475_v62  ;;  %478 = vst [vmem:[%s2311_s30 + $0x3f8] sm:$0xff] %v477_v63 }
  0x50 PF: > { %p1822_p6 = scmp.ge.s32.totalorder %s2234_s19, 1  ;;  %p503_p7 = scmp.lt.s32.totalorder %s2234_s19, 5 }
  0x52   : > { %p504_p8 = pnand %p1822_p6, %p503_p7 }
  0x53   : > { %s510_s5 = sand.u32 (!%p504_p8), 1, %s2218_s15   ;;  %s1824_s10 = sshll.u32 (!%p504_p8), %s2226_s17, 2 }
  0x54   : > { %507 = sbr.rel (%p504_p8) target bundleno = 442 (0x1ba), region = 55  ;;  %s1823_s8 = sshll.u32 (!%p504_p8), %s510_s5, 10 }
  0x55   : > { %s2576_s9 = scalar_lea.vmem (!%p504_p8), [#allocation3], %s1823_s8  ;;  %p570_p9 = scmp.lt.s32.totalorder (!%p504_p8), %s1824_s10, 15 }
  0x59   : > { %v2572_v0 = vld.sshfl [vmem:[%s2771_s0] sm:$0x33 pattern:$0x75316420]  ;;  %v739_v1 = vlaneseq  ;;  %v2236_v2 = vmov 1966171168  }
  0x5a   : > { %v737_v3 = vunpack.c.l.s4 %v2236_v2  ;;  %v2004_v5 = vld [vmem:[%s2576_s9 + $0xe4] ss:$16 sps:$4 sm:$0xff]   ;;  %v735_v7 = vcombine.high %v2572_v0, %v2572_v0  ;;  %v2008_v9 = vld [vmem:[%s2576_s9 + $0xe0] ss:$16 sps:$4 sm:$0xff]   ;;  %s2783_s10 = smov (!%p570_p9, %s1824_s10), 15 }
  0x5b   : > { %v2574_v4 = vshrl.u32 %v739_v1, 7  ;;  %v2006_v6 = vld [vmem:[%s2576_s9 + $0x2e4] ss:$16 sps:$4 sm:$0xff]   ;;  %1396 = vmatprep.subr.bf16.mxu0 %v2004_v5  ;;  %v2009_v10 = vld [vmem:[%s2576_s9 + $0x2e0] ss:$16 sps:$4 sm:$0xff]   ;;  %s572_s13 = scalar_lea.vmem %s2773_s2, %s2783_s10  ;;  %s581_s17 = scalar_lea.vmem %s2774_s3, %s2783_s10 }
  0x5c   : > { %v738_v8 = vunpack.c.0.s8 %v737_v3  ;;  %1437 = vmatprep.subr.bf16.mxu1 %v2006_v6  ;;  %v2010_v11 = vld [vmem:[%s2576_s9 + $0xc4] ss:$16 sps:$4 sm:$0xff]   ;;  %1397 = vmatpush1.bf16.msra.mxu0 %v2008_v9  ;;  %v2014_v14 = vld [vmem:[%s2576_s9 + $0xc0] ss:$16 sps:$4 sm:$0xff]   ;;  %s590_s24 = scalar_lea.vmem %s2775_s4, %s2783_s10 }
  0x5d   : > { %1438 = vmatpush1.bf16.msra.mxu1 %v2009_v10  ;;  %v2012_v13 = vld [vmem:[%s2576_s9 + $0x2c4] ss:$16 sps:$4 sm:$0xff]   ;;  %1398 = vmatprep.subr.bf16.mxu0 %v2010_v11  ;;  %v2015_v15 = vld [vmem:[%s2576_s9 + $0x2c0] ss:$16 sps:$4 sm:$0xff]  }
  0x5e   : > { %v2586_v12 = vsub.s32 %v738_v8, %v2574_v4  ;;  %1439 = vmatprep.subr.bf16.mxu1 %v2012_v13  ;;  %v2016_v17 = vld [vmem:[%s2576_s9 + $0xa4] ss:$16 sps:$4 sm:$0xff]   ;;  %v2020_v19 = vld [vmem:[%s2576_s9 + $0xa0] ss:$16 sps:$4 sm:$0xff]  }
  0x5f   : > { %v2018_v18 = vld [vmem:[%s2576_s9 + $0x2a4] ss:$16 sps:$4 sm:$0xff]   ;;  %v2021_v20 = vld [vmem:[%s2576_s9 + $0x2a0] ss:$16 sps:$4 sm:$0xff]  }
  0x60   : > { %v2592_v16 = vrot.slane %v735_v7, %v2586_v12  ;;  %1399 = vmatpush1.bf16.msra.mxu0 %v2014_v14  ;;  %v2022_v22 = vld [vmem:[%s2576_s9 + $0x84] ss:$16 sps:$4 sm:$0xff]   ;;  %v2026_v24 = vld [vmem:[%s2576_s9 + $0x80] ss:$16 sps:$4 sm:$0xff]   ;;  %v2658_v13 = vrot.slane %v2572_v0, %v2586_v12  ;;  %v2102_v14 = vld [vmem:[%s2576_s9 + $0xec] ss:$16 sps:$4 sm:$0xff]  }
  0x61   : > { %1440 = vmatpush1.bf16.msra.mxu1 %v2015_v15  ;;  %1400 = vmatprep.subr.bf16.mxu0 %v2016_v17  ;;  %v2024_v23 = vld [vmem:[%s2576_s9 + $0x284] ss:$16 sps:$4 sm:$0xff]   ;;  %v2027_v25 = vld [vmem:[%s2576_s9 + $0x280] ss:$16 sps:$4 sm:$0xff]   ;;  %v2105_v15 = vld [vmem:[%s2576_s9 + $0x2ec] ss:$16 sps:$4 sm:$0xff]  }
  0x62   : > { %1428 = vmatprep.mubr.bf16.mxu0 %v2592_v16  ;;  %v2601_v21 = vcombine.high %v2592_v16, %v2592_v16  ;;  %1441 = vmatprep.subr.bf16.mxu1 %v2018_v18  ;;  %v2028_v26 = vld [vmem:[%s2576_s9 + $0x64] ss:$16 sps:$4 sm:$0xff]   ;;  %v2032_v28 = vld [vmem:[%s2576_s9 + $0x60] ss:$16 sps:$4 sm:$0xff]   ;;  %v2664_v17 = vcombine.high %v2658_v13, %v2658_v13  ;;  %v2100_v18 = vld [vmem:[%s2576_s9 + $0xe8] ss:$16 sps:$4 sm:$0xff]  }
  0x63   : > { %v2030_v27 = vld [vmem:[%s2576_s9 + $0x264] ss:$16 sps:$4 sm:$0xff]   ;;  %v2033_v29 = vld [vmem:[%s2576_s9 + $0x260] ss:$16 sps:$4 sm:$0xff]   ;;  %v2108_v0 = vld [vmem:[%s2576_s9 + $0xcc] ss:$16 sps:$4 sm:$0xff]  }
  0x64   : > { %1469 = vmatprep.mubr.bf16.mxu1 %v2601_v21  ;;  %1401 = vmatpush1.bf16.msra.mxu0 %v2020_v19  ;;  %v2034_v30 = vld [vmem:[%s2576_s9 + $0x44] ss:$16 sps:$4 sm:$0xff]   ;;  %v2038_v32 = vld [vmem:[%s2576_s9 + $0x40] ss:$16 sps:$4 sm:$0xff]   ;;  %v2103_v19 = vld [vmem:[%s2576_s9 + $0x2e8] ss:$16 sps:$4 sm:$0xff]  }
  0x65   : > { %1442 = vmatpush1.bf16.msra.mxu1 %v2021_v20  ;;  %1402 = vmatprep.subr.bf16.mxu0 %v2022_v22  ;;  %v2036_v31 = vld [vmem:[%s2576_s9 + $0x244] ss:$16 sps:$4 sm:$0xff]   ;;  %v2039_v33 = vld [vmem:[%s2576_s9 + $0x240] ss:$16 sps:$4 sm:$0xff]   ;;  %v2111_v20 = vld [vmem:[%s2576_s9 + $0x2cc] ss:$16 sps:$4 sm:$0xff]  }
  0x66   : > { %1443 = vmatprep.subr.bf16.mxu1 %v2024_v23  ;;  %v2040_v34 = vld [vmem:[%s2576_s9 + $0x24] ss:$16 sps:$4 sm:$0xff]   ;;  %v2044_v36 = vld [vmem:[%s2576_s9 + $0x20] ss:$16 sps:$4 sm:$0xff]   ;;  %v2106_v22 = vld [vmem:[%s2576_s9 + $0xc8] ss:$16 sps:$4 sm:$0xff]  }
  0x67   : > { %v2042_v35 = vld [vmem:[%s2576_s9 + $0x224] ss:$16 sps:$4 sm:$0xff]   ;;  %v2045_v37 = vld [vmem:[%s2576_s9 + $0x220] ss:$16 sps:$4 sm:$0xff]   ;;  %v2109_v23 = vld [vmem:[%s2576_s9 + $0x2c8] ss:$16 sps:$4 sm:$0xff]  }
  0x68   : > { %1403 = vmatpush1.bf16.msra.mxu0 %v2026_v24  ;;  %v2046_v38 = vld [vmem:[%s2576_s9 + $0x4] ss:$16 sps:$4 sm:$0xff]   ;;  %v2050_v40 = vld [vmem:[%s2576_s9] ss:$16 sps:$4 sm:$0xff]   ;;  %v2114_v24 = vld [vmem:[%s2576_s9 + $0xac] ss:$16 sps:$4 sm:$0xff]  }
  0x69   : > { %1444 = vmatpush1.bf16.msra.mxu1 %v2027_v25  ;;  %1404 = vmatprep.subr.bf16.mxu0 %v2028_v26  ;;  %v2048_v39 = vld [vmem:[%s2576_s9 + $0x204] ss:$16 sps:$4 sm:$0xff]   ;;  %v2051_v41 = vld [vmem:[%s2576_s9 + $0x200] ss:$16 sps:$4 sm:$0xff]   ;;  %v2117_v25 = vld [vmem:[%s2576_s9 + $0x2ac] ss:$16 sps:$4 sm:$0xff]  }
  0x6a   : > { %1445 = vmatprep.subr.bf16.mxu1 %v2030_v27  ;;  %v2052_v42 = vld [vmem:[%s2576_s9 + $0x1e4] ss:$16 sps:$4 sm:$0xff]   ;;  %v2056_v44 = vld [vmem:[%s2576_s9 + $0x1e0] ss:$16 sps:$4 sm:$0xff]   ;;  %v2112_v26 = vld [vmem:[%s2576_s9 + $0xa8] ss:$16 sps:$4 sm:$0xff]  }
  0x6b   : > { %v2054_v43 = vld [vmem:[%s2576_s9 + $0x3e4] ss:$16 sps:$4 sm:$0xff]   ;;  %v2057_v45 = vld [vmem:[%s2576_s9 + $0x3e0] ss:$16 sps:$4 sm:$0xff]   ;;  %v2115_v27 = vld [vmem:[%s2576_s9 + $0x2a8] ss:$16 sps:$4 sm:$0xff]  }
  0x6c   : > { %1405 = vmatpush1.bf16.msra.mxu0 %v2032_v28  ;;  %v2058_v46 = vld [vmem:[%s2576_s9 + $0x1c4] ss:$16 sps:$4 sm:$0xff]   ;;  %v2062_v48 = vld [vmem:[%s2576_s9 + $0x1c0] ss:$16 sps:$4 sm:$0xff]   ;;  %v2120_v28 = vld [vmem:[%s2576_s9 + $0x8c] ss:$16 sps:$4 sm:$0xff]  }
  0x6d   : > { %1446 = vmatpush1.bf16.msra.mxu1 %v2033_v29  ;;  %1406 = vmatprep.subr.bf16.mxu0 %v2034_v30  ;;  %v2060_v47 = vld [vmem:[%s2576_s9 + $0x3c4] ss:$16 sps:$4 sm:$0xff]   ;;  %v2063_v49 = vld [vmem:[%s2576_s9 + $0x3c0] ss:$16 sps:$4 sm:$0xff]   ;;  %v2123_v29 = vld [vmem:[%s2576_s9 + $0x28c] ss:$16 sps:$4 sm:$0xff]  }
  0x6e   : > { %1447 = vmatprep.subr.bf16.mxu1 %v2036_v31  ;;  %v2064_v50 = vld [vmem:[%s2576_s9 + $0x1a4] ss:$16 sps:$4 sm:$0xff]   ;;  %v2068_v52 = vld [vmem:[%s2576_s9 + $0x1a0] ss:$16 sps:$4 sm:$0xff]   ;;  %v2118_v30 = vld [vmem:[%s2576_s9 + $0x88] ss:$16 sps:$4 sm:$0xff]  }
  0x6f   : > { %v2066_v51 = vld [vmem:[%s2576_s9 + $0x3a4] ss:$16 sps:$4 sm:$0xff]   ;;  %v2069_v53 = vld [vmem:[%s2576_s9 + $0x3a0] ss:$16 sps:$4 sm:$0xff]   ;;  %v2121_v31 = vld [vmem:[%s2576_s9 + $0x288] ss:$16 sps:$4 sm:$0xff]  }
  0x70   : > { %1407 = vmatpush1.bf16.msra.mxu0 %v2038_v32  ;;  %v2070_v54 = vld [vmem:[%s2576_s9 + $0x184] ss:$16 sps:$4 sm:$0xff]   ;;  %v2074_v56 = vld [vmem:[%s2576_s9 + $0x180] ss:$16 sps:$4 sm:$0xff]   ;;  %v2124_v32 = vld [vmem:[%s2576_s9 + $0x68] ss:$16 sps:$4 sm:$0xff]  }
  0x71   : > { %1448 = vmatpush1.bf16.msra.mxu1 %v2039_v33  ;;  %1408 = vmatprep.subr.bf16.mxu0 %v2040_v34  ;;  %v2072_v55 = vld [vmem:[%s2576_s9 + $0x384] ss:$16 sps:$4 sm:$0xff]   ;;  %v2075_v57 = vld [vmem:[%s2576_s9 + $0x380] ss:$16 sps:$4 sm:$0xff]   ;;  %v2127_v33 = vld [vmem:[%s2576_s9 + $0x268] ss:$16 sps:$4 sm:$0xff]  }
  0x72   : > { %1449 = vmatprep.subr.bf16.mxu1 %v2042_v35  ;;  %v2076_v58 = vld [vmem:[%s2576_s9 + $0x164] ss:$16 sps:$4 sm:$0xff]   ;;  %v2080_v60 = vld [vmem:[%s2576_s9 + $0x160] ss:$16 sps:$4 sm:$0xff]   ;;  %v2132_v34 = vld [vmem:[%s2576_s9 + $0x4c] ss:$16 sps:$4 sm:$0xff]  }
  0x73   : > { %v2078_v59 = vld [vmem:[%s2576_s9 + $0x364] ss:$16 sps:$4 sm:$0xff]   ;;  %v2081_v61 = vld [vmem:[%s2576_s9 + $0x360] ss:$16 sps:$4 sm:$0xff]   ;;  %v2135_v35 = vld [vmem:[%s2576_s9 + $0x24c] ss:$16 sps:$4 sm:$0xff]  }
  0x74   : > { %1409 = vmatpush1.bf16.msra.mxu0 %v2044_v36  ;;  %v2082_v62 = vld [vmem:[%s2576_s9 + $0x144] ss:$16 sps:$4 sm:$0xff]   ;;  %v2086_v1 = vld [vmem:[%s2576_s9 + $0x140] ss:$16 sps:$4 sm:$0xff]   ;;  %v2130_v36 = vld [vmem:[%s2576_s9 + $0x48] ss:$16 sps:$4 sm:$0xff]  }
  0x75   : > { %1450 = vmatpush1.bf16.msra.mxu1 %v2045_v37  ;;  %1410 = vmatprep.subr.bf16.mxu0 %v2046_v38  ;;  %v2084_v63 = vld [vmem:[%s2576_s9 + $0x344] ss:$16 sps:$4 sm:$0xff]   ;;  %v2087_v2 = vld [vmem:[%s2576_s9 + $0x340] ss:$16 sps:$4 sm:$0xff]   ;;  %v2133_v37 = vld [vmem:[%s2576_s9 + $0x248] ss:$16 sps:$4 sm:$0xff]  }
  0x76   : > { %1451 = vmatprep.subr.bf16.mxu1 %v2048_v39  ;;  %v2088_v3 = vld [vmem:[%s2576_s9 + $0x124] ss:$16 sps:$4 sm:$0xff]   ;;  %v2092_v6 = vld [vmem:[%s2576_s9 + $0x120] ss:$16 sps:$4 sm:$0xff]   ;;  %v2138_v38 = vld [vmem:[%s2576_s9 + $0x2c] ss:$16 sps:$4 sm:$0xff]  }
  0x77   : > { %v2090_v5 = vld [vmem:[%s2576_s9 + $0x324] ss:$16 sps:$4 sm:$0xff]   ;;  %v2093_v7 = vld [vmem:[%s2576_s9 + $0x320] ss:$16 sps:$4 sm:$0xff]   ;;  %v2141_v39 = vld [vmem:[%s2576_s9 + $0x22c] ss:$16 sps:$4 sm:$0xff]  }
  0x78   : > { %1411 = vmatpush1.bf16.msra.mxu0 %v2050_v40  ;;  %v2094_v8 = vld [vmem:[%s2576_s9 + $0x104] ss:$16 sps:$4 sm:$0xff]   ;;  %v2098_v10 = vld [vmem:[%s2576_s9 + $0x100] ss:$16 sps:$4 sm:$0xff]   ;;  %v2136_v40 = vld [vmem:[%s2576_s9 + $0x28] ss:$16 sps:$4 sm:$0xff]  }
  0x79   : > { %1452 = vmatpush1.bf16.msra.mxu1 %v2051_v41  ;;  %1412 = vmatprep.subr.bf16.mxu0 %v2052_v42  ;;  %v2096_v9 = vld [vmem:[%s2576_s9 + $0x304] ss:$16 sps:$4 sm:$0xff]   ;;  %v2099_v11 = vld [vmem:[%s2576_s9 + $0x300] ss:$16 sps:$4 sm:$0xff]   ;;  %v2139_v41 = vld [vmem:[%s2576_s9 + $0x228] ss:$16 sps:$4 sm:$0xff]  }
  0x7a   : > { %1453 = vmatprep.subr.bf16.mxu1 %v2054_v43  ;;  %v2144_v42 = vld [vmem:[%s2576_s9 + $0xc] ss:$16 sps:$4 sm:$0xff]  }
  0x7b   : > { %v2147_v43 = vld [vmem:[%s2576_s9 + $0x20c] ss:$16 sps:$4 sm:$0xff]  }
  0x7c   : > { %1413 = vmatpush2.bf16.msra.mxu0 %v2056_v44  ;;  %v2142_v44 = vld [vmem:[%s2576_s9 + $0x8] ss:$16 sps:$4 sm:$0xff]  }
  0x7d   : > { %1454 = vmatpush2.bf16.msra.mxu1 %v2057_v45  ;;  %1414 = vmatprep.subr.bf16.mxu0 %v2058_v46  ;;  %v2145_v45 = vld [vmem:[%s2576_s9 + $0x208] ss:$16 sps:$4 sm:$0xff]   ;;  %v2150_v46 = vld [vmem:[%s2576_s9 + $0x1ec] ss:$16 sps:$4 sm:$0xff]  }
  0x7e   : > { %1455 = vmatprep.subr.bf16.mxu1 %v2060_v47  ;;  %v2153_v47 = vld [vmem:[%s2576_s9 + $0x3ec] ss:$16 sps:$4 sm:$0xff]  }
  0x80   : > { %1415 = vmatpush2.bf16.msra.mxu0 %v2062_v48  ;;  %v2148_v48 = vld [vmem:[%s2576_s9 + $0x1e8] ss:$16 sps:$4 sm:$0xff]  }
  0x81   : > { %1456 = vmatpush2.bf16.msra.mxu1 %v2063_v49  ;;  %1416 = vmatprep.subr.bf16.mxu0 %v2064_v50  ;;  %v2151_v49 = vld [vmem:[%s2576_s9 + $0x3e8] ss:$16 sps:$4 sm:$0xff]   ;;  %v2156_v50 = vld [vmem:[%s2576_s9 + $0x1cc] ss:$16 sps:$4 sm:$0xff]  }
  0x82   : > { %1457 = vmatprep.subr.bf16.mxu1 %v2066_v51  ;;  %v2159_v51 = vld [vmem:[%s2576_s9 + $0x3cc] ss:$16 sps:$4 sm:$0xff]  }
  0x84   : > { %1417 = vmatpush2.bf16.msra.mxu0 %v2068_v52  ;;  %v2154_v52 = vld [vmem:[%s2576_s9 + $0x1c8] ss:$16 sps:$4 sm:$0xff]  }
  0x85   : > { %1458 = vmatpush2.bf16.msra.mxu1 %v2069_v53  ;;  %1418 = vmatprep.subr.bf16.mxu0 %v2070_v54  ;;  %v2157_v53 = vld [vmem:[%s2576_s9 + $0x3c8] ss:$16 sps:$4 sm:$0xff]   ;;  %v2162_v54 = vld [vmem:[%s2576_s9 + $0x1ac] ss:$16 sps:$4 sm:$0xff]  }
  0x86   : > { %1459 = vmatprep.subr.bf16.mxu1 %v2072_v55  ;;  %v2165_v55 = vld [vmem:[%s2576_s9 + $0x3ac] ss:$16 sps:$4 sm:$0xff]  }
  0x88   : > { %1419 = vmatpush2.bf16.msra.mxu0 %v2074_v56  ;;  %v2160_v56 = vld [vmem:[%s2576_s9 + $0x1a8] ss:$16 sps:$4 sm:$0xff]  }
  0x89   : > { %1460 = vmatpush2.bf16.msra.mxu1 %v2075_v57  ;;  %1420 = vmatprep.subr.bf16.mxu0 %v2076_v58  ;;  %v2163_v57 = vld [vmem:[%s2576_s9 + $0x3a8] ss:$16 sps:$4 sm:$0xff]   ;;  %v2168_v58 = vld [vmem:[%s2576_s9 + $0x18c] ss:$16 sps:$4 sm:$0xff]  }
  0x8a   : > { %1461 = vmatprep.subr.bf16.mxu1 %v2078_v59  ;;  %v2171_v59 = vld [vmem:[%s2576_s9 + $0x38c] ss:$16 sps:$4 sm:$0xff]  }
  0x8c   : > { %1421 = vmatpush2.bf16.msra.mxu0 %v2080_v60  ;;  %v2166_v60 = vld [vmem:[%s2576_s9 + $0x188] ss:$16 sps:$4 sm:$0xff]  }
  0x8d   : > { %1462 = vmatpush2.bf16.msra.mxu1 %v2081_v61  ;;  %1422 = vmatprep.subr.bf16.mxu0 %v2082_v62  ;;  %v2169_v61 = vld [vmem:[%s2576_s9 + $0x388] ss:$16 sps:$4 sm:$0xff]   ;;  %v2174_v62 = vld [vmem:[%s2576_s9 + $0x16c] ss:$16 sps:$4 sm:$0xff]  }
  0x8e   : > { %1463 = vmatprep.subr.bf16.mxu1 %v2084_v63  ;;  %v2177_v63 = vld [vmem:[%s2576_s9 + $0x36c] ss:$16 sps:$4 sm:$0xff]  }
  0x90   : > { %1423 = vmatpush2.bf16.msra.mxu0 %v2086_v1  ;;  %v2172_v1 = vld [vmem:[%s2576_s9 + $0x168] ss:$16 sps:$4 sm:$0xff]  }
  0x91   : > { %1464 = vmatpush2.bf16.msra.mxu1 %v2087_v2  ;;  %1424 = vmatprep.subr.bf16.mxu0 %v2088_v3  ;;  %v2175_v2 = vld [vmem:[%s2576_s9 + $0x368] ss:$16 sps:$4 sm:$0xff]   ;;  %v2180_v3 = vld [vmem:[%s2576_s9 + $0x14c] ss:$16 sps:$4 sm:$0xff]  }
  0x92   : > { %1465 = vmatprep.subr.bf16.mxu1 %v2090_v5  ;;  %v2183_v5 = vld [vmem:[%s2576_s9 + $0x34c] ss:$16 sps:$4 sm:$0xff]  }
  0x94   : > { %1425 = vmatpush2.bf16.msra.mxu0 %v2092_v6  ;;  %v2178_v6 = vld [vmem:[%s2576_s9 + $0x148] ss:$16 sps:$4 sm:$0xff]  }
  0x95   : > { %1466 = vmatpush2.bf16.msra.mxu1 %v2093_v7  ;;  %1426 = vmatprep.subr.bf16.mxu0 %v2094_v8  ;;  %v2181_v7 = vld [vmem:[%s2576_s9 + $0x348] ss:$16 sps:$4 sm:$0xff]   ;;  %v2186_v8 = vld [vmem:[%s2576_s9 + $0x12c] ss:$16 sps:$4 sm:$0xff]  }
  0x96   : > { %1467 = vmatprep.subr.bf16.mxu1 %v2096_v9  ;;  %v2189_v9 = vld [vmem:[%s2576_s9 + $0x32c] ss:$16 sps:$4 sm:$0xff]  }
  0x98   : > { %1427 = vmatpush2.bf16.msra.mxu0 %v2098_v10  ;;  %v2184_v10 = vld [vmem:[%s2576_s9 + $0x128] ss:$16 sps:$4 sm:$0xff]  }
  0x99   : > { %1468 = vmatpush2.bf16.msra.mxu1 %v2099_v11  ;;  %1478 = vmatprep.subr.bf16.mxu0 %v2102_v14  ;;  %v2187_v11 = vld [vmem:[%s2576_s9 + $0x328] ss:$16 sps:$4 sm:$0xff]   ;;  %v2192_v14 = vld [vmem:[%s2576_s9 + $0x10c] ss:$16 sps:$4 sm:$0xff]  }
  0x9a   : > { %1519 = vmatprep.subr.bf16.mxu1 %v2105_v15  ;;  %v2195_v15 = vld [vmem:[%s2576_s9 + $0x30c] ss:$16 sps:$4 sm:$0xff]  }
  0x9b   : > { %1429 = vmatmul.mubr.bf16.vlgmr.msra.gmra.mxu0 %v2658_v13 }
  0x9c   : > { %1470 = vmatmul.mubr.bf16.vlgmr.msra.gmra.mxu1 %v2664_v17  ;;  %1479 = vmatpush1.bf16.msra.mxu0 %v2100_v18  ;;  %v2190_v18 = vld [vmem:[%s2576_s9 + $0x108] ss:$16 sps:$4 sm:$0xff]  }
  0x9d   : > { %1520 = vmatpush1.bf16.msra.mxu1 %v2103_v19  ;;  %1480 = vmatprep.subr.bf16.mxu0 %v2108_v0  ;;  %v2193_v19 = vld [vmem:[%s2576_s9 + $0x308] ss:$16 sps:$4 sm:$0xff]  }
  0x9e   : > { %1521 = vmatprep.subr.bf16.mxu1 %v2111_v20  ;;  %1510 = vmatprep.mubr.bf16.mxu0 %v2592_v16  ;;  %v2126_v16 = vld [vmem:[%s2576_s9 + $0x6c] ss:$16 sps:$4 sm:$0xff]  }
  0x9f   : > { %1551 = vmatprep.mubr.bf16.mxu1 %v2601_v21  ;;  %v2129_v21 = vld [vmem:[%s2576_s9 + $0x26c] ss:$16 sps:$4 sm:$0xff]  }
  0xa0   : > { %1481 = vmatpush1.bf16.msra.mxu0 %v2106_v22 }
  0xa1   : > { %1522 = vmatpush1.bf16.msra.mxu1 %v2109_v23  ;;  %1482 = vmatprep.subr.bf16.mxu0 %v2114_v24 }
  0xa2   : > { %1523 = vmatprep.subr.bf16.mxu1 %v2117_v25 }
  0xa4   : > { %1483 = vmatpush1.bf16.msra.mxu0 %v2112_v26 }
  0xa5   : > { %1524 = vmatpush1.bf16.msra.mxu1 %v2115_v27  ;;  %1484 = vmatprep.subr.bf16.mxu0 %v2120_v28 }
  0xa6   : > { %1525 = vmatprep.subr.bf16.mxu1 %v2123_v29 }
  0xa8   : > { %1485 = vmatpush1.bf16.msra.mxu0 %v2118_v30 }
  0xa9   : > { %1526 = vmatpush1.bf16.msra.mxu1 %v2121_v31  ;;  %1486 = vmatprep.subr.bf16.mxu0 %v2126_v16  ;;  %v1600_v31 = vsub.s32 2, %v2574_v4  ;;  %v1604_v16 = vsub.s32 3, %v2574_v4 }
  0xaa   : > { %1527 = vmatprep.subr.bf16.mxu1 %v2129_v21  ;;  %v1588_v21 = vld [vmem:[%s572_s13] sm:$0xf] }
  0xac   : > { %1487 = vmatpush1.bf16.msra.mxu0 %v2124_v32  ;;  %v2237_v32 = vmov 1983009808  }
  0xad   : > { %1528 = vmatpush1.bf16.msra.mxu1 %v2127_v33  ;;  %1488 = vmatprep.subr.bf16.mxu0 %v2132_v34  ;;  %v1567_v33 = vunpack.c.l.s4 %v2237_v32 }
  0xae   : > { %1529 = vmatprep.subr.bf16.mxu1 %v2135_v35 }
  0xb0   : > { %1489 = vmatpush1.bf16.msra.mxu0 %v2130_v36  ;;  %v1601_v36 = vrot.slane %v1588_v21, %v1600_v31 }
  0xb1   : > { %1530 = vmatpush1.bf16.msra.mxu1 %v2133_v37  ;;  %1490 = vmatprep.subr.bf16.mxu0 %v2138_v38  ;;  %v1605_v37 = vrot.slane %v1588_v21, %v1604_v16  ;;  %v1568_v38 = vunpack.c.0.s8 %v1567_v33 }
  0xb2   : > { %1531 = vmatprep.subr.bf16.mxu1 %v2141_v39 }
  0xb4   : > { %1491 = vmatpush1.bf16.msra.mxu0 %v2136_v40  ;;  %v1607_v40 = vcombine.low %v1601_v36, %v1605_v37 }
  0xb5   : > { %1532 = vmatpush1.bf16.msra.mxu1 %v2139_v41  ;;  %1492 = vmatprep.subr.bf16.mxu0 %v2144_v42 }
  0xb6   : > { %1533 = vmatprep.subr.bf16.mxu1 %v2147_v43  ;;  %v1571_v43 = vsub.s32 %v1568_v38, %v2574_v4 }
  0xb8   : > { %1493 = vmatpush1.bf16.msra.mxu0 %v2142_v44 }
  0xb9   : > { %1534 = vmatpush1.bf16.msra.mxu1 %v2145_v45  ;;  %1494 = vmatprep.subr.bf16.mxu0 %v2150_v46 }
  0xba   : > { %1535 = vmatprep.subr.bf16.mxu1 %v2153_v47 }
  0xbc   : > { %1495 = vmatpush2.bf16.msra.mxu0 %v2148_v48 }
  0xbd   : > { %1536 = vmatpush2.bf16.msra.mxu1 %v2151_v49  ;;  %1496 = vmatprep.subr.bf16.mxu0 %v2156_v50  ;;  %v1621_v49 = vrot.slane %v1607_v40, %v1571_v43 }
  0xbe   : > { %1537 = vmatprep.subr.bf16.mxu1 %v2159_v51 }
  0xc0   : > { %1497 = vmatpush2.bf16.msra.mxu0 %v2154_v52 }
  0xc1   : > { %1538 = vmatpush2.bf16.msra.mxu1 %v2157_v53  ;;  %1498 = vmatprep.subr.bf16.mxu0 %v2162_v54  ;;  %v1625_v53 = vld [vmem:[%s581_s17] sm:$0xf] }
  0xc2   : > { %1539 = vmatprep.subr.bf16.mxu1 %v2165_v55 }
  0xc4   : > { %1499 = vmatpush2.bf16.msra.mxu0 %v2160_v56 }
  0xc5   : > { %1540 = vmatpush2.bf16.msra.mxu1 %v2163_v57  ;;  %1500 = vmatprep.subr.bf16.mxu0 %v2168_v58 }
  0xc6   : > { %1541 = vmatprep.subr.bf16.mxu1 %v2171_v59  ;;  %v1626_v59 = vunpack.c.l.bf16 %v1625_v53 }
  0xc8   : > { %1501 = vmatpush2.bf16.msra.mxu0 %v2166_v60 }
  0xc9   : > { %1542 = vmatpush2.bf16.msra.mxu1 %v2169_v61  ;;  %1502 = vmatprep.subr.bf16.mxu0 %v2174_v62 }
  0xca   : > { %1543 = vmatprep.subr.bf16.mxu1 %v2177_v63 }
  0xcc   : > { %1503 = vmatpush2.bf16.msra.mxu0 %v2172_v1 }
  0xcd   : > { %1544 = vmatpush2.bf16.msra.mxu1 %v2175_v2  ;;  %1504 = vmatprep.subr.bf16.mxu0 %v2180_v3 }
  0xce   : > { %1545 = vmatprep.subr.bf16.mxu1 %v2183_v5 }
  0xd0   : > { %1505 = vmatpush2.bf16.msra.mxu0 %v2178_v6 }
  0xd1   : > { %1546 = vmatpush2.bf16.msra.mxu1 %v2181_v7  ;;  %1506 = vmatprep.subr.bf16.mxu0 %v2186_v8 }
  0xd2   : > { %1547 = vmatprep.subr.bf16.mxu1 %v2189_v9 }
  0xd4   : > { %1507 = vmatpush2.bf16.msra.mxu0 %v2184_v10 }
  0xd5   : > { %1548 = vmatpush2.bf16.msra.mxu1 %v2187_v11  ;;  %1508 = vmatprep.subr.bf16.mxu0 %v2192_v14 }
  0xd6   : > { %1549 = vmatprep.subr.bf16.mxu1 %v2195_v15 }
  0xd8   : > { %1509 = vmatpush2.bf16.msra.mxu0 %v2190_v18 }
  0xd9   : > { %1550 = vmatpush2.bf16.msra.mxu1 %v2193_v19 }
  0xdb   : > { %1511 = vmatmul.mubr.bf16.vlgmr.msra.gmra.mxu0 %v2658_v13  ;;  %v1592_v13 = vsub.s32 0, %v2574_v4 }
  0xdc   : > { %1552 = vmatmul.mubr.bf16.vlgmr.msra.gmra.mxu1 %v2664_v17  ;;  %v1596_v17 = vsub.s32 1, %v2574_v4 }
  0xdd   : > { %v1593_v34 = vrot.slane %v1588_v21, %v1592_v13 }
  0xde   : > { %v1597_v35 = vrot.slane %v1588_v21, %v1596_v17 }
  0xe0   : > { %v1606_v39 = vcombine.low %v1593_v34, %v1597_v35 }
  0xe2   : > { %v1614_v48 = vrot.slane %v1606_v39, %v1571_v43 }
  0xe4   : > { %v1622_v4 = vcombine.low %v1614_v48, %v1621_v49 }
 0x15b   : > { %v1430_v0 = vpop.f32.mrf.mxu0 }
 0x15c   : > { %v1471_v20 = vpop.f32.mrf.mxu1 }
 0x15d   : > { %v1472_v22 = vadd.f32 %v1471_v20, %v1430_v0  ;;  %v1432_v23 = vpop.f32.mrf.mxu0 }
 0x15e   : > { %v1473_v24 = vpop.f32.mrf.mxu1 }
 0x15f   : > { %v1474_v25 = vadd.f32 %v1473_v24, %v1432_v23  ;;  %v1434_v26 = vpop.f32.mrf.mxu0 }
 0x160   : > { %v1475_v27 = vpop.f32.mrf.mxu1 }
 0x161   : > { %v1564_v28 = vcombine.low %v1472_v22, %v1474_v25  ;;  %v1435_v29 = vpop.f32.mrf.mxu0 }
 0x162   : > { %v1476_v30 = vpop.f32.mrf.mxu1 }
 0x163   : > { %v1572_v56 = vrot.slane %v1564_v28, %v1571_v43 }
 0x19b   : > { %v1512_v41 = vpop.f32.mrf.mxu0 }
 0x19c   : > { %v1553_v42 = vpop.f32.mrf.mxu1 }
 0x19d   : > { %v1514_v44 = vpop.f32.mrf.mxu0  ;;  %v1554_v46 = vadd.f32 %v1553_v42, %v1512_v41 }
 0x19e   : > { %v1555_v45 = vpop.f32.mrf.mxu1 }
 0x19f   : > { %v1556_v47 = vadd.f32 %v1555_v45, %v1514_v44  ;;  %v1516_v50 = vpop.f32.mrf.mxu0 }
 0x1a0   : > { %v1557_v51 = vpop.f32.mrf.mxu1 }
 0x1a1   : > { %v1565_v52 = vcombine.low %v1554_v46, %v1556_v47  ;;  %v1517_v54 = vpop.f32.mrf.mxu0 }
 0x1a2   : > { %v1558_v55 = vpop.f32.mrf.mxu1 }
 0x1a3   : > { %v1579_v57 = vrot.slane %v1565_v52, %v1571_v43 }
 0x1a5   : > { %v1580_v58 = vcombine.low %v1572_v56, %v1579_v57 }
 0x1a7   : > { %v1624_v60 = vadd.f32 %v1622_v4, %v1580_v58 }
 0x1a9   : > { %v1627_v61 = vadd.f32 %v1626_v59, %v1624_v60 }
 0x1ab   : > { %v1628_v62 = vmax.f32 %v1627_v61, 0.0 }
 0x1ad   : > { %v1630_v63 = vcombine.high %v1628_v62, %v1628_v62  ;;  %v1637_v1 = vrot.slane %v1628_v62, %v1571_v43 }
 0x1af   : > { %v1644_v2 = vrot.slane %v1630_v63, %v1571_v43  ;;  %v1645_v3 = vcombine.high %v1637_v1, %v1637_v1 }
 0x1b1   : > { %v1646_v5 = vcombine.high %v1644_v2, %v1644_v2  ;;  %v1956_v6 = vpack.c.bf16 %v1645_v3, %v1637_v1 }
 0x1b3   : > { %v1957_v7 = vpack.c.bf16 %v1646_v5, %v1644_v2  ;;  %v1667_v8 = vrot.slane %v1956_v6, %v2586_v12 }
 0x1b5   : > { %v1674_v9 = vrot.slane %v1957_v7, %v2586_v12 }
 0x1b7   : > { %v1675_v10 = vcombine.low %v1667_v8, %v1674_v9 }
 0x1b9   : > { %1958 = vst.sshfl [vmem:[%s590_s24] sm:$0x55 pattern:$0x73625140] %v1675_v10 }
 0x1ba PF: > { %s14_s19 = sadd.s32 1, %s2234_s19   ;;  %s2776_s15 = smov %s2222_s16 }
 0x1bb   : > { %p11_p10 = scmp.ge.s32.totalorder %s14_s19, 6   ;;  %s2777_s16 = smov %s2298_s23 }
 0x1bc   : > { %s2778_s17 = smov %s2230_s18  ;;  %s2779_s18 = smov %s2781_s20 }
 0x1bd   :  { %13 = sbr.rel (!%p11_p10) target bundleno = 3 (0x3), region = 111 }

// kernel: depth_aware_resnet_forward.38
= control target key start
LH: loop header
LB: loop body
LE: loop exit
PB: predicated region body
PF: predicated region fallthrough
CT: control target
= control target key end

     0   :  { %s2217_s12 = smov 0   ;;  %s2219_s13 = smov 0   ;;  %s2750_s0 = inlined_call_operand.vmem [shape: bf16[2,1024], index: 0, kind: input, shape index: {}]   ;;  %s2751_s1 = inlined_call_operand.vmem [shape: bf16[1024,2048], index: 1, kind: input, shape index: {}]   ;;  %s2752_s2 = inlined_call_operand.vmem [shape: f32[1,2048], index: 2, kind: input, shape index: {}]   ;;  %s2753_s3 = inlined_call_operand.vmem [shape: bf16[2,2048], index: 3, kind: output, shape index: {}]  }
   0x1   :  { %s2221_s14 = smov 0   ;;  %s2223_s15 = smov 0  }
   0x2   :  { %s2225_s16 = smov 0   ;;  %s2227_s17 = smov 0  }
   0x3   :  { %s2229_s18 = smov 0  }
   0x4 LB: > { %s25_s19 = sadd.s32 1, %s2184_s16  ;;  %s28_s20 = sadd.s32 1, %s2188_s17  ;;  %s2192_s18 = sphi %s2229_s18, %s13_s18   ;;  %s2188_s17 = sphi %s2227_s17, %s2759_s17   ;;  %s2184_s16 = sphi %s2225_s16, %s2758_s16   ;;  %s2180_s15 = sphi %s2223_s15, %s2757_s15   ;;  %s2176_s14 = sphi %s2221_s14, %s2756_s14   ;;  %s2172_s13 = sphi %s2219_s13, %s2755_s13   ;;  %s2168_s12 = sphi %s2217_s12, %s2754_s12  }
   0x5   : > { %p26_p0 = scmp.ge.s32.totalorder %s25_s19, 2  ;;  %p76_p1 = scmp.ne.s32.totalorder %s2172_s13, %s2168_s12 }
   0x6   : > { %p77_p2 = scmp.eq.s32.totalorder %s2192_s18, 0  ;;  %s69_s24 = sadd.s32 1, %s2172_s13 }
   0x7   : > { %s2761_s19 = smov (%p26_p0, %s25_s19), 0  ;;  %s2763_s20 = smov (!%p26_p0, %s28_s20), %s2188_s17 }
   0x8   : > { %p78_p3 = por %p77_p2, %p76_p1  ;;  %p30_p4 = scmp.ge.s32.totalorder %s2763_s20, 4 }
   0x9   : > { %s64_s21 = ssub.s32 %s2184_s16, %s2761_s19  ;;  %p1739_p6 = scmp.ge.s32.totalorder %s2192_s18, 8 }
   0xa   : > { %s2765_s20 = smov (%p30_p4, %s2763_s20), 0 }
   0xb   : > { %s65_s22 = ssub.s32 %s2188_s17, %s2765_s20  ;;  %156 = sbr.rel (%p1739_p6) target bundleno = 87 (0x57), region = 16 }
   0xc   : > { %s66_s23 = sor.u32 %s65_s22, %s64_s21 }
   0xd   : > { %p67_p5 = scmp.eq.s32.totalorder %s66_s23, 0 }
   0xf   : > { %s2268_s25 = scalar_select %p67_p5, %s2172_s13, %s69_s24  }
  0x10   : > { %171 = sbr.rel (!%p78_p3) target bundleno = 87 (0x57), region = 24  ;;  %s173_s26 = sand.u32 (%p78_p3), 1, %s2172_s13  }
  0x11   : > { %s1742_s27 = sshll.u32 (%p78_p3), %s2188_s17, 2  ;;  %s1740_s28 = sshll.u32 (%p78_p3), %s173_s26, 10 }
  0x12   : > { %s1886_s29 = sshll.u32 (%p78_p3), %s2184_s16, 10  ;;  %s2282_s8 = scalar_lea.vmem (%p78_p3), [#allocation3], %s1740_s28 }
  0x13   : > { %s179_s30 = sadd.s32 (%p78_p3), %s1886_s29, %s1742_s27 }
  0x14   : > { %s1744_s4 = sshll.u32 (%p78_p3), %s179_s30, 2 }
  0x15   : > { %s2277_s7 = scalar_lea.vmem %s2751_s1, %s1744_s4 }
  0x16   : > { %v194_v0 = vld [vmem:[%s2277_s7] sm:$0xff]  ;;  %v196_v1 = vld [vmem:[%s2277_s7 + $0x8] sm:$0xff] }
  0x17   : > { %v198_v2 = vld [vmem:[%s2277_s7 + $0x40] sm:$0xff]  ;;  %195 = vst [vmem:[%s2282_s8] sm:$0xff] %v194_v0  ;;  %197 = vst [vmem:[%s2282_s8 + $0x8] sm:$0xff] %v196_v1  ;;  %v200_v3 = vld [vmem:[%s2277_s7 + $0x48] sm:$0xff] }
  0x18   : > { %199 = vst [vmem:[%s2282_s8 + $0x10] sm:$0xff] %v198_v2  ;;  %v202_v4 = vld [vmem:[%s2277_s7 + $0x80] sm:$0xff]  ;;  %v204_v5 = vld [vmem:[%s2277_s7 + $0x88] sm:$0xff]  ;;  %201 = vst [vmem:[%s2282_s8 + $0x18] sm:$0xff] %v200_v3 }
  0x19   : > { %203 = vst [vmem:[%s2282_s8 + $0x20] sm:$0xff] %v202_v4  ;;  %205 = vst [vmem:[%s2282_s8 + $0x28] sm:$0xff] %v204_v5  ;;  %v206_v6 = vld [vmem:[%s2277_s7 + $0xc0] sm:$0xff]  ;;  %v208_v7 = vld [vmem:[%s2277_s7 + $0xc8] sm:$0xff] }
  0x1a   : > { %v210_v8 = vld [vmem:[%s2277_s7 + $0x100] sm:$0xff]  ;;  %207 = vst [vmem:[%s2282_s8 + $0x30] sm:$0xff] %v206_v6  ;;  %209 = vst [vmem:[%s2282_s8 + $0x38] sm:$0xff] %v208_v7  ;;  %v212_v9 = vld [vmem:[%s2277_s7 + $0x108] sm:$0xff] }
  0x1b   : > { %211 = vst [vmem:[%s2282_s8 + $0x40] sm:$0xff] %v210_v8  ;;  %v214_v10 = vld [vmem:[%s2277_s7 + $0x140] sm:$0xff]  ;;  %v216_v11 = vld [vmem:[%s2277_s7 + $0x148] sm:$0xff]  ;;  %213 = vst [vmem:[%s2282_s8 + $0x48] sm:$0xff] %v212_v9 }
  0x1c   : > { %215 = vst [vmem:[%s2282_s8 + $0x50] sm:$0xff] %v214_v10  ;;  %217 = vst [vmem:[%s2282_s8 + $0x58] sm:$0xff] %v216_v11  ;;  %v218_v12 = vld [vmem:[%s2277_s7 + $0x180] sm:$0xff]  ;;  %v220_v13 = vld [vmem:[%s2277_s7 + $0x188] sm:$0xff] }
  0x1d   : > { %v222_v14 = vld [vmem:[%s2277_s7 + $0x1c0] sm:$0xff]  ;;  %219 = vst [vmem:[%s2282_s8 + $0x60] sm:$0xff] %v218_v12  ;;  %221 = vst [vmem:[%s2282_s8 + $0x68] sm:$0xff] %v220_v13  ;;  %v224_v15 = vld [vmem:[%s2277_s7 + $0x1c8] sm:$0xff] }
  0x1e   : > { %223 = vst [vmem:[%s2282_s8 + $0x70] sm:$0xff] %v222_v14  ;;  %v226_v16 = vld [vmem:[%s2277_s7 + $0x200] sm:$0xff]  ;;  %v228_v17 = vld [vmem:[%s2277_s7 + $0x208] sm:$0xff]  ;;  %225 = vst [vmem:[%s2282_s8 + $0x78] sm:$0xff] %v224_v15 }
  0x1f   : > { %227 = vst [vmem:[%s2282_s8 + $0x80] sm:$0xff] %v226_v16  ;;  %229 = vst [vmem:[%s2282_s8 + $0x88] sm:$0xff] %v228_v17  ;;  %v230_v18 = vld [vmem:[%s2277_s7 + $0x240] sm:$0xff]  ;;  %v232_v19 = vld [vmem:[%s2277_s7 + $0x248] sm:$0xff] }
  0x20   : > { %v234_v20 = vld [vmem:[%s2277_s7 + $0x280] sm:$0xff]  ;;  %231 = vst [vmem:[%s2282_s8 + $0x90] sm:$0xff] %v230_v18  ;;  %233 = vst [vmem:[%s2282_s8 + $0x98] sm:$0xff] %v232_v19  ;;  %v236_v21 = vld [vmem:[%s2277_s7 + $0x288] sm:$0xff] }
  0x21   : > { %235 = vst [vmem:[%s2282_s8 + $0xa0] sm:$0xff] %v234_v20  ;;  %v238_v22 = vld [vmem:[%s2277_s7 + $0x2c0] sm:$0xff]  ;;  %v240_v23 = vld [vmem:[%s2277_s7 + $0x2c8] sm:$0xff]  ;;  %237 = vst [vmem:[%s2282_s8 + $0xa8] sm:$0xff] %v236_v21 }
  0x22   : > { %239 = vst [vmem:[%s2282_s8 + $0xb0] sm:$0xff] %v238_v22  ;;  %241 = vst [vmem:[%s2282_s8 + $0xb8] sm:$0xff] %v240_v23  ;;  %v242_v24 = vld [vmem:[%s2277_s7 + $0x300] sm:$0xff]  ;;  %v244_v25 = vld [vmem:[%s2277_s7 + $0x308] sm:$0xff] }
  0x23   : > { %v246_v26 = vld [vmem:[%s2277_s7 + $0x340] sm:$0xff]  ;;  %243 = vst [vmem:[%s2282_s8 + $0xc0] sm:$0xff] %v242_v24  ;;  %245 = vst [vmem:[%s2282_s8 + $0xc8] sm:$0xff] %v244_v25  ;;  %v248_v27 = vld [vmem:[%s2277_s7 + $0x348] sm:$0xff] }
  0x24   : > { %247 = vst [vmem:[%s2282_s8 + $0xd0] sm:$0xff] %v246_v26  ;;  %v250_v28 = vld [vmem:[%s2277_s7 + $0x380] sm:$0xff]  ;;  %v252_v29 = vld [vmem:[%s2277_s7 + $0x388] sm:$0xff]  ;;  %249 = vst [vmem:[%s2282_s8 + $0xd8] sm:$0xff] %v248_v27 }
  0x25   : > { %251 = vst [vmem:[%s2282_s8 + $0xe0] sm:$0xff] %v250_v28  ;;  %253 = vst [vmem:[%s2282_s8 + $0xe8] sm:$0xff] %v252_v29  ;;  %v254_v30 = vld [vmem:[%s2277_s7 + $0x3c0] sm:$0xff]  ;;  %v256_v31 = vld [vmem:[%s2277_s7 + $0x3c8] sm:$0xff] }
  0x26   : > { %v258_v32 = vld [vmem:[%s2277_s7 + $0x400] sm:$0xff]  ;;  %255 = vst [vmem:[%s2282_s8 + $0xf0] sm:$0xff] %v254_v30  ;;  %257 = vst [vmem:[%s2282_s8 + $0xf8] sm:$0xff] %v256_v31  ;;  %v260_v33 = vld [vmem:[%s2277_s7 + $0x408] sm:$0xff] }
  0x27   : > { %259 = vst [vmem:[%s2282_s8 + $0x100] sm:$0xff] %v258_v32  ;;  %v262_v34 = vld [vmem:[%s2277_s7 + $0x440] sm:$0xff]  ;;  %v264_v35 = vld [vmem:[%s2277_s7 + $0x448] sm:$0xff]  ;;  %261 = vst [vmem:[%s2282_s8 + $0x108] sm:$0xff] %v260_v33 }
  0x28   : > { %263 = vst [vmem:[%s2282_s8 + $0x110] sm:$0xff] %v262_v34  ;;  %265 = vst [vmem:[%s2282_s8 + $0x118] sm:$0xff] %v264_v35  ;;  %v266_v36 = vld [vmem:[%s2277_s7 + $0x480] sm:$0xff]  ;;  %v268_v37 = vld [vmem:[%s2277_s7 + $0x488] sm:$0xff] }
  0x29   : > { %v270_v38 = vld [vmem:[%s2277_s7 + $0x4c0] sm:$0xff]  ;;  %267 = vst [vmem:[%s2282_s8 + $0x120] sm:$0xff] %v266_v36  ;;  %269 = vst [vmem:[%s2282_s8 + $0x128] sm:$0xff] %v268_v37  ;;  %v272_v39 = vld [vmem:[%s2277_s7 + $0x4c8] sm:$0xff] }
  0x2a   : > { %271 = vst [vmem:[%s2282_s8 + $0x130] sm:$0xff] %v270_v38  ;;  %v274_v40 = vld [vmem:[%s2277_s7 + $0x500] sm:$0xff]  ;;  %v276_v41 = vld [vmem:[%s2277_s7 + $0x508] sm:$0xff]  ;;  %273 = vst [vmem:[%s2282_s8 + $0x138] sm:$0xff] %v272_v39 }
  0x2b   : > { %275 = vst [vmem:[%s2282_s8 + $0x140] sm:$0xff] %v274_v40  ;;  %277 = vst [vmem:[%s2282_s8 + $0x148] sm:$0xff] %v276_v41  ;;  %v278_v42 = vld [vmem:[%s2277_s7 + $0x540] sm:$0xff]  ;;  %v280_v43 = vld [vmem:[%s2277_s7 + $0x548] sm:$0xff] }
  0x2c   : > { %v282_v44 = vld [vmem:[%s2277_s7 + $0x580] sm:$0xff]  ;;  %279 = vst [vmem:[%s2282_s8 + $0x150] sm:$0xff] %v278_v42  ;;  %281 = vst [vmem:[%s2282_s8 + $0x158] sm:$0xff] %v280_v43  ;;  %v284_v45 = vld [vmem:[%s2277_s7 + $0x588] sm:$0xff] }
  0x2d   : > { %283 = vst [vmem:[%s2282_s8 + $0x160] sm:$0xff] %v282_v44  ;;  %v286_v46 = vld [vmem:[%s2277_s7 + $0x5c0] sm:$0xff]  ;;  %v288_v47 = vld [vmem:[%s2277_s7 + $0x5c8] sm:$0xff]  ;;  %285 = vst [vmem:[%s2282_s8 + $0x168] sm:$0xff] %v284_v45 }
  0x2e   : > { %287 = vst [vmem:[%s2282_s8 + $0x170] sm:$0xff] %v286_v46  ;;  %289 = vst [vmem:[%s2282_s8 + $0x178] sm:$0xff] %v288_v47  ;;  %v290_v48 = vld [vmem:[%s2277_s7 + $0x600] sm:$0xff]  ;;  %v292_v49 = vld [vmem:[%s2277_s7 + $0x608] sm:$0xff] }
  0x2f   : > { %v294_v50 = vld [vmem:[%s2277_s7 + $0x640] sm:$0xff]  ;;  %291 = vst [vmem:[%s2282_s8 + $0x180] sm:$0xff] %v290_v48  ;;  %293 = vst [vmem:[%s2282_s8 + $0x188] sm:$0xff] %v292_v49  ;;  %v296_v51 = vld [vmem:[%s2277_s7 + $0x648] sm:$0xff] }
  0x30   : > { %295 = vst [vmem:[%s2282_s8 + $0x190] sm:$0xff] %v294_v50  ;;  %v298_v52 = vld [vmem:[%s2277_s7 + $0x680] sm:$0xff]  ;;  %v300_v53 = vld [vmem:[%s2277_s7 + $0x688] sm:$0xff]  ;;  %297 = vst [vmem:[%s2282_s8 + $0x198] sm:$0xff] %v296_v51 }
  0x31   : > { %299 = vst [vmem:[%s2282_s8 + $0x1a0] sm:$0xff] %v298_v52  ;;  %301 = vst [vmem:[%s2282_s8 + $0x1a8] sm:$0xff] %v300_v53  ;;  %v302_v54 = vld [vmem:[%s2277_s7 + $0x6c0] sm:$0xff]  ;;  %v304_v55 = vld [vmem:[%s2277_s7 + $0x6c8] sm:$0xff] }
  0x32   : > { %v306_v56 = vld [vmem:[%s2277_s7 + $0x700] sm:$0xff]  ;;  %303 = vst [vmem:[%s2282_s8 + $0x1b0] sm:$0xff] %v302_v54  ;;  %305 = vst [vmem:[%s2282_s8 + $0x1b8] sm:$0xff] %v304_v55  ;;  %v308_v57 = vld [vmem:[%s2277_s7 + $0x708] sm:$0xff] }
  0x33   : > { %307 = vst [vmem:[%s2282_s8 + $0x1c0] sm:$0xff] %v306_v56  ;;  %v310_v58 = vld [vmem:[%s2277_s7 + $0x740] sm:$0xff]  ;;  %v312_v59 = vld [vmem:[%s2277_s7 + $0x748] sm:$0xff]  ;;  %309 = vst [vmem:[%s2282_s8 + $0x1c8] sm:$0xff] %v308_v57 }
  0x34   : > { %311 = vst [vmem:[%s2282_s8 + $0x1d0] sm:$0xff] %v310_v58  ;;  %313 = vst [vmem:[%s2282_s8 + $0x1d8] sm:$0xff] %v312_v59  ;;  %v314_v60 = vld [vmem:[%s2277_s7 + $0x780] sm:$0xff]  ;;  %v316_v61 = vld [vmem:[%s2277_s7 + $0x788] sm:$0xff] }
  0x35   : > { %v318_v62 = vld [vmem:[%s2277_s7 + $0x7c0] sm:$0xff]  ;;  %315 = vst [vmem:[%s2282_s8 + $0x1e0] sm:$0xff] %v314_v60  ;;  %317 = vst [vmem:[%s2282_s8 + $0x1e8] sm:$0xff] %v316_v61  ;;  %v320_v63 = vld [vmem:[%s2277_s7 + $0x7c8] sm:$0xff] }
  0x36   : > { %319 = vst [vmem:[%s2282_s8 + $0x1f0] sm:$0xff] %v318_v62  ;;  %v322_v0 = vld [vmem:[%s2277_s7 + $0x800] sm:$0xff]  ;;  %v324_v1 = vld [vmem:[%s2277_s7 + $0x808] sm:$0xff]  ;;  %321 = vst [vmem:[%s2282_s8 + $0x1f8] sm:$0xff] %v320_v63 }
  0x37   : > { %323 = vst [vmem:[%s2282_s8 + $0x200] sm:$0xff] %v322_v0  ;;  %325 = vst [vmem:[%s2282_s8 + $0x208] sm:$0xff] %v324_v1  ;;  %v326_v2 = vld [vmem:[%s2277_s7 + $0x840] sm:$0xff]  ;;  %v328_v3 = vld [vmem:[%s2277_s7 + $0x848] sm:$0xff] }
  0x38   : > { %v330_v4 = vld [vmem:[%s2277_s7 + $0x880] sm:$0xff]  ;;  %327 = vst [vmem:[%s2282_s8 + $0x210] sm:$0xff] %v326_v2  ;;  %329 = vst [vmem:[%s2282_s8 + $0x218] sm:$0xff] %v328_v3  ;;  %v332_v5 = vld [vmem:[%s2277_s7 + $0x888] sm:$0xff] }
  0x39   : > { %331 = vst [vmem:[%s2282_s8 + $0x220] sm:$0xff] %v330_v4  ;;  %v334_v6 = vld [vmem:[%s2277_s7 + $0x8c0] sm:$0xff]  ;;  %v336_v7 = vld [vmem:[%s2277_s7 + $0x8c8] sm:$0xff]  ;;  %333 = vst [vmem:[%s2282_s8 + $0x228] sm:$0xff] %v332_v5 }
  0x3a   : > { %335 = vst [vmem:[%s2282_s8 + $0x230] sm:$0xff] %v334_v6  ;;  %337 = vst [vmem:[%s2282_s8 + $0x238] sm:$0xff] %v336_v7  ;;  %v338_v8 = vld [vmem:[%s2277_s7 + $0x900] sm:$0xff]  ;;  %v340_v9 = vld [vmem:[%s2277_s7 + $0x908] sm:$0xff] }
  0x3b   : > { %v342_v10 = vld [vmem:[%s2277_s7 + $0x940] sm:$0xff]  ;;  %339 = vst [vmem:[%s2282_s8 + $0x240] sm:$0xff] %v338_v8  ;;  %341 = vst [vmem:[%s2282_s8 + $0x248] sm:$0xff] %v340_v9  ;;  %v344_v11 = vld [vmem:[%s2277_s7 + $0x948] sm:$0xff] }
  0x3c   : > { %343 = vst [vmem:[%s2282_s8 + $0x250] sm:$0xff] %v342_v10  ;;  %v346_v12 = vld [vmem:[%s2277_s7 + $0x980] sm:$0xff]  ;;  %v348_v13 = vld [vmem:[%s2277_s7 + $0x988] sm:$0xff]  ;;  %345 = vst [vmem:[%s2282_s8 + $0x258] sm:$0xff] %v344_v11 }
  0x3d   : > { %347 = vst [vmem:[%s2282_s8 + $0x260] sm:$0xff] %v346_v12  ;;  %349 = vst [vmem:[%s2282_s8 + $0x268] sm:$0xff] %v348_v13  ;;  %v350_v14 = vld [vmem:[%s2277_s7 + $0x9c0] sm:$0xff]  ;;  %v352_v15 = vld [vmem:[%s2277_s7 + $0x9c8] sm:$0xff] }
  0x3e   : > { %v354_v16 = vld [vmem:[%s2277_s7 + $0xa00] sm:$0xff]  ;;  %351 = vst [vmem:[%s2282_s8 + $0x270] sm:$0xff] %v350_v14  ;;  %353 = vst [vmem:[%s2282_s8 + $0x278] sm:$0xff] %v352_v15  ;;  %v356_v17 = vld [vmem:[%s2277_s7 + $0xa08] sm:$0xff] }
  0x3f   : > { %355 = vst [vmem:[%s2282_s8 + $0x280] sm:$0xff] %v354_v16  ;;  %v358_v18 = vld [vmem:[%s2277_s7 + $0xa40] sm:$0xff]  ;;  %v360_v19 = vld [vmem:[%s2277_s7 + $0xa48] sm:$0xff]  ;;  %357 = vst [vmem:[%s2282_s8 + $0x288] sm:$0xff] %v356_v17 }
  0x40   : > { %359 = vst [vmem:[%s2282_s8 + $0x290] sm:$0xff] %v358_v18  ;;  %361 = vst [vmem:[%s2282_s8 + $0x298] sm:$0xff] %v360_v19  ;;  %v362_v20 = vld [vmem:[%s2277_s7 + $0xa80] sm:$0xff]  ;;  %v364_v21 = vld [vmem:[%s2277_s7 + $0xa88] sm:$0xff] }
  0x41   : > { %v366_v22 = vld [vmem:[%s2277_s7 + $0xac0] sm:$0xff]  ;;  %363 = vst [vmem:[%s2282_s8 + $0x2a0] sm:$0xff] %v362_v20  ;;  %365 = vst [vmem:[%s2282_s8 + $0x2a8] sm:$0xff] %v364_v21  ;;  %v368_v23 = vld [vmem:[%s2277_s7 + $0xac8] sm:$0xff] }
  0x42   : > { %367 = vst [vmem:[%s2282_s8 + $0x2b0] sm:$0xff] %v366_v22  ;;  %v370_v24 = vld [vmem:[%s2277_s7 + $0xb00] sm:$0xff]  ;;  %v372_v25 = vld [vmem:[%s2277_s7 + $0xb08] sm:$0xff]  ;;  %369 = vst [vmem:[%s2282_s8 + $0x2b8] sm:$0xff] %v368_v23 }
  0x43   : > { %371 = vst [vmem:[%s2282_s8 + $0x2c0] sm:$0xff] %v370_v24  ;;  %373 = vst [vmem:[%s2282_s8 + $0x2c8] sm:$0xff] %v372_v25  ;;  %v374_v26 = vld [vmem:[%s2277_s7 + $0xb40] sm:$0xff]  ;;  %v376_v27 = vld [vmem:[%s2277_s7 + $0xb48] sm:$0xff] }
  0x44   : > { %v378_v28 = vld [vmem:[%s2277_s7 + $0xb80] sm:$0xff]  ;;  %375 = vst [vmem:[%s2282_s8 + $0x2d0] sm:$0xff] %v374_v26  ;;  %377 = vst [vmem:[%s2282_s8 + $0x2d8] sm:$0xff] %v376_v27  ;;  %v380_v29 = vld [vmem:[%s2277_s7 + $0xb88] sm:$0xff] }
  0x45   : > { %379 = vst [vmem:[%s2282_s8 + $0x2e0] sm:$0xff] %v378_v28  ;;  %v382_v30 = vld [vmem:[%s2277_s7 + $0xbc0] sm:$0xff]  ;;  %v384_v31 = vld [vmem:[%s2277_s7 + $0xbc8] sm:$0xff]  ;;  %381 = vst [vmem:[%s2282_s8 + $0x2e8] sm:$0xff] %v380_v29 }
  0x46   : > { %383 = vst [vmem:[%s2282_s8 + $0x2f0] sm:$0xff] %v382_v30  ;;  %385 = vst [vmem:[%s2282_s8 + $0x2f8] sm:$0xff] %v384_v31  ;;  %v386_v32 = vld [vmem:[%s2277_s7 + $0xc00] sm:$0xff]  ;;  %v388_v33 = vld [vmem:[%s2277_s7 + $0xc08] sm:$0xff] }
  0x47   : > { %v390_v34 = vld [vmem:[%s2277_s7 + $0xc40] sm:$0xff]  ;;  %387 = vst [vmem:[%s2282_s8 + $0x300] sm:$0xff] %v386_v32  ;;  %389 = vst [vmem:[%s2282_s8 + $0x308] sm:$0xff] %v388_v33  ;;  %v392_v35 = vld [vmem:[%s2277_s7 + $0xc48] sm:$0xff] }
  0x48   : > { %391 = vst [vmem:[%s2282_s8 + $0x310] sm:$0xff] %v390_v34  ;;  %v394_v36 = vld [vmem:[%s2277_s7 + $0xc80] sm:$0xff]  ;;  %v396_v37 = vld [vmem:[%s2277_s7 + $0xc88] sm:$0xff]  ;;  %393 = vst [vmem:[%s2282_s8 + $0x318] sm:$0xff] %v392_v35 }
  0x49   : > { %395 = vst [vmem:[%s2282_s8 + $0x320] sm:$0xff] %v394_v36  ;;  %397 = vst [vmem:[%s2282_s8 + $0x328] sm:$0xff] %v396_v37  ;;  %v398_v38 = vld [vmem:[%s2277_s7 + $0xcc0] sm:$0xff]  ;;  %v400_v39 = vld [vmem:[%s2277_s7 + $0xcc8] sm:$0xff] }
  0x4a   : > { %v402_v40 = vld [vmem:[%s2277_s7 + $0xd00] sm:$0xff]  ;;  %399 = vst [vmem:[%s2282_s8 + $0x330] sm:$0xff] %v398_v38  ;;  %401 = vst [vmem:[%s2282_s8 + $0x338] sm:$0xff] %v400_v39  ;;  %v404_v41 = vld [vmem:[%s2277_s7 + $0xd08] sm:$0xff] }
  0x4b   : > { %403 = vst [vmem:[%s2282_s8 + $0x340] sm:$0xff] %v402_v40  ;;  %v406_v42 = vld [vmem:[%s2277_s7 + $0xd40] sm:$0xff]  ;;  %v408_v43 = vld [vmem:[%s2277_s7 + $0xd48] sm:$0xff]  ;;  %405 = vst [vmem:[%s2282_s8 + $0x348] sm:$0xff] %v404_v41 }
  0x4c   : > { %407 = vst [vmem:[%s2282_s8 + $0x350] sm:$0xff] %v406_v42  ;;  %409 = vst [vmem:[%s2282_s8 + $0x358] sm:$0xff] %v408_v43  ;;  %v410_v44 = vld [vmem:[%s2277_s7 + $0xd80] sm:$0xff]  ;;  %v412_v45 = vld [vmem:[%s2277_s7 + $0xd88] sm:$0xff] }
  0x4d   : > { %v414_v46 = vld [vmem:[%s2277_s7 + $0xdc0] sm:$0xff]  ;;  %411 = vst [vmem:[%s2282_s8 + $0x360] sm:$0xff] %v410_v44  ;;  %413 = vst [vmem:[%s2282_s8 + $0x368] sm:$0xff] %v412_v45  ;;  %v416_v47 = vld [vmem:[%s2277_s7 + $0xdc8] sm:$0xff] }
  0x4e   : > { %415 = vst [vmem:[%s2282_s8 + $0x370] sm:$0xff] %v414_v46  ;;  %v418_v48 = vld [vmem:[%s2277_s7 + $0xe00] sm:$0xff]  ;;  %v420_v49 = vld [vmem:[%s2277_s7 + $0xe08] sm:$0xff]  ;;  %417 = vst [vmem:[%s2282_s8 + $0x378] sm:$0xff] %v416_v47 }
  0x4f   : > { %419 = vst [vmem:[%s2282_s8 + $0x380] sm:$0xff] %v418_v48  ;;  %421 = vst [vmem:[%s2282_s8 + $0x388] sm:$0xff] %v420_v49  ;;  %v422_v50 = vld [vmem:[%s2277_s7 + $0xe40] sm:$0xff]  ;;  %v424_v51 = vld [vmem:[%s2277_s7 + $0xe48] sm:$0xff] }
  0x50   : > { %v426_v52 = vld [vmem:[%s2277_s7 + $0xe80] sm:$0xff]  ;;  %423 = vst [vmem:[%s2282_s8 + $0x390] sm:$0xff] %v422_v50  ;;  %425 = vst [vmem:[%s2282_s8 + $0x398] sm:$0xff] %v424_v51  ;;  %v428_v53 = vld [vmem:[%s2277_s7 + $0xe88] sm:$0xff] }
  0x51   : > { %427 = vst [vmem:[%s2282_s8 + $0x3a0] sm:$0xff] %v426_v52  ;;  %v430_v54 = vld [vmem:[%s2277_s7 + $0xec0] sm:$0xff]  ;;  %v432_v55 = vld [vmem:[%s2277_s7 + $0xec8] sm:$0xff]  ;;  %429 = vst [vmem:[%s2282_s8 + $0x3a8] sm:$0xff] %v428_v53 }
  0x52   : > { %431 = vst [vmem:[%s2282_s8 + $0x3b0] sm:$0xff] %v430_v54  ;;  %433 = vst [vmem:[%s2282_s8 + $0x3b8] sm:$0xff] %v432_v55  ;;  %v434_v56 = vld [vmem:[%s2277_s7 + $0xf00] sm:$0xff]  ;;  %v436_v57 = vld [vmem:[%s2277_s7 + $0xf08] sm:$0xff] }
  0x53   : > { %v438_v58 = vld [vmem:[%s2277_s7 + $0xf40] sm:$0xff]  ;;  %435 = vst [vmem:[%s2282_s8 + $0x3c0] sm:$0xff] %v434_v56  ;;  %437 = vst [vmem:[%s2282_s8 + $0x3c8] sm:$0xff] %v436_v57  ;;  %v440_v59 = vld [vmem:[%s2277_s7 + $0xf48] sm:$0xff] }
  0x54   : > { %439 = vst [vmem:[%s2282_s8 + $0x3d0] sm:$0xff] %v438_v58  ;;  %v442_v60 = vld [vmem:[%s2277_s7 + $0xf80] sm:$0xff]  ;;  %v444_v61 = vld [vmem:[%s2277_s7 + $0xf88] sm:$0xff]  ;;  %441 = vst [vmem:[%s2282_s8 + $0x3d8] sm:$0xff] %v440_v59 }
  0x55   : > { %443 = vst [vmem:[%s2282_s8 + $0x3e0] sm:$0xff] %v442_v60  ;;  %445 = vst [vmem:[%s2282_s8 + $0x3e8] sm:$0xff] %v444_v61  ;;  %v446_v62 = vld [vmem:[%s2277_s7 + $0xfc0] sm:$0xff]  ;;  %v448_v63 = vld [vmem:[%s2277_s7 + $0xfc8] sm:$0xff] }
  0x56   : > { %447 = vst [vmem:[%s2282_s8 + $0x3f0] sm:$0xff] %v446_v62  ;;  %449 = vst [vmem:[%s2282_s8 + $0x3f8] sm:$0xff] %v448_v63 }
  0x57 PF: > { %p1745_p7 = scmp.ge.s32.totalorder %s2192_s18, 1  ;;  %p462_p8 = scmp.lt.s32.totalorder %s2192_s18, 9 }
  0x59   : > { %p463_p9 = pnand %p1745_p7, %p462_p8 }
  0x5a   : > { %s469_s9 = sand.u32 (!%p463_p9), 1, %s2168_s12   ;;  %s1747_s10 = sshll.u32 (!%p463_p9), %s2176_s14, 2 }
  0x5b   : > { %466 = sbr.rel (%p463_p9) target bundleno = 466 (0x1d2), region = 51  ;;  %s1746_s11 = sshll.u32 (!%p463_p9), %s469_s9, 10 }
  0x5c   : > { %p510_p10 = scmp.lt.s32.totalorder (!%p463_p9), %s1747_s10, 7  ;;  %s1748_s21 = sshll.u32 (!%p463_p9), %s2180_s15, 2 }
  0x5d   : > { %p519_p11 = scmp.lt.s32.totalorder (!%p463_p9), %s1748_s21, 15  ;;  %s2558_s30 = scalar_lea.vmem (!%p463_p9), [#allocation3], %s1746_s11 }
  0x5e   : > { %p1750_p12 = scmp.ne.s32.totalorder (!%p463_p9), %s2176_s14, 0 }
  0x60   : > { %s2767_s10 = smov (!%p510_p10, %s1747_s10), 7  ;;  %s2769_s21 = smov (!%p519_p11, %s1748_s21), 15 }
  0x61   : > { %s514_s24 = scalar_lea.vmem %s2750_s0, %s2767_s10  ;;  %s521_s12 = scalar_lea.vmem %s2752_s2, %s2769_s21 }
  0x62   : > { %s530_s15 = scalar_lea.vmem %s2753_s3, %s2769_s21  ;;  %535 = sbr.rel (%p1750_p12) target bundleno = 105 (0x69), region = 59 }
  0x67   : > { %v2194_v0 = vmov 0.0  }
  0x68   : > { %536 = vst [vmem:[#allocation2] sm:$0xff] %v2194_v0 }
  0x69 PF: > { %v1946_v1 = vld [vmem:[%s2558_s30 + $0xe4] ss:$16 sps:$4 sm:$0xff]   ;;  %v1950_v3 = vld [vmem:[%s2558_s30 + $0xe0] ss:$16 sps:$4 sm:$0xff]   ;;  %v2195_v39 = vmov 1966171168   ;;  %v679_v41 = vlaneseq }
  0x6a   : > { %v1948_v2 = vld [vmem:[%s2558_s30 + $0x2e4] ss:$16 sps:$4 sm:$0xff]   ;;  %1336 = vmatprep.subr.bf16.mxu0 %v1946_v1  ;;  %v1951_v4 = vld [vmem:[%s2558_s30 + $0x2e0] ss:$16 sps:$4 sm:$0xff]   ;;  %v677_v40 = vunpack.c.l.s4 %v2195_v39  ;;  %v2078_v39 = vld [vmem:[%s2558_s30 + $0x28] ss:$16 sps:$4 sm:$0xff]  }
  0x6b   : > { %1377 = vmatprep.subr.bf16.mxu1 %v1948_v2  ;;  %v1952_v5 = vld [vmem:[%s2558_s30 + $0xc4] ss:$16 sps:$4 sm:$0xff]   ;;  %1337 = vmatpush1.bf16.msra.mxu0 %v1950_v3  ;;  %v1956_v7 = vld [vmem:[%s2558_s30 + $0xc0] ss:$16 sps:$4 sm:$0xff]   ;;  %v2603_v47 = vshrl.u32 %v679_v41, 7  ;;  %p1880_p13 = scmp.ne.s32.totalorder %s2176_s14, 1 }
  0x6c   : > { %1378 = vmatpush1.bf16.msra.mxu1 %v1951_v4  ;;  %v1954_v6 = vld [vmem:[%s2558_s30 + $0x2c4] ss:$16 sps:$4 sm:$0xff]   ;;  %1338 = vmatprep.subr.bf16.mxu0 %v1952_v5  ;;  %v1957_v8 = vld [vmem:[%s2558_s30 + $0x2c0] ss:$16 sps:$4 sm:$0xff]   ;;  %v678_v46 = vunpack.c.0.s8 %v677_v40  ;;  %v2081_v40 = vld [vmem:[%s2558_s30 + $0x228] ss:$16 sps:$4 sm:$0xff]  }
  0x6d   : > { %1379 = vmatprep.subr.bf16.mxu1 %v1954_v6  ;;  %v1958_v9 = vld [vmem:[%s2558_s30 + $0xa4] ss:$16 sps:$4 sm:$0xff]   ;;  %v1962_v11 = vld [vmem:[%s2558_s30 + $0xa0] ss:$16 sps:$4 sm:$0xff]   ;;  %v2086_v41 = vld [vmem:[%s2558_s30 + $0xc] ss:$16 sps:$4 sm:$0xff]  }
  0x6e   : > { %v1960_v10 = vld [vmem:[%s2558_s30 + $0x2a4] ss:$16 sps:$4 sm:$0xff]   ;;  %v1963_v12 = vld [vmem:[%s2558_s30 + $0x2a0] ss:$16 sps:$4 sm:$0xff]   ;;  %v2610_v52 = vsub.s32 %v678_v46, %v2603_v47  ;;  %v2095_v46 = vld [vmem:[%s2558_s30 + $0x3ec] ss:$16 sps:$4 sm:$0xff]  }
  0x6f   : > { %1339 = vmatpush1.bf16.msra.mxu0 %v1956_v7  ;;  %v1964_v13 = vld [vmem:[%s2558_s30 + $0x84] ss:$16 sps:$4 sm:$0xff]   ;;  %v1968_v15 = vld [vmem:[%s2558_s30 + $0x80] ss:$16 sps:$4 sm:$0xff]  }
  0x70   : > { %1380 = vmatpush1.bf16.msra.mxu1 %v1957_v8  ;;  %1340 = vmatprep.subr.bf16.mxu0 %v1958_v9  ;;  %v1966_v14 = vld [vmem:[%s2558_s30 + $0x284] ss:$16 sps:$4 sm:$0xff]   ;;  %v1969_v16 = vld [vmem:[%s2558_s30 + $0x280] ss:$16 sps:$4 sm:$0xff]  }
  0x71   : > { %1381 = vmatprep.subr.bf16.mxu1 %v1960_v10  ;;  %v1970_v17 = vld [vmem:[%s2558_s30 + $0x64] ss:$16 sps:$4 sm:$0xff]   ;;  %v1974_v19 = vld [vmem:[%s2558_s30 + $0x60] ss:$16 sps:$4 sm:$0xff]  }
  0x72   : > { %v1972_v18 = vld [vmem:[%s2558_s30 + $0x264] ss:$16 sps:$4 sm:$0xff]   ;;  %v1975_v20 = vld [vmem:[%s2558_s30 + $0x260] ss:$16 sps:$4 sm:$0xff]  }
  0x73   : > { %1341 = vmatpush1.bf16.msra.mxu0 %v1962_v11  ;;  %v1976_v21 = vld [vmem:[%s2558_s30 + $0x44] ss:$16 sps:$4 sm:$0xff]   ;;  %v1980_v23 = vld [vmem:[%s2558_s30 + $0x40] ss:$16 sps:$4 sm:$0xff]  }
  0x74   : > { %1382 = vmatpush1.bf16.msra.mxu1 %v1963_v12  ;;  %1342 = vmatprep.subr.bf16.mxu0 %v1964_v13  ;;  %v1978_v22 = vld [vmem:[%s2558_s30 + $0x244] ss:$16 sps:$4 sm:$0xff]   ;;  %v1981_v24 = vld [vmem:[%s2558_s30 + $0x240] ss:$16 sps:$4 sm:$0xff]   ;;  %v2044_v12 = vld [vmem:[%s2558_s30 + $0xec] ss:$16 sps:$4 sm:$0xff]  }
  0x75   : > { %1383 = vmatprep.subr.bf16.mxu1 %v1966_v14  ;;  %v1982_v25 = vld [vmem:[%s2558_s30 + $0x24] ss:$16 sps:$4 sm:$0xff]   ;;  %v1986_v27 = vld [vmem:[%s2558_s30 + $0x20] ss:$16 sps:$4 sm:$0xff]   ;;  %v2047_v13 = vld [vmem:[%s2558_s30 + $0x2ec] ss:$16 sps:$4 sm:$0xff]  }
  0x76   : > { %v1984_v26 = vld [vmem:[%s2558_s30 + $0x224] ss:$16 sps:$4 sm:$0xff]   ;;  %v1987_v28 = vld [vmem:[%s2558_s30 + $0x220] ss:$16 sps:$4 sm:$0xff]  }
  0x77   : > { %1343 = vmatpush1.bf16.msra.mxu0 %v1968_v15  ;;  %v1988_v29 = vld [vmem:[%s2558_s30 + $0x4] ss:$16 sps:$4 sm:$0xff]   ;;  %v1992_v31 = vld [vmem:[%s2558_s30] ss:$16 sps:$4 sm:$0xff]   ;;  %v2042_v15 = vld [vmem:[%s2558_s30 + $0xe8] ss:$16 sps:$4 sm:$0xff]  }
  0x78   : > { %1384 = vmatpush1.bf16.msra.mxu1 %v1969_v16  ;;  %1344 = vmatprep.subr.bf16.mxu0 %v1970_v17  ;;  %v1990_v30 = vld [vmem:[%s2558_s30 + $0x204] ss:$16 sps:$4 sm:$0xff]   ;;  %v1993_v32 = vld [vmem:[%s2558_s30 + $0x200] ss:$16 sps:$4 sm:$0xff]   ;;  %v2045_v16 = vld [vmem:[%s2558_s30 + $0x2e8] ss:$16 sps:$4 sm:$0xff]  }
  0x79   : > { %1385 = vmatprep.subr.bf16.mxu1 %v1972_v18  ;;  %v1994_v33 = vld [vmem:[%s2558_s30 + $0x1e4] ss:$16 sps:$4 sm:$0xff]   ;;  %v1998_v35 = vld [vmem:[%s2558_s30 + $0x1e0] ss:$16 sps:$4 sm:$0xff]   ;;  %v2050_v17 = vld [vmem:[%s2558_s30 + $0xcc] ss:$16 sps:$4 sm:$0xff]  }
  0x7a   : > { %v1996_v34 = vld [vmem:[%s2558_s30 + $0x3e4] ss:$16 sps:$4 sm:$0xff]   ;;  %v1999_v36 = vld [vmem:[%s2558_s30 + $0x3e0] ss:$16 sps:$4 sm:$0xff]   ;;  %v2053_v18 = vld [vmem:[%s2558_s30 + $0x2cc] ss:$16 sps:$4 sm:$0xff]  }
  0x7b   : > { %1345 = vmatpush1.bf16.msra.mxu0 %v1974_v19  ;;  %v2000_v37 = vld [vmem:[%s2558_s30 + $0x1c4] ss:$16 sps:$4 sm:$0xff]   ;;  %v2004_v42 = vld [vmem:[%s2558_s30 + $0x1c0] ss:$16 sps:$4 sm:$0xff]   ;;  %v2048_v19 = vld [vmem:[%s2558_s30 + $0xc8] ss:$16 sps:$4 sm:$0xff]  }
  0x7c   : > { %1386 = vmatpush1.bf16.msra.mxu1 %v1975_v20  ;;  %1346 = vmatprep.subr.bf16.mxu0 %v1976_v21  ;;  %v2002_v38 = vld [vmem:[%s2558_s30 + $0x3c4] ss:$16 sps:$4 sm:$0xff]   ;;  %v2005_v43 = vld [vmem:[%s2558_s30 + $0x3c0] ss:$16 sps:$4 sm:$0xff]   ;;  %v2051_v20 = vld [vmem:[%s2558_s30 + $0x2c8] ss:$16 sps:$4 sm:$0xff]  }
  0x7d   : > { %1387 = vmatprep.subr.bf16.mxu1 %v1978_v22  ;;  %v2006_v44 = vld [vmem:[%s2558_s30 + $0x1a4] ss:$16 sps:$4 sm:$0xff]   ;;  %v2010_v48 = vld [vmem:[%s2558_s30 + $0x1a0] ss:$16 sps:$4 sm:$0xff]   ;;  %v2056_v21 = vld [vmem:[%s2558_s30 + $0xac] ss:$16 sps:$4 sm:$0xff]  }
  0x7e   : > { %v2008_v45 = vld [vmem:[%s2558_s30 + $0x3a4] ss:$16 sps:$4 sm:$0xff]   ;;  %v2011_v49 = vld [vmem:[%s2558_s30 + $0x3a0] ss:$16 sps:$4 sm:$0xff]   ;;  %v2059_v22 = vld [vmem:[%s2558_s30 + $0x2ac] ss:$16 sps:$4 sm:$0xff]  }
  0x7f   : > { %1347 = vmatpush1.bf16.msra.mxu0 %v1980_v23  ;;  %v2012_v50 = vld [vmem:[%s2558_s30 + $0x184] ss:$16 sps:$4 sm:$0xff]   ;;  %v1751_v53 = vld.sshfl [vmem:[%s514_s24] sm:$0x33 pattern:$0x75316420] }
  0x80   : > { %1388 = vmatpush1.bf16.msra.mxu1 %v1981_v24  ;;  %1348 = vmatprep.subr.bf16.mxu0 %v1982_v25  ;;  %v2014_v51 = vld [vmem:[%s2558_s30 + $0x384] ss:$16 sps:$4 sm:$0xff]   ;;  %v2016_v54 = vld [vmem:[%s2558_s30 + $0x180] ss:$16 sps:$4 sm:$0xff]   ;;  %v675_v56 = vcombine.high %v1751_v53, %v1751_v53  ;;  %v2636_v10 = vrot.slane %v1751_v53, %v2610_v52  ;;  %v2054_v23 = vld [vmem:[%s2558_s30 + $0xa8] ss:$16 sps:$4 sm:$0xff]  }
  0x81   : > { %1389 = vmatprep.subr.bf16.mxu1 %v1984_v26  ;;  %v2017_v55 = vld [vmem:[%s2558_s30 + $0x380] ss:$16 sps:$4 sm:$0xff]   ;;  %v2018_v57 = vld [vmem:[%s2558_s30 + $0x164] ss:$16 sps:$4 sm:$0xff]   ;;  %v2057_v24 = vld [vmem:[%s2558_s30 + $0x2a8] ss:$16 sps:$4 sm:$0xff]  }
  0x82   : > { %v2020_v58 = vld [vmem:[%s2558_s30 + $0x364] ss:$16 sps:$4 sm:$0xff]   ;;  %v689_v59 = vrot.slane %v675_v56, %v2610_v52  ;;  %v2022_v60 = vld [vmem:[%s2558_s30 + $0x160] ss:$16 sps:$4 sm:$0xff]   ;;  %v2643_v14 = vcombine.high %v2636_v10, %v2636_v10  ;;  %v2062_v25 = vld [vmem:[%s2558_s30 + $0x8c] ss:$16 sps:$4 sm:$0xff]  }
  0x83   : > { %1349 = vmatpush1.bf16.msra.mxu0 %v1986_v27  ;;  %v2023_v61 = vld [vmem:[%s2558_s30 + $0x360] ss:$16 sps:$4 sm:$0xff]   ;;  %v2024_v63 = vld [vmem:[%s2558_s30 + $0x144] ss:$16 sps:$4 sm:$0xff]   ;;  %v2065_v26 = vld [vmem:[%s2558_s30 + $0x28c] ss:$16 sps:$4 sm:$0xff]  }
  0x84   : > { %1390 = vmatpush1.bf16.msra.mxu1 %v1987_v28  ;;  %1350 = vmatprep.subr.bf16.mxu0 %v1988_v29  ;;  %v691_v62 = vcombine.high %v689_v59, %v689_v59  ;;  %v2026_v0 = vld [vmem:[%s2558_s30 + $0x344] ss:$16 sps:$4 sm:$0xff]   ;;  %v2028_v1 = vld [vmem:[%s2558_s30 + $0x140] ss:$16 sps:$4 sm:$0xff]   ;;  %v2060_v27 = vld [vmem:[%s2558_s30 + $0x88] ss:$16 sps:$4 sm:$0xff]  }
  0x85   : > { %1391 = vmatprep.subr.bf16.mxu1 %v1990_v30  ;;  %1368 = vmatprep.mubr.bf16.mxu0 %v689_v59  ;;  %v2029_v2 = vld [vmem:[%s2558_s30 + $0x340] ss:$16 sps:$4 sm:$0xff]   ;;  %v2030_v3 = vld [vmem:[%s2558_s30 + $0x124] ss:$16 sps:$4 sm:$0xff]   ;;  %v2063_v28 = vld [vmem:[%s2558_s30 + $0x288] ss:$16 sps:$4 sm:$0xff]  }
  0x86   : > { %1409 = vmatprep.mubr.bf16.mxu1 %v691_v62  ;;  %v2032_v4 = vld [vmem:[%s2558_s30 + $0x324] ss:$16 sps:$4 sm:$0xff]   ;;  %v2034_v5 = vld [vmem:[%s2558_s30 + $0x120] ss:$16 sps:$4 sm:$0xff]   ;;  %v2068_v29 = vld [vmem:[%s2558_s30 + $0x6c] ss:$16 sps:$4 sm:$0xff]  }
  0x87   : > { %1351 = vmatpush1.bf16.msra.mxu0 %v1992_v31  ;;  %v2035_v6 = vld [vmem:[%s2558_s30 + $0x320] ss:$16 sps:$4 sm:$0xff]   ;;  %v2036_v7 = vld [vmem:[%s2558_s30 + $0x104] ss:$16 sps:$4 sm:$0xff]   ;;  %v2071_v30 = vld [vmem:[%s2558_s30 + $0x26c] ss:$16 sps:$4 sm:$0xff]  }
  0x88   : > { %1392 = vmatpush1.bf16.msra.mxu1 %v1993_v32  ;;  %1352 = vmatprep.subr.bf16.mxu0 %v1994_v33  ;;  %v2038_v8 = vld [vmem:[%s2558_s30 + $0x304] ss:$16 sps:$4 sm:$0xff]   ;;  %v2040_v9 = vld [vmem:[%s2558_s30 + $0x100] ss:$16 sps:$4 sm:$0xff]   ;;  %v2066_v31 = vld [vmem:[%s2558_s30 + $0x68] ss:$16 sps:$4 sm:$0xff]  }
  0x89   : > { %1393 = vmatprep.subr.bf16.mxu1 %v1996_v34  ;;  %v2041_v11 = vld [vmem:[%s2558_s30 + $0x300] ss:$16 sps:$4 sm:$0xff]   ;;  %v2069_v32 = vld [vmem:[%s2558_s30 + $0x268] ss:$16 sps:$4 sm:$0xff]   ;;  %v2074_v33 = vld [vmem:[%s2558_s30 + $0x4c] ss:$16 sps:$4 sm:$0xff]  }
  0x8a   : > { %v2077_v34 = vld [vmem:[%s2558_s30 + $0x24c] ss:$16 sps:$4 sm:$0xff]   ;;  %v2096_v53 = vld [vmem:[%s2558_s30 + $0x1c8] ss:$16 sps:$4 sm:$0xff]  }
  0x8b   : > { %1353 = vmatpush2.bf16.msra.mxu0 %v1998_v35  ;;  %v2072_v35 = vld [vmem:[%s2558_s30 + $0x48] ss:$16 sps:$4 sm:$0xff]   ;;  %v2107_v56 = vld [vmem:[%s2558_s30 + $0x3ac] ss:$16 sps:$4 sm:$0xff]  }
  0x8c   : > { %1394 = vmatpush2.bf16.msra.mxu1 %v1999_v36  ;;  %1354 = vmatprep.subr.bf16.mxu0 %v2000_v37  ;;  %v2075_v36 = vld [vmem:[%s2558_s30 + $0x248] ss:$16 sps:$4 sm:$0xff]   ;;  %v2080_v37 = vld [vmem:[%s2558_s30 + $0x2c] ss:$16 sps:$4 sm:$0xff]  }
  0x8d   : > { %1395 = vmatprep.subr.bf16.mxu1 %v2002_v38  ;;  %v2083_v38 = vld [vmem:[%s2558_s30 + $0x22c] ss:$16 sps:$4 sm:$0xff]  }
  0x8f   : > { %1355 = vmatpush2.bf16.msra.mxu0 %v2004_v42  ;;  %v2089_v42 = vld [vmem:[%s2558_s30 + $0x20c] ss:$16 sps:$4 sm:$0xff]  }
  0x90   : > { %1396 = vmatpush2.bf16.msra.mxu1 %v2005_v43  ;;  %1356 = vmatprep.subr.bf16.mxu0 %v2006_v44  ;;  %v2084_v43 = vld [vmem:[%s2558_s30 + $0x8] ss:$16 sps:$4 sm:$0xff]  }
  0x91   : > { %1397 = vmatprep.subr.bf16.mxu1 %v2008_v45  ;;  %v2087_v44 = vld [vmem:[%s2558_s30 + $0x208] ss:$16 sps:$4 sm:$0xff]   ;;  %v2092_v45 = vld [vmem:[%s2558_s30 + $0x1ec] ss:$16 sps:$4 sm:$0xff]  }
  0x93   : > { %1357 = vmatpush2.bf16.msra.mxu0 %v2010_v48  ;;  %v2090_v48 = vld [vmem:[%s2558_s30 + $0x1e8] ss:$16 sps:$4 sm:$0xff]  }
  0x94   : > { %1398 = vmatpush2.bf16.msra.mxu1 %v2011_v49  ;;  %1358 = vmatprep.subr.bf16.mxu0 %v2012_v50  ;;  %v2093_v49 = vld [vmem:[%s2558_s30 + $0x3e8] ss:$16 sps:$4 sm:$0xff]   ;;  %v2098_v50 = vld [vmem:[%s2558_s30 + $0x1cc] ss:$16 sps:$4 sm:$0xff]  }
  0x95   : > { %1399 = vmatprep.subr.bf16.mxu1 %v2014_v51  ;;  %v2101_v51 = vld [vmem:[%s2558_s30 + $0x3cc] ss:$16 sps:$4 sm:$0xff]  }
  0x97   : > { %1359 = vmatpush2.bf16.msra.mxu0 %v2016_v54  ;;  %v2099_v54 = vld [vmem:[%s2558_s30 + $0x3c8] ss:$16 sps:$4 sm:$0xff]  }
  0x98   : > { %1400 = vmatpush2.bf16.msra.mxu1 %v2017_v55  ;;  %1360 = vmatprep.subr.bf16.mxu0 %v2018_v57  ;;  %v2104_v55 = vld [vmem:[%s2558_s30 + $0x1ac] ss:$16 sps:$4 sm:$0xff]   ;;  %v2102_v57 = vld [vmem:[%s2558_s30 + $0x1a8] ss:$16 sps:$4 sm:$0xff]  }
  0x99   : > { %1401 = vmatprep.subr.bf16.mxu1 %v2020_v58  ;;  %v2105_v58 = vld [vmem:[%s2558_s30 + $0x3a8] ss:$16 sps:$4 sm:$0xff]  }
  0x9b   : > { %1361 = vmatpush2.bf16.msra.mxu0 %v2022_v60  ;;  %v2113_v60 = vld [vmem:[%s2558_s30 + $0x38c] ss:$16 sps:$4 sm:$0xff]  }
  0x9c   : > { %1402 = vmatpush2.bf16.msra.mxu1 %v2023_v61  ;;  %1362 = vmatprep.subr.bf16.mxu0 %v2024_v63  ;;  %v2108_v61 = vld [vmem:[%s2558_s30 + $0x188] ss:$16 sps:$4 sm:$0xff]   ;;  %v2116_v63 = vld [vmem:[%s2558_s30 + $0x16c] ss:$16 sps:$4 sm:$0xff]  }
  0x9d   : > { %1403 = vmatprep.subr.bf16.mxu1 %v2026_v0  ;;  %v2119_v0 = vld [vmem:[%s2558_s30 + $0x36c] ss:$16 sps:$4 sm:$0xff]  }
  0x9f   : > { %1363 = vmatpush2.bf16.msra.mxu0 %v2028_v1  ;;  %v2114_v1 = vld [vmem:[%s2558_s30 + $0x168] ss:$16 sps:$4 sm:$0xff]  }
  0xa0   : > { %1404 = vmatpush2.bf16.msra.mxu1 %v2029_v2  ;;  %1364 = vmatprep.subr.bf16.mxu0 %v2030_v3  ;;  %v2117_v2 = vld [vmem:[%s2558_s30 + $0x368] ss:$16 sps:$4 sm:$0xff]   ;;  %v2122_v3 = vld [vmem:[%s2558_s30 + $0x14c] ss:$16 sps:$4 sm:$0xff]  }
  0xa1   : > { %1405 = vmatprep.subr.bf16.mxu1 %v2032_v4  ;;  %v2125_v4 = vld [vmem:[%s2558_s30 + $0x34c] ss:$16 sps:$4 sm:$0xff]  }
  0xa3   : > { %1365 = vmatpush2.bf16.msra.mxu0 %v2034_v5  ;;  %v2120_v5 = vld [vmem:[%s2558_s30 + $0x148] ss:$16 sps:$4 sm:$0xff]  }
  0xa4   : > { %1406 = vmatpush2.bf16.msra.mxu1 %v2035_v6  ;;  %1366 = vmatprep.subr.bf16.mxu0 %v2036_v7  ;;  %v2123_v6 = vld [vmem:[%s2558_s30 + $0x348] ss:$16 sps:$4 sm:$0xff]   ;;  %v2128_v7 = vld [vmem:[%s2558_s30 + $0x12c] ss:$16 sps:$4 sm:$0xff]  }
  0xa5   : > { %1407 = vmatprep.subr.bf16.mxu1 %v2038_v8  ;;  %v2131_v8 = vld [vmem:[%s2558_s30 + $0x32c] ss:$16 sps:$4 sm:$0xff]  }
  0xa7   : > { %1367 = vmatpush2.bf16.msra.mxu0 %v2040_v9  ;;  %v2126_v9 = vld [vmem:[%s2558_s30 + $0x128] ss:$16 sps:$4 sm:$0xff]  }
  0xa8   : > { %1408 = vmatpush2.bf16.msra.mxu1 %v2041_v11  ;;  %1418 = vmatprep.subr.bf16.mxu0 %v2044_v12  ;;  %v2129_v11 = vld [vmem:[%s2558_s30 + $0x328] ss:$16 sps:$4 sm:$0xff]   ;;  %v2134_v12 = vld [vmem:[%s2558_s30 + $0x10c] ss:$16 sps:$4 sm:$0xff]  }
  0xa9   : > { %1459 = vmatprep.subr.bf16.mxu1 %v2047_v13  ;;  %v2137_v13 = vld [vmem:[%s2558_s30 + $0x30c] ss:$16 sps:$4 sm:$0xff]  }
  0xaa   : > { %1369 = vmatmul.mubr.bf16.vlgmr.msra.gmra.mxu0 %v2636_v10 }
  0xab   : > { %1410 = vmatmul.mubr.bf16.vlgmr.msra.gmra.mxu1 %v2643_v14  ;;  %1419 = vmatpush1.bf16.msra.mxu0 %v2042_v15  ;;  %v2132_v15 = vld [vmem:[%s2558_s30 + $0x108] ss:$16 sps:$4 sm:$0xff]  }
  0xac   : > { %1460 = vmatpush1.bf16.msra.mxu1 %v2045_v16  ;;  %1420 = vmatprep.subr.bf16.mxu0 %v2050_v17  ;;  %v2135_v16 = vld [vmem:[%s2558_s30 + $0x308] ss:$16 sps:$4 sm:$0xff]  }
  0xad   : > { %1461 = vmatprep.subr.bf16.mxu1 %v2053_v18  ;;  %1450 = vmatprep.mubr.bf16.mxu0 %v689_v59  ;;  %v2110_v59 = vld [vmem:[%s2558_s30 + $0x18c] ss:$16 sps:$4 sm:$0xff]  }
  0xae   : > { %1491 = vmatprep.mubr.bf16.mxu1 %v691_v62  ;;  %v2111_v62 = vld [vmem:[%s2558_s30 + $0x388] ss:$16 sps:$4 sm:$0xff]  }
  0xaf   : > { %1421 = vmatpush1.bf16.msra.mxu0 %v2048_v19 }
  0xb0   : > { %1462 = vmatpush1.bf16.msra.mxu1 %v2051_v20  ;;  %1422 = vmatprep.subr.bf16.mxu0 %v2056_v21 }
  0xb1   : > { %1463 = vmatprep.subr.bf16.mxu1 %v2059_v22 }
  0xb3   : > { %1423 = vmatpush1.bf16.msra.mxu0 %v2054_v23 }
  0xb4   : > { %1464 = vmatpush1.bf16.msra.mxu1 %v2057_v24  ;;  %1424 = vmatprep.subr.bf16.mxu0 %v2062_v25 }
  0xb5   : > { %1465 = vmatprep.subr.bf16.mxu1 %v2065_v26 }
  0xb7   : > { %1425 = vmatpush1.bf16.msra.mxu0 %v2060_v27 }
  0xb8   : > { %1466 = vmatpush1.bf16.msra.mxu1 %v2063_v28  ;;  %1426 = vmatprep.subr.bf16.mxu0 %v2068_v29  ;;  %v2196_v28 = vmov 1983009808  }
  0xb9   : > { %1467 = vmatprep.subr.bf16.mxu1 %v2071_v30  ;;  %v1507_v29 = vunpack.c.l.s4 %v2196_v28 }
  0xbb   : > { %1427 = vmatpush1.bf16.msra.mxu0 %v2066_v31  ;;  %v1508_v30 = vunpack.c.0.s8 %v1507_v29 }
  0xbc   : > { %1468 = vmatpush1.bf16.msra.mxu1 %v2069_v32  ;;  %1428 = vmatprep.subr.bf16.mxu0 %v2074_v33 }
  0xbd   : > { %1469 = vmatprep.subr.bf16.mxu1 %v2077_v34 }
  0xbf   : > { %1429 = vmatpush1.bf16.msra.mxu0 %v2072_v35 }
  0xc0   : > { %1470 = vmatpush1.bf16.msra.mxu1 %v2075_v36  ;;  %1430 = vmatprep.subr.bf16.mxu0 %v2080_v37 }
  0xc1   : > { %1471 = vmatprep.subr.bf16.mxu1 %v2083_v38 }
  0xc3   : > { %1431 = vmatpush1.bf16.msra.mxu0 %v2078_v39 }
  0xc4   : > { %1472 = vmatpush1.bf16.msra.mxu1 %v2081_v40  ;;  %1432 = vmatprep.subr.bf16.mxu0 %v2086_v41 }
  0xc5   : > { %1473 = vmatprep.subr.bf16.mxu1 %v2089_v42 }
  0xc7   : > { %1433 = vmatpush1.bf16.msra.mxu0 %v2084_v43  ;;  %v537_v43 = vld [vmem:[#allocation2] sm:$0xff] }
  0xc8   : > { %1474 = vmatpush1.bf16.msra.mxu1 %v2087_v44  ;;  %1434 = vmatprep.subr.bf16.mxu0 %v2092_v45 }
  0xc9   : > { %1475 = vmatprep.subr.bf16.mxu1 %v2095_v46 }
  0xcb   : > { %1435 = vmatpush2.bf16.msra.mxu0 %v2090_v48 }
  0xcc   : > { %1476 = vmatpush2.bf16.msra.mxu1 %v2093_v49  ;;  %1436 = vmatprep.subr.bf16.mxu0 %v2098_v50 }
  0xcd   : > { %1477 = vmatprep.subr.bf16.mxu1 %v2101_v51 }
  0xcf   : > { %1437 = vmatpush2.bf16.msra.mxu0 %v2096_v53 }
  0xd0   : > { %1478 = vmatpush2.bf16.msra.mxu1 %v2099_v54  ;;  %1438 = vmatprep.subr.bf16.mxu0 %v2104_v55 }
  0xd1   : > { %1479 = vmatprep.subr.bf16.mxu1 %v2107_v56 }
  0xd3   : > { %1439 = vmatpush2.bf16.msra.mxu0 %v2102_v57 }
  0xd4   : > { %1480 = vmatpush2.bf16.msra.mxu1 %v2105_v58  ;;  %1440 = vmatprep.subr.bf16.mxu0 %v2110_v59 }
  0xd5   : > { %1481 = vmatprep.subr.bf16.mxu1 %v2113_v60 }
  0xd7   : > { %1441 = vmatpush2.bf16.msra.mxu0 %v2108_v61 }
  0xd8   : > { %1482 = vmatpush2.bf16.msra.mxu1 %v2111_v62  ;;  %1442 = vmatprep.subr.bf16.mxu0 %v2116_v63 }
  0xd9   : > { %1483 = vmatprep.subr.bf16.mxu1 %v2119_v0 }
  0xdb   : > { %1443 = vmatpush2.bf16.msra.mxu0 %v2114_v1 }
  0xdc   : > { %1484 = vmatpush2.bf16.msra.mxu1 %v2117_v2  ;;  %1444 = vmatprep.subr.bf16.mxu0 %v2122_v3 }
  0xdd   : > { %1485 = vmatprep.subr.bf16.mxu1 %v2125_v4 }
  0xdf   : > { %1445 = vmatpush2.bf16.msra.mxu0 %v2120_v5 }
  0xe0   : > { %1486 = vmatpush2.bf16.msra.mxu1 %v2123_v6  ;;  %1446 = vmatprep.subr.bf16.mxu0 %v2128_v7 }
  0xe1   : > { %1487 = vmatprep.subr.bf16.mxu1 %v2131_v8 }
  0xe3   : > { %1447 = vmatpush2.bf16.msra.mxu0 %v2126_v9 }
  0xe4   : > { %1488 = vmatpush2.bf16.msra.mxu1 %v2129_v11  ;;  %1448 = vmatprep.subr.bf16.mxu0 %v2134_v12 }
  0xe5   : > { %1489 = vmatprep.subr.bf16.mxu1 %v2137_v13 }
  0xe7   : > { %1449 = vmatpush2.bf16.msra.mxu0 %v2132_v15 }
  0xe8   : > { %1490 = vmatpush2.bf16.msra.mxu1 %v2135_v16 }
  0xea   : > { %1451 = vmatmul.mubr.bf16.vlgmr.msra.gmra.mxu0 %v2636_v10 }
  0xeb   : > { %1492 = vmatmul.mubr.bf16.vlgmr.msra.gmra.mxu1 %v2643_v14  ;;  %v1511_v14 = vsub.s32 %v1508_v30, %v2603_v47 }
 0x16a   : > { %v1370_v17 = vpop.f32.mrf.mxu0 }
 0x16b   : > { %v1411_v18 = vpop.f32.mrf.mxu1 }
 0x16c   : > { %v1412_v19 = vadd.f32 %v1411_v18, %v1370_v17  ;;  %v1372_v20 = vpop.f32.mrf.mxu0 }
 0x16d   : > { %v1413_v21 = vpop.f32.mrf.mxu1 }
 0x16e   : > { %v1414_v22 = vadd.f32 %v1413_v21, %v1372_v20  ;;  %v1374_v23 = vpop.f32.mrf.mxu0 }
 0x16f   : > { %v1415_v24 = vpop.f32.mrf.mxu1 }
 0x170   : > { %v1504_v25 = vcombine.low %v1412_v19, %v1414_v22  ;;  %v1375_v26 = vpop.f32.mrf.mxu0 }
 0x171   : > { %v1416_v27 = vpop.f32.mrf.mxu1 }
 0x172   : > { %v1512_v41 = vrot.slane %v1504_v25, %v1511_v14 }
 0x1aa   : > { %v1452_v31 = vpop.f32.mrf.mxu0 }
 0x1ab   : > { %v1493_v32 = vpop.f32.mrf.mxu1 }
 0x1ac   : > { %v1454_v33 = vpop.f32.mrf.mxu0  ;;  %v1494_v34 = vadd.f32 %v1493_v32, %v1452_v31 }
 0x1ad   : > { %v1495_v10 = vpop.f32.mrf.mxu1 }
 0x1ae   : > { %v1496_v35 = vadd.f32 %v1495_v10, %v1454_v33  ;;  %v1456_v36 = vpop.f32.mrf.mxu0 }
 0x1af   : > { %v1497_v37 = vpop.f32.mrf.mxu1 }
 0x1b0   : > { %v1505_v38 = vcombine.low %v1494_v34, %v1496_v35  ;;  %v1457_v39 = vpop.f32.mrf.mxu0 }
 0x1b1   : > { %v1498_v40 = vpop.f32.mrf.mxu1 }
 0x1b2   : > { %v1519_v42 = vrot.slane %v1505_v38, %v1511_v14 }
 0x1b4   : > { %v1520_v44 = vcombine.low %v1512_v41, %v1519_v42  ;;  %1527 = sbr.rel (%p1880_p13) target bundleno = 466 (0x1d2), region = 63 }
 0x1b6   : > { %v1522_v45 = vadd.f32 %v1520_v44, %v537_v43 }
 0x1b8   : > { %1523 = vst [vmem:[#allocation2] sm:$0xff] %v1522_v45 }
 0x1b9   : > { %v1529_v46 = vld [vmem:[%s521_s12] sm:$0xf]  ;;  %v1533_v48 = vsub.s32 0, %v2603_v47  ;;  %v1537_v49 = vsub.s32 1, %v2603_v47  ;;  %v1541_v50 = vsub.s32 2, %v2603_v47  ;;  %v1545_v51 = vsub.s32 3, %v2603_v47 }
 0x1bb   : > { %v1534_v53 = vrot.slane %v1529_v46, %v1533_v48  ;;  %v1538_v54 = vrot.slane %v1529_v46, %v1537_v49  ;;  %v1542_v55 = vrot.slane %v1529_v46, %v1541_v50  ;;  %v1546_v56 = vrot.slane %v1529_v46, %v1545_v51 }
 0x1bd   : > { %v1547_v57 = vcombine.low %v1534_v53, %v1538_v54  ;;  %v1548_v58 = vcombine.low %v1542_v55, %v1546_v56 }
 0x1bf   : > { %v1555_v59 = vrot.slane %v1547_v57, %v1511_v14  ;;  %v1562_v60 = vrot.slane %v1548_v58, %v1511_v14  ;;  %v1528_v61 = vld [vmem:[#allocation2] sm:$0xff] }
 0x1c1   : > { %v1563_v62 = vcombine.low %v1555_v59, %v1562_v60 }
 0x1c3   : > { %v1565_v63 = vadd.f32 %v1563_v62, %v1528_v61 }
 0x1c5   : > { %v1567_v0 = vcombine.high %v1565_v63, %v1565_v63  ;;  %v1574_v1 = vrot.slane %v1565_v63, %v1511_v14 }
 0x1c7   : > { %v1581_v2 = vrot.slane %v1567_v0, %v1511_v14  ;;  %v1582_v3 = vcombine.high %v1574_v1, %v1574_v1 }
 0x1c9   : > { %v1583_v4 = vcombine.high %v1581_v2, %v1581_v2  ;;  %v1881_v5 = vpack.c.bf16 %v1582_v3, %v1574_v1 }
 0x1cb   : > { %v1882_v6 = vpack.c.bf16 %v1583_v4, %v1581_v2  ;;  %v1604_v47 = vrot.slane %v1881_v5, %v2610_v52 }
 0x1cd   : > { %v1611_v7 = vrot.slane %v1882_v6, %v2610_v52 }
 0x1cf   : > { %v1612_v8 = vcombine.low %v1604_v47, %v1611_v7 }
 0x1d1   : > { %1883 = vst.sshfl [vmem:[%s530_s15] sm:$0x55 pattern:$0x73625140] %v1612_v8 }
 0x1d2 PF: > { %s13_s18 = sadd.s32 1, %s2192_s18   ;;  %s2754_s12 = smov %s2172_s13 }
 0x1d3   : > { %p10_p0 = scmp.ge.s32.totalorder %s13_s18, 10   ;;  %s2755_s13 = smov %s2268_s25 }
 0x1d4   : > { %s2756_s14 = smov %s2184_s16  ;;  %s2757_s15 = smov %s2188_s17 }
 0x1d5   : > { %s2758_s16 = smov %s2761_s19  ;;  %s2759_s17 = smov %s2765_s20 }
 0x1d6   :  { %12 = sbr.rel (!%p10_p0) target bundleno = 4 (0x4), region = 104 }

// kernel: depth_aware_resnet_forward.40
= control target key start
LH: loop header
LB: loop body
LE: loop exit
PB: predicated region body
PF: predicated region fallthrough
CT: control target
= control target key end

     0   :  { %s1885_s12 = smov 0   ;;  %s1887_s13 = smov 0   ;;  %s2092_s0 = inlined_call_operand.vmem [shape: bf16[2,2048], index: 0, kind: input, shape index: {}]   ;;  %s2093_s1 = inlined_call_operand.vmem [shape: bf16[2048,512], index: 1, kind: input, shape index: {}]   ;;  %s2094_s2 = inlined_call_operand.vmem [shape: f32[1,512], index: 2, kind: input, shape index: {}]   ;;  %s2095_s3 = inlined_call_operand.vmem [shape: bf16[2,512], index: 3, kind: output, shape index: {}]  }
   0x1   :  { %s1889_s14 = smov 0  }
   0x2 LB: > { %s25_s15 = sadd.s32 1, %s1856_s13  ;;  %p1475_p0 = scmp.ge.s32.totalorder %s1860_s14, 1  ;;  %s1860_s14 = sphi %s1889_s14, %s13_s14   ;;  %s1856_s13 = sphi %s1887_s13, %s2097_s13   ;;  %s1852_s12 = sphi %s1885_s12, %s2096_s12  }
   0x3   : > { %p26_p1 = scmp.ge.s32.totalorder %s25_s15, 4  ;;  %p193_p2 = scmp.lt.s32.totalorder %s1860_s14, 5 }
   0x5   : > { %s2099_s15 = smov (%p26_p1, %s25_s15), 0  ;;  %p194_p3 = pnand %p1475_p0, %p193_p2 }
   0x6   : > { %s1476_s16 = sshll.u32 (!%p194_p3), %s1852_s12, 2  ;;  %s1477_s17 = sshll.u32 (!%p194_p3), %s1852_s12, 6 }
   0x7   : > { %197 = sbr.rel (%p194_p3) target bundleno = 384 (0x180), region = 32  ;;  %p240_p4 = scmp.lt.s32.totalorder (!%p194_p3), %s1476_s16, 15 }
   0x8   : > { %p248_p5 = scmp.lt.s32.totalorder (!%p194_p3), %s1477_s17, 255  ;;  %p1480_p6 = scmp.ne.s32.totalorder (!%p194_p3), %s1852_s12, 0 }
   0xc   : > { %s2101_s16 = smov (!%p240_p4, %s1476_s16), 15  ;;  %s2103_s17 = smov (!%p248_p5, %s1477_s17), 255 }
   0xd   : > { %s244_s20 = scalar_lea.vmem %s2092_s0, %s2101_s16  ;;  %s1618_s21 = sshll.u32 %s2103_s17, 4 }
   0xe   : > { %s1916_s24 = scalar_lea.vmem %s2093_s1, %s1618_s21  ;;  %275 = sbr.rel (%p1480_p6) target bundleno = 21 (0x15), region = 36 }
  0x13   : > { %v1862_v0 = vmov 0.0  }
  0x14   : > { %276 = vst [vmem:[#allocation2] sm:$0xff] %v1862_v0 }
  0x15 PF: > { %v1646_v1 = vld [vmem:[%s1916_s24 + $0xe4] ss:$16 sps:$4 sm:$0xff]   ;;  %v1650_v3 = vld [vmem:[%s1916_s24 + $0xe0] ss:$16 sps:$4 sm:$0xff]   ;;  %v1863_v39 = vmov 1966171168   ;;  %v419_v41 = vlaneseq }
  0x16   : > { %v1648_v2 = vld [vmem:[%s1916_s24 + $0x2e4] ss:$16 sps:$4 sm:$0xff]   ;;  %1076 = vmatprep.subr.bf16.mxu0 %v1646_v1  ;;  %v1651_v4 = vld [vmem:[%s1916_s24 + $0x2e0] ss:$16 sps:$4 sm:$0xff]   ;;  %v417_v40 = vunpack.c.l.s4 %v1863_v39  ;;  %v1778_v39 = vld [vmem:[%s1916_s24 + $0x28] ss:$16 sps:$4 sm:$0xff]  }
  0x17   : > { %1117 = vmatprep.subr.bf16.mxu1 %v1648_v2  ;;  %v1652_v5 = vld [vmem:[%s1916_s24 + $0xc4] ss:$16 sps:$4 sm:$0xff]   ;;  %1077 = vmatpush1.bf16.msra.mxu0 %v1650_v3  ;;  %v1656_v7 = vld [vmem:[%s1916_s24 + $0xc0] ss:$16 sps:$4 sm:$0xff]   ;;  %v1961_v47 = vshrl.u32 %v419_v41, 7  ;;  %p1610_p7 = scmp.ne.s32.totalorder %s1852_s12, 3 }
  0x18   : > { %1118 = vmatpush1.bf16.msra.mxu1 %v1651_v4  ;;  %v1654_v6 = vld [vmem:[%s1916_s24 + $0x2c4] ss:$16 sps:$4 sm:$0xff]   ;;  %1078 = vmatprep.subr.bf16.mxu0 %v1652_v5  ;;  %v1657_v8 = vld [vmem:[%s1916_s24 + $0x2c0] ss:$16 sps:$4 sm:$0xff]   ;;  %v418_v46 = vunpack.c.0.s8 %v417_v40  ;;  %v1781_v40 = vld [vmem:[%s1916_s24 + $0x228] ss:$16 sps:$4 sm:$0xff]  }
  0x19   : > { %1119 = vmatprep.subr.bf16.mxu1 %v1654_v6  ;;  %v1658_v9 = vld [vmem:[%s1916_s24 + $0xa4] ss:$16 sps:$4 sm:$0xff]   ;;  %v1662_v11 = vld [vmem:[%s1916_s24 + $0xa0] ss:$16 sps:$4 sm:$0xff]   ;;  %v1786_v41 = vld [vmem:[%s1916_s24 + $0xc] ss:$16 sps:$4 sm:$0xff]  }
  0x1a   : > { %v1660_v10 = vld [vmem:[%s1916_s24 + $0x2a4] ss:$16 sps:$4 sm:$0xff]   ;;  %v1663_v12 = vld [vmem:[%s1916_s24 + $0x2a0] ss:$16 sps:$4 sm:$0xff]   ;;  %v1968_v52 = vsub.s32 %v418_v46, %v1961_v47  ;;  %v1795_v46 = vld [vmem:[%s1916_s24 + $0x3ec] ss:$16 sps:$4 sm:$0xff]  }
  0x1b   : > { %1079 = vmatpush1.bf16.msra.mxu0 %v1656_v7  ;;  %v1664_v13 = vld [vmem:[%s1916_s24 + $0x84] ss:$16 sps:$4 sm:$0xff]   ;;  %v1668_v15 = vld [vmem:[%s1916_s24 + $0x80] ss:$16 sps:$4 sm:$0xff]  }
  0x1c   : > { %1120 = vmatpush1.bf16.msra.mxu1 %v1657_v8  ;;  %1080 = vmatprep.subr.bf16.mxu0 %v1658_v9  ;;  %v1666_v14 = vld [vmem:[%s1916_s24 + $0x284] ss:$16 sps:$4 sm:$0xff]   ;;  %v1669_v16 = vld [vmem:[%s1916_s24 + $0x280] ss:$16 sps:$4 sm:$0xff]  }
  0x1d   : > { %1121 = vmatprep.subr.bf16.mxu1 %v1660_v10  ;;  %v1670_v17 = vld [vmem:[%s1916_s24 + $0x64] ss:$16 sps:$4 sm:$0xff]   ;;  %v1674_v19 = vld [vmem:[%s1916_s24 + $0x60] ss:$16 sps:$4 sm:$0xff]  }
  0x1e   : > { %v1672_v18 = vld [vmem:[%s1916_s24 + $0x264] ss:$16 sps:$4 sm:$0xff]   ;;  %v1675_v20 = vld [vmem:[%s1916_s24 + $0x260] ss:$16 sps:$4 sm:$0xff]  }
  0x1f   : > { %1081 = vmatpush1.bf16.msra.mxu0 %v1662_v11  ;;  %v1676_v21 = vld [vmem:[%s1916_s24 + $0x44] ss:$16 sps:$4 sm:$0xff]   ;;  %v1680_v23 = vld [vmem:[%s1916_s24 + $0x40] ss:$16 sps:$4 sm:$0xff]  }
  0x20   : > { %1122 = vmatpush1.bf16.msra.mxu1 %v1663_v12  ;;  %1082 = vmatprep.subr.bf16.mxu0 %v1664_v13  ;;  %v1678_v22 = vld [vmem:[%s1916_s24 + $0x244] ss:$16 sps:$4 sm:$0xff]   ;;  %v1681_v24 = vld [vmem:[%s1916_s24 + $0x240] ss:$16 sps:$4 sm:$0xff]   ;;  %v1744_v12 = vld [vmem:[%s1916_s24 + $0xec] ss:$16 sps:$4 sm:$0xff]  }
  0x21   : > { %1123 = vmatprep.subr.bf16.mxu1 %v1666_v14  ;;  %v1682_v25 = vld [vmem:[%s1916_s24 + $0x24] ss:$16 sps:$4 sm:$0xff]   ;;  %v1686_v27 = vld [vmem:[%s1916_s24 + $0x20] ss:$16 sps:$4 sm:$0xff]   ;;  %v1747_v13 = vld [vmem:[%s1916_s24 + $0x2ec] ss:$16 sps:$4 sm:$0xff]  }
  0x22   : > { %v1684_v26 = vld [vmem:[%s1916_s24 + $0x224] ss:$16 sps:$4 sm:$0xff]   ;;  %v1687_v28 = vld [vmem:[%s1916_s24 + $0x220] ss:$16 sps:$4 sm:$0xff]  }
  0x23   : > { %1083 = vmatpush1.bf16.msra.mxu0 %v1668_v15  ;;  %v1688_v29 = vld [vmem:[%s1916_s24 + $0x4] ss:$16 sps:$4 sm:$0xff]   ;;  %v1692_v31 = vld [vmem:[%s1916_s24] ss:$16 sps:$4 sm:$0xff]   ;;  %v1742_v15 = vld [vmem:[%s1916_s24 + $0xe8] ss:$16 sps:$4 sm:$0xff]  }
  0x24   : > { %1124 = vmatpush1.bf16.msra.mxu1 %v1669_v16  ;;  %1084 = vmatprep.subr.bf16.mxu0 %v1670_v17  ;;  %v1690_v30 = vld [vmem:[%s1916_s24 + $0x204] ss:$16 sps:$4 sm:$0xff]   ;;  %v1693_v32 = vld [vmem:[%s1916_s24 + $0x200] ss:$16 sps:$4 sm:$0xff]   ;;  %v1745_v16 = vld [vmem:[%s1916_s24 + $0x2e8] ss:$16 sps:$4 sm:$0xff]  }
  0x25   : > { %1125 = vmatprep.subr.bf16.mxu1 %v1672_v18  ;;  %v1694_v33 = vld [vmem:[%s1916_s24 + $0x1e4] ss:$16 sps:$4 sm:$0xff]   ;;  %v1698_v35 = vld [vmem:[%s1916_s24 + $0x1e0] ss:$16 sps:$4 sm:$0xff]   ;;  %v1750_v17 = vld [vmem:[%s1916_s24 + $0xcc] ss:$16 sps:$4 sm:$0xff]  }
  0x26   : > { %v1696_v34 = vld [vmem:[%s1916_s24 + $0x3e4] ss:$16 sps:$4 sm:$0xff]   ;;  %v1699_v36 = vld [vmem:[%s1916_s24 + $0x3e0] ss:$16 sps:$4 sm:$0xff]   ;;  %v1753_v18 = vld [vmem:[%s1916_s24 + $0x2cc] ss:$16 sps:$4 sm:$0xff]  }
  0x27   : > { %1085 = vmatpush1.bf16.msra.mxu0 %v1674_v19  ;;  %v1700_v37 = vld [vmem:[%s1916_s24 + $0x1c4] ss:$16 sps:$4 sm:$0xff]   ;;  %v1704_v42 = vld [vmem:[%s1916_s24 + $0x1c0] ss:$16 sps:$4 sm:$0xff]   ;;  %v1748_v19 = vld [vmem:[%s1916_s24 + $0xc8] ss:$16 sps:$4 sm:$0xff]  }
  0x28   : > { %1126 = vmatpush1.bf16.msra.mxu1 %v1675_v20  ;;  %1086 = vmatprep.subr.bf16.mxu0 %v1676_v21  ;;  %v1702_v38 = vld [vmem:[%s1916_s24 + $0x3c4] ss:$16 sps:$4 sm:$0xff]   ;;  %v1705_v43 = vld [vmem:[%s1916_s24 + $0x3c0] ss:$16 sps:$4 sm:$0xff]   ;;  %v1751_v20 = vld [vmem:[%s1916_s24 + $0x2c8] ss:$16 sps:$4 sm:$0xff]  }
  0x29   : > { %1127 = vmatprep.subr.bf16.mxu1 %v1678_v22  ;;  %v1706_v44 = vld [vmem:[%s1916_s24 + $0x1a4] ss:$16 sps:$4 sm:$0xff]   ;;  %v1710_v48 = vld [vmem:[%s1916_s24 + $0x1a0] ss:$16 sps:$4 sm:$0xff]   ;;  %v1756_v21 = vld [vmem:[%s1916_s24 + $0xac] ss:$16 sps:$4 sm:$0xff]  }
  0x2a   : > { %v1708_v45 = vld [vmem:[%s1916_s24 + $0x3a4] ss:$16 sps:$4 sm:$0xff]   ;;  %v1711_v49 = vld [vmem:[%s1916_s24 + $0x3a0] ss:$16 sps:$4 sm:$0xff]   ;;  %v1759_v22 = vld [vmem:[%s1916_s24 + $0x2ac] ss:$16 sps:$4 sm:$0xff]  }
  0x2b   : > { %1087 = vmatpush1.bf16.msra.mxu0 %v1680_v23  ;;  %v1712_v50 = vld [vmem:[%s1916_s24 + $0x184] ss:$16 sps:$4 sm:$0xff]   ;;  %v1481_v53 = vld.sshfl [vmem:[%s244_s20] sm:$0x33 pattern:$0x75316420] }
  0x2c   : > { %1128 = vmatpush1.bf16.msra.mxu1 %v1681_v24  ;;  %1088 = vmatprep.subr.bf16.mxu0 %v1682_v25  ;;  %v1714_v51 = vld [vmem:[%s1916_s24 + $0x384] ss:$16 sps:$4 sm:$0xff]   ;;  %v1716_v54 = vld [vmem:[%s1916_s24 + $0x180] ss:$16 sps:$4 sm:$0xff]   ;;  %v415_v56 = vcombine.high %v1481_v53, %v1481_v53  ;;  %v1994_v10 = vrot.slane %v1481_v53, %v1968_v52  ;;  %v1754_v23 = vld [vmem:[%s1916_s24 + $0xa8] ss:$16 sps:$4 sm:$0xff]  }
  0x2d   : > { %1129 = vmatprep.subr.bf16.mxu1 %v1684_v26  ;;  %v1717_v55 = vld [vmem:[%s1916_s24 + $0x380] ss:$16 sps:$4 sm:$0xff]   ;;  %v1718_v57 = vld [vmem:[%s1916_s24 + $0x164] ss:$16 sps:$4 sm:$0xff]   ;;  %v1757_v24 = vld [vmem:[%s1916_s24 + $0x2a8] ss:$16 sps:$4 sm:$0xff]  }
  0x2e   : > { %v1720_v58 = vld [vmem:[%s1916_s24 + $0x364] ss:$16 sps:$4 sm:$0xff]   ;;  %v429_v59 = vrot.slane %v415_v56, %v1968_v52  ;;  %v1722_v60 = vld [vmem:[%s1916_s24 + $0x160] ss:$16 sps:$4 sm:$0xff]   ;;  %v2001_v14 = vcombine.high %v1994_v10, %v1994_v10  ;;  %v1762_v25 = vld [vmem:[%s1916_s24 + $0x8c] ss:$16 sps:$4 sm:$0xff]  }
  0x2f   : > { %1089 = vmatpush1.bf16.msra.mxu0 %v1686_v27  ;;  %v1723_v61 = vld [vmem:[%s1916_s24 + $0x360] ss:$16 sps:$4 sm:$0xff]   ;;  %v1724_v63 = vld [vmem:[%s1916_s24 + $0x144] ss:$16 sps:$4 sm:$0xff]   ;;  %v1765_v26 = vld [vmem:[%s1916_s24 + $0x28c] ss:$16 sps:$4 sm:$0xff]  }
  0x30   : > { %1130 = vmatpush1.bf16.msra.mxu1 %v1687_v28  ;;  %1090 = vmatprep.subr.bf16.mxu0 %v1688_v29  ;;  %v431_v62 = vcombine.high %v429_v59, %v429_v59  ;;  %v1726_v0 = vld [vmem:[%s1916_s24 + $0x344] ss:$16 sps:$4 sm:$0xff]   ;;  %v1728_v1 = vld [vmem:[%s1916_s24 + $0x140] ss:$16 sps:$4 sm:$0xff]   ;;  %v1760_v27 = vld [vmem:[%s1916_s24 + $0x88] ss:$16 sps:$4 sm:$0xff]  }
  0x31   : > { %1131 = vmatprep.subr.bf16.mxu1 %v1690_v30  ;;  %1108 = vmatprep.mubr.bf16.mxu0 %v429_v59  ;;  %v1729_v2 = vld [vmem:[%s1916_s24 + $0x340] ss:$16 sps:$4 sm:$0xff]   ;;  %v1730_v3 = vld [vmem:[%s1916_s24 + $0x124] ss:$16 sps:$4 sm:$0xff]   ;;  %v1763_v28 = vld [vmem:[%s1916_s24 + $0x288] ss:$16 sps:$4 sm:$0xff]  }
  0x32   : > { %1149 = vmatprep.mubr.bf16.mxu1 %v431_v62  ;;  %v1732_v4 = vld [vmem:[%s1916_s24 + $0x324] ss:$16 sps:$4 sm:$0xff]   ;;  %v1734_v5 = vld [vmem:[%s1916_s24 + $0x120] ss:$16 sps:$4 sm:$0xff]   ;;  %v1768_v29 = vld [vmem:[%s1916_s24 + $0x6c] ss:$16 sps:$4 sm:$0xff]  }
  0x33   : > { %1091 = vmatpush1.bf16.msra.mxu0 %v1692_v31  ;;  %v1735_v6 = vld [vmem:[%s1916_s24 + $0x320] ss:$16 sps:$4 sm:$0xff]   ;;  %v1736_v7 = vld [vmem:[%s1916_s24 + $0x104] ss:$16 sps:$4 sm:$0xff]   ;;  %v1771_v30 = vld [vmem:[%s1916_s24 + $0x26c] ss:$16 sps:$4 sm:$0xff]  }
  0x34   : > { %1132 = vmatpush1.bf16.msra.mxu1 %v1693_v32  ;;  %1092 = vmatprep.subr.bf16.mxu0 %v1694_v33  ;;  %v1738_v8 = vld [vmem:[%s1916_s24 + $0x304] ss:$16 sps:$4 sm:$0xff]   ;;  %v1740_v9 = vld [vmem:[%s1916_s24 + $0x100] ss:$16 sps:$4 sm:$0xff]   ;;  %v1766_v31 = vld [vmem:[%s1916_s24 + $0x68] ss:$16 sps:$4 sm:$0xff]  }
  0x35   : > { %1133 = vmatprep.subr.bf16.mxu1 %v1696_v34  ;;  %v1741_v11 = vld [vmem:[%s1916_s24 + $0x300] ss:$16 sps:$4 sm:$0xff]   ;;  %v1769_v32 = vld [vmem:[%s1916_s24 + $0x268] ss:$16 sps:$4 sm:$0xff]   ;;  %v1774_v33 = vld [vmem:[%s1916_s24 + $0x4c] ss:$16 sps:$4 sm:$0xff]  }
  0x36   : > { %v1777_v34 = vld [vmem:[%s1916_s24 + $0x24c] ss:$16 sps:$4 sm:$0xff]   ;;  %v1796_v53 = vld [vmem:[%s1916_s24 + $0x1c8] ss:$16 sps:$4 sm:$0xff]  }
  0x37   : > { %1093 = vmatpush2.bf16.msra.mxu0 %v1698_v35  ;;  %v1772_v35 = vld [vmem:[%s1916_s24 + $0x48] ss:$16 sps:$4 sm:$0xff]   ;;  %v1807_v56 = vld [vmem:[%s1916_s24 + $0x3ac] ss:$16 sps:$4 sm:$0xff]  }
  0x38   : > { %1134 = vmatpush2.bf16.msra.mxu1 %v1699_v36  ;;  %1094 = vmatprep.subr.bf16.mxu0 %v1700_v37  ;;  %v1775_v36 = vld [vmem:[%s1916_s24 + $0x248] ss:$16 sps:$4 sm:$0xff]   ;;  %v1780_v37 = vld [vmem:[%s1916_s24 + $0x2c] ss:$16 sps:$4 sm:$0xff]  }
  0x39   : > { %1135 = vmatprep.subr.bf16.mxu1 %v1702_v38  ;;  %v1783_v38 = vld [vmem:[%s1916_s24 + $0x22c] ss:$16 sps:$4 sm:$0xff]  }
  0x3b   : > { %1095 = vmatpush2.bf16.msra.mxu0 %v1704_v42  ;;  %v1789_v42 = vld [vmem:[%s1916_s24 + $0x20c] ss:$16 sps:$4 sm:$0xff]  }
  0x3c   : > { %1136 = vmatpush2.bf16.msra.mxu1 %v1705_v43  ;;  %1096 = vmatprep.subr.bf16.mxu0 %v1706_v44  ;;  %v1784_v43 = vld [vmem:[%s1916_s24 + $0x8] ss:$16 sps:$4 sm:$0xff]  }
  0x3d   : > { %1137 = vmatprep.subr.bf16.mxu1 %v1708_v45  ;;  %v1787_v44 = vld [vmem:[%s1916_s24 + $0x208] ss:$16 sps:$4 sm:$0xff]   ;;  %v1792_v45 = vld [vmem:[%s1916_s24 + $0x1ec] ss:$16 sps:$4 sm:$0xff]  }
  0x3f   : > { %1097 = vmatpush2.bf16.msra.mxu0 %v1710_v48  ;;  %v1790_v48 = vld [vmem:[%s1916_s24 + $0x1e8] ss:$16 sps:$4 sm:$0xff]  }
  0x40   : > { %1138 = vmatpush2.bf16.msra.mxu1 %v1711_v49  ;;  %1098 = vmatprep.subr.bf16.mxu0 %v1712_v50  ;;  %v1793_v49 = vld [vmem:[%s1916_s24 + $0x3e8] ss:$16 sps:$4 sm:$0xff]   ;;  %v1798_v50 = vld [vmem:[%s1916_s24 + $0x1cc] ss:$16 sps:$4 sm:$0xff]  }
  0x41   : > { %1139 = vmatprep.subr.bf16.mxu1 %v1714_v51  ;;  %v1801_v51 = vld [vmem:[%s1916_s24 + $0x3cc] ss:$16 sps:$4 sm:$0xff]  }
  0x43   : > { %1099 = vmatpush2.bf16.msra.mxu0 %v1716_v54  ;;  %v1799_v54 = vld [vmem:[%s1916_s24 + $0x3c8] ss:$16 sps:$4 sm:$0xff]  }
  0x44   : > { %1140 = vmatpush2.bf16.msra.mxu1 %v1717_v55  ;;  %1100 = vmatprep.subr.bf16.mxu0 %v1718_v57  ;;  %v1804_v55 = vld [vmem:[%s1916_s24 + $0x1ac] ss:$16 sps:$4 sm:$0xff]   ;;  %v1802_v57 = vld [vmem:[%s1916_s24 + $0x1a8] ss:$16 sps:$4 sm:$0xff]  }
  0x45   : > { %1141 = vmatprep.subr.bf16.mxu1 %v1720_v58  ;;  %v1805_v58 = vld [vmem:[%s1916_s24 + $0x3a8] ss:$16 sps:$4 sm:$0xff]  }
  0x47   : > { %1101 = vmatpush2.bf16.msra.mxu0 %v1722_v60  ;;  %v1813_v60 = vld [vmem:[%s1916_s24 + $0x38c] ss:$16 sps:$4 sm:$0xff]  }
  0x48   : > { %1142 = vmatpush2.bf16.msra.mxu1 %v1723_v61  ;;  %1102 = vmatprep.subr.bf16.mxu0 %v1724_v63  ;;  %v1808_v61 = vld [vmem:[%s1916_s24 + $0x188] ss:$16 sps:$4 sm:$0xff]   ;;  %v1816_v63 = vld [vmem:[%s1916_s24 + $0x16c] ss:$16 sps:$4 sm:$0xff]  }
  0x49   : > { %1143 = vmatprep.subr.bf16.mxu1 %v1726_v0  ;;  %v1819_v0 = vld [vmem:[%s1916_s24 + $0x36c] ss:$16 sps:$4 sm:$0xff]  }
  0x4b   : > { %1103 = vmatpush2.bf16.msra.mxu0 %v1728_v1  ;;  %v1814_v1 = vld [vmem:[%s1916_s24 + $0x168] ss:$16 sps:$4 sm:$0xff]  }
  0x4c   : > { %1144 = vmatpush2.bf16.msra.mxu1 %v1729_v2  ;;  %1104 = vmatprep.subr.bf16.mxu0 %v1730_v3  ;;  %v1817_v2 = vld [vmem:[%s1916_s24 + $0x368] ss:$16 sps:$4 sm:$0xff]   ;;  %v1822_v3 = vld [vmem:[%s1916_s24 + $0x14c] ss:$16 sps:$4 sm:$0xff]  }
  0x4d   : > { %1145 = vmatprep.subr.bf16.mxu1 %v1732_v4  ;;  %v1825_v4 = vld [vmem:[%s1916_s24 + $0x34c] ss:$16 sps:$4 sm:$0xff]  }
  0x4f   : > { %1105 = vmatpush2.bf16.msra.mxu0 %v1734_v5  ;;  %v1820_v5 = vld [vmem:[%s1916_s24 + $0x148] ss:$16 sps:$4 sm:$0xff]  }
  0x50   : > { %1146 = vmatpush2.bf16.msra.mxu1 %v1735_v6  ;;  %1106 = vmatprep.subr.bf16.mxu0 %v1736_v7  ;;  %v1823_v6 = vld [vmem:[%s1916_s24 + $0x348] ss:$16 sps:$4 sm:$0xff]   ;;  %v1828_v7 = vld [vmem:[%s1916_s24 + $0x12c] ss:$16 sps:$4 sm:$0xff]  }
  0x51   : > { %1147 = vmatprep.subr.bf16.mxu1 %v1738_v8  ;;  %v1831_v8 = vld [vmem:[%s1916_s24 + $0x32c] ss:$16 sps:$4 sm:$0xff]  }
  0x53   : > { %1107 = vmatpush2.bf16.msra.mxu0 %v1740_v9  ;;  %v1826_v9 = vld [vmem:[%s1916_s24 + $0x128] ss:$16 sps:$4 sm:$0xff]  }
  0x54   : > { %1148 = vmatpush2.bf16.msra.mxu1 %v1741_v11  ;;  %1158 = vmatprep.subr.bf16.mxu0 %v1744_v12  ;;  %v1829_v11 = vld [vmem:[%s1916_s24 + $0x328] ss:$16 sps:$4 sm:$0xff]   ;;  %v1834_v12 = vld [vmem:[%s1916_s24 + $0x10c] ss:$16 sps:$4 sm:$0xff]  }
  0x55   : > { %1199 = vmatprep.subr.bf16.mxu1 %v1747_v13  ;;  %v1837_v13 = vld [vmem:[%s1916_s24 + $0x30c] ss:$16 sps:$4 sm:$0xff]  }
  0x56   : > { %1109 = vmatmul.mubr.bf16.vlgmr.msra.gmra.mxu0 %v1994_v10 }
  0x57   : > { %1150 = vmatmul.mubr.bf16.vlgmr.msra.gmra.mxu1 %v2001_v14  ;;  %1159 = vmatpush1.bf16.msra.mxu0 %v1742_v15  ;;  %v1832_v15 = vld [vmem:[%s1916_s24 + $0x108] ss:$16 sps:$4 sm:$0xff]  }
  0x58   : > { %1200 = vmatpush1.bf16.msra.mxu1 %v1745_v16  ;;  %1160 = vmatprep.subr.bf16.mxu0 %v1750_v17  ;;  %v1835_v16 = vld [vmem:[%s1916_s24 + $0x308] ss:$16 sps:$4 sm:$0xff]  }
  0x59   : > { %1201 = vmatprep.subr.bf16.mxu1 %v1753_v18  ;;  %1190 = vmatprep.mubr.bf16.mxu0 %v429_v59  ;;  %v1810_v59 = vld [vmem:[%s1916_s24 + $0x18c] ss:$16 sps:$4 sm:$0xff]  }
  0x5a   : > { %1231 = vmatprep.mubr.bf16.mxu1 %v431_v62  ;;  %v1811_v62 = vld [vmem:[%s1916_s24 + $0x388] ss:$16 sps:$4 sm:$0xff]  }
  0x5b   : > { %1161 = vmatpush1.bf16.msra.mxu0 %v1748_v19 }
  0x5c   : > { %1202 = vmatpush1.bf16.msra.mxu1 %v1751_v20  ;;  %1162 = vmatprep.subr.bf16.mxu0 %v1756_v21 }
  0x5d   : > { %1203 = vmatprep.subr.bf16.mxu1 %v1759_v22 }
  0x5f   : > { %1163 = vmatpush1.bf16.msra.mxu0 %v1754_v23 }
  0x60   : > { %1204 = vmatpush1.bf16.msra.mxu1 %v1757_v24  ;;  %1164 = vmatprep.subr.bf16.mxu0 %v1762_v25 }
  0x61   : > { %1205 = vmatprep.subr.bf16.mxu1 %v1765_v26 }
  0x63   : > { %1165 = vmatpush1.bf16.msra.mxu0 %v1760_v27 }
  0x64   : > { %1206 = vmatpush1.bf16.msra.mxu1 %v1763_v28  ;;  %1166 = vmatprep.subr.bf16.mxu0 %v1768_v29  ;;  %v1864_v28 = vmov 1983009808  }
  0x65   : > { %1207 = vmatprep.subr.bf16.mxu1 %v1771_v30  ;;  %v1247_v29 = vunpack.c.l.s4 %v1864_v28 }
  0x67   : > { %1167 = vmatpush1.bf16.msra.mxu0 %v1766_v31  ;;  %v1248_v30 = vunpack.c.0.s8 %v1247_v29 }
  0x68   : > { %1208 = vmatpush1.bf16.msra.mxu1 %v1769_v32  ;;  %1168 = vmatprep.subr.bf16.mxu0 %v1774_v33 }
  0x69   : > { %1209 = vmatprep.subr.bf16.mxu1 %v1777_v34 }
  0x6b   : > { %1169 = vmatpush1.bf16.msra.mxu0 %v1772_v35 }
  0x6c   : > { %1210 = vmatpush1.bf16.msra.mxu1 %v1775_v36  ;;  %1170 = vmatprep.subr.bf16.mxu0 %v1780_v37 }
  0x6d   : > { %1211 = vmatprep.subr.bf16.mxu1 %v1783_v38 }
  0x6f   : > { %1171 = vmatpush1.bf16.msra.mxu0 %v1778_v39 }
  0x70   : > { %1212 = vmatpush1.bf16.msra.mxu1 %v1781_v40  ;;  %1172 = vmatprep.subr.bf16.mxu0 %v1786_v41 }
  0x71   : > { %1213 = vmatprep.subr.bf16.mxu1 %v1789_v42 }
  0x73   : > { %1173 = vmatpush1.bf16.msra.mxu0 %v1784_v43  ;;  %v277_v43 = vld [vmem:[#allocation2] sm:$0xff] }
  0x74   : > { %1214 = vmatpush1.bf16.msra.mxu1 %v1787_v44  ;;  %1174 = vmatprep.subr.bf16.mxu0 %v1792_v45 }
  0x75   : > { %1215 = vmatprep.subr.bf16.mxu1 %v1795_v46 }
  0x77   : > { %1175 = vmatpush2.bf16.msra.mxu0 %v1790_v48 }
  0x78   : > { %1216 = vmatpush2.bf16.msra.mxu1 %v1793_v49  ;;  %1176 = vmatprep.subr.bf16.mxu0 %v1798_v50 }
  0x79   : > { %1217 = vmatprep.subr.bf16.mxu1 %v1801_v51 }
  0x7b   : > { %1177 = vmatpush2.bf16.msra.mxu0 %v1796_v53 }
  0x7c   : > { %1218 = vmatpush2.bf16.msra.mxu1 %v1799_v54  ;;  %1178 = vmatprep.subr.bf16.mxu0 %v1804_v55 }
  0x7d   : > { %1219 = vmatprep.subr.bf16.mxu1 %v1807_v56 }
  0x7f   : > { %1179 = vmatpush2.bf16.msra.mxu0 %v1802_v57 }
  0x80   : > { %1220 = vmatpush2.bf16.msra.mxu1 %v1805_v58  ;;  %1180 = vmatprep.subr.bf16.mxu0 %v1810_v59 }
  0x81   : > { %1221 = vmatprep.subr.bf16.mxu1 %v1813_v60 }
  0x83   : > { %1181 = vmatpush2.bf16.msra.mxu0 %v1808_v61 }
  0x84   : > { %1222 = vmatpush2.bf16.msra.mxu1 %v1811_v62  ;;  %1182 = vmatprep.subr.bf16.mxu0 %v1816_v63 }
  0x85   : > { %1223 = vmatprep.subr.bf16.mxu1 %v1819_v0 }
  0x87   : > { %1183 = vmatpush2.bf16.msra.mxu0 %v1814_v1 }
  0x88   : > { %1224 = vmatpush2.bf16.msra.mxu1 %v1817_v2  ;;  %1184 = vmatprep.subr.bf16.mxu0 %v1822_v3 }
  0x89   : > { %1225 = vmatprep.subr.bf16.mxu1 %v1825_v4 }
  0x8b   : > { %1185 = vmatpush2.bf16.msra.mxu0 %v1820_v5 }
  0x8c   : > { %1226 = vmatpush2.bf16.msra.mxu1 %v1823_v6  ;;  %1186 = vmatprep.subr.bf16.mxu0 %v1828_v7 }
  0x8d   : > { %1227 = vmatprep.subr.bf16.mxu1 %v1831_v8 }
  0x8f   : > { %1187 = vmatpush2.bf16.msra.mxu0 %v1826_v9 }
  0x90   : > { %1228 = vmatpush2.bf16.msra.mxu1 %v1829_v11  ;;  %1188 = vmatprep.subr.bf16.mxu0 %v1834_v12 }
  0x91   : > { %1229 = vmatprep.subr.bf16.mxu1 %v1837_v13 }
  0x93   : > { %1189 = vmatpush2.bf16.msra.mxu0 %v1832_v15 }
  0x94   : > { %1230 = vmatpush2.bf16.msra.mxu1 %v1835_v16 }
  0x96   : > { %1191 = vmatmul.mubr.bf16.vlgmr.msra.gmra.mxu0 %v1994_v10 }
  0x97   : > { %1232 = vmatmul.mubr.bf16.vlgmr.msra.gmra.mxu1 %v2001_v14  ;;  %v1251_v14 = vsub.s32 %v1248_v30, %v1961_v47 }
 0x116   : > { %v1110_v17 = vpop.f32.mrf.mxu0 }
 0x117   : > { %v1151_v18 = vpop.f32.mrf.mxu1 }
 0x118   : > { %v1152_v19 = vadd.f32 %v1151_v18, %v1110_v17  ;;  %v1112_v20 = vpop.f32.mrf.mxu0 }
 0x119   : > { %v1153_v21 = vpop.f32.mrf.mxu1 }
 0x11a   : > { %v1154_v22 = vadd.f32 %v1153_v21, %v1112_v20  ;;  %v1114_v23 = vpop.f32.mrf.mxu0 }
 0x11b   : > { %v1155_v24 = vpop.f32.mrf.mxu1 }
 0x11c   : > { %v1244_v25 = vcombine.low %v1152_v19, %v1154_v22  ;;  %v1115_v26 = vpop.f32.mrf.mxu0 }
 0x11d   : > { %v1156_v27 = vpop.f32.mrf.mxu1 }
 0x11e   : > { %v1252_v41 = vrot.slane %v1244_v25, %v1251_v14 }
 0x156   : > { %v1192_v31 = vpop.f32.mrf.mxu0 }
 0x157   : > { %v1233_v32 = vpop.f32.mrf.mxu1 }
 0x158   : > { %v1194_v33 = vpop.f32.mrf.mxu0  ;;  %v1234_v34 = vadd.f32 %v1233_v32, %v1192_v31 }
 0x159   : > { %v1235_v10 = vpop.f32.mrf.mxu1 }
 0x15a   : > { %v1236_v35 = vadd.f32 %v1235_v10, %v1194_v33  ;;  %v1196_v36 = vpop.f32.mrf.mxu0 }
 0x15b   : > { %v1237_v37 = vpop.f32.mrf.mxu1 }
 0x15c   : > { %v1245_v38 = vcombine.low %v1234_v34, %v1236_v35  ;;  %v1197_v39 = vpop.f32.mrf.mxu0 }
 0x15d   : > { %v1238_v40 = vpop.f32.mrf.mxu1 }
 0x15e   : > { %v1259_v42 = vrot.slane %v1245_v38, %v1251_v14 }
 0x160   : > { %v1260_v44 = vcombine.low %v1252_v41, %v1259_v42  ;;  %1267 = sbr.rel (%p1610_p7) target bundleno = 384 (0x180), region = 40 }
 0x162   : > { %v1262_v45 = vadd.f32 %v1260_v44, %v277_v43 }
 0x164   : > { %1263 = vst [vmem:[#allocation2] sm:$0xff] %v1262_v45 }
 0x165   : > { %v1269_v46 = vld [vmem:[%s2094_s2] sm:$0xf]  ;;  %v1273_v48 = vsub.s32 0, %v1961_v47  ;;  %v1277_v49 = vsub.s32 1, %v1961_v47  ;;  %v1281_v50 = vsub.s32 2, %v1961_v47  ;;  %v1285_v51 = vsub.s32 3, %v1961_v47 }
 0x167   : > { %v1274_v53 = vrot.slane %v1269_v46, %v1273_v48  ;;  %v1278_v54 = vrot.slane %v1269_v46, %v1277_v49  ;;  %v1282_v55 = vrot.slane %v1269_v46, %v1281_v50  ;;  %v1286_v56 = vrot.slane %v1269_v46, %v1285_v51 }
 0x169   : > { %v1287_v57 = vcombine.low %v1274_v53, %v1278_v54  ;;  %v1288_v58 = vcombine.low %v1282_v55, %v1286_v56 }
 0x16b   : > { %v1295_v59 = vrot.slane %v1287_v57, %v1251_v14  ;;  %v1302_v60 = vrot.slane %v1288_v58, %v1251_v14  ;;  %v1268_v61 = vld [vmem:[#allocation2] sm:$0xff] }
 0x16d   : > { %v1303_v62 = vcombine.low %v1295_v59, %v1302_v60 }
 0x16f   : > { %v1305_v63 = vadd.f32 %v1303_v62, %v1268_v61 }
 0x171   : > { %v1306_v0 = vmax.f32 %v1305_v63, 0.0 }
 0x173   : > { %v1308_v1 = vcombine.high %v1306_v0, %v1306_v0  ;;  %v1315_v2 = vrot.slane %v1306_v0, %v1251_v14 }
 0x175   : > { %v1322_v3 = vrot.slane %v1308_v1, %v1251_v14  ;;  %v1323_v4 = vcombine.high %v1315_v2, %v1315_v2 }
 0x177   : > { %v1324_v5 = vcombine.high %v1322_v3, %v1322_v3  ;;  %v1611_v6 = vpack.c.bf16 %v1323_v4, %v1315_v2 }
 0x179   : > { %v1612_v7 = vpack.c.bf16 %v1324_v5, %v1322_v3  ;;  %v1345_v47 = vrot.slane %v1611_v6, %v1968_v52 }
 0x17b   : > { %v1352_v8 = vrot.slane %v1612_v7, %v1968_v52 }
 0x17d   : > { %v1353_v9 = vcombine.low %v1345_v47, %v1352_v8 }
 0x17f   : > { %1613 = vst.sshfl [vmem:[%s2095_s3] sm:$0x55 pattern:$0x73625140] %v1353_v9 }
 0x180 PF: > { %s13_s14 = sadd.s32 1, %s1860_s14   ;;  %s2096_s12 = smov %s1856_s13 }
 0x181   : > { %p10_p8 = scmp.ge.s32.totalorder %s13_s14, 6   ;;  %s2097_s13 = smov %s2099_s15 }
 0x183   :  { %12 = sbr.rel (!%p10_p8) target bundleno = 2 (0x2), region = 76 }

</bundles_post_ra>
